<compile_context>
chip_gen: v7x
topology: tpu7x:2x2x1
jax: 0.10.0
libtpu: 0.0.40
codegen_flags: <defaults>
</compile_context>

<pallas_src>
import functools
import math

import jax
import jax.numpy as jnp
import numpy as np
from jax import lax
from jax.experimental import pallas as pl
from jax.experimental.pallas import tpu as pltpu


# ------------------------------ fused Pallas kernel ---------------------------

def _fused_kernel(p1_ref, m2_ref,
                  w1_ref, w2_ref, b2_ref, w3_ref, b3_ref,
                  wer_ref, be_ref, wa_ref, ba_ref, wh_ref, bh_ref,
                  out_ref, a1cat_ref, o2cat_ref, enc_ref):
    """conv1 -> conv2 -> conv3 -> encoder -> affine -> merged value|policy head.

    One grid step processes one batch chunk of `bc` images.

    p1_ref : [81*25*bc, 16C+1] bf16 conv1 patches + validity-flag column, rows
             ordered (q2, q3, p3, b); w1_ref's last row is conv1's bias so
             relu(p1 @ w1) reproduces conv2's zero padding without a mask.
    m2_ref : [9*25*bc, 1] f32 batch-invariant mask implementing conv3's padding.
    a1cat  : [9*25*bc, 288] bf16 conv1 activations, lane-blocked by conv2 tap.
    o2cat  : [25*bc, 288]   bf16 conv2 activations, lane-blocked by conv3 tap.
    enc    : [bc, 800]      f32 conv3 activations in PyTorch NCHW-flatten order
                            (the permutation is baked into wer by prepare_params).
    """
    r2 = a1cat_ref.shape[0]          # 9 * 25 * bc   rows (q3, p3, b)
    s3b = o2cat_ref.shape[0]         # 25 * bc       rows (p3, b)
    bc = out_ref.shape[0]
    n_q2 = a1cat_ref.shape[1] // 32
    n_q3 = o2cat_ref.shape[1] // 32
    n_sp = wer_ref.shape[0] // 32    # conv3 spatial positions (5*5)

    # conv1: 9 matmuls [r2, 65] @ [65, 32]; results staged lane-dense for conv2.
    for q2 in range(n_q2):
        a1 = jnp.dot(p1_ref[q2 * r2:(q2 + 1) * r2, :], w1_ref[...],
                     preferred_element_type=jnp.float32)
        a1cat_ref[:, q2 * 32:(q2 + 1) * 32] = jnp.maximum(a1, 0.0).astype(jnp.bfloat16)

    # conv2: 9 big-K matmuls [s3b, 288] @ [288, 32]; m2 (applied after bias+relu)
    # implements conv3's zero padding; results staged lane-dense for conv3.
    for q3 in range(n_q3):
        rows = slice(q3 * s3b, (q3 + 1) * s3b)
        acc2 = jnp.dot(a1cat_ref[rows, :], w2_ref[...],
                       preferred_element_type=jnp.float32)
        act2 = jnp.maximum(acc2 + b2_ref[...], 0.0) * m2_ref[rows, :]
        o2cat_ref[:, q3 * 32:(q3 + 1) * 32] = act2.astype(jnp.bfloat16)

    # conv3: a single [s3b, 288] @ [288, 32] matmul.
    acc3 = jnp.dot(o2cat_ref[...], w3_ref[...], preferred_element_type=jnp.float32)
    act3 = jnp.maximum(acc3 + b3_ref[...], 0.0)

    # Stage act3 (rows = (p3, b)) into a lane-dense [bc, 800] encoder input.
    for p3 in range(n_sp):
        enc_ref[:, p3 * 32:(p3 + 1) * 32] = act3[p3 * bc:(p3 + 1) * bc, :]

    # encoder -> affine(relu(.)) -> merged value|policy head (lane-padded to 128).
    enc = jnp.dot(enc_ref[...], wer_ref[...],
                  preferred_element_type=jnp.float32) + be_ref[...]
    hid = jnp.dot(jnp.maximum(enc, 0.0), wa_ref[...],
                  preferred_element_type=jnp.float32) + ba_ref[...]
    out_ref[...] = jnp.dot(hid, wh_ref[...],
                           preferred_element_type=jnp.float32) + bh_ref[...]


# ------------------------------ wrapper-side glue -----------------------------

def _im2col_taps(x, k, stride, pad):
    """x: [B, H, W, F] -> ([k*k, B, OH, OW, F], OH, OW); taps ordered (i, j)."""
    b, h, w, f = x.shape
    oh = (h + 2 * pad - k) // stride + 1
    ow = (w + 2 * pad - k) // stride + 1
    xp = jnp.pad(x, ((0, 0), (pad, pad), (pad, pad), (0, 0)))
    taps = []
    for i in range(k):
        for j in range(k):
            taps.append(xp[:, i:i + stride * (oh - 1) + 1:stride,
                            j:j + stride * (ow - 1) + 1:stride, :])
    return jnp.stack(taps, axis=0), oh, ow


def _validity_patterns(a1_hw, a2_hw, a3_hw):
    """Batch-invariant numpy validity patterns for the hierarchical im2col.

    v1[q2, q3, p]: the act1 position read by conv2-tap q2 of conv3-tap q3 of
                   conv3 output p lies inside act1 (else that patch row is pad).
    v2[q3, p]    : the act2 position read by conv3-tap q3 of p lies inside act2.
    """
    (h1, w1), (h2, w2), (h3, w3) = a1_hw, a2_hw, a3_hw
    q = np.arange(9)
    iq, jq = q // 3, q % 3
    p = np.arange(h3 * w3)
    oh3, ow3 = p // w3, p % w3
    h2c = 2 * oh3[None, :] + iq[:, None] - 1              # [9, P]
    w2c = 2 * ow3[None, :] + jq[:, None] - 1
    v2 = (h2c >= 0) & (h2c < h2) & (w2c >= 0) & (w2c < w2)
    h1c = 2 * h2c[None, :, :] + iq[:, None, None] - 1     # [9, 9, P]
    w1c = 2 * w2c[None, :, :] + jq[:, None, None] - 1
    v1 = (h1c >= 0) & (h1c < h1) & (w1c >= 0) & (w1c < w1)
    return v1, v2


def prepare_params(p):
    """One-time weight repack: bf16 conv weights lane-concatenated per tap, conv1
    bias folded in as an extra weight row (gated by the patch validity flag),
    NCHW-flatten order baked into the encoder weight, and the value/policy heads
    merged into a single lane-dense [H, 128] matrix."""
    hd = p["we"].shape[1]
    n_sp = p["we"].shape[0] // 32
    cin = p["w1"].shape[1]
    w1 = p["w1"].transpose(2, 3, 1, 0).reshape(16 * cin, 32)
    w1 = jnp.concatenate([w1, p["b1"][None, :]], axis=0)                 # [16C+1, 32]
    wh = jnp.concatenate([p["wv"], p["wp"]], axis=1)                     # [H, 1+A]
    wh = jnp.pad(wh, ((0, 0), (0, 128 - wh.shape[1])))
    bh = jnp.concatenate([p["bv"], p["bp"]])[None, :]
    bh = jnp.pad(bh, ((0, 0), (0, 128 - bh.shape[1])))
    return {
        "w1": w1.astype(jnp.bfloat16),
        "w2": p["w2"].transpose(2, 3, 1, 0).reshape(9 * 32, 32).astype(jnp.bfloat16),
        "b2": p["b2"][None, :].astype(jnp.float32),
        "w3": p["w3"].transpose(2, 3, 1, 0).reshape(9 * 32, 32).astype(jnp.bfloat16),
        "b3": p["b3"][None, :].astype(jnp.float32),
        "wer": p["we"].reshape(32, n_sp, hd).transpose(1, 0, 2)
                       .reshape(32 * n_sp, hd).astype(jnp.float32),
        "be": p["be"][None, :].astype(jnp.float32),
        "wa": p["wa"].astype(jnp.float32),
        "ba": p["ba"][None, :].astype(jnp.float32),
        "wh": wh.astype(jnp.float32),
        "bh": bh.astype(jnp.float32),
    }


def _full_spec(shape):
    nd = len(shape)
    return pl.BlockSpec(shape, lambda *_: (0,) * nd)


@functools.partial(jax.jit, static_argnames=("n_act", "block_batch"))
def actor_critic_forward(state, params, *, n_act, block_batch=4):
    """state: [B, C, 40, 40] NCHW f32 -> (state_value [B,1], action_value [B,n_act])."""
    b, c, _, _ = state.shape
    bc = max(1, min(block_batch, b))
    num_chunks = pl.cdiv(b, bc)
    bpad = num_chunks * bc

    x = jnp.transpose(state, (0, 2, 3, 1))                               # NHWC
    if bpad > b:
        x = jnp.pad(x, ((0, bpad - b), (0, 0), (0, 0), (0, 0)))

    # Hierarchical im2col: per chunk, row (q2, q3, p3, b) of p1 holds the 4x4xC
    # conv1 patch of the act1 pixel needed by conv2-tap q2 of conv3-tap q3 of
    # conv3 output p3; the extra column is the patch validity flag gating conv1's
    # bias (== conv2's zero padding) inside the kernel.
    t1, h1, w1 = _im2col_taps(x, 4, 2, 1)                                # [16,B,20,20,C]
    f1 = jnp.transpose(t1, (1, 2, 3, 0, 4)).reshape(bpad, h1, w1, 16 * c)
    t2, h2, w2 = _im2col_taps(f1, 3, 2, 1)                               # [9,B,10,10,16C]
    f2 = jnp.transpose(t2, (1, 2, 3, 0, 4)).reshape(bpad, h2, w2, 9 * 16 * c)
    t3, h3, w3 = _im2col_taps(f2, 3, 2, 1)                               # [9,B,5,5,9*16C]
    s3 = h3 * w3
    assert params["wer"].shape[0] == 32 * s3, "encoder expects 32*5*5 = 800 features"

    p1 = t3.reshape(9, bpad, h3, w3, 9, 16 * c)
    p1 = jnp.transpose(p1, (4, 0, 2, 3, 1, 5))                           # (q2,q3,p3..,b,f)
    p1 = p1.reshape(9, 9, s3, num_chunks, bc, 16 * c)
    p1 = jnp.transpose(p1, (3, 0, 1, 2, 4, 5))                           # (g,q2,q3,p3,b,f)
    p1 = p1.reshape(num_chunks, 81 * s3 * bc, 16 * c)

    v1, v2 = _validity_patterns((h1, w1), (h2, w2), (h3, w3))
    flag = np.broadcast_to(v1[None, :, :, :, None, None],
                           (num_chunks, 9, 9, s3, bc, 1)).astype(np.float32)
    flag = jnp.asarray(flag.reshape(num_chunks, 81 * s3 * bc, 1))
    p1 = jnp.concatenate([p1, flag], axis=-1).astype(jnp.bfloat16)

    m2 = np.broadcast_to(v2[:, :, None], (9, s3, bc)).astype(np.float32)
    m2 = jnp.asarray(m2.reshape(9 * s3 * bc, 1))

    r1 = 81 * s3 * bc                    # conv1 patch rows per chunk
    r2 = 9 * s3 * bc                     # conv2 output rows per chunk
    s3b = s3 * bc                        # conv3 output rows per chunk
    hd = params["wa"].shape[0]
    k1 = 16 * c + 1

    flops = 2 * num_chunks * (9 * r2 * k1 * 32 + 9 * s3b * 288 * 32 + s3b * 288 * 32
                              + bc * 32 * s3 * hd + bc * hd * hd + bc * hd * 128)
    bytes_accessed = (p1.size * 2 + m2.size * 4 + bpad * 128 * 4
                      + sum(int(np.prod(v.shape)) * v.dtype.itemsize
                            for v in params.values()))

    # Per-step VMEM estimate (lane-padded, inputs double-buffered) with margin so
    # v5e's 16 MiB scoped default is never the binding constraint.
    def _padded(rows, lanes, itemsize):
        return ((rows + 7) // 8 * 8) * ((lanes + 127) // 128 * 128) * itemsize
    vmem_est = (2 * (_padded(r1, k1, 2) + _padded(r2, 1, 4) + _padded(bc, 128, 4))
                + 2 * sum(_padded(v.shape[0], v.shape[1], v.dtype.itemsize)
                          for v in params.values())
                + _padded(r2, 288, 2) + _padded(s3b, 288, 2) + _padded(bc, 32 * s3, 4))
    vmem_limit = int(min(64 << 20, max(16 << 20, 2 * vmem_est)))

    heads = pl.pallas_call(
        _fused_kernel,
        grid=(num_chunks,),
        in_specs=[
            pl.BlockSpec((None, r1, k1), lambda g: (g, 0, 0)),           # p1 (per chunk)
            _full_spec(m2.shape),                                        # batch-invariant
            _full_spec(params["w1"].shape), _full_spec(params["w2"].shape),
            _full_spec(params["b2"].shape), _full_spec(params["w3"].shape),
            _full_spec(params["b3"].shape), _full_spec(params["wer"].shape),
            _full_spec(params["be"].shape), _full_spec(params["wa"].shape),
            _full_spec(params["ba"].shape), _full_spec(params["wh"].shape),
            _full_spec(params["bh"].shape),
        ],
        out_specs=pl.BlockSpec((None, bc, 128), lambda g: (g, 0, 0)),
        out_shape=jax.ShapeDtypeStruct((num_chunks, bc, 128), jnp.float32),
        scratch_shapes=[
            pltpu.VMEM((r2, 9 * 32), jnp.bfloat16),    # conv1 acts, conv2-tap lane blocks
            pltpu.VMEM((s3b, 9 * 32), jnp.bfloat16),   # conv2 acts, conv3-tap lane blocks
            pltpu.VMEM((bc, 32 * s3), jnp.float32),    # conv3 acts, flatten order (800)
        ],
        compiler_params=pltpu.CompilerParams(
            dimension_semantics=("parallel",),
            vmem_limit_bytes=vmem_limit),
        cost_estimate=pl.CostEstimate(flops=int(flops), transcendentals=0,
                                      bytes_accessed=int(bytes_accessed)),
    )(p1, m2,
      params["w1"], params["w2"], params["b2"], params["w3"], params["b3"],
      params["wer"], params["be"], params["wa"], params["ba"],
      params["wh"], params["bh"])

    heads = heads.reshape(bpad, 128)[:b]
    return heads[:, 0:1], heads[:, 1:1 + n_act]


# ---------------------------- parameter construction --------------------------

def init_params(key, input_dim, hidden_dim, output_dim):
    def uni(k, shape, fan_in):
        bound = 1.0 / math.sqrt(fan_in)
        return jax.random.uniform(k, shape, jnp.float32, -bound, bound)

    ks = jax.random.split(key, 16)
    p = {}
    p["w1"] = uni(ks[0], (32, input_dim, 4, 4), input_dim * 16)
    p["b1"] = uni(ks[1], (32,), input_dim * 16)
    p["w2"] = uni(ks[2], (32, 32, 3, 3), 32 * 9)
    p["b2"] = uni(ks[3], (32,), 32 * 9)
    p["w3"] = uni(ks[4], (32, 32, 3, 3), 32 * 9)
    p["b3"] = uni(ks[5], (32,), 32 * 9)
    p["we"] = uni(ks[6], (800, hidden_dim), 800)        # stored [in, out]
    p["be"] = uni(ks[7], (hidden_dim,), 800)
    p["wa"] = uni(ks[8], (hidden_dim, hidden_dim), hidden_dim)
    p["ba"] = uni(ks[9], (hidden_dim,), hidden_dim)
    p["wv"] = uni(ks[10], (hidden_dim, 1), hidden_dim)
    p["bv"] = uni(ks[11], (1,), hidden_dim)
    p["wp"] = uni(ks[12], (hidden_dim, output_dim), hidden_dim)
    p["bp"] = uni(ks[13], (output_dim,), hidden_dim)
    return p


# ------------------------------ pure-JAX reference ----------------------------

def reference_forward(state, params):
    def conv(x, w, b, stride, pad):
        y = lax.conv_general_dilated(
            x, w, window_strides=(stride, stride),
            padding=[(pad, pad), (pad, pad)],
            dimension_numbers=("NCHW", "OIHW", "NCHW"))
        return jnp.maximum(y + b.reshape(1, -1, 1, 1), 0.0)

    x = conv(state, params["w1"], params["b1"], 2, 1)
    x = conv(x, params["w2"], params["b2"], 2, 1)
    x = conv(x, params["w3"], params["b3"], 2, 1)
    feat = x.reshape(x.shape[0], -1)
    enc = feat @ params["we"] + params["be"]
    h = jnp.maximum(enc, 0.0) @ params["wa"] + params["ba"]
    value = h @ params["wv"] + params["bv"]
    action = h @ params["wp"] + params["bp"]
    return value, action


# ----------------------------------- main --------------------------------------

if __name__ == "__main__":
    # Linear(800, hidden) after three stride-2 convs (32 channels) forces a 40x40
    # spatial input: 40 -> 20 -> 10 -> 5, 32 * 5 * 5 = 800.
    B, input_dim, hidden_dim, output_dim = 2, 4, 32, 6

    key = jax.random.PRNGKey(0)
    k_params, k_state = jax.random.split(key)
    params = init_params(k_params, input_dim, hidden_dim, output_dim)
    state = jax.random.normal(k_state, (B, input_dim, 40, 40), jnp.float32)

    prepped = prepare_params(params)
    # block_batch=1 -> a 2-step "parallel" batch grid is exercised even at B=2.
    value, action = jax.block_until_ready(
        actor_critic_forward(state, prepped, n_act=output_dim, block_batch=1))
    ref_value, ref_action = jax.block_until_ready(reference_forward(state, params))

    assert value.shape == (B, 1) and action.shape == (B, output_dim)
    # bf16 conv operands with f32 accumulation -> bf16-appropriate tolerance.
    assert jnp.allclose(value, ref_value, rtol=2e-2, atol=2e-2)
    assert jnp.allclose(action, ref_action, rtol=2e-2, atol=2e-2)

    print("KERNEL_OK")
</pallas_src>

<mosaic_0001>
module attributes {stable_mosaic.version = 11 : i64} {
  func.func @_fused_kernel(%arg0: i32, %arg1: memref<1x2025x65xbf16, #tpu.memory_space<vmem>>, %arg2: memref<225x1xf32, #tpu.memory_space<vmem>>, %arg3: memref<65x32xbf16, #tpu.memory_space<vmem>>, %arg4: memref<288x32xbf16, #tpu.memory_space<vmem>>, %arg5: memref<1x32xf32, #tpu.memory_space<vmem>>, %arg6: memref<288x32xbf16, #tpu.memory_space<vmem>>, %arg7: memref<1x32xf32, #tpu.memory_space<vmem>>, %arg8: memref<800x32xf32, #tpu.memory_space<vmem>>, %arg9: memref<1x32xf32, #tpu.memory_space<vmem>>, %arg10: memref<32x32xf32, #tpu.memory_space<vmem>>, %arg11: memref<1x32xf32, #tpu.memory_space<vmem>>, %arg12: memref<32x128xf32, #tpu.memory_space<vmem>>, %arg13: memref<1x128xf32, #tpu.memory_space<vmem>>, %arg14: memref<1x1x128xf32, #tpu.memory_space<vmem>>, %arg15: memref<225x288xbf16, #tpu.memory_space<vmem>>, %arg16: memref<25x288xbf16, #tpu.memory_space<vmem>>, %arg17: memref<1x800xf32, #tpu.memory_space<vmem>>) attributes {dimension_semantics = [#tpu.dimension_semantics<parallel>], iteration_bounds = array<i64: 2>, scalar_prefetch = 0 : i64, scratch_operands = 3 : i64, tpu.core_type = #tpu.core_type<tc>, window_params = [{transform_indices = @transform_0, window_bounds = array<i64: 1, 2025, 65>}, {pipeline_mode = #tpu.pipeline_mode<synchronous>, transform_indices = @transform_1, window_bounds = array<i64: 225, 1>}, {pipeline_mode = #tpu.pipeline_mode<synchronous>, transform_indices = @transform_2, window_bounds = array<i64: 65, 32>}, {pipeline_mode = #tpu.pipeline_mode<synchronous>, transform_indices = @transform_3, window_bounds = array<i64: 288, 32>}, {pipeline_mode = #tpu.pipeline_mode<synchronous>, transform_indices = @transform_4, window_bounds = array<i64: 1, 32>}, {pipeline_mode = #tpu.pipeline_mode<synchronous>, transform_indices = @transform_5, window_bounds = array<i64: 288, 32>}, {pipeline_mode = #tpu.pipeline_mode<synchronous>, transform_indices = @transform_6, window_bounds = array<i64: 1, 32>}, {pipeline_mode = #tpu.pipeline_mode<synchronous>, transform_indices = @transform_7, window_bounds = array<i64: 800, 32>}, {pipeline_mode = #tpu.pipeline_mode<synchronous>, transform_indices = @transform_8, window_bounds = array<i64: 1, 32>}, {pipeline_mode = #tpu.pipeline_mode<synchronous>, transform_indices = @transform_9, window_bounds = array<i64: 32, 32>}, {pipeline_mode = #tpu.pipeline_mode<synchronous>, transform_indices = @transform_10, window_bounds = array<i64: 1, 32>}, {pipeline_mode = #tpu.pipeline_mode<synchronous>, transform_indices = @transform_11, window_bounds = array<i64: 32, 128>}, {pipeline_mode = #tpu.pipeline_mode<synchronous>, transform_indices = @transform_12, window_bounds = array<i64: 1, 128>}, {transform_indices = @transform_13, window_bounds = array<i64: 1, 1, 128>}]} {
    %c0 = arith.constant 0 : index
    %c0_0 = arith.constant 0 : index
    %c0_1 = arith.constant 0 : index
    %0 = vector.load %arg1[%c0, %c0_0, %c0_1] : memref<1x2025x65xbf16, #tpu.memory_space<vmem>>, vector<1x225x65xbf16>
    %1 = vector.shape_cast %0 : vector<1x225x65xbf16> to vector<225x65xbf16>
    %c0_2 = arith.constant 0 : index
    %c0_3 = arith.constant 0 : index
    %2 = vector.load %arg3[%c0_2, %c0_3] : memref<65x32xbf16, #tpu.memory_space<vmem>>, vector<65x32xbf16>
    %cst = arith.constant dense<0.000000e+00> : vector<225x32xf32>
    %3 = tpu.matmul %1, %2, %cst {dimension_numbers = #tpu.dot_dimension_numbers<[1], [0], [0], [1], [0, 0, 1, 1], [], []>} : vector<225x65xbf16>, vector<65x32xbf16>, vector<225x32xf32> -> vector<225x32xf32>
    %cst_4 = arith.constant 0.000000e+00 : f32
    %4 = vector.broadcast %cst_4 : f32 to vector<225x32xf32>
    %5 = arith.maximumf %3, %4 : vector<225x32xf32>
    %6 = arith.truncf %5 : vector<225x32xf32> to vector<225x32xbf16>
    %c0_5 = arith.constant 0 : index
    %c0_6 = arith.constant 0 : index
    %7 = vector.load %arg15[%c0_5, %c0_6] : memref<225x288xbf16, #tpu.memory_space<vmem>>, vector<225x32xbf16>
    tpu.vector_store %arg15[%c0_5, %c0_6], %6 {strides = array<i32>} : memref<225x288xbf16, #tpu.memory_space<vmem>>, vector<225x32xbf16>,
    %c0_7 = arith.constant 0 : index
    %c225 = arith.constant 225 : index
    %c0_8 = arith.constant 0 : index
    %8 = vector.load %arg1[%c0_7, %c225, %c0_8] : memref<1x2025x65xbf16, #tpu.memory_space<vmem>>, vector<1x225x65xbf16>
    %9 = vector.shape_cast %8 : vector<1x225x65xbf16> to vector<225x65xbf16>
    %c0_9 = arith.constant 0 : index
    %c0_10 = arith.constant 0 : index
    %10 = vector.load %arg3[%c0_9, %c0_10] : memref<65x32xbf16, #tpu.memory_space<vmem>>, vector<65x32xbf16>
    %cst_11 = arith.constant dense<0.000000e+00> : vector<225x32xf32>
    %11 = tpu.matmul %9, %10, %cst_11 {dimension_numbers = #tpu.dot_dimension_numbers<[1], [0], [0], [1], [0, 0, 1, 1], [], []>} : vector<225x65xbf16>, vector<65x32xbf16>, vector<225x32xf32> -> vector<225x32xf32>
    %cst_12 = arith.constant 0.000000e+00 : f32
    %12 = vector.broadcast %cst_12 : f32 to vector<225x32xf32>
    %13 = arith.maximumf %11, %12 : vector<225x32xf32>
    %14 = arith.truncf %13 : vector<225x32xf32> to vector<225x32xbf16>
    %c0_13 = arith.constant 0 : index
    %c32 = arith.constant 32 : index
    %15 = vector.load %arg15[%c0_13, %c32] : memref<225x288xbf16, #tpu.memory_space<vmem>>, vector<225x32xbf16>
    tpu.vector_store %arg15[%c0_13, %c32], %14 {strides = array<i32>} : memref<225x288xbf16, #tpu.memory_space<vmem>>, vector<225x32xbf16>,
    %c0_14 = arith.constant 0 : index
    %c450 = arith.constant 450 : index
    %c0_15 = arith.constant 0 : index
    %16 = vector.load %arg1[%c0_14, %c450, %c0_15] : memref<1x2025x65xbf16, #tpu.memory_space<vmem>>, vector<1x225x65xbf16>
    %17 = vector.shape_cast %16 : vector<1x225x65xbf16> to vector<225x65xbf16>
    %c0_16 = arith.constant 0 : index
    %c0_17 = arith.constant 0 : index
    %18 = vector.load %arg3[%c0_16, %c0_17] : memref<65x32xbf16, #tpu.memory_space<vmem>>, vector<65x32xbf16>
    %cst_18 = arith.constant dense<0.000000e+00> : vector<225x32xf32>
    %19 = tpu.matmul %17, %18, %cst_18 {dimension_numbers = #tpu.dot_dimension_numbers<[1], [0], [0], [1], [0, 0, 1, 1], [], []>} : vector<225x65xbf16>, vector<65x32xbf16>, vector<225x32xf32> -> vector<225x32xf32>
    %cst_19 = arith.constant 0.000000e+00 : f32
    %20 = vector.broadcast %cst_19 : f32 to vector<225x32xf32>
    %21 = arith.maximumf %19, %20 : vector<225x32xf32>
    %22 = arith.truncf %21 : vector<225x32xf32> to vector<225x32xbf16>
    %c0_20 = arith.constant 0 : index
    %c64 = arith.constant 64 : index
    %23 = vector.load %arg15[%c0_20, %c64] : memref<225x288xbf16, #tpu.memory_space<vmem>>, vector<225x32xbf16>
    tpu.vector_store %arg15[%c0_20, %c64], %22 {strides = array<i32>} : memref<225x288xbf16, #tpu.memory_space<vmem>>, vector<225x32xbf16>,
    %c0_21 = arith.constant 0 : index
    %c675 = arith.constant 675 : index
    %c0_22 = arith.constant 0 : index
    %24 = vector.load %arg1[%c0_21, %c675, %c0_22] : memref<1x2025x65xbf16, #tpu.memory_space<vmem>>, vector<1x225x65xbf16>
    %25 = vector.shape_cast %24 : vector<1x225x65xbf16> to vector<225x65xbf16>
    %c0_23 = arith.constant 0 : index
    %c0_24 = arith.constant 0 : index
    %26 = vector.load %arg3[%c0_23, %c0_24] : memref<65x32xbf16, #tpu.memory_space<vmem>>, vector<65x32xbf16>
    %cst_25 = arith.constant dense<0.000000e+00> : vector<225x32xf32>
    %27 = tpu.matmul %25, %26, %cst_25 {dimension_numbers = #tpu.dot_dimension_numbers<[1], [0], [0], [1], [0, 0, 1, 1], [], []>} : vector<225x65xbf16>, vector<65x32xbf16>, vector<225x32xf32> -> vector<225x32xf32>
    %cst_26 = arith.constant 0.000000e+00 : f32
    %28 = vector.broadcast %cst_26 : f32 to vector<225x32xf32>
    %29 = arith.maximumf %27, %28 : vector<225x32xf32>
    %30 = arith.truncf %29 : vector<225x32xf32> to vector<225x32xbf16>
    %c0_27 = arith.constant 0 : index
    %c96 = arith.constant 96 : index
    %31 = vector.load %arg15[%c0_27, %c96] : memref<225x288xbf16, #tpu.memory_space<vmem>>, vector<225x32xbf16>
    tpu.vector_store %arg15[%c0_27, %c96], %30 {strides = array<i32>} : memref<225x288xbf16, #tpu.memory_space<vmem>>, vector<225x32xbf16>,
    %c0_28 = arith.constant 0 : index
    %c900 = arith.constant 900 : index
    %c0_29 = arith.constant 0 : index
    %32 = vector.load %arg1[%c0_28, %c900, %c0_29] : memref<1x2025x65xbf16, #tpu.memory_space<vmem>>, vector<1x225x65xbf16>
    %33 = vector.shape_cast %32 : vector<1x225x65xbf16> to vector<225x65xbf16>
    %c0_30 = arith.constant 0 : index
    %c0_31 = arith.constant 0 : index
    %34 = vector.load %arg3[%c0_30, %c0_31] : memref<65x32xbf16, #tpu.memory_space<vmem>>, vector<65x32xbf16>
    %cst_32 = arith.constant dense<0.000000e+00> : vector<225x32xf32>
    %35 = tpu.matmul %33, %34, %cst_32 {dimension_numbers = #tpu.dot_dimension_numbers<[1], [0], [0], [1], [0, 0, 1, 1], [], []>} : vector<225x65xbf16>, vector<65x32xbf16>, vector<225x32xf32> -> vector<225x32xf32>
    %cst_33 = arith.constant 0.000000e+00 : f32
    %36 = vector.broadcast %cst_33 : f32 to vector<225x32xf32>
    %37 = arith.maximumf %35, %36 : vector<225x32xf32>
    %38 = arith.truncf %37 : vector<225x32xf32> to vector<225x32xbf16>
    %c0_34 = arith.constant 0 : index
    %c128 = arith.constant 128 : index
    %39 = vector.load %arg15[%c0_34, %c128] : memref<225x288xbf16, #tpu.memory_space<vmem>>, vector<225x32xbf16>
    tpu.vector_store %arg15[%c0_34, %c128], %38 {strides = array<i32>} : memref<225x288xbf16, #tpu.memory_space<vmem>>, vector<225x32xbf16>,
    %c0_35 = arith.constant 0 : index
    %c1125 = arith.constant 1125 : index
    %c0_36 = arith.constant 0 : index
    %40 = vector.load %arg1[%c0_35, %c1125, %c0_36] : memref<1x2025x65xbf16, #tpu.memory_space<vmem>>, vector<1x225x65xbf16>
    %41 = vector.shape_cast %40 : vector<1x225x65xbf16> to vector<225x65xbf16>
    %c0_37 = arith.constant 0 : index
    %c0_38 = arith.constant 0 : index
    %42 = vector.load %arg3[%c0_37, %c0_38] : memref<65x32xbf16, #tpu.memory_space<vmem>>, vector<65x32xbf16>
    %cst_39 = arith.constant dense<0.000000e+00> : vector<225x32xf32>
    %43 = tpu.matmul %41, %42, %cst_39 {dimension_numbers = #tpu.dot_dimension_numbers<[1], [0], [0], [1], [0, 0, 1, 1], [], []>} : vector<225x65xbf16>, vector<65x32xbf16>, vector<225x32xf32> -> vector<225x32xf32>
    %cst_40 = arith.constant 0.000000e+00 : f32
    %44 = vector.broadcast %cst_40 : f32 to vector<225x32xf32>
    %45 = arith.maximumf %43, %44 : vector<225x32xf32>
    %46 = arith.truncf %45 : vector<225x32xf32> to vector<225x32xbf16>
    %c0_41 = arith.constant 0 : index
    %c160 = arith.constant 160 : index
    %47 = vector.load %arg15[%c0_41, %c160] : memref<225x288xbf16, #tpu.memory_space<vmem>>, vector<225x32xbf16>
    tpu.vector_store %arg15[%c0_41, %c160], %46 {strides = array<i32>} : memref<225x288xbf16, #tpu.memory_space<vmem>>, vector<225x32xbf16>,
    %c0_42 = arith.constant 0 : index
    %c1350 = arith.constant 1350 : index
    %c0_43 = arith.constant 0 : index
    %48 = vector.load %arg1[%c0_42, %c1350, %c0_43] : memref<1x2025x65xbf16, #tpu.memory_space<vmem>>, vector<1x225x65xbf16>
    %49 = vector.shape_cast %48 : vector<1x225x65xbf16> to vector<225x65xbf16>
    %c0_44 = arith.constant 0 : index
    %c0_45 = arith.constant 0 : index
    %50 = vector.load %arg3[%c0_44, %c0_45] : memref<65x32xbf16, #tpu.memory_space<vmem>>, vector<65x32xbf16>
    %cst_46 = arith.constant dense<0.000000e+00> : vector<225x32xf32>
    %51 = tpu.matmul %49, %50, %cst_46 {dimension_numbers = #tpu.dot_dimension_numbers<[1], [0], [0], [1], [0, 0, 1, 1], [], []>} : vector<225x65xbf16>, vector<65x32xbf16>, vector<225x32xf32> -> vector<225x32xf32>
    %cst_47 = arith.constant 0.000000e+00 : f32
    %52 = vector.broadcast %cst_47 : f32 to vector<225x32xf32>
    %53 = arith.maximumf %51, %52 : vector<225x32xf32>
    %54 = arith.truncf %53 : vector<225x32xf32> to vector<225x32xbf16>
    %c0_48 = arith.constant 0 : index
    %c192 = arith.constant 192 : index
    %55 = vector.load %arg15[%c0_48, %c192] : memref<225x288xbf16, #tpu.memory_space<vmem>>, vector<225x32xbf16>
    tpu.vector_store %arg15[%c0_48, %c192], %54 {strides = array<i32>} : memref<225x288xbf16, #tpu.memory_space<vmem>>, vector<225x32xbf16>,
    %c0_49 = arith.constant 0 : index
    %c1575 = arith.constant 1575 : index
    %c0_50 = arith.constant 0 : index
    %56 = vector.load %arg1[%c0_49, %c1575, %c0_50] : memref<1x2025x65xbf16, #tpu.memory_space<vmem>>, vector<1x225x65xbf16>
    %57 = vector.shape_cast %56 : vector<1x225x65xbf16> to vector<225x65xbf16>
    %c0_51 = arith.constant 0 : index
    %c0_52 = arith.constant 0 : index
    %58 = vector.load %arg3[%c0_51, %c0_52] : memref<65x32xbf16, #tpu.memory_space<vmem>>, vector<65x32xbf16>
    %cst_53 = arith.constant dense<0.000000e+00> : vector<225x32xf32>
    %59 = tpu.matmul %57, %58, %cst_53 {dimension_numbers = #tpu.dot_dimension_numbers<[1], [0], [0], [1], [0, 0, 1, 1], [], []>} : vector<225x65xbf16>, vector<65x32xbf16>, vector<225x32xf32> -> vector<225x32xf32>
    %cst_54 = arith.constant 0.000000e+00 : f32
    %60 = vector.broadcast %cst_54 : f32 to vector<225x32xf32>
    %61 = arith.maximumf %59, %60 : vector<225x32xf32>
    %62 = arith.truncf %61 : vector<225x32xf32> to vector<225x32xbf16>
    %c0_55 = arith.constant 0 : index
    %c224 = arith.constant 224 : index
    %63 = vector.load %arg15[%c0_55, %c224] : memref<225x288xbf16, #tpu.memory_space<vmem>>, vector<225x32xbf16>
    tpu.vector_store %arg15[%c0_55, %c224], %62 {strides = array<i32>} : memref<225x288xbf16, #tpu.memory_space<vmem>>, vector<225x32xbf16>,
    %c0_56 = arith.constant 0 : index
    %c1800 = arith.constant 1800 : index
    %c0_57 = arith.constant 0 : index
    %64 = vector.load %arg1[%c0_56, %c1800, %c0_57] : memref<1x2025x65xbf16, #tpu.memory_space<vmem>>, vector<1x225x65xbf16>
    %65 = vector.shape_cast %64 : vector<1x225x65xbf16> to vector<225x65xbf16>
    %c0_58 = arith.constant 0 : index
    %c0_59 = arith.constant 0 : index
    %66 = vector.load %arg3[%c0_58, %c0_59] : memref<65x32xbf16, #tpu.memory_space<vmem>>, vector<65x32xbf16>
    %cst_60 = arith.constant dense<0.000000e+00> : vector<225x32xf32>
    %67 = tpu.matmul %65, %66, %cst_60 {dimension_numbers = #tpu.dot_dimension_numbers<[1], [0], [0], [1], [0, 0, 1, 1], [], []>} : vector<225x65xbf16>, vector<65x32xbf16>, vector<225x32xf32> -> vector<225x32xf32>
    %cst_61 = arith.constant 0.000000e+00 : f32
    %68 = vector.broadcast %cst_61 : f32 to vector<225x32xf32>
    %69 = arith.maximumf %67, %68 : vector<225x32xf32>
    %70 = arith.truncf %69 : vector<225x32xf32> to vector<225x32xbf16>
    %c0_62 = arith.constant 0 : index
    %c256 = arith.constant 256 : index
    %71 = vector.load %arg15[%c0_62, %c256] : memref<225x288xbf16, #tpu.memory_space<vmem>>, vector<225x32xbf16>
    tpu.vector_store %arg15[%c0_62, %c256], %70 {strides = array<i32>} : memref<225x288xbf16, #tpu.memory_space<vmem>>, vector<225x32xbf16>,
    %c0_63 = arith.constant 0 : index
    %c0_64 = arith.constant 0 : index
    %72 = vector.load %arg15[%c0_63, %c0_64] : memref<225x288xbf16, #tpu.memory_space<vmem>>, vector<25x288xbf16>
    %c0_65 = arith.constant 0 : index
    %c0_66 = arith.constant 0 : index
    %73 = vector.load %arg4[%c0_65, %c0_66] : memref<288x32xbf16, #tpu.memory_space<vmem>>, vector<288x32xbf16>
    %cst_67 = arith.constant dense<0.000000e+00> : vector<25x32xf32>
    %74 = tpu.matmul %72, %73, %cst_67 {dimension_numbers = #tpu.dot_dimension_numbers<[1], [0], [0], [1], [0, 0, 1, 1], [], []>} : vector<25x288xbf16>, vector<288x32xbf16>, vector<25x32xf32> -> vector<25x32xf32>
    %c0_68 = arith.constant 0 : index
    %c0_69 = arith.constant 0 : index
    %75 = vector.load %arg5[%c0_68, %c0_69] : memref<1x32xf32, #tpu.memory_space<vmem>>, vector<1x32xf32>
    %76 = vector.broadcast %75 : vector<1x32xf32> to vector<25x32xf32>
    %77 = arith.addf %74, %76 : vector<25x32xf32>
    %cst_70 = arith.constant 0.000000e+00 : f32
    %78 = vector.broadcast %cst_70 : f32 to vector<25x32xf32>
    %79 = arith.maximumf %77, %78 : vector<25x32xf32>
    %c0_71 = arith.constant 0 : index
    %c0_72 = arith.constant 0 : index
    %80 = vector.load %arg2[%c0_71, %c0_72] : memref<225x1xf32, #tpu.memory_space<vmem>>, vector<25x1xf32>
    %81 = vector.broadcast %80 : vector<25x1xf32> to vector<25x32xf32>
    %82 = arith.mulf %79, %81 : vector<25x32xf32>
    %83 = arith.truncf %82 : vector<25x32xf32> to vector<25x32xbf16>
    %c0_73 = arith.constant 0 : index
    %c0_74 = arith.constant 0 : index
    %84 = vector.load %arg16[%c0_73, %c0_74] : memref<25x288xbf16, #tpu.memory_space<vmem>>, vector<25x32xbf16>
    tpu.vector_store %arg16[%c0_73, %c0_74], %83 {strides = array<i32>} : memref<25x288xbf16, #tpu.memory_space<vmem>>, vector<25x32xbf16>,
    %c25 = arith.constant 25 : index
    %c0_75 = arith.constant 0 : index
    %85 = vector.load %arg15[%c25, %c0_75] : memref<225x288xbf16, #tpu.memory_space<vmem>>, vector<25x288xbf16>
    %c0_76 = arith.constant 0 : index
    %c0_77 = arith.constant 0 : index
    %86 = vector.load %arg4[%c0_76, %c0_77] : memref<288x32xbf16, #tpu.memory_space<vmem>>, vector<288x32xbf16>
    %cst_78 = arith.constant dense<0.000000e+00> : vector<25x32xf32>
    %87 = tpu.matmul %85, %86, %cst_78 {dimension_numbers = #tpu.dot_dimension_numbers<[1], [0], [0], [1], [0, 0, 1, 1], [], []>} : vector<25x288xbf16>, vector<288x32xbf16>, vector<25x32xf32> -> vector<25x32xf32>
    %c0_79 = arith.constant 0 : index
    %c0_80 = arith.constant 0 : index
    %88 = vector.load %arg5[%c0_79, %c0_80] : memref<1x32xf32, #tpu.memory_space<vmem>>, vector<1x32xf32>
    %89 = vector.broadcast %88 : vector<1x32xf32> to vector<25x32xf32>
    %90 = arith.addf %87, %89 : vector<25x32xf32>
    %cst_81 = arith.constant 0.000000e+00 : f32
    %91 = vector.broadcast %cst_81 : f32 to vector<25x32xf32>
    %92 = arith.maximumf %90, %91 : vector<25x32xf32>
    %c25_82 = arith.constant 25 : index
    %c0_83 = arith.constant 0 : index
    %93 = vector.load %arg2[%c25_82, %c0_83] : memref<225x1xf32, #tpu.memory_space<vmem>>, vector<25x1xf32>
    %94 = vector.broadcast %93 : vector<25x1xf32> to vector<25x32xf32>
    %95 = arith.mulf %92, %94 : vector<25x32xf32>
    %96 = arith.truncf %95 : vector<25x32xf32> to vector<25x32xbf16>
    %c0_84 = arith.constant 0 : index
    %c32_85 = arith.constant 32 : index
    %97 = vector.load %arg16[%c0_84, %c32_85] : memref<25x288xbf16, #tpu.memory_space<vmem>>, vector<25x32xbf16>
    tpu.vector_store %arg16[%c0_84, %c32_85], %96 {strides = array<i32>} : memref<25x288xbf16, #tpu.memory_space<vmem>>, vector<25x32xbf16>,
    %c50 = arith.constant 50 : index
    %c0_86 = arith.constant 0 : index
    %98 = vector.load %arg15[%c50, %c0_86] : memref<225x288xbf16, #tpu.memory_space<vmem>>, vector<25x288xbf16>
    %c0_87 = arith.constant 0 : index
    %c0_88 = arith.constant 0 : index
    %99 = vector.load %arg4[%c0_87, %c0_88] : memref<288x32xbf16, #tpu.memory_space<vmem>>, vector<288x32xbf16>
    %cst_89 = arith.constant dense<0.000000e+00> : vector<25x32xf32>
    %100 = tpu.matmul %98, %99, %cst_89 {dimension_numbers = #tpu.dot_dimension_numbers<[1], [0], [0], [1], [0, 0, 1, 1], [], []>} : vector<25x288xbf16>, vector<288x32xbf16>, vector<25x32xf32> -> vector<25x32xf32>
    %c0_90 = arith.constant 0 : index
    %c0_91 = arith.constant 0 : index
    %101 = vector.load %arg5[%c0_90, %c0_91] : memref<1x32xf32, #tpu.memory_space<vmem>>, vector<1x32xf32>
    %102 = vector.broadcast %101 : vector<1x32xf32> to vector<25x32xf32>
    %103 = arith.addf %100, %102 : vector<25x32xf32>
    %cst_92 = arith.constant 0.000000e+00 : f32
    %104 = vector.broadcast %cst_92 : f32 to vector<25x32xf32>
    %105 = arith.maximumf %103, %104 : vector<25x32xf32>
    %c50_93 = arith.constant 50 : index
    %c0_94 = arith.constant 0 : index
    %106 = vector.load %arg2[%c50_93, %c0_94] : memref<225x1xf32, #tpu.memory_space<vmem>>, vector<25x1xf32>
    %107 = vector.broadcast %106 : vector<25x1xf32> to vector<25x32xf32>
    %108 = arith.mulf %105, %107 : vector<25x32xf32>
    %109 = arith.truncf %108 : vector<25x32xf32> to vector<25x32xbf16>
    %c0_95 = arith.constant 0 : index
    %c64_96 = arith.constant 64 : index
    %110 = vector.load %arg16[%c0_95, %c64_96] : memref<25x288xbf16, #tpu.memory_space<vmem>>, vector<25x32xbf16>
    tpu.vector_store %arg16[%c0_95, %c64_96], %109 {strides = array<i32>} : memref<25x288xbf16, #tpu.memory_space<vmem>>, vector<25x32xbf16>,
    %c75 = arith.constant 75 : index
    %c0_97 = arith.constant 0 : index
    %111 = vector.load %arg15[%c75, %c0_97] : memref<225x288xbf16, #tpu.memory_space<vmem>>, vector<25x288xbf16>
    %c0_98 = arith.constant 0 : index
    %c0_99 = arith.constant 0 : index
    %112 = vector.load %arg4[%c0_98, %c0_99] : memref<288x32xbf16, #tpu.memory_space<vmem>>, vector<288x32xbf16>
    %cst_100 = arith.constant dense<0.000000e+00> : vector<25x32xf32>
    %113 = tpu.matmul %111, %112, %cst_100 {dimension_numbers = #tpu.dot_dimension_numbers<[1], [0], [0], [1], [0, 0, 1, 1], [], []>} : vector<25x288xbf16>, vector<288x32xbf16>, vector<25x32xf32> -> vector<25x32xf32>
    %c0_101 = arith.constant 0 : index
    %c0_102 = arith.constant 0 : index
    %114 = vector.load %arg5[%c0_101, %c0_102] : memref<1x32xf32, #tpu.memory_space<vmem>>, vector<1x32xf32>
    %115 = vector.broadcast %114 : vector<1x32xf32> to vector<25x32xf32>
    %116 = arith.addf %113, %115 : vector<25x32xf32>
    %cst_103 = arith.constant 0.000000e+00 : f32
    %117 = vector.broadcast %cst_103 : f32 to vector<25x32xf32>
    %118 = arith.maximumf %116, %117 : vector<25x32xf32>
    %c75_104 = arith.constant 75 : index
    %c0_105 = arith.constant 0 : index
    %119 = vector.load %arg2[%c75_104, %c0_105] : memref<225x1xf32, #tpu.memory_space<vmem>>, vector<25x1xf32>
    %120 = vector.broadcast %119 : vector<25x1xf32> to vector<25x32xf32>
    %121 = arith.mulf %118, %120 : vector<25x32xf32>
    %122 = arith.truncf %121 : vector<25x32xf32> to vector<25x32xbf16>
    %c0_106 = arith.constant 0 : index
    %c96_107 = arith.constant 96 : index
    %123 = vector.load %arg16[%c0_106, %c96_107] : memref<25x288xbf16, #tpu.memory_space<vmem>>, vector<25x32xbf16>
    tpu.vector_store %arg16[%c0_106, %c96_107], %122 {strides = array<i32>} : memref<25x288xbf16, #tpu.memory_space<vmem>>, vector<25x32xbf16>,
    %c100 = arith.constant 100 : index
    %c0_108 = arith.constant 0 : index
    %124 = vector.load %arg15[%c100, %c0_108] : memref<225x288xbf16, #tpu.memory_space<vmem>>, vector<25x288xbf16>
    %c0_109 = arith.constant 0 : index
    %c0_110 = arith.constant 0 : index
    %125 = vector.load %arg4[%c0_109, %c0_110] : memref<288x32xbf16, #tpu.memory_space<vmem>>, vector<288x32xbf16>
    %cst_111 = arith.constant dense<0.000000e+00> : vector<25x32xf32>
    %126 = tpu.matmul %124, %125, %cst_111 {dimension_numbers = #tpu.dot_dimension_numbers<[1], [0], [0], [1], [0, 0, 1, 1], [], []>} : vector<25x288xbf16>, vector<288x32xbf16>, vector<25x32xf32> -> vector<25x32xf32>
    %c0_112 = arith.constant 0 : index
    %c0_113 = arith.constant 0 : index
    %127 = vector.load %arg5[%c0_112, %c0_113] : memref<1x32xf32, #tpu.memory_space<vmem>>, vector<1x32xf32>
    %128 = vector.broadcast %127 : vector<1x32xf32> to vector<25x32xf32>
    %129 = arith.addf %126, %128 : vector<25x32xf32>
    %cst_114 = arith.constant 0.000000e+00 : f32
    %130 = vector.broadcast %cst_114 : f32 to vector<25x32xf32>
    %131 = arith.maximumf %129, %130 : vector<25x32xf32>
    %c100_115 = arith.constant 100 : index
    %c0_116 = arith.constant 0 : index
    %132 = vector.load %arg2[%c100_115, %c0_116] : memref<225x1xf32, #tpu.memory_space<vmem>>, vector<25x1xf32>
    %133 = vector.broadcast %132 : vector<25x1xf32> to vector<25x32xf32>
    %134 = arith.mulf %131, %133 : vector<25x32xf32>
    %135 = arith.truncf %134 : vector<25x32xf32> to vector<25x32xbf16>
    %c0_117 = arith.constant 0 : index
    %c128_118 = arith.constant 128 : index
    %136 = vector.load %arg16[%c0_117, %c128_118] : memref<25x288xbf16, #tpu.memory_space<vmem>>, vector<25x32xbf16>
    tpu.vector_store %arg16[%c0_117, %c128_118], %135 {strides = array<i32>} : memref<25x288xbf16, #tpu.memory_space<vmem>>, vector<25x32xbf16>,
    %c125 = arith.constant 125 : index
    %c0_119 = arith.constant 0 : index
    %137 = vector.load %arg15[%c125, %c0_119] : memref<225x288xbf16, #tpu.memory_space<vmem>>, vector<25x288xbf16>
    %c0_120 = arith.constant 0 : index
    %c0_121 = arith.constant 0 : index
    %138 = vector.load %arg4[%c0_120, %c0_121] : memref<288x32xbf16, #tpu.memory_space<vmem>>, vector<288x32xbf16>
    %cst_122 = arith.constant dense<0.000000e+00> : vector<25x32xf32>
    %139 = tpu.matmul %137, %138, %cst_122 {dimension_numbers = #tpu.dot_dimension_numbers<[1], [0], [0], [1], [0, 0, 1, 1], [], []>} : vector<25x288xbf16>, vector<288x32xbf16>, vector<25x32xf32> -> vector<25x32xf32>
    %c0_123 = arith.constant 0 : index
    %c0_124 = arith.constant 0 : index
    %140 = vector.load %arg5[%c0_123, %c0_124] : memref<1x32xf32, #tpu.memory_space<vmem>>, vector<1x32xf32>
    %141 = vector.broadcast %140 : vector<1x32xf32> to vector<25x32xf32>
    %142 = arith.addf %139, %141 : vector<25x32xf32>
    %cst_125 = arith.constant 0.000000e+00 : f32
    %143 = vector.broadcast %cst_125 : f32 to vector<25x32xf32>
    %144 = arith.maximumf %142, %143 : vector<25x32xf32>
    %c125_126 = arith.constant 125 : index
    %c0_127 = arith.constant 0 : index
    %145 = vector.load %arg2[%c125_126, %c0_127] : memref<225x1xf32, #tpu.memory_space<vmem>>, vector<25x1xf32>
    %146 = vector.broadcast %145 : vector<25x1xf32> to vector<25x32xf32>
    %147 = arith.mulf %144, %146 : vector<25x32xf32>
    %148 = arith.truncf %147 : vector<25x32xf32> to vector<25x32xbf16>
    %c0_128 = arith.constant 0 : index
    %c160_129 = arith.constant 160 : index
    %149 = vector.load %arg16[%c0_128, %c160_129] : memref<25x288xbf16, #tpu.memory_space<vmem>>, vector<25x32xbf16>
    tpu.vector_store %arg16[%c0_128, %c160_129], %148 {strides = array<i32>} : memref<25x288xbf16, #tpu.memory_space<vmem>>, vector<25x32xbf16>,
    %c150 = arith.constant 150 : index
    %c0_130 = arith.constant 0 : index
    %150 = vector.load %arg15[%c150, %c0_130] : memref<225x288xbf16, #tpu.memory_space<vmem>>, vector<25x288xbf16>
    %c0_131 = arith.constant 0 : index
    %c0_132 = arith.constant 0 : index
    %151 = vector.load %arg4[%c0_131, %c0_132] : memref<288x32xbf16, #tpu.memory_space<vmem>>, vector<288x32xbf16>
    %cst_133 = arith.constant dense<0.000000e+00> : vector<25x32xf32>
    %152 = tpu.matmul %150, %151, %cst_133 {dimension_numbers = #tpu.dot_dimension_numbers<[1], [0], [0], [1], [0, 0, 1, 1], [], []>} : vector<25x288xbf16>, vector<288x32xbf16>, vector<25x32xf32> -> vector<25x32xf32>
    %c0_134 = arith.constant 0 : index
    %c0_135 = arith.constant 0 : index
    %153 = vector.load %arg5[%c0_134, %c0_135] : memref<1x32xf32, #tpu.memory_space<vmem>>, vector<1x32xf32>
    %154 = vector.broadcast %153 : vector<1x32xf32> to vector<25x32xf32>
    %155 = arith.addf %152, %154 : vector<25x32xf32>
    %cst_136 = arith.constant 0.000000e+00 : f32
    %156 = vector.broadcast %cst_136 : f32 to vector<25x32xf32>
    %157 = arith.maximumf %155, %156 : vector<25x32xf32>
    %c150_137 = arith.constant 150 : index
    %c0_138 = arith.constant 0 : index
    %158 = vector.load %arg2[%c150_137, %c0_138] : memref<225x1xf32, #tpu.memory_space<vmem>>, vector<25x1xf32>
    %159 = vector.broadcast %158 : vector<25x1xf32> to vector<25x32xf32>
    %160 = arith.mulf %157, %159 : vector<25x32xf32>
    %161 = arith.truncf %160 : vector<25x32xf32> to vector<25x32xbf16>
    %c0_139 = arith.constant 0 : index
    %c192_140 = arith.constant 192 : index
    %162 = vector.load %arg16[%c0_139, %c192_140] : memref<25x288xbf16, #tpu.memory_space<vmem>>, vector<25x32xbf16>
    tpu.vector_store %arg16[%c0_139, %c192_140], %161 {strides = array<i32>} : memref<25x288xbf16, #tpu.memory_space<vmem>>, vector<25x32xbf16>,
    %c175 = arith.constant 175 : index
    %c0_141 = arith.constant 0 : index
    %163 = vector.load %arg15[%c175, %c0_141] : memref<225x288xbf16, #tpu.memory_space<vmem>>, vector<25x288xbf16>
    %c0_142 = arith.constant 0 : index
    %c0_143 = arith.constant 0 : index
    %164 = vector.load %arg4[%c0_142, %c0_143] : memref<288x32xbf16, #tpu.memory_space<vmem>>, vector<288x32xbf16>
    %cst_144 = arith.constant dense<0.000000e+00> : vector<25x32xf32>
    %165 = tpu.matmul %163, %164, %cst_144 {dimension_numbers = #tpu.dot_dimension_numbers<[1], [0], [0], [1], [0, 0, 1, 1], [], []>} : vector<25x288xbf16>, vector<288x32xbf16>, vector<25x32xf32> -> vector<25x32xf32>
    %c0_145 = arith.constant 0 : index
    %c0_146 = arith.constant 0 : index
    %166 = vector.load %arg5[%c0_145, %c0_146] : memref<1x32xf32, #tpu.memory_space<vmem>>, vector<1x32xf32>
    %167 = vector.broadcast %166 : vector<1x32xf32> to vector<25x32xf32>
    %168 = arith.addf %165, %167 : vector<25x32xf32>
    %cst_147 = arith.constant 0.000000e+00 : f32
    %169 = vector.broadcast %cst_147 : f32 to vector<25x32xf32>
    %170 = arith.maximumf %168, %169 : vector<25x32xf32>
    %c175_148 = arith.constant 175 : index
    %c0_149 = arith.constant 0 : index
    %171 = vector.load %arg2[%c175_148, %c0_149] : memref<225x1xf32, #tpu.memory_space<vmem>>, vector<25x1xf32>
    %172 = vector.broadcast %171 : vector<25x1xf32> to vector<25x32xf32>
    %173 = arith.mulf %170, %172 : vector<25x32xf32>
    %174 = arith.truncf %173 : vector<25x32xf32> to vector<25x32xbf16>
    %c0_150 = arith.constant 0 : index
    %c224_151 = arith.constant 224 : index
    %175 = vector.load %arg16[%c0_150, %c224_151] : memref<25x288xbf16, #tpu.memory_space<vmem>>, vector<25x32xbf16>
    tpu.vector_store %arg16[%c0_150, %c224_151], %174 {strides = array<i32>} : memref<25x288xbf16, #tpu.memory_space<vmem>>, vector<25x32xbf16>,
    %c200 = arith.constant 200 : index
    %c0_152 = arith.constant 0 : index
    %176 = vector.load %arg15[%c200, %c0_152] : memref<225x288xbf16, #tpu.memory_space<vmem>>, vector<25x288xbf16>
    %c0_153 = arith.constant 0 : index
    %c0_154 = arith.constant 0 : index
    %177 = vector.load %arg4[%c0_153, %c0_154] : memref<288x32xbf16, #tpu.memory_space<vmem>>, vector<288x32xbf16>
    %cst_155 = arith.constant dense<0.000000e+00> : vector<25x32xf32>
    %178 = tpu.matmul %176, %177, %cst_155 {dimension_numbers = #tpu.dot_dimension_numbers<[1], [0], [0], [1], [0, 0, 1, 1], [], []>} : vector<25x288xbf16>, vector<288x32xbf16>, vector<25x32xf32> -> vector<25x32xf32>
    %c0_156 = arith.constant 0 : index
    %c0_157 = arith.constant 0 : index
    %179 = vector.load %arg5[%c0_156, %c0_157] : memref<1x32xf32, #tpu.memory_space<vmem>>, vector<1x32xf32>
    %180 = vector.broadcast %179 : vector<1x32xf32> to vector<25x32xf32>
    %181 = arith.addf %178, %180 : vector<25x32xf32>
    %cst_158 = arith.constant 0.000000e+00 : f32
    %182 = vector.broadcast %cst_158 : f32 to vector<25x32xf32>
    %183 = arith.maximumf %181, %182 : vector<25x32xf32>
    %c200_159 = arith.constant 200 : index
    %c0_160 = arith.constant 0 : index
    %184 = vector.load %arg2[%c200_159, %c0_160] : memref<225x1xf32, #tpu.memory_space<vmem>>, vector<25x1xf32>
    %185 = vector.broadcast %184 : vector<25x1xf32> to vector<25x32xf32>
    %186 = arith.mulf %183, %185 : vector<25x32xf32>
    %187 = arith.truncf %186 : vector<25x32xf32> to vector<25x32xbf16>
    %c0_161 = arith.constant 0 : index
    %c256_162 = arith.constant 256 : index
    %188 = vector.load %arg16[%c0_161, %c256_162] : memref<25x288xbf16, #tpu.memory_space<vmem>>, vector<25x32xbf16>
    tpu.vector_store %arg16[%c0_161, %c256_162], %187 {strides = array<i32>} : memref<25x288xbf16, #tpu.memory_space<vmem>>, vector<25x32xbf16>,
    %c0_163 = arith.constant 0 : index
    %c0_164 = arith.constant 0 : index
    %189 = vector.load %arg16[%c0_163, %c0_164] : memref<25x288xbf16, #tpu.memory_space<vmem>>, vector<25x288xbf16>
    %c0_165 = arith.constant 0 : index
    %c0_166 = arith.constant 0 : index
    %190 = vector.load %arg6[%c0_165, %c0_166] : memref<288x32xbf16, #tpu.memory_space<vmem>>, vector<288x32xbf16>
    %cst_167 = arith.constant dense<0.000000e+00> : vector<25x32xf32>
    %191 = tpu.matmul %189, %190, %cst_167 {dimension_numbers = #tpu.dot_dimension_numbers<[1], [0], [0], [1], [0, 0, 1, 1], [], []>} : vector<25x288xbf16>, vector<288x32xbf16>, vector<25x32xf32> -> vector<25x32xf32>
    %c0_168 = arith.constant 0 : index
    %c0_169 = arith.constant 0 : index
    %192 = vector.load %arg7[%c0_168, %c0_169] : memref<1x32xf32, #tpu.memory_space<vmem>>, vector<1x32xf32>
    %193 = vector.broadcast %192 : vector<1x32xf32> to vector<25x32xf32>
    %194 = arith.addf %191, %193 : vector<25x32xf32>
    %cst_170 = arith.constant 0.000000e+00 : f32
    %195 = vector.broadcast %cst_170 : f32 to vector<25x32xf32>
    %196 = arith.maximumf %194, %195 : vector<25x32xf32>
    %197 = vector.extract_strided_slice %196 {offsets = [0, 0], sizes = [1, 32], strides = [1, 1]} : vector<25x32xf32> to vector<1x32xf32>
    %c0_171 = arith.constant 0 : index
    %c0_172 = arith.constant 0 : index
    %198 = vector.load %arg17[%c0_171, %c0_172] : memref<1x800xf32, #tpu.memory_space<vmem>>, vector<1x32xf32>
    tpu.vector_store %arg17[%c0_171, %c0_172], %197 {strides = array<i32>} : memref<1x800xf32, #tpu.memory_space<vmem>>, vector<1x32xf32>,
    %199 = vector.extract_strided_slice %196 {offsets = [1, 0], sizes = [1, 32], strides = [1, 1]} : vector<25x32xf32> to vector<1x32xf32>
    %c0_173 = arith.constant 0 : index
    %c32_174 = arith.constant 32 : index
    %200 = vector.load %arg17[%c0_173, %c32_174] : memref<1x800xf32, #tpu.memory_space<vmem>>, vector<1x32xf32>
    tpu.vector_store %arg17[%c0_173, %c32_174], %199 {strides = array<i32>} : memref<1x800xf32, #tpu.memory_space<vmem>>, vector<1x32xf32>,
    %201 = vector.extract_strided_slice %196 {offsets = [2, 0], sizes = [1, 32], strides = [1, 1]} : vector<25x32xf32> to vector<1x32xf32>
    %c0_175 = arith.constant 0 : index
    %c64_176 = arith.constant 64 : index
    %202 = vector.load %arg17[%c0_175, %c64_176] : memref<1x800xf32, #tpu.memory_space<vmem>>, vector<1x32xf32>
    tpu.vector_store %arg17[%c0_175, %c64_176], %201 {strides = array<i32>} : memref<1x800xf32, #tpu.memory_space<vmem>>, vector<1x32xf32>,
    %203 = vector.extract_strided_slice %196 {offsets = [3, 0], sizes = [1, 32], strides = [1, 1]} : vector<25x32xf32> to vector<1x32xf32>
    %c0_177 = arith.constant 0 : index
    %c96_178 = arith.constant 96 : index
    %204 = vector.load %arg17[%c0_177, %c96_178] : memref<1x800xf32, #tpu.memory_space<vmem>>, vector<1x32xf32>
    tpu.vector_store %arg17[%c0_177, %c96_178], %203 {strides = array<i32>} : memref<1x800xf32, #tpu.memory_space<vmem>>, vector<1x32xf32>,
    %205 = vector.extract_strided_slice %196 {offsets = [4, 0], sizes = [1, 32], strides = [1, 1]} : vector<25x32xf32> to vector<1x32xf32>
    %c0_179 = arith.constant 0 : index
    %c128_180 = arith.constant 128 : index
    %206 = vector.load %arg17[%c0_179, %c128_180] : memref<1x800xf32, #tpu.memory_space<vmem>>, vector<1x32xf32>
    tpu.vector_store %arg17[%c0_179, %c128_180], %205 {strides = array<i32>} : memref<1x800xf32, #tpu.memory_space<vmem>>, vector<1x32xf32>,
    %207 = vector.extract_strided_slice %196 {offsets = [5, 0], sizes = [1, 32], strides = [1, 1]} : vector<25x32xf32> to vector<1x32xf32>
    %c0_181 = arith.constant 0 : index
    %c160_182 = arith.constant 160 : index
    %208 = vector.load %arg17[%c0_181, %c160_182] : memref<1x800xf32, #tpu.memory_space<vmem>>, vector<1x32xf32>
    tpu.vector_store %arg17[%c0_181, %c160_182], %207 {strides = array<i32>} : memref<1x800xf32, #tpu.memory_space<vmem>>, vector<1x32xf32>,
    %209 = vector.extract_strided_slice %196 {offsets = [6, 0], sizes = [1, 32], strides = [1, 1]} : vector<25x32xf32> to vector<1x32xf32>
    %c0_183 = arith.constant 0 : index
    %c192_184 = arith.constant 192 : index
    %210 = vector.load %arg17[%c0_183, %c192_184] : memref<1x800xf32, #tpu.memory_space<vmem>>, vector<1x32xf32>
    tpu.vector_store %arg17[%c0_183, %c192_184], %209 {strides = array<i32>} : memref<1x800xf32, #tpu.memory_space<vmem>>, vector<1x32xf32>,
    %211 = vector.extract_strided_slice %196 {offsets = [7, 0], sizes = [1, 32], strides = [1, 1]} : vector<25x32xf32> to vector<1x32xf32>
    %c0_185 = arith.constant 0 : index
    %c224_186 = arith.constant 224 : index
    %212 = vector.load %arg17[%c0_185, %c224_186] : memref<1x800xf32, #tpu.memory_space<vmem>>, vector<1x32xf32>
    tpu.vector_store %arg17[%c0_185, %c224_186], %211 {strides = array<i32>} : memref<1x800xf32, #tpu.memory_space<vmem>>, vector<1x32xf32>,
    %213 = vector.extract_strided_slice %196 {offsets = [8, 0], sizes = [1, 32], strides = [1, 1]} : vector<25x32xf32> to vector<1x32xf32>
    %c0_187 = arith.constant 0 : index
    %c256_188 = arith.constant 256 : index
    %214 = vector.load %arg17[%c0_187, %c256_188] : memref<1x800xf32, #tpu.memory_space<vmem>>, vector<1x32xf32>
    tpu.vector_store %arg17[%c0_187, %c256_188], %213 {strides = array<i32>} : memref<1x800xf32, #tpu.memory_space<vmem>>, vector<1x32xf32>,
    %215 = vector.extract_strided_slice %196 {offsets = [9, 0], sizes = [1, 32], strides = [1, 1]} : vector<25x32xf32> to vector<1x32xf32>
    %c0_189 = arith.constant 0 : index
    %c288 = arith.constant 288 : index
    %216 = vector.load %arg17[%c0_189, %c288] : memref<1x800xf32, #tpu.memory_space<vmem>>, vector<1x32xf32>
    tpu.vector_store %arg17[%c0_189, %c288], %215 {strides = array<i32>} : memref<1x800xf32, #tpu.memory_space<vmem>>, vector<1x32xf32>,
    %217 = vector.extract_strided_slice %196 {offsets = [10, 0], sizes = [1, 32], strides = [1, 1]} : vector<25x32xf32> to vector<1x32xf32>
    %c0_190 = arith.constant 0 : index
    %c320 = arith.constant 320 : index
    %218 = vector.load %arg17[%c0_190, %c320] : memref<1x800xf32, #tpu.memory_space<vmem>>, vector<1x32xf32>
    tpu.vector_store %arg17[%c0_190, %c320], %217 {strides = array<i32>} : memref<1x800xf32, #tpu.memory_space<vmem>>, vector<1x32xf32>,
    %219 = vector.extract_strided_slice %196 {offsets = [11, 0], sizes = [1, 32], strides = [1, 1]} : vector<25x32xf32> to vector<1x32xf32>
    %c0_191 = arith.constant 0 : index
    %c352 = arith.constant 352 : index
    %220 = vector.load %arg17[%c0_191, %c352] : memref<1x800xf32, #tpu.memory_space<vmem>>, vector<1x32xf32>
    tpu.vector_store %arg17[%c0_191, %c352], %219 {strides = array<i32>} : memref<1x800xf32, #tpu.memory_space<vmem>>, vector<1x32xf32>,
    %221 = vector.extract_strided_slice %196 {offsets = [12, 0], sizes = [1, 32], strides = [1, 1]} : vector<25x32xf32> to vector<1x32xf32>
    %c0_192 = arith.constant 0 : index
    %c384 = arith.constant 384 : index
    %222 = vector.load %arg17[%c0_192, %c384] : memref<1x800xf32, #tpu.memory_space<vmem>>, vector<1x32xf32>
    tpu.vector_store %arg17[%c0_192, %c384], %221 {strides = array<i32>} : memref<1x800xf32, #tpu.memory_space<vmem>>, vector<1x32xf32>,
    %223 = vector.extract_strided_slice %196 {offsets = [13, 0], sizes = [1, 32], strides = [1, 1]} : vector<25x32xf32> to vector<1x32xf32>
    %c0_193 = arith.constant 0 : index
    %c416 = arith.constant 416 : index
    %224 = vector.load %arg17[%c0_193, %c416] : memref<1x800xf32, #tpu.memory_space<vmem>>, vector<1x32xf32>
    tpu.vector_store %arg17[%c0_193, %c416], %223 {strides = array<i32>} : memref<1x800xf32, #tpu.memory_space<vmem>>, vector<1x32xf32>,
    %225 = vector.extract_strided_slice %196 {offsets = [14, 0], sizes = [1, 32], strides = [1, 1]} : vector<25x32xf32> to vector<1x32xf32>
    %c0_194 = arith.constant 0 : index
    %c448 = arith.constant 448 : index
    %226 = vector.load %arg17[%c0_194, %c448] : memref<1x800xf32, #tpu.memory_space<vmem>>, vector<1x32xf32>
    tpu.vector_store %arg17[%c0_194, %c448], %225 {strides = array<i32>} : memref<1x800xf32, #tpu.memory_space<vmem>>, vector<1x32xf32>,
    %227 = vector.extract_strided_slice %196 {offsets = [15, 0], sizes = [1, 32], strides = [1, 1]} : vector<25x32xf32> to vector<1x32xf32>
    %c0_195 = arith.constant 0 : index
    %c480 = arith.constant 480 : index
    %228 = vector.load %arg17[%c0_195, %c480] : memref<1x800xf32, #tpu.memory_space<vmem>>, vector<1x32xf32>
    tpu.vector_store %arg17[%c0_195, %c480], %227 {strides = array<i32>} : memref<1x800xf32, #tpu.memory_space<vmem>>, vector<1x32xf32>,
    %229 = vector.extract_strided_slice %196 {offsets = [16, 0], sizes = [1, 32], strides = [1, 1]} : vector<25x32xf32> to vector<1x32xf32>
    %c0_196 = arith.constant 0 : index
    %c512 = arith.constant 512 : index
    %230 = vector.load %arg17[%c0_196, %c512] : memref<1x800xf32, #tpu.memory_space<vmem>>, vector<1x32xf32>
    tpu.vector_store %arg17[%c0_196, %c512], %229 {strides = array<i32>} : memref<1x800xf32, #tpu.memory_space<vmem>>, vector<1x32xf32>,
    %231 = vector.extract_strided_slice %196 {offsets = [17, 0], sizes = [1, 32], strides = [1, 1]} : vector<25x32xf32> to vector<1x32xf32>
    %c0_197 = arith.constant 0 : index
    %c544 = arith.constant 544 : index
    %232 = vector.load %arg17[%c0_197, %c544] : memref<1x800xf32, #tpu.memory_space<vmem>>, vector<1x32xf32>
    tpu.vector_store %arg17[%c0_197, %c544], %231 {strides = array<i32>} : memref<1x800xf32, #tpu.memory_space<vmem>>, vector<1x32xf32>,
    %233 = vector.extract_strided_slice %196 {offsets = [18, 0], sizes = [1, 32], strides = [1, 1]} : vector<25x32xf32> to vector<1x32xf32>
    %c0_198 = arith.constant 0 : index
    %c576 = arith.constant 576 : index
    %234 = vector.load %arg17[%c0_198, %c576] : memref<1x800xf32, #tpu.memory_space<vmem>>, vector<1x32xf32>
    tpu.vector_store %arg17[%c0_198, %c576], %233 {strides = array<i32>} : memref<1x800xf32, #tpu.memory_space<vmem>>, vector<1x32xf32>,
    %235 = vector.extract_strided_slice %196 {offsets = [19, 0], sizes = [1, 32], strides = [1, 1]} : vector<25x32xf32> to vector<1x32xf32>
    %c0_199 = arith.constant 0 : index
    %c608 = arith.constant 608 : index
    %236 = vector.load %arg17[%c0_199, %c608] : memref<1x800xf32, #tpu.memory_space<vmem>>, vector<1x32xf32>
    tpu.vector_store %arg17[%c0_199, %c608], %235 {strides = array<i32>} : memref<1x800xf32, #tpu.memory_space<vmem>>, vector<1x32xf32>,
    %237 = vector.extract_strided_slice %196 {offsets = [20, 0], sizes = [1, 32], strides = [1, 1]} : vector<25x32xf32> to vector<1x32xf32>
    %c0_200 = arith.constant 0 : index
    %c640 = arith.constant 640 : index
    %238 = vector.load %arg17[%c0_200, %c640] : memref<1x800xf32, #tpu.memory_space<vmem>>, vector<1x32xf32>
    tpu.vector_store %arg17[%c0_200, %c640], %237 {strides = array<i32>} : memref<1x800xf32, #tpu.memory_space<vmem>>, vector<1x32xf32>,
    %239 = vector.extract_strided_slice %196 {offsets = [21, 0], sizes = [1, 32], strides = [1, 1]} : vector<25x32xf32> to vector<1x32xf32>
    %c0_201 = arith.constant 0 : index
    %c672 = arith.constant 672 : index
    %240 = vector.load %arg17[%c0_201, %c672] : memref<1x800xf32, #tpu.memory_space<vmem>>, vector<1x32xf32>
    tpu.vector_store %arg17[%c0_201, %c672], %239 {strides = array<i32>} : memref<1x800xf32, #tpu.memory_space<vmem>>, vector<1x32xf32>,
    %241 = vector.extract_strided_slice %196 {offsets = [22, 0], sizes = [1, 32], strides = [1, 1]} : vector<25x32xf32> to vector<1x32xf32>
    %c0_202 = arith.constant 0 : index
    %c704 = arith.constant 704 : index
    %242 = vector.load %arg17[%c0_202, %c704] : memref<1x800xf32, #tpu.memory_space<vmem>>, vector<1x32xf32>
    tpu.vector_store %arg17[%c0_202, %c704], %241 {strides = array<i32>} : memref<1x800xf32, #tpu.memory_space<vmem>>, vector<1x32xf32>,
    %243 = vector.extract_strided_slice %196 {offsets = [23, 0], sizes = [1, 32], strides = [1, 1]} : vector<25x32xf32> to vector<1x32xf32>
    %c0_203 = arith.constant 0 : index
    %c736 = arith.constant 736 : index
    %244 = vector.load %arg17[%c0_203, %c736] : memref<1x800xf32, #tpu.memory_space<vmem>>, vector<1x32xf32>
    tpu.vector_store %arg17[%c0_203, %c736], %243 {strides = array<i32>} : memref<1x800xf32, #tpu.memory_space<vmem>>, vector<1x32xf32>,
    %245 = vector.extract_strided_slice %196 {offsets = [24, 0], sizes = [1, 32], strides = [1, 1]} : vector<25x32xf32> to vector<1x32xf32>
    %c0_204 = arith.constant 0 : index
    %c768 = arith.constant 768 : index
    %246 = vector.load %arg17[%c0_204, %c768] : memref<1x800xf32, #tpu.memory_space<vmem>>, vector<1x32xf32>
    tpu.vector_store %arg17[%c0_204, %c768], %245 {strides = array<i32>} : memref<1x800xf32, #tpu.memory_space<vmem>>, vector<1x32xf32>,
    %c0_205 = arith.constant 0 : index
    %c0_206 = arith.constant 0 : index
    %247 = vector.load %arg17[%c0_205, %c0_206] : memref<1x800xf32, #tpu.memory_space<vmem>>, vector<1x800xf32>
    %c0_207 = arith.constant 0 : index
    %c0_208 = arith.constant 0 : index
    %248 = vector.load %arg8[%c0_207, %c0_208] : memref<800x32xf32, #tpu.memory_space<vmem>>, vector<800x32xf32>
    %cst_209 = arith.constant dense<0.000000e+00> : vector<1x32xf32>
    %249 = tpu.matmul %247, %248, %cst_209 {dimension_numbers = #tpu.dot_dimension_numbers<[1], [0], [0], [1], [0, 0, 1, 1], [], []>} : vector<1x800xf32>, vector<800x32xf32>, vector<1x32xf32> -> vector<1x32xf32>
    %c0_210 = arith.constant 0 : index
    %c0_211 = arith.constant 0 : index
    %250 = vector.load %arg9[%c0_210, %c0_211] : memref<1x32xf32, #tpu.memory_space<vmem>>, vector<1x32xf32>
    %251 = arith.addf %249, %250 : vector<1x32xf32>
    %cst_212 = arith.constant 0.000000e+00 : f32
    %252 = vector.broadcast %cst_212 : f32 to vector<1x32xf32>
    %253 = arith.maximumf %251, %252 : vector<1x32xf32>
    %c0_213 = arith.constant 0 : index
    %c0_214 = arith.constant 0 : index
    %254 = vector.load %arg10[%c0_213, %c0_214] : memref<32x32xf32, #tpu.memory_space<vmem>>, vector<32x32xf32>
    %cst_215 = arith.constant dense<0.000000e+00> : vector<1x32xf32>
    %255 = tpu.matmul %253, %254, %cst_215 {dimension_numbers = #tpu.dot_dimension_numbers<[1], [0], [0], [1], [0, 0, 1, 1], [], []>} : vector<1x32xf32>, vector<32x32xf32>, vector<1x32xf32> -> vector<1x32xf32>
    %c0_216 = arith.constant 0 : index
    %c0_217 = arith.constant 0 : index
    %256 = vector.load %arg11[%c0_216, %c0_217] : memref<1x32xf32, #tpu.memory_space<vmem>>, vector<1x32xf32>
    %257 = arith.addf %255, %256 : vector<1x32xf32>
    %c0_218 = arith.constant 0 : index
    %c0_219 = arith.constant 0 : index
    %258 = vector.load %arg12[%c0_218, %c0_219] : memref<32x128xf32, #tpu.memory_space<vmem>>, vector<32x128xf32>
    %cst_220 = arith.constant dense<0.000000e+00> : vector<1x128xf32>
    %259 = tpu.matmul %257, %258, %cst_220 {dimension_numbers = #tpu.dot_dimension_numbers<[1], [0], [0], [1], [0, 0, 1, 1], [], []>} : vector<1x32xf32>, vector<32x128xf32>, vector<1x128xf32> -> vector<1x128xf32>
    %c0_221 = arith.constant 0 : index
    %c0_222 = arith.constant 0 : index
    %260 = vector.load %arg13[%c0_221, %c0_222] : memref<1x128xf32, #tpu.memory_space<vmem>>, vector<1x128xf32>
    %261 = arith.addf %259, %260 : vector<1x128xf32>
    %c0_223 = arith.constant 0 : index
    %c0_224 = arith.constant 0 : index
    %c0_225 = arith.constant 0 : index
    %262 = vector.load %arg14[%c0_223, %c0_224, %c0_225] : memref<1x1x128xf32, #tpu.memory_space<vmem>>, vector<1x1x128xf32>
    %263 = vector.shape_cast %262 : vector<1x1x128xf32> to vector<1x128xf32>
    %264 = vector.shape_cast %261 : vector<1x128xf32> to vector<1x1x128xf32>
    tpu.vector_store %arg14[%c0_223, %c0_224, %c0_225], %264 {strides = array<i32>} : memref<1x1x128xf32, #tpu.memory_space<vmem>>, vector<1x1x128xf32>,
    return
  }
  func.func @transform_0(%arg0: i32) -> (i32, i32, i32) {
    %c0_i32 = arith.constant 0 : i32
    %c0_i32_0 = arith.constant 0 : i32
    %c0_i32_1 = arith.constant 0 : i32
    return %arg0, %c0_i32, %c0_i32_0 : i32, i32, i32
  }
  func.func @transform_1(%arg0: i32) -> (i32, i32) {
    %c0_i32 = arith.constant 0 : i32
    %c0_i32_0 = arith.constant 0 : i32
    %c0_i32_1 = arith.constant 0 : i32
    return %c0_i32, %c0_i32_0 : i32, i32
  }
  func.func @transform_2(%arg0: i32) -> (i32, i32) {
    %c0_i32 = arith.constant 0 : i32
    %c0_i32_0 = arith.constant 0 : i32
    %c0_i32_1 = arith.constant 0 : i32
    return %c0_i32, %c0_i32_0 : i32, i32
  }
  func.func @transform_3(%arg0: i32) -> (i32, i32) {
    %c0_i32 = arith.constant 0 : i32
    %c0_i32_0 = arith.constant 0 : i32
    %c0_i32_1 = arith.constant 0 : i32
    return %c0_i32, %c0_i32_0 : i32, i32
  }
  func.func @transform_4(%arg0: i32) -> (i32, i32) {
    %c0_i32 = arith.constant 0 : i32
    %c0_i32_0 = arith.constant 0 : i32
    %c0_i32_1 = arith.constant 0 : i32
    return %c0_i32, %c0_i32_0 : i32, i32
  }
  func.func @transform_5(%arg0: i32) -> (i32, i32) {
    %c0_i32 = arith.constant 0 : i32
    %c0_i32_0 = arith.constant 0 : i32
    %c0_i32_1 = arith.constant 0 : i32
    return %c0_i32, %c0_i32_0 : i32, i32
  }
  func.func @transform_6(%arg0: i32) -> (i32, i32) {
    %c0_i32 = arith.constant 0 : i32
    %c0_i32_0 = arith.constant 0 : i32
    %c0_i32_1 = arith.constant 0 : i32
    return %c0_i32, %c0_i32_0 : i32, i32
  }
  func.func @transform_7(%arg0: i32) -> (i32, i32) {
    %c0_i32 = arith.constant 0 : i32
    %c0_i32_0 = arith.constant 0 : i32
    %c0_i32_1 = arith.constant 0 : i32
    return %c0_i32, %c0_i32_0 : i32, i32
  }
  func.func @transform_8(%arg0: i32) -> (i32, i32) {
    %c0_i32 = arith.constant 0 : i32
    %c0_i32_0 = arith.constant 0 : i32
    %c0_i32_1 = arith.constant 0 : i32
    return %c0_i32, %c0_i32_0 : i32, i32
  }
  func.func @transform_9(%arg0: i32) -> (i32, i32) {
    %c0_i32 = arith.constant 0 : i32
    %c0_i32_0 = arith.constant 0 : i32
    %c0_i32_1 = arith.constant 0 : i32
    return %c0_i32, %c0_i32_0 : i32, i32
  }
  func.func @transform_10(%arg0: i32) -> (i32, i32) {
    %c0_i32 = arith.constant 0 : i32
    %c0_i32_0 = arith.constant 0 : i32
    %c0_i32_1 = arith.constant 0 : i32
    return %c0_i32, %c0_i32_0 : i32, i32
  }
  func.func @transform_11(%arg0: i32) -> (i32, i32) {
    %c0_i32 = arith.constant 0 : i32
    %c0_i32_0 = arith.constant 0 : i32
    %c0_i32_1 = arith.constant 0 : i32
    return %c0_i32, %c0_i32_0 : i32, i32
  }
  func.func @transform_12(%arg0: i32) -> (i32, i32) {
    %c0_i32 = arith.constant 0 : i32
    %c0_i32_0 = arith.constant 0 : i32
    %c0_i32_1 = arith.constant 0 : i32
    return %c0_i32, %c0_i32_0 : i32, i32
  }
  func.func @transform_13(%arg0: i32) -> (i32, i32, i32) {
    %c0_i32 = arith.constant 0 : i32
    %c0_i32_0 = arith.constant 0 : i32
    %c0_i32_1 = arith.constant 0 : i32
    return %arg0, %c0_i32, %c0_i32_0 : i32, i32, i32
  }
}

</mosaic_0001>

<bundles_post_ra>
// kernel: actor_critic_forward.1
= control target key start
LH: loop header
LB: loop body
LE: loop exit
PB: predicated region body
PF: predicated region fallthrough
CT: control target
= control target key end

     0   :  { %s13825_s25 = smov 0   ;;  %s17183_s0 = inlined_call_operand.vmem [shape: bf16[2,2025,65], index: 0, kind: input, shape index: {}]   ;;  %s17184_s1 = inlined_call_operand.vmem [shape: f32[225,1], index: 1, kind: input, shape index: {}]   ;;  %s17185_s2 = inlined_call_operand.vmem [shape: bf16[65,32], index: 2, kind: input, shape index: {}]   ;;  %s17186_s3 = inlined_call_operand.vmem [shape: bf16[288,32], index: 3, kind: input, shape index: {}]   ;;  %s17187_s4 = inlined_call_operand.vmem [shape: f32[1,32], index: 4, kind: input, shape index: {}]   ;;  %s17188_s5 = inlined_call_operand.vmem [shape: bf16[288,32], index: 5, kind: input, shape index: {}]   ;;  %s17189_s6 = inlined_call_operand.vmem [shape: f32[1,32], index: 6, kind: input, shape index: {}]   ;;  %s17190_s7 = inlined_call_operand.vmem [shape: f32[800,32], index: 7, kind: input, shape index: {}]   ;;  %s17191_s8 = inlined_call_operand.vmem [shape: f32[1,32], index: 8, kind: input, shape index: {}]   ;;  %s17192_s9 = inlined_call_operand.vmem [shape: f32[32,32], index: 9, kind: input, shape index: {}]   ;;  %s17193_s10 = inlined_call_operand.vmem [shape: f32[1,32], index: 10, kind: input, shape index: {}]   ;;  %s17194_s11 = inlined_call_operand.vmem [shape: f32[32,128], index: 11, kind: input, shape index: {}]   ;;  %s17195_s12 = inlined_call_operand.vmem [shape: f32[1,128], index: 12, kind: input, shape index: {}]   ;;  %s17196_s13 = inlined_call_operand.vmem [shape: f32[2,1,128], index: 13, kind: output, shape index: {}]  }
   0x1 LB: > { %s10615_s26 = sadd.s32 4294967295, %s13745_s25   ;;  %p10619_p0 = scmp.ge.s32.totalorder %s13745_s25, 1  ;;  %s13745_s25 = sphi %s13825_s25, %s23_s25  }
   0x2   : > { %p387_p1 = scmp.lt.s32.totalorder %s13745_s25, 3 }
   0x4   : > { %p388_p2 = pnand %p10619_p0, %p387_p1 }
   0x6   : > { %391 = sbr.rel (%p388_p2) target bundleno = 2382 (0x94e), region = 72 }
   0xd   : > { %v13301_v0 = vld [vmem:[%s17185_s2] sm:$0xff]   ;;  %v17197_v1 = vmov 0.0   ;;  %v13303_v3 = vld [vmem:[%s17185_s2 + $0x8] sm:$0xff]   ;;  %v13748_v5 = vmov 0   ;;  %vm13749_vm0 = vmmov 0   ;;  %p429_p3 = scmp.lt.s32.totalorder %s10615_s26, 1 }
   0xe   : > { %12425 = vmatprep.subr.bf16.mxu0 %v17197_v1  ;;  %12495 = vmatprep.subr.bf16.mxu1 %v17197_v1  ;;  %v13302_v2 = vld [vmem:[%s17185_s2] sm:$0xff]   ;;  %v13304_v4 = vld [vmem:[%s17185_s2 + $0x8] sm:$0xff]   ;;  %v13305_v6 = vld [vmem:[%s17185_s2 + $0x10] sm:$0xff]   ;;  %vm622_vm1 = vcmask 1040384   ;;  %vm576_vm2 = vcmask 531456   ;;  %vm1767_vm4 = vcmask 1046528  }
   0xf   : > { %12426 = vmatpush3.bf16.msra.mxu0 %v13301_v0  ;;  %12496 = vmatpush3.bf16.msra.mxu1 %v13302_v2  ;;  %v13306_v7 = vld [vmem:[%s17185_s2 + $0x10] sm:$0xff]   ;;  %s17273_s26 = smov (!%p429_p3, %s10615_s26), 1  ;;  %v13309_v8 = vld [vmem:[%s17185_s2 + $0x20] ss:$0 sps:$4 sm:$0x11]   ;;  %v13307_v10 = vld [vmem:[%s17185_s2 + $0x18] sm:$0xff]  }
  0x10   : > { %12427 = vmatprep.subr.bf16.mxu0 %v17197_v1  ;;  %12497 = vmatprep.subr.bf16.mxu1 %v17197_v1  ;;  %v13310_v9 = vld [vmem:[%s17185_s2 + $0x20] ss:$0 sps:$4 sm:$0x11]   ;;  %s13282_s28 = smul.u32 1016, %s17273_s26  ;;  %v13308_v11 = vld [vmem:[%s17185_s2 + $0x18] sm:$0xff]   ;;  %v13877_v12 = vsel %vm622_vm1, 65535, %v13748_v5  ;;  %s436_s19 = scalar_lea.vmem %s17196_s13, %s17273_s26 }
  0x11   : > { %13299 = vset.pattern.permute.xlu0 %v13748_v5  ;;  %12435 = vmatprep.mubr.msk.bf16.mxu0 %vm13749_vm0, %v17197_v1  ;;  %v626_v13 = vand.u32 %v13309_v8, %v13877_v12  ;;  %v1264_v16 = vand.u32 %v13310_v9, %v13877_v12  ;;  %v13314_v20 = vld [vmem:[%s17185_s2] sm:$0xff]   ;;  %vm1072_vm3 = vsmask.f32 7424  ;;  %v13322_v30 = vld [vmem:[%s17185_s2 + $0x8] sm:$0xff]   ;;  %v13330_v40 = vld [vmem:[%s17185_s2 + $0x10] sm:$0xff]   ;;  %vm926_vm6 = vcmask 257024  }
  0x12   : > { %12505 = vmatprep.mubr.msk.bf16.mxu1 %vm13749_vm0, %v17197_v1  ;;  %13300 = vset.pattern.permute.xlu1 %v13748_v5  ;;  %s13882_s18 = scalar_lea.vmem %s17183_s0, %s13282_s28  ;;  %v13315_v25 = vld [vmem:[%s17185_s2] sm:$0xff]   ;;  %v13323_v34 = vld [vmem:[%s17185_s2 + $0x8] sm:$0xff]   ;;  %v13331_v43 = vld [vmem:[%s17185_s2 + $0x10] sm:$0xff]   ;;  %vm2373_vm5 = vsmask.f32 6400  ;;  %s13750_s16 = smov 32  }
  0x13   : > { %12428 = vmatpush3.bf16.msra.mxu0 %v13303_v3  ;;  %12498 = vmatpush3.bf16.msra.mxu1 %v13304_v4  ;;  %v13312_v14 = vld [vmem:[%s13882_s18 + $0x70] sm:$0xff]   ;;  %v13313_v15 = vld [vmem:[%s13882_s18 + $0x78] sm:$0xff]   ;;  %v13317_v21 = vld [vmem:[%s13882_s18 + $0x80] sm:$0xff]   ;;  %vm3084_vm7 = vcmask 1045504   ;;  %vm3629_vm8 = vsmask.f32 5376 }
  0x14   : > { %12429 = vmatprep.subr.bf16.mxu0 %v17197_v1  ;;  %12499 = vmatprep.subr.bf16.mxu1 %v17197_v1  ;;  %v1074_v17 = vshrl.u32 %v13312_v14, 16  ;;  %v1076_v18 = vshll.u32 %v13312_v14, 16  ;;  %v1081_v19 = vshll.u32 %v13313_v15, 16  ;;  %v13311_v22 = vld [vmem:[%s13882_s18] sm:$0xff]   ;;  %v1085_v27 = vshrl.u32 %v13313_v15, 16  ;;  %v13319_v31 = vld [vmem:[%s13882_s18 + $0x88] sm:$0xff]  }
  0x15   : > { %v1089_v28 = vshll.u32 %v13317_v21, 16  ;;  %v13316_v35 = vld [vmem:[%s13882_s18 + $0x8] sm:$0xff]   ;;  %v1093_v37 = vshrl.u32 %v13317_v21, 16  ;;  %v1097_v38 = vshll.u32 %v13319_v31, 16  ;;  %v13321_v39 = vld [vmem:[%s13882_s18 + $0x90] sm:$0xff]   ;;  %v1101_v46 = vshrl.u32 %v13319_v31, 16 }
  0x16   : > { %v1078_v23 = vrot.slane %v1076_v18, 1  ;;  %v1083_v24 = vrot.slane %v1081_v19, 1  ;;  %v13318_v44 = vld [vmem:[%s13882_s18 + $0x10] sm:$0xff]   ;;  %v1105_v47 = vshll.u32 %v13321_v39, 16  ;;  %v13320_v48 = vld [vmem:[%s13882_s18 + $0x18] sm:$0xff]   ;;  %v1109_v55 = vshrl.u32 %v13321_v39, 16 }
  0x17   : > { %12430 = vmatpush3.bf16.msra.mxu0 %v13305_v6  ;;  %12500 = vmatpush3.bf16.msra.mxu1 %v13306_v7  ;;  %v1091_v33 = vrot.slane %v1089_v28, 1  ;;  %v1099_v42 = vrot.slane %v1097_v38, 1  ;;  %v13338_v49 = vld [vmem:[%s17185_s2 + $0x18] sm:$0xff]   ;;  %v13346_v57 = vld [vmem:[%s17185_s2 + $0x20] ss:$0 sps:$4 sm:$0x11]  }
  0x18   : > { %12431 = vmatprep.subr.bf16.mxu0 %v17197_v1  ;;  %12501 = vmatprep.subr.bf16.mxu1 %v17197_v1  ;;  %v1079_v26 = vor.u32 %v1078_v23, %v1074_v17  ;;  %v1087_v32 = vor.u32 %v1085_v27, %v1083_v24  ;;  %v1107_v51 = vrot.slane %v1105_v47, 1  ;;  %v13325_v52 = vld [vmem:[%s13882_s18 + $0x98] sm:$0xff]   ;;  %v13327_v60 = vld [vmem:[%s13882_s18 + $0xa0] sm:$0xff]   ;;  %v1870_v62 = vand.u32 %v13346_v57, %v13877_v12  ;;  %v13329_v7 = vld [vmem:[%s13882_s18 + $0xa8] sm:$0xff]   ;;  %s13751_s27 = smov 64   ;;  %s13752_s28 = smov 96  }
  0x19   : > { %v1095_v41 = vor.u32 %v1093_v37, %v1091_v33  ;;  %v1103_v50 = vor.u32 %v1101_v46, %v1099_v42  ;;  %v13339_v53 = vld [vmem:[%s17185_s2 + $0x18] sm:$0xff]   ;;  %v1113_v56 = vshll.u32 %v13325_v52, 16  ;;  %v13324_v61 = vld [vmem:[%s13882_s18 + $0x20] sm:$0xff]   ;;  %v1117_v3 = vshrl.u32 %v13325_v52, 16  ;;  %v13326_v8 = vld [vmem:[%s13882_s18 + $0x28] sm:$0xff]  }
  0x1a   : > { %v1084_v29 = vsel %vm1072_vm3, %v1079_v26, %v1083_v24  ;;  %v1092_v36 = vsel %vm1072_vm3, %v1087_v32, %v1091_v33  ;;  %v1111_v58 = vor.u32 %v1109_v55, %v1107_v51  ;;  %v13347_v63 = vld [vmem:[%s17185_s2 + $0x20] ss:$0 sps:$4 sm:$0x11]   ;;  %v1121_v4 = vshll.u32 %v13327_v60, 16  ;;  %v13333_v15 = vld [vmem:[%s13882_s18 + $0xb0] sm:$0xff]   ;;  %v13332_v23 = vld [vmem:[%s13882_s18 + $0x38] sm:$0xff]  }
  0x1b   : > { %12432 = vmatpush3.bf16.msra.mxu0 %v13307_v10  ;;  %12502 = vmatpush3.bf16.msra.mxu1 %v13308_v11  ;;  %v1100_v45 = vsel %vm1072_vm3, %v1095_v41, %v1099_v42  ;;  %v1108_v54 = vsel %vm1072_vm3, %v1103_v50, %v1107_v51  ;;  %v1115_v59 = vrot.slane %v1113_v56, 1  ;;  %v2581_v0 = vand.u32 %v13347_v63, %v13877_v12  ;;  %v13341_v37 = vld [vmem:[%s13882_s18 + $0xc8] sm:$0xff]   ;;  %v13343_v41 = vld [vmem:[%s13882_s18 + $0xd0] sm:$0xff]   ;;  %v13345_v51 = vld [vmem:[%s13882_s18 + $0xd8] sm:$0xff]  }
  0x1c   : > { %12433 = vmatprep.subr.bf16.mxu0 %v17197_v1  ;;  %12503 = vmatprep.subr.bf16.mxu1 %v17197_v1  ;;  %v1123_v6 = vrot.slane %v1121_v4, 1  ;;  %v1125_v10 = vshrl.u32 %v13327_v60, 16  ;;  %v1129_v11 = vshll.u32 %v13329_v7, 16  ;;  %v1133_v18 = vshrl.u32 %v13329_v7, 16  ;;  %v13340_v42 = vld [vmem:[%s13882_s18 + $0x50] sm:$0xff]   ;;  %v13344_v56 = vld [vmem:[%s13882_s18 + $0x60] sm:$0xff]  }
  0x1d   : > { %v1116_v2 = vsel %vm1072_vm3, %v1111_v58, %v1115_v59  ;;  %v1119_v5 = vor.u32 %v1117_v3, %v1115_v59  ;;  %v1137_v19 = vshll.u32 %v13333_v15, 16  ;;  %v1169_v46 = vshll.u32 %v13343_v41, 16  ;;  %v13349_v52 = vld [vmem:[%s13882_s18 + $0xe0] ss:$0 sps:$4 sm:$0x11]   ;;  %v13348_v63 = vld [vmem:[%s13882_s18 + $0x68] sm:$0xff]  }
  0x1e   : > { %v1131_v14 = vrot.slane %v1129_v11, 1  ;;  %v1177_v55 = vshll.u32 %v13345_v51, 16  ;;  %v1185_v59 = vshll.u32 %v13349_v52, 16  ;;  %v13353_v3 = vld [vmem:[%s13882_s18 + $0x150] sm:$0xfe]   ;;  %vm955_vm10 = vcmask 253952  }
  0x1f   : > { %12434 = vmatpush3.bf16.msra.mxu0 %v626_v13  ;;  %12504 = vmatpush3.bf16.msra.mxu1 %v1264_v16  ;;  %v1124_v9 = vsel %vm1072_vm3, %v1119_v5, %v1123_v6  ;;  %v1127_v13 = vor.u32 %v1125_v10, %v1123_v6  ;;  %v13328_v16 = vld [vmem:[%s13882_s18 + $0x30] sm:$0xff]   ;;  %v1139_v21 = vrot.slane %v1137_v19, 1  ;;  %v1171_v50 = vrot.slane %v1169_v46, 1  ;;  %v13351_v11 = vld [vmem:[%s13882_s18 + $0xe0] sm:$0xfe]  }
  0x20   : > { %12565 = vmatprep.subr.bf16.mxu0 %v17197_v1  ;;  %12635 = vmatprep.subr.bf16.mxu1 %v17197_v1  ;;  %v1179_v58 = vrot.slane %v1177_v55, 1  ;;  %v13350_v7 = vld [vmem:[%s13882_s18 + $0x70] ss:$0 sps:$4 sm:$0x11]   ;;  %v1189_v10 = vshrl.u32 %v13349_v52, 16  ;;  %v1768_v19 = vrot.slane %v13351_v11, 1 }
  0x21   : > { %v1132_v17 = vsel %vm1072_vm3, %v1127_v13, %v1131_v14  ;;  %v13352_v13 = vld [vmem:[%s13882_s18 + $0xe8] sm:$0xff]   ;;  %v13372_v46 = vld [vmem:[%s17185_s2 + $0x10] sm:$0xff]   ;;  %v13388_v52 = vld [vmem:[%s17185_s2 + $0x20] ss:$0 sps:$4 sm:$0x11]   ;;  %vm1622_vm12 = vcmask 519424  }
  0x22   : > { %12436 = vmatmul.mubr.msk.bf16.vlgmr.msra.gmra.mrb[0].mxu0 %vm576_vm2, %v13311_v22  ;;  %12506 = vmatmul.mubr.msk.bf16.vlgmr.msra.gmra.mrb[0].mxu1 %vm576_vm2, %v1084_v29  ;;  %v13335_v22 = vld [vmem:[%s13882_s18 + $0xb8] sm:$0xff]   ;;  %v13337_v29 = vld [vmem:[%s13882_s18 + $0xc0] sm:$0xff]   ;;  %v13367_v11 = vld [vmem:[%s13882_s18 + $0x110] sm:$0xff]   ;;  %vm956_vm9 = vsmask.f32 256  ;;  %vm4337_vm13 = vcmask 1044480  }
  0x23   : > { %12566 = vmatpush3.bf16.msra.mxu0 %v13314_v20  ;;  %12439 = vmatprep.mubr.msk.bf16.mxu0 %vm13749_vm0, %v17197_v1  ;;  %v1135_v20 = vor.u32 %v1133_v18, %v1131_v14  ;;  %v1145_v26 = vshll.u32 %v13335_v22, 16  ;;  %v1149_v32 = vshrl.u32 %v13335_v22, 16  ;;  %v1153_v33 = vshll.u32 %v13337_v29, 16  ;;  %vm14580_vm11 = vmand %vm955_vm10, %vm956_vm9 }
  0x24   : > { %12567 = vmatprep.subr.bf16.mxu0 %v17197_v1  ;;  %12636 = vmatpush3.bf16.msra.mxu1 %v13315_v25  ;;  %v1141_v25 = vshrl.u32 %v13333_v15, 16  ;;  %v1157_v39 = vshrl.u32 %v13337_v29, 16  ;;  %v13356_v29 = vld [vmem:[%s17185_s2] sm:$0xff]   ;;  %vm4940_vm14 = vsmask.f32 4352  ;;  %vm2228_vm15 = vcmask 781824  }
  0x25   : > { %12509 = vmatprep.mubr.msk.bf16.mxu1 %vm13749_vm0, %v17197_v1  ;;  %12637 = vmatprep.subr.bf16.mxu1 %v17197_v1  ;;  %v1140_v24 = vsel %vm1072_vm3, %v1135_v20, %v1139_v21  ;;  %v1147_v28 = vrot.slane %v1145_v26, 1  ;;  %v1769_v20 = vrot.slane %v13352_v13, 1  ;;  %vm2939_vm1 = vcmask 1044224  }
  0x26   : > { %v1143_v27 = vor.u32 %v1141_v25, %v1139_v21  ;;  %v13357_v21 = vld [vmem:[%s13882_s18 + $0xf0] sm:$0xff]   ;;  %v13355_v25 = vld [vmem:[%s17185_s2] sm:$0xff]  }
  0x27   : > { %12568 = vmatpush3.bf16.msra.mxu0 %v13322_v30  ;;  %v13334_v30 = vld [vmem:[%s13882_s18 + $0x40] sm:$0xff]  }
  0x28   : > { %12569 = vmatprep.subr.bf16.mxu0 %v17197_v1  ;;  %12638 = vmatpush3.bf16.msra.mxu1 %v13323_v34  ;;  %v1148_v31 = vsel %vm1072_vm3, %v1143_v27, %v1147_v28  ;;  %v13336_v34 = vld [vmem:[%s13882_s18 + $0x48] sm:$0xff]  }
  0x29   : > { %12639 = vmatprep.subr.bf16.mxu1 %v17197_v1  ;;  %v13360_v27 = vld [vmem:[%s13882_s18 + $0x168] sm:$0xff]  }
  0x2a   : > { %12440 = vmatmul.mubr.msk.bf16.gmra.mrb[4].mxu0 %vm576_vm2, %v13316_v35  ;;  %12510 = vmatmul.mubr.msk.bf16.gmra.mrb[4].mxu1 %vm576_vm2, %v1092_v36  ;;  %v1151_v35 = vor.u32 %v1149_v32, %v1147_v28  ;;  %v1155_v36 = vrot.slane %v1153_v33, 1  ;;  %v1770_v28 = vsel %vm1767_vm4, %v1768_v19, %v1769_v20 }
  0x2b   : > { %12443 = vmatprep.mubr.msk.bf16.mxu0 %vm13749_vm0, %v17197_v1  ;;  %12513 = vmatprep.mubr.msk.bf16.mxu1 %vm13749_vm0, %v17197_v1 }
  0x2c   : > { %12570 = vmatpush3.bf16.msra.mxu0 %v13330_v40  ;;  %12640 = vmatpush3.bf16.msra.mxu1 %v13331_v43  ;;  %v1156_v38 = vsel %vm1072_vm3, %v1151_v35, %v1155_v36  ;;  %v1161_v40 = vshll.u32 %v13341_v37, 16  ;;  %v1159_v43 = vor.u32 %v1157_v39, %v1155_v36  ;;  %v2401_v35 = vshrl.u32 %v13360_v27, 16 }
  0x2d   : > { %12571 = vmatprep.subr.bf16.mxu0 %v17197_v1  ;;  %12641 = vmatprep.subr.bf16.mxu1 %v17197_v1  ;;  %v2404_v36 = vshll.u32 %v13360_v27, 16 }
  0x30   : > { %12572 = vmatpush3.bf16.msra.mxu0 %v13338_v49  ;;  %12642 = vmatpush3.bf16.msra.mxu1 %v13339_v53 }
  0x31   : > { %12573 = vmatprep.subr.bf16.mxu0 %v17197_v1  ;;  %12643 = vmatprep.subr.bf16.mxu1 %v17197_v1 }
  0x32   : > { %12444 = vmatmul.mubr.msk.bf16.gmra.mrb[8].mxu0 %vm576_vm2, %v13318_v44  ;;  %12514 = vmatmul.mubr.msk.bf16.gmra.mrb[8].mxu1 %vm576_vm2, %v1100_v45  ;;  %v1163_v44 = vrot.slane %v1161_v40, 1  ;;  %v1165_v45 = vshrl.u32 %v13341_v37, 16  ;;  %v13362_v37 = vld [vmem:[%s13882_s18 + $0x170] sm:$0xff]  }
  0x33   : > { %12447 = vmatprep.mubr.msk.bf16.mxu0 %vm13749_vm0, %v17197_v1  ;;  %12517 = vmatprep.mubr.msk.bf16.mxu1 %vm13749_vm0, %v17197_v1 }
  0x34   : > { %12574 = vmatpush3.bf16.msra.mxu0 %v1870_v62  ;;  %12644 = vmatpush3.bf16.msra.mxu1 %v2581_v0  ;;  %v1164_v47 = vsel %vm1072_vm3, %v1159_v43, %v1163_v44  ;;  %v1167_v49 = vor.u32 %v1165_v45, %v1163_v44  ;;  %v1187_v62 = vrot.slane %v1185_v59, 1  ;;  %v2403_v43 = vrot.slane %v2401_v35, 1  ;;  %v13371_v45 = vld [vmem:[%s17185_s2 + $0x10] sm:$0xff]   ;;  %v13366_v59 = vld [vmem:[%s13882_s18 + $0x178] sm:$0xff]   ;;  %v13373_v35 = vld [vmem:[%s13882_s18 + $0x120] sm:$0xff]  }
  0x35   : > { %12705 = vmatprep.subr.bf16.mxu0 %v17197_v1  ;;  %12775 = vmatprep.subr.bf16.mxu1 %v17197_v1  ;;  %v2406_v44 = vrot.slane %v2404_v36, 2 }
  0x36   : > { %v1172_v53 = vsel %vm1072_vm3, %v1167_v49, %v1171_v50  ;;  %v13379_v49 = vld [vmem:[%s17185_s2 + $0x18] sm:$0xff]  }
  0x37   : > { %v2407_v55 = vor.u32 %v2406_v44, %v2403_v43 }
  0x3a   : > { %12448 = vmatmul.mubr.msk.bf16.gmra.mrb[12].mxu0 %vm576_vm2, %v13320_v48  ;;  %12518 = vmatmul.mubr.msk.bf16.gmra.mrb[12].mxu1 %vm576_vm2, %v1108_v54  ;;  %v13342_v48 = vld [vmem:[%s13882_s18 + $0x58] sm:$0xff]   ;;  %v1173_v54 = vshrl.u32 %v13343_v41, 16  ;;  %v13364_v41 = vld [vmem:[%s17185_s2 + $0x8] sm:$0xff]  }
  0x3b   : > { %12451 = vmatprep.mubr.msk.bf16.mxu0 %vm13749_vm0, %v17197_v1  ;;  %12521 = vmatprep.mubr.msk.bf16.mxu1 %vm13749_vm0, %v17197_v1 }
  0x3c   : > { %v1175_v57 = vor.u32 %v1173_v54, %v1171_v50  ;;  %v13387_v50 = vld [vmem:[%s17185_s2 + $0x20] ss:$0 sps:$4 sm:$0x11]   ;;  %v13380_v54 = vld [vmem:[%s17185_s2 + $0x18] sm:$0xff]  }
  0x3e   : > { %v1180_v60 = vsel %vm1072_vm3, %v1175_v57, %v1179_v58  ;;  %v3187_v57 = vand.u32 %v13387_v50, %v13877_v12 }
  0x42   : > { %12452 = vmatmul.mubr.msk.bf16.gmra.mrb[16].mxu0 %vm576_vm2, %v13324_v61  ;;  %12522 = vmatmul.mubr.msk.bf16.gmra.mrb[16].mxu1 %vm576_vm2, %v1116_v2  ;;  %v1181_v61 = vshrl.u32 %v13345_v51, 16  ;;  %v13354_v2 = vld [vmem:[%s13882_s18 + $0x158] sm:$0xff]   ;;  %v13361_v51 = vld [vmem:[%s13882_s18 + $0x100] sm:$0xff]  }
  0x43   : > { %12455 = vmatprep.mubr.msk.bf16.mxu0 %vm13749_vm0, %v17197_v1  ;;  %12525 = vmatprep.mubr.msk.bf16.mxu1 %vm13749_vm0, %v17197_v1  ;;  %v2383_v5 = vshrl.u32 %v13354_v2, 16  ;;  %v2386_v6 = vshll.u32 %v13354_v2, 16  ;;  %v2422_v2 = vshll.u32 %v13366_v59, 16 }
  0x44   : > { %v1183_v0 = vor.u32 %v1181_v61, %v1179_v58  ;;  %v1775_v58 = vrot.slane %v13361_v51, 1 }
  0x45   : > { %v2385_v14 = vrot.slane %v2383_v5, 1  ;;  %v2388_v15 = vrot.slane %v2386_v6, 2  ;;  %v13368_v6 = vld [vmem:[%s13882_s18 + $0x180] sm:$0xff]  }
  0x46   : > { %v1188_v4 = vsel %vm1072_vm3, %v1183_v0, %v1187_v62  ;;  %v2419_v0 = vshrl.u32 %v13366_v59, 16  ;;  %v2428_v13 = vshrl.u32 %v13368_v6, 16 }
  0x4a   : > { %12456 = vmatmul.mubr.msk.bf16.gmra.mrb[20].mxu0 %vm576_vm2, %v13326_v8  ;;  %12526 = vmatmul.mubr.msk.bf16.gmra.mrb[20].mxu1 %vm576_vm2, %v1124_v9  ;;  %v2375_v8 = vshrl.u32 %v13353_v3, 16  ;;  %v2378_v9 = vshll.u32 %v13353_v3, 16 }
  0x4b   : > { %12459 = vmatprep.mubr.msk.bf16.mxu0 %vm13749_vm0, %v17197_v1  ;;  %12529 = vmatprep.mubr.msk.bf16.mxu1 %vm13749_vm0, %v17197_v1 }
  0x4c   : > { %v2380_v18 = vrot.slane %v2378_v9, 2  ;;  %v2424_v9 = vrot.slane %v2422_v2, 2  ;;  %v13381_v2 = vld [vmem:[%s13882_s18 + $0x138] sm:$0xff]  }
  0x52   : > { %12460 = vmatmul.mubr.msk.bf16.gmra.mrb[24].mxu0 %vm576_vm2, %v13328_v16  ;;  %12530 = vmatmul.mubr.msk.bf16.gmra.mrb[24].mxu1 %vm576_vm2, %v1132_v17  ;;  %v13358_v16 = vld [vmem:[%s13882_s18 + $0x160] sm:$0xff]   ;;  %v2377_v17 = vrot.slane %v2375_v8, 1  ;;  %v2421_v8 = vrot.slane %v2419_v0, 1 }
  0x53   : > { %12463 = vmatprep.mubr.msk.bf16.mxu0 %vm13749_vm0, %v17197_v1  ;;  %12533 = vmatprep.mubr.msk.bf16.mxu1 %vm13749_vm0, %v17197_v1  ;;  %v2392_v22 = vshrl.u32 %v13358_v16, 16  ;;  %v2395_v26 = vshll.u32 %v13358_v16, 16 }
  0x55   : > { %v2394_v32 = vrot.slane %v2392_v22, 1  ;;  %v2397_v33 = vrot.slane %v2395_v26, 2  ;;  %v13369_v22 = vld [vmem:[%s13882_s18 + $0x118] sm:$0xff]  }
  0x56   : > { %v1781_v27 = vrot.slane %v13369_v22, 1 }
  0x57   : > { %v2398_v39 = vor.u32 %v2397_v33, %v2394_v32 }
  0x5a   : > { %12464 = vmatmul.mubr.msk.bf16.gmra.mrb[28].mxu0 %vm576_vm2, %v13332_v23  ;;  %12534 = vmatmul.mubr.msk.bf16.gmra.mrb[28].mxu1 %vm576_vm2, %v1140_v24  ;;  %v2381_v23 = vor.u32 %v2380_v18, %v2377_v17  ;;  %v2389_v24 = vor.u32 %v2388_v15, %v2385_v14  ;;  %v2431_v14 = vshll.u32 %v13368_v6, 16  ;;  %v2425_v15 = vor.u32 %v2424_v9, %v2421_v8  ;;  %v13370_v18 = vld [vmem:[%s13882_s18 + $0x188] sm:$0xff]   ;;  %v13383_v9 = vld [vmem:[%s13882_s18 + $0x140] sm:$0xff]  }
  0x5b   : > { %12467 = vmatprep.mubr.msk.bf16.mxu0 %vm13749_vm0, %v17197_v1  ;;  %12537 = vmatprep.mubr.msk.bf16.mxu1 %vm13749_vm0, %v17197_v1  ;;  %v1779_v17 = vrot.slane %v13367_v11, 1  ;;  %v1789_v8 = vrot.slane %v13381_v2, 1 }
  0x5d   : > { %v1782_v36 = vsel %vm1767_vm4, %v1779_v17, %v1781_v27 }
  0x62   : > { %12468 = vmatmul.mubr.msk.bf16.gmra.mrb[32].mxu0 %vm576_vm2, %v13334_v30  ;;  %12538 = vmatmul.mubr.msk.bf16.gmra.mrb[32].mxu1 %vm576_vm2, %v1148_v31  ;;  %v14082_v30 = vld [vmem:[%s13882_s18 + $0xf8] sm:$0xff]   ;;  %v2390_v31 = vsel %vm2373_vm5, %v2381_v23, %v2389_v24  ;;  %v2437_v23 = vshrl.u32 %v13370_v18, 16 }
  0x63   : > { %12471 = vmatprep.mubr.msk.bf16.mxu0 %vm13749_vm0, %v17197_v1  ;;  %12541 = vmatprep.mubr.msk.bf16.mxu1 %vm13749_vm0, %v17197_v1  ;;  %v1773_v40 = vrot.slane %v14082_v30, 1 }
  0x64   : > { %v2439_v30 = vrot.slane %v2437_v23, 1  ;;  %v13390_v23 = vld [vmem:[%s13882_s18 + $0x1c0] ss:$0 sps:$4 sm:$0x33]  }
  0x65   : > { %v1776_v5 = vsel %vm1767_vm4, %v1773_v40, %v1775_v58 }
  0x6a   : > { %12472 = vmatmul.mubr.msk.bf16.gmra.mrb[36].mxu0 %vm576_vm2, %v13336_v34  ;;  %12542 = vmatmul.mubr.msk.bf16.gmra.mrb[36].mxu1 %vm576_vm2, %v1156_v38  ;;  %v1771_v34 = vrot.slane %v13357_v21, 1  ;;  %v13363_v38 = vld [vmem:[%s17185_s2 + $0x8] sm:$0xff]   ;;  %v2433_v21 = vrot.slane %v2431_v14, 2 }
  0x6b   : > { %12475 = vmatprep.mubr.msk.bf16.mxu0 %vm13749_vm0, %v17197_v1  ;;  %12545 = vmatprep.mubr.msk.bf16.mxu1 %vm13749_vm0, %v17197_v1 }
  0x72   : > { %12476 = vmatmul.mubr.msk.bf16.gmra.mrb[40].mxu0 %vm576_vm2, %v13340_v42  ;;  %12546 = vmatmul.mubr.msk.bf16.gmra.mrb[40].mxu1 %vm576_vm2, %v1164_v47  ;;  %v1772_v42 = vsel %vm1767_vm4, %v1769_v20, %v1771_v34  ;;  %v2399_v47 = vsel %vm2373_vm5, %v2389_v24, %v2398_v39  ;;  %v2430_v20 = vrot.slane %v2428_v13, 1  ;;  %v2440_v24 = vshll.u32 %v13370_v18, 16 }
  0x73   : > { %12479 = vmatprep.mubr.msk.bf16.mxu0 %vm13749_vm0, %v17197_v1  ;;  %12549 = vmatprep.mubr.msk.bf16.mxu1 %vm13749_vm0, %v17197_v1 }
  0x7a   : > { %12480 = vmatmul.mubr.msk.bf16.gmra.mrb[44].mxu0 %vm576_vm2, %v13342_v48  ;;  %12550 = vmatmul.mubr.msk.bf16.gmra.mrb[44].mxu1 %vm576_vm2, %v1172_v53  ;;  %v2410_v48 = vshrl.u32 %v13362_v37, 16  ;;  %v2413_v53 = vshll.u32 %v13362_v37, 16  ;;  %v13376_v37 = vld [vmem:[%s13882_s18 + $0x198] sm:$0xff]  }
  0x7b   : > { %12483 = vmatprep.mubr.msk.bf16.mxu0 %vm13749_vm0, %v17197_v1  ;;  %12553 = vmatprep.mubr.msk.bf16.mxu1 %vm13749_vm0, %v17197_v1  ;;  %v2455_v43 = vshrl.u32 %v13376_v37, 16  ;;  %v2458_v44 = vshll.u32 %v13376_v37, 16 }
  0x7c   : > { %v2412_v61 = vrot.slane %v2410_v48, 1  ;;  %v2415_v62 = vrot.slane %v2413_v53, 2  ;;  %v13378_v48 = vld [vmem:[%s13882_s18 + $0x1a0] sm:$0xff]  }
  0x7d   : > { %v2457_v50 = vrot.slane %v2455_v43, 1  ;;  %v2460_v51 = vrot.slane %v2458_v44, 2  ;;  %v2464_v53 = vshrl.u32 %v13378_v48, 16 }
  0x7e   : > { %v2416_v3 = vor.u32 %v2415_v62, %v2412_v61 }
  0x80   : > { %v2426_v19 = vsel %vm2373_vm5, %v2416_v3, %v2425_v15 }
  0x82   : > { %12484 = vmatmul.mubr.msk.bf16.gmra.mrb[48].mxu0 %vm576_vm2, %v13344_v56  ;;  %12554 = vmatmul.mubr.msk.bf16.gmra.mrb[48].mxu1 %vm576_vm2, %v1180_v60  ;;  %v1774_v56 = vsel %vm1767_vm4, %v1771_v34, %v1773_v40  ;;  %v2408_v60 = vsel %vm2373_vm5, %v2398_v39, %v2407_v55 }
  0x83   : > { %12487 = vmatprep.mubr.msk.bf16.mxu0 %vm13749_vm0, %v17197_v1  ;;  %12557 = vmatprep.mubr.msk.bf16.mxu1 %vm13749_vm0, %v17197_v1 }
  0x8a   : > { %12488 = vmatmul.mubr.msk.bf16.gmra.mrb[52].mxu0 %vm576_vm2, %v13348_v63  ;;  %12558 = vmatmul.mubr.msk.bf16.gmra.mrb[52].mxu1 %vm576_vm2, %v1188_v4  ;;  %v3837_v63 = vand.u32 %v13388_v52, %v13877_v12  ;;  %v13365_v4 = vld [vmem:[%s13882_s18 + $0x108] sm:$0xff]   ;;  %v13377_v52 = vld [vmem:[%s13882_s18 + $0x130] sm:$0xff]  }
  0x8b   : > { %12491 = vmatprep.mubr.msk.bf16.mxu0 %vm13749_vm0, %v17197_v1  ;;  %12561 = vmatprep.mubr.msk.bf16.mxu1 %vm13749_vm0, %v17197_v1 }
  0x92   : > { %12492 = vmatmul.mubr.msk.bf16.gmra.mrb[56].mxu0 %vm576_vm2, %v13350_v7  ;;  %12562 = vmatmul.mubr.msk.bf16.gmra.mrb[56].mxu1 %vm576_vm2, %v1189_v10  ;;  %v2417_v7 = vsel %vm2373_vm5, %v2407_v55, %v2416_v3  ;;  %v1777_v10 = vrot.slane %v13365_v4, 1  ;;  %v2461_v55 = vor.u32 %v2460_v51, %v2457_v50  ;;  %v13384_v4 = vld [vmem:[%s13882_s18 + $0x1b0] sm:$0xff]  }
  0x93   : > { %12575 = vmatprep.mubr.msk.bf16.mxu0 %vm13749_vm0, %v17197_v1  ;;  %12645 = vmatprep.mubr.msk.bf16.mxu1 %vm13749_vm0, %v17197_v1  ;;  %v2485_v11 = vshll.u32 %v13384_v4, 16 }
  0x94   : > { %v1778_v16 = vsel %vm1767_vm4, %v1775_v58, %v1777_v10  ;;  %v1780_v26 = vsel %vm1767_vm4, %v1777_v10, %v1779_v17  ;;  %v13382_v58 = vld [vmem:[%s13882_s18 + $0x1a8] sm:$0xff]   ;;  %v2482_v10 = vshrl.u32 %v13384_v4, 16 }
  0x95   : > { %v2473_v62 = vshrl.u32 %v13382_v58, 16 }
  0x96   : > { %v2484_v18 = vrot.slane %v2482_v10, 1 }
  0x97   : > { %v2475_v6 = vrot.slane %v2473_v62, 1 }
  0x9a   : > { %12576 = vmatmul.mubr.msk.bf16.vlgmr.msra.gmra.mrb[60].mxu0 %vm576_vm2, %v1770_v28  ;;  %12646 = vmatmul.mubr.msk.bf16.vlgmr.msra.gmra.mrb[60].mxu1 %vm576_vm2, %v2390_v31  ;;  %v13374_v28 = vld [vmem:[%s13882_s18 + $0x190] sm:$0xff]   ;;  %v2442_v31 = vrot.slane %v2440_v24, 2 }
  0x9b   : > { %12706 = vmatpush3.bf16.msra.mxu0 %v13355_v25  ;;  %12579 = vmatprep.mubr.msk.bf16.mxu0 %vm13749_vm0, %v17197_v1  ;;  %v2434_v25 = vor.u32 %v2433_v21, %v2430_v20  ;;  %v2446_v32 = vshrl.u32 %v13374_v28, 16  ;;  %v2449_v33 = vshll.u32 %v13374_v28, 16 }
  0x9c   : > { %12707 = vmatprep.subr.bf16.mxu0 %v17197_v1  ;;  %12776 = vmatpush3.bf16.msra.mxu1 %v13356_v29  ;;  %v2443_v34 = vor.u32 %v2442_v31, %v2439_v30  ;;  %v2500_v30 = vshrl.u32 %v13390_v23, 16  ;;  %v14236_v31 = vld [vmem:[%s13882_s18 + $0x150] ss:$0 sps:$4 sm:$0x33]  }
  0x9d   : > { %12649 = vmatprep.mubr.msk.bf16.mxu1 %vm13749_vm0, %v17197_v1  ;;  %12777 = vmatprep.subr.bf16.mxu1 %v17197_v1  ;;  %v2435_v29 = vsel %vm2373_vm5, %v2425_v15, %v2434_v25  ;;  %v2448_v39 = vrot.slane %v2446_v32, 1  ;;  %v2451_v40 = vrot.slane %v2449_v33, 2  ;;  %v1791_v15 = vrot.slane %v13383_v9, 1  ;;  %v14239_v33 = vld [vmem:[%s13882_s18 + $0x230] sm:$0xfc]  }
  0x9e   : > { %v2503_v32 = vshll.u32 %v13390_v23, 16  ;;  %v1795_v51 = vrot.slane %v14236_v31, 1 }
  0x9f   : > { %12708 = vmatpush3.bf16.msra.mxu0 %v13363_v38  ;;  %v2444_v38 = vsel %vm2373_vm5, %v2434_v25, %v2443_v34  ;;  %v1792_v24 = vsel %vm1767_vm4, %v1789_v8, %v1791_v15  ;;  %v13386_v25 = vld [vmem:[%s13882_s18 + $0x148] sm:$0xff]  }
  0xa0   : > { %12709 = vmatprep.subr.bf16.mxu0 %v17197_v1  ;;  %12778 = vmatpush3.bf16.msra.mxu1 %v13364_v41  ;;  %v1783_v41 = vrot.slane %v13373_v35, 1 }
  0xa1   : > { %12779 = vmatprep.subr.bf16.mxu1 %v17197_v1 }
  0xa2   : > { %12580 = vmatmul.mubr.msk.bf16.gmra.mrb[64].mxu0 %vm576_vm2, %v1772_v42  ;;  %12650 = vmatmul.mubr.msk.bf16.gmra.mrb[64].mxu1 %vm576_vm2, %v2399_v47  ;;  %v13375_v42 = vld [vmem:[%s13882_s18 + $0x128] sm:$0xff]  }
  0xa3   : > { %12583 = vmatprep.mubr.msk.bf16.mxu0 %vm13749_vm0, %v17197_v1  ;;  %12710 = vmatpush3.bf16.msra.mxu0 %v13371_v45  ;;  %v2452_v45 = vor.u32 %v2451_v40, %v2448_v39  ;;  %v1785_v47 = vrot.slane %v13375_v42, 1  ;;  %v14247_v42 = vrot.slane %v2500_v30, 1 }
  0xa4   : > { %12711 = vmatprep.subr.bf16.mxu0 %v17197_v1  ;;  %12653 = vmatprep.mubr.msk.bf16.mxu1 %vm13749_vm0, %v17197_v1 }
  0xa5   : > { %12780 = vmatpush3.bf16.msra.mxu1 %v13372_v46  ;;  %v1784_v46 = vsel %vm1767_vm4, %v1781_v27, %v1783_v41  ;;  %v2462_v59 = vsel %vm2373_vm5, %v2452_v45, %v2461_v55 }
  0xa6   : > { %12781 = vmatprep.subr.bf16.mxu1 %v17197_v1 }
  0xa7   : > { %12712 = vmatpush3.bf16.msra.mxu0 %v13379_v49  ;;  %v2453_v49 = vsel %vm2373_vm5, %v2443_v34, %v2452_v45 }
  0xa8   : > { %12713 = vmatprep.subr.bf16.mxu0 %v17197_v1 }
  0xa9   : > { %12782 = vmatpush3.bf16.msra.mxu1 %v13380_v54  ;;  %v2467_v54 = vshll.u32 %v13378_v48, 16  ;;  %v2505_v48 = vrot.slane %v2503_v32, 2 }
  0xaa   : > { %12584 = vmatmul.mubr.msk.bf16.gmra.mrb[68].mxu0 %vm576_vm2, %v1774_v56  ;;  %12783 = vmatprep.subr.bf16.mxu1 %v17197_v1  ;;  %v1786_v56 = vsel %vm1767_vm4, %v1783_v41, %v1785_v47 }
  0xab   : > { %12587 = vmatprep.mubr.msk.bf16.mxu0 %vm13749_vm0, %v17197_v1  ;;  %12714 = vmatpush3.bf16.msra.mxu0 %v3187_v57  ;;  %v1787_v57 = vrot.slane %v13377_v52, 1  ;;  %v2469_v61 = vrot.slane %v2467_v54, 2  ;;  %v3631_v52 = vshrl.u32 %v14239_v33, 16 }
  0xac   : > { %12654 = vmatmul.mubr.msk.bf16.gmra.mrb[68].mxu1 %vm576_vm2, %v2408_v60  ;;  %12845 = vmatprep.subr.bf16.mxu0 %v17197_v1  ;;  %v2466_v60 = vrot.slane %v2464_v53, 1  ;;  %v3634_v53 = vshll.u32 %v14239_v33, 16 }
  0xad   : > { %12657 = vmatprep.mubr.msk.bf16.mxu1 %vm13749_vm0, %v17197_v1  ;;  %12784 = vmatpush3.bf16.msra.mxu1 %v3837_v63  ;;  %v2476_v63 = vshll.u32 %v13382_v58, 16  ;;  %v1788_v3 = vsel %vm1767_vm4, %v1785_v47, %v1787_v57  ;;  %v1790_v14 = vsel %vm1767_vm4, %v1787_v57, %v1789_v8 }
  0xae   : > { %12915 = vmatprep.subr.bf16.mxu1 %v17197_v1  ;;  %v2470_v0 = vor.u32 %v2469_v61, %v2466_v60  ;;  %v2506_v61 = vor.u32 %v2505_v48, %v14247_v42 }
  0xb2   : > { %12588 = vmatmul.mubr.msk.bf16.gmra.mrb[72].mxu0 %vm576_vm2, %v1776_v5  ;;  %v2471_v5 = vsel %vm2373_vm5, %v2461_v55, %v2470_v0 }
  0xb3   : > { %12591 = vmatprep.mubr.msk.bf16.mxu0 %vm13749_vm0, %v17197_v1 }
  0xb4   : > { %12658 = vmatmul.mubr.msk.bf16.gmra.mrb[72].mxu1 %vm576_vm2, %v2417_v7  ;;  %v2478_v7 = vrot.slane %v2476_v63, 2 }
  0xb5   : > { %12661 = vmatprep.mubr.msk.bf16.mxu1 %vm13749_vm0, %v17197_v1 }
  0xb6   : > { %v2479_v13 = vor.u32 %v2478_v7, %v2475_v6 }
  0xb8   : > { %v2480_v17 = vsel %vm2373_vm5, %v2470_v0, %v2479_v13 }
  0xba   : > { %12592 = vmatmul.mubr.msk.bf16.gmra.mrb[76].mxu0 %vm576_vm2, %v1778_v16  ;;  %v13385_v16 = vld [vmem:[%s13882_s18 + $0x1b8] sm:$0xff]  }
  0xbb   : > { %12595 = vmatprep.mubr.msk.bf16.mxu0 %vm13749_vm0, %v17197_v1  ;;  %v2491_v20 = vshrl.u32 %v13385_v16, 16  ;;  %v2494_v21 = vshll.u32 %v13385_v16, 16 }
  0xbc   : > { %12662 = vmatmul.mubr.msk.bf16.gmra.mrb[76].mxu1 %vm576_vm2, %v2426_v19  ;;  %v2487_v19 = vrot.slane %v2485_v11, 2 }
  0xbd   : > { %12665 = vmatprep.mubr.msk.bf16.mxu1 %vm13749_vm0, %v17197_v1  ;;  %v2493_v27 = vrot.slane %v2491_v20, 1  ;;  %v2496_v28 = vrot.slane %v2494_v21, 2  ;;  %v14284_v21 = vld [vmem:[%s13882_s18 + $0x1c8] sm:$0xff]  }
  0xbe   : > { %v2488_v22 = vor.u32 %v2487_v19, %v2484_v18 }
  0xbf   : > { %v2497_v35 = vor.u32 %v2496_v28, %v2493_v27  ;;  %v3636_v27 = vrot.slane %v3634_v53, 3 }
  0xc1   : > { %v2498_v50 = vsel %vm2373_vm5, %v2488_v22, %v2497_v35 }
  0xc2   : > { %12596 = vmatmul.mubr.msk.bf16.gmra.mrb[80].mxu0 %vm576_vm2, %v1780_v26  ;;  %v2489_v26 = vsel %vm2373_vm5, %v2479_v13, %v2488_v22  ;;  %v2507_v13 = vsel %vm2373_vm5, %v2497_v35, %v2506_v61  ;;  %v14286_v22 = vrot.slane %v3631_v52, 2  ;;  %v14294_v35 = vld [vmem:[%s13882_s18 + $0x1d0] sm:$0xff]  }
  0xc3   : > { %12599 = vmatprep.mubr.msk.bf16.mxu0 %vm13749_vm0, %v17197_v1  ;;  %v3088_v53 = vrot.slane %v14294_v35, 2 }
  0xc4   : > { %12666 = vmatmul.mubr.msk.bf16.gmra.mrb[80].mxu1 %vm576_vm2, %v2435_v29  ;;  %v1793_v29 = vrot.slane %v13386_v25, 1 }
  0xc5   : > { %12669 = vmatprep.mubr.msk.bf16.mxu1 %vm13749_vm0, %v17197_v1 }
  0xc6   : > { %v1794_v41 = vsel %vm1767_vm4, %v1791_v15, %v1793_v29  ;;  %v1796_v4 = vsel %vm1767_vm4, %v1793_v29, %v1795_v51  ;;  %v14275_v15 = vld [vmem:[%s13882_s18 + $0x248] sm:$0xff]  }
  0xca   : > { %12600 = vmatmul.mubr.msk.bf16.gmra.mrb[84].mxu0 %vm576_vm2, %v1782_v36 }
  0xcb   : > { %12603 = vmatprep.mubr.msk.bf16.mxu0 %vm13749_vm0, %v17197_v1 }
  0xcc   : > { %12670 = vmatmul.mubr.msk.bf16.gmra.mrb[84].mxu1 %vm576_vm2, %v2444_v38  ;;  %v14244_v38 = vld [vmem:[%s13882_s18 + $0x238] sm:$0xff]  }
  0xcd   : > { %12673 = vmatprep.mubr.msk.bf16.mxu1 %vm13749_vm0, %v17197_v1  ;;  %v3639_v58 = vshrl.u32 %v14244_v38, 16  ;;  %v3642_v62 = vshll.u32 %v14244_v38, 16 }
  0xcf   : > { %v3641_v28 = vrot.slane %v3639_v58, 2 }
  0xd2   : > { %12604 = vmatmul.mubr.msk.bf16.gmra.mrb[88].mxu0 %vm576_vm2, %v1784_v46 }
  0xd3   : > { %12607 = vmatprep.mubr.msk.bf16.mxu0 %vm13749_vm0, %v17197_v1 }
  0xd4   : > { %12674 = vmatmul.mubr.msk.bf16.gmra.mrb[88].mxu1 %vm576_vm2, %v2453_v49 }
  0xd5   : > { %12677 = vmatprep.mubr.msk.bf16.mxu1 %vm13749_vm0, %v17197_v1 }
  0xda   : > { %12608 = vmatmul.mubr.msk.bf16.gmra.mrb[92].mxu0 %vm576_vm2, %v1786_v56 }
  0xdb   : > { %12611 = vmatprep.mubr.msk.bf16.mxu0 %vm13749_vm0, %v17197_v1 }
  0xdc   : > { %12678 = vmatmul.mubr.msk.bf16.gmra.mrb[92].mxu1 %vm576_vm2, %v2462_v59 }
  0xdd   : > { %12681 = vmatprep.mubr.msk.bf16.mxu1 %vm13749_vm0, %v17197_v1 }
  0xe2   : > { %12612 = vmatmul.mubr.msk.bf16.gmra.mrb[96].mxu0 %vm576_vm2, %v1788_v3 }
  0xe3   : > { %12615 = vmatprep.mubr.msk.bf16.mxu0 %vm13749_vm0, %v17197_v1 }
  0xe4   : > { %12682 = vmatmul.mubr.msk.bf16.gmra.mrb[96].mxu1 %vm576_vm2, %v2471_v5  ;;  %v13398_v5 = vld [vmem:[%s13882_s18 + $0x240] sm:$0xff]  }
  0xe5   : > { %12685 = vmatprep.mubr.msk.bf16.mxu1 %vm13749_vm0, %v17197_v1  ;;  %v3651_v29 = vshll.u32 %v13398_v5, 16 }
  0xe7   : > { %v3653_v52 = vrot.slane %v3651_v29, 3 }
  0xea   : > { %12616 = vmatmul.mubr.msk.bf16.gmra.mrb[100].mxu0 %vm576_vm2, %v1790_v14  ;;  %v14272_v14 = vld [vmem:[%s13882_s18 + $0x1c0] sm:$0xfc]  }
  0xeb   : > { %12619 = vmatprep.mubr.msk.bf16.mxu0 %vm13749_vm0, %v17197_v1  ;;  %v3085_v33 = vrot.slane %v14272_v14, 2 }
  0xec   : > { %12686 = vmatmul.mubr.msk.bf16.gmra.mrb[100].mxu1 %vm576_vm2, %v2480_v17 }
  0xed   : > { %12689 = vmatprep.mubr.msk.bf16.mxu1 %vm13749_vm0, %v17197_v1 }
  0xf2   : > { %12620 = vmatmul.mubr.msk.bf16.gmra.mrb[104].mxu0 %vm576_vm2, %v1792_v24  ;;  %v3648_v24 = vshrl.u32 %v13398_v5, 16 }
  0xf3   : > { %12623 = vmatprep.mubr.msk.bf16.mxu0 %vm13749_vm0, %v17197_v1 }
  0xf4   : > { %12690 = vmatmul.mubr.msk.bf16.gmra.mrb[104].mxu1 %vm576_vm2, %v2489_v26 }
  0xf5   : > { %v662_v34 = vpop.f32.mrb[0].mxu0  ;;  %12693 = vmatprep.mubr.msk.bf16.mxu1 %vm13749_vm0, %v17197_v1  ;;  %v1300_v39 = vpop.f32.mrb[0].mxu1 }
  0xf6   : > { %v780_v36 = vmax.f32 %v662_v34, 0.0  ;;  %v12437_v37 = vpop.f32.mrb[1].mxu0  ;;  %v12507_v45 = vpop.f32.mrb[1].mxu1  ;;  %v1418_v47 = vmax.f32 %v1300_v39, 0.0  ;;  %v3644_v34 = vrot.slane %v3642_v62, 3 }
  0xf7   : > { %v665_v40 = vpop.f32.mrb[2].mxu0  ;;  %v1303_v49 = vpop.f32.mrb[2].mxu1  ;;  %v3650_v45 = vrot.slane %v3648_v24, 2 }
  0xf8   : > { %v11508_v43 = vpack.c.bf16 %v780_v36, %v780_v36  ;;  %v781_v44 = vmax.f32 %v665_v40, 0.0  ;;  %v12438_v46 = vpop.f32.mrb[3].mxu0  ;;  %v1419_v55 = vmax.f32 %v1303_v49, 0.0  ;;  %v12508_v56 = vpop.f32.mrb[3].mxu1  ;;  %v11537_v57 = vpack.c.bf16 %v1418_v47, %v1418_v47 }
  0xf9   : > { %v3657_v36 = vshrl.u32 %v14275_v15, 16  ;;  %v13402_v46 = vld [vmem:[%s13882_s18 + $0x250] sm:$0xff]   ;;  %v3660_v56 = vshll.u32 %v14275_v15, 16  ;;  %v3645_v58 = vor.u32 %v3644_v34, %v3641_v28  ;;  %v13403_v15 = vld [vmem:[%s17185_s2 + $0x8] sm:$0xff]  }
  0xfa   : > { %v11509_v54 = vpack.c.bf16 %v781_v44, %v781_v44  ;;  %12624 = vmatmul.mubr.msk.bf16.gmra.mrb[108].mxu0 %vm576_vm2, %v1794_v41  ;;  %927 = vst.msk [vmem:[#allocation2] sm:$0xf] %vm926_vm6, %v11508_v43  ;;  %1535 = vrot.lane.b32.xlu0 %v11537_v57, %s13750_s16  ;;  %v11538_v59 = vpack.c.bf16 %v1419_v55, %v1419_v55  ;;  %v3086_v43 = vrot.slane %v14284_v21, 2 }
  0xfb   : > { %12627 = vmatprep.mubr.msk.bf16.mxu0 %vm13749_vm0, %v17197_v1  ;;  %v14309_v55 = vrot.slane %v3657_v36, 2  ;;  %v3637_v57 = vor.u32 %v3636_v27, %v14286_v22  ;;  %v13404_v22 = vld [vmem:[%s17185_s2 + $0x8] sm:$0xff]  }
  0xfc   : > { %12694 = vmatmul.mubr.msk.bf16.gmra.mrb[108].mxu1 %vm576_vm2, %v2498_v50  ;;  %928 = vst.msk [vmem:[#allocation2 + $0xc] sm:$0xf] %vm926_vm6, %v11509_v54  ;;  %v14307_v54 = vld [vmem:[%s13882_s18 + $0x1d8] sm:$0xff]  }
  0xfd   : > { %v670_v60 = vpop.f32.mrb[4].mxu0  ;;  %12697 = vmatprep.mubr.msk.bf16.mxu1 %vm13749_vm0, %v17197_v1  ;;  %v1308_v2 = vpop.f32.mrb[4].mxu1 }
  0xfe   : > { %v782_v63 = vmax.f32 %v670_v60, 0.0  ;;  %v12441_v0 = vpop.f32.mrb[5].mxu0  ;;  %1537 = vrot.lane.b32.xlu0 %v11538_v59, %s13750_s16  ;;  %v1420_v7 = vmax.f32 %v1308_v2, 0.0  ;;  %v12511_v9 = vpop.f32.mrb[5].mxu1  ;;  %v13395_v59 = vld [vmem:[%s17185_s2] sm:$0xff]   ;;  %v3666_v60 = vshrl.u32 %v13402_v46, 16 }
  0xff   : > { %v673_v3 = vpop.f32.mrb[6].mxu0  ;;  %v1311_v11 = vpop.f32.mrb[6].mxu1  ;;  %v3087_v0 = vsel %vm3084_vm7, %v3085_v33, %v3086_v43  ;;  %v13396_v2 = vld [vmem:[%s17185_s2] sm:$0xff]   ;;  %v13412_v33 = vld [vmem:[%s17185_s2 + $0x10] sm:$0xff]  }
 0x100   : > { %v11510_v6 = vpack.c.bf16 %v782_v63, %v782_v63  ;;  %v783_v8 = vmax.f32 %v673_v3, 0.0  ;;  %v12442_v10 = vpop.f32.mrb[7].mxu0  ;;  %v12512_v17 = vpop.f32.mrb[7].mxu1  ;;  %v11539_v18 = vpack.c.bf16 %v1420_v7, %v1420_v7  ;;  %v1421_v19 = vmax.f32 %v1311_v11, 0.0 }
 0x101   : > { %v14328_v3 = vrot.slane %v3660_v56, 3  ;;  %v3646_v11 = vsel %vm3629_vm8, %v3637_v57, %v3645_v58  ;;  %v14333_v14 = vrot.slane %v3666_v60, 2 }
 0x102   : > { %v11511_v16 = vpack.c.bf16 %v783_v8, %v783_v8  ;;  %12628 = vmatmul.mubr.msk.bf16.gmra.mrb[112].mxu0 %vm576_vm2, %v1796_v4  ;;  %929 = vst.msk [vmem:[#allocation2 + $0x18] sm:$0xf] %vm926_vm6, %v11510_v6  ;;  %1539 = vrot.lane.b32.xlu0 %v11539_v18, %s13750_s16  ;;  %v11540_v20 = vpack.c.bf16 %v1421_v19, %v1421_v19  ;;  %v3669_v4 = vshll.u32 %v13402_v46, 16 }
 0x103   : > { %12631 = vmatprep.mubr.msk.bf16.mxu0 %vm13749_vm0, %v17197_v1  ;;  %v3663_v56 = vor.u32 %v14328_v3, %v14309_v55 }
 0x104   : > { %12698 = vmatmul.mubr.msk.bf16.gmra.mrb[112].mxu1 %vm576_vm2, %v2507_v13  ;;  %930 = vst.msk [vmem:[#allocation2 + $0x24] sm:$0xf] %vm926_vm6, %v11511_v16  ;;  %1541 = vrot.lane.b32.xlu1 %v11540_v20, %s13750_s16  ;;  %v3090_v13 = vrot.slane %v14307_v54, 2  ;;  %v14342_v20 = vrot.slane %v3669_v4, 3 }
 0x105   : > { %v678_v23 = vpop.f32.mrb[8].mxu0  ;;  %12701 = vmatprep.mubr.msk.bf16.mxu1 %vm13749_vm0, %v17197_v1  ;;  %v1316_v30 = vpop.f32.mrb[8].mxu1 }
 0x106   : > { %v784_v25 = vmax.f32 %v678_v23, 0.0  ;;  %v12445_v26 = vpop.f32.mrb[9].mxu0  ;;  %v1422_v38 = vmax.f32 %v1316_v30, 0.0  ;;  %v12515_v40 = vpop.f32.mrb[9].mxu1  ;;  %v3091_v55 = vsel %vm3084_vm7, %v3088_v53, %v3090_v13 }
 0x107   : > { %v681_v32 = vpop.f32.mrb[10].mxu0  ;;  %v1319_v44 = vpop.f32.mrb[10].mxu1  ;;  %v13411_v26 = vld [vmem:[%s17185_s2 + $0x10] sm:$0xff]  }
 0x108   : > { %v11512_v37 = vpack.c.bf16 %v784_v25, %v784_v25  ;;  %v785_v39 = vmax.f32 %v681_v32, 0.0  ;;  %v12446_v41 = vpop.f32.mrb[11].mxu0  ;;  %v1423_v48 = vmax.f32 %v1319_v44, 0.0  ;;  %v12516_v49 = vpop.f32.mrb[11].mxu1  ;;  %v11541_v50 = vpack.c.bf16 %v1422_v38, %v1422_v38 }
 0x109   : > { %v3654_v25 = vor.u32 %v3653_v52, %v3650_v45  ;;  %v3089_v32 = vsel %vm3084_vm7, %v3086_v43, %v3088_v53  ;;  %v13419_v41 = vld [vmem:[%s17185_s2 + $0x18] sm:$0xff]   ;;  %v13427_v43 = vld [vmem:[%s17185_s2 + $0x20] ss:$0 sps:$4 sm:$0x11]  }
 0x10a   : > { %v11513_v47 = vpack.c.bf16 %v785_v39, %v785_v39  ;;  %12632 = vmatmul.mubr.msk.bf16.gmra.mrb[116].mxu0 %vm576_vm2, %v1795_v51  ;;  %931 = vst.msk [vmem:[#allocation2 + $0x30] sm:$0xf] %vm926_vm6, %v11512_v37  ;;  %1543 = vrot.lane.b32.xlu0 %v11541_v50, %s13750_s16  ;;  %v11542_v31 = vpack.c.bf16 %v1423_v48, %v1423_v48  ;;  %v14380_v48 = vld [vmem:[%s13882_s18 + $0x258] sm:$0xff]   ;;  %v13428_v49 = vld [vmem:[%s17185_s2 + $0x20] ss:$0 sps:$4 sm:$0x11]  }
 0x10b   : > { %12715 = vmatprep.mubr.msk.bf16.mxu0 %vm13749_vm0, %v17197_v1  ;;  %v3655_v21 = vsel %vm3629_vm8, %v3645_v58, %v3654_v25  ;;  %v3664_v4 = vsel %vm3629_vm8, %v3654_v25, %v3663_v56  ;;  %v5148_v35 = vand.u32 %v13428_v49, %v13877_v12 }
 0x10c   : > { %12702 = vmatmul.mubr.msk.bf16.gmra.mrb[116].mxu1 %vm576_vm2, %v14247_v42  ;;  %932 = vst.msk [vmem:[#allocation2 + $0x3c] sm:$0xf] %vm926_vm6, %v11513_v47 }
 0x10d   : > { %v686_v51 = vpop.f32.mrb[12].mxu0  ;;  %12785 = vmatprep.mubr.msk.bf16.mxu1 %vm13749_vm0, %v17197_v1  ;;  %v1324_v42 = vpop.f32.mrb[12].mxu1 }
 0x10e   : > { %v786_v61 = vmax.f32 %v686_v51, 0.0  ;;  %v12449_v62 = vpop.f32.mrb[13].mxu0  ;;  %1545 = vrot.lane.b32.xlu0 %v11542_v31, %s13750_s16  ;;  %v1424_v6 = vmax.f32 %v1324_v42, 0.0  ;;  %v12519_v8 = vpop.f32.mrb[13].mxu1  ;;  %v14393_v31 = vld [vmem:[%s13882_s18 + $0x1e0] sm:$0xff]   ;;  %v13420_v51 = vld [vmem:[%s17185_s2 + $0x18] sm:$0xff]  }
 0x10f   : > { %v689_v63 = vpop.f32.mrb[14].mxu0  ;;  %v1327_v10 = vpop.f32.mrb[14].mxu1 }
 0x110   : > { %v11514_v5 = vpack.c.bf16 %v786_v61, %v786_v61  ;;  %v787_v7 = vmax.f32 %v689_v63, 0.0  ;;  %v12450_v9 = vpop.f32.mrb[15].mxu0  ;;  %v1425_v17 = vmax.f32 %v1327_v10, 0.0  ;;  %v12520_v18 = vpop.f32.mrb[15].mxu1  ;;  %v11543_v19 = vpack.c.bf16 %v1424_v6, %v1424_v6 }
 0x111   : > { %v4440_v61 = vand.u32 %v13427_v43, %v13877_v12  ;;  %v3092_v9 = vrot.slane %v14393_v31, 2  ;;  %v3678_v10 = vshll.u32 %v14380_v48, 16  ;;  %v13407_v43 = vld [vmem:[%s13882_s18 + $0x1f0] sm:$0xff]  }
 0x112   : > { %v11515_v16 = vpack.c.bf16 %v787_v7, %v787_v7  ;;  %12716 = vmatmul.mubr.msk.bf16.vlgmr.msra.gmra.mrb[120].mxu0 %vm576_vm2, %v3087_v0  ;;  %933 = vst.msk [vmem:[#allocation2 + $0x48] sm:$0xf] %vm926_vm6, %v11514_v5  ;;  %1547 = vrot.lane.b32.xlu1 %v11543_v19, %s13750_s16  ;;  %v11544_v23 = vpack.c.bf16 %v1425_v17, %v1425_v17  ;;  %v3675_v5 = vshrl.u32 %v14380_v48, 16  ;;  %v14426_v17 = vld [vmem:[%s13882_s18 + $0x1e8] sm:$0xff]  }
 0x113   : > { %12846 = vmatpush3.bf16.msra.mxu0 %v13395_v59  ;;  %12719 = vmatprep.mubr.msk.bf16.mxu0 %vm13749_vm0, %v17197_v1  ;;  %v3094_v54 = vrot.slane %v14426_v17, 2 }
 0x114   : > { %12786 = vmatmul.mubr.msk.bf16.vlgmr.msra.gmra.mrb[120].mxu1 %vm576_vm2, %v3646_v11  ;;  %934 = vst.msk [vmem:[#allocation2 + $0x54] sm:$0xf] %vm926_vm6, %v11515_v16  ;;  %1549 = vrot.lane.b32.xlu0 %v11544_v23, %s13750_s16  ;;  %v3672_v16 = vor.u32 %v14342_v20, %v14333_v14  ;;  %v13408_v23 = vld [vmem:[%s13882_s18 + $0x260] sm:$0xff]  }
 0x115   : > { %v694_v24 = vpop.f32.mrb[16].mxu0  ;;  %12916 = vmatpush3.bf16.msra.mxu1 %v13396_v2  ;;  %12789 = vmatprep.mubr.msk.bf16.mxu1 %vm13749_vm0, %v17197_v1  ;;  %v1332_v29 = vpop.f32.mrb[16].mxu1 }
 0x116   : > { %v788_v27 = vmax.f32 %v694_v24, 0.0  ;;  %v12453_v28 = vpop.f32.mrb[17].mxu0  ;;  %12847 = vmatprep.subr.bf16.mxu0 %v17197_v1  ;;  %12917 = vmatprep.subr.bf16.mxu1 %v17197_v1  ;;  %v1426_v36 = vmax.f32 %v1332_v29, 0.0  ;;  %v12523_v38 = vpop.f32.mrb[17].mxu1 }
 0x117   : > { %v697_v30 = vpop.f32.mrb[18].mxu0  ;;  %12848 = vmatpush3.bf16.msra.mxu0 %v13403_v15  ;;  %v1335_v40 = vpop.f32.mrb[18].mxu1 }
 0x118   : > { %v11516_v34 = vpack.c.bf16 %v788_v27, %v788_v27  ;;  %v789_v37 = vmax.f32 %v697_v30, 0.0  ;;  %v12454_v39 = vpop.f32.mrb[19].mxu0  ;;  %12849 = vmatprep.subr.bf16.mxu0 %v17197_v1  ;;  %v1427_v45 = vmax.f32 %v1335_v40, 0.0  ;;  %v12524_v46 = vpop.f32.mrb[19].mxu1  ;;  %v11545_v47 = vpack.c.bf16 %v1426_v36, %v1426_v36 }
 0x119   : > { %12918 = vmatpush3.bf16.msra.mxu1 %v13404_v22  ;;  %v3677_v22 = vrot.slane %v3675_v5, 2  ;;  %v3687_v40 = vshll.u32 %v13408_v23, 16 }
 0x11a   : > { %v11517_v44 = vpack.c.bf16 %v789_v37, %v789_v37  ;;  %12720 = vmatmul.mubr.msk.bf16.gmra.mrb[124].mxu0 %vm576_vm2, %v3089_v32  ;;  %12919 = vmatprep.subr.bf16.mxu1 %v17197_v1  ;;  %935 = vst.msk [vmem:[#allocation2 + $0x60] sm:$0xf] %vm926_vm6, %v11516_v34  ;;  %v11546_v50 = vpack.c.bf16 %v1427_v45, %v1427_v45 }
 0x11b   : > { %12723 = vmatprep.mubr.msk.bf16.mxu0 %vm13749_vm0, %v17197_v1  ;;  %12850 = vmatpush3.bf16.msra.mxu0 %v13411_v26  ;;  %v3093_v26 = vsel %vm3084_vm7, %v3090_v13, %v3092_v9  ;;  %v3673_v32 = vsel %vm3629_vm8, %v3663_v56, %v3672_v16  ;;  %v3684_v13 = vshrl.u32 %v13408_v23, 16 }
 0x11c   : > { %12790 = vmatmul.mubr.msk.bf16.gmra.mrb[124].mxu1 %vm576_vm2, %v3655_v21  ;;  %1551 = vrot.lane.b32.xlu1 %v11545_v47, %s13750_s16  ;;  %936 = vst.msk [vmem:[#allocation2 + $0x6c] sm:$0xf] %vm926_vm6, %v11517_v44  ;;  %v13410_v44 = vld [vmem:[%s13882_s18 + $0x268] sm:$0xff]   ;;  %v3095_v47 = vsel %vm3084_vm7, %v3092_v9, %v3094_v54 }
 0x11d   : > { %v702_v52 = vpop.f32.mrb[20].mxu0  ;;  %12793 = vmatprep.mubr.msk.bf16.mxu1 %vm13749_vm0, %v17197_v1  ;;  %12920 = vmatpush3.bf16.msra.mxu1 %v13412_v33  ;;  %v1340_v59 = vpop.f32.mrb[20].mxu1  ;;  %v3680_v33 = vrot.slane %v3678_v10, 3  ;;  %v3686_v56 = vrot.slane %v3684_v13, 2 }
 0x11e   : > { %v790_v57 = vmax.f32 %v702_v52, 0.0  ;;  %1553 = vrot.lane.b32.xlu0 %v11546_v50, %s13750_s16  ;;  %v12457_v58 = vpop.f32.mrb[21].mxu0  ;;  %12851 = vmatprep.subr.bf16.mxu0 %v17197_v1  ;;  %v1428_v42 = vmax.f32 %v1340_v59, 0.0  ;;  %v12527_v0 = vpop.f32.mrb[21].mxu1 }
 0x11f   : > { %v705_v60 = vpop.f32.mrb[22].mxu0  ;;  %12852 = vmatpush3.bf16.msra.mxu0 %v13419_v41  ;;  %12921 = vmatprep.subr.bf16.mxu1 %v17197_v1  ;;  %v1343_v3 = vpop.f32.mrb[22].mxu1  ;;  %v3681_v39 = vor.u32 %v3680_v33, %v3677_v22  ;;  %v13414_v0 = vld [vmem:[%s13882_s18 + $0x270] sm:$0xff]  }
 0x120   : > { %v11518_v62 = vpack.c.bf16 %v790_v57, %v790_v57  ;;  %v791_v63 = vmax.f32 %v705_v60, 0.0  ;;  %v12458_v2 = vpop.f32.mrb[23].mxu0  ;;  %12853 = vmatprep.subr.bf16.mxu0 %v17197_v1  ;;  %v1429_v6 = vmax.f32 %v1343_v3, 0.0  ;;  %v12528_v7 = vpop.f32.mrb[23].mxu1  ;;  %v11547_v8 = vpack.c.bf16 %v1428_v42, %v1428_v42 }
 0x121   : > { %12922 = vmatpush3.bf16.msra.mxu1 %v13420_v51  ;;  %v3682_v51 = vsel %vm3629_vm8, %v3672_v16, %v3681_v39  ;;  %v3689_v57 = vrot.slane %v3687_v40, 3  ;;  %v3096_v60 = vrot.slane %v13407_v43, 2  ;;  %v3705_v22 = vshll.u32 %v13414_v0, 16 }
 0x122   : > { %v11519_v53 = vpack.c.bf16 %v791_v63, %v791_v63  ;;  %12724 = vmatmul.mubr.msk.bf16.gmra.mrb[128].mxu0 %vm576_vm2, %v3091_v55  ;;  %937 = vst.msk [vmem:[#allocation2 + $0x78] sm:$0xf] %vm926_vm6, %v11518_v62  ;;  %12923 = vmatprep.subr.bf16.mxu1 %v17197_v1  ;;  %v11548_v11 = vpack.c.bf16 %v1429_v6, %v1429_v6  ;;  %v3693_v55 = vshrl.u32 %v13410_v44, 16  ;;  %v14461_v62 = vld [vmem:[%s13882_s18 + $0x1f8] sm:$0xff]  }
 0x123   : > { %12727 = vmatprep.mubr.msk.bf16.mxu0 %vm13749_vm0, %v17197_v1  ;;  %12854 = vmatpush3.bf16.msra.mxu0 %v4440_v61  ;;  %v3696_v61 = vshll.u32 %v13410_v44, 16  ;;  %v3690_v63 = vor.u32 %v3689_v57, %v3686_v56 }
 0x124   : > { %12794 = vmatmul.mubr.msk.bf16.gmra.mrb[128].mxu1 %vm576_vm2, %v3664_v4  ;;  %1555 = vrot.lane.b32.xlu0 %v11547_v8, %s13750_s16  ;;  %938 = vst.msk [vmem:[#allocation2 + $0x84] sm:$0xf] %vm926_vm6, %v11519_v53  ;;  %v3695_v9 = vrot.slane %v3693_v55, 2 }
 0x125   : > { %v710_v15 = vpop.f32.mrb[24].mxu0  ;;  %12797 = vmatprep.mubr.msk.bf16.mxu1 %vm13749_vm0, %v17197_v1  ;;  %12924 = vmatpush3.bf16.msra.mxu1 %v5148_v35  ;;  %v1348_v24 = vpop.f32.mrb[24].mxu1  ;;  %v3097_v35 = vsel %vm3084_vm7, %v3094_v54, %v3096_v60 }
 0x126   : > { %v792_v18 = vmax.f32 %v710_v15, 0.0  ;;  %1557 = vrot.lane.b32.xlu1 %v11548_v11, %s13750_s16  ;;  %v12461_v19 = vpop.f32.mrb[25].mxu0  ;;  %12985 = vmatprep.subr.bf16.mxu0 %v17197_v1  ;;  %v1430_v28 = vmax.f32 %v1348_v24, 0.0  ;;  %v12531_v20 = vpop.f32.mrb[25].mxu1  ;;  %v3691_v11 = vsel %vm3629_vm8, %v3681_v39, %v3690_v63  ;;  %v3698_v15 = vrot.slane %v3696_v61, 3 }
 0x127   : > { %v713_v25 = vpop.f32.mrb[26].mxu0  ;;  %v14434_v30 = vpop.f32.mrb[26].mxu1  ;;  %v3702_v19 = vshrl.u32 %v13414_v0, 16 }
 0x128   : > { %v11520_v27 = vpack.c.bf16 %v792_v18, %v792_v18  ;;  %v793_v14 = vmax.f32 %v713_v25, 0.0  ;;  %v12462_v29 = vpop.f32.mrb[27].mxu0  ;;  %v12532_v36 = vpop.f32.mrb[27].mxu1  ;;  %v11549_v37 = vpack.c.bf16 %v1430_v28, %v1430_v28  ;;  %v3098_v18 = vrot.slane %v14461_v62, 2  ;;  %v14483_v25 = vld [vmem:[%s13882_s18 + $0x200] sm:$0xff]  }
 0x129   : > { %v3699_v24 = vor.u32 %v3698_v15, %v3695_v9  ;;  %v3704_v36 = vrot.slane %v3702_v19, 2 }
 0x12a   : > { %v11521_v34 = vpack.c.bf16 %v793_v14, %v793_v14  ;;  %12728 = vmatmul.mubr.msk.bf16.gmra.mrb[132].mxu0 %vm576_vm2, %v3093_v26  ;;  %939 = vst.msk [vmem:[#allocation2 + $0x90] sm:$0xf] %vm926_vm6, %v11520_v27  ;;  %1559 = vrot.lane.b32.xlu0 %v11549_v37, %s13750_s16  ;;  %v3099_v20 = vsel %vm3084_vm7, %v3096_v60, %v3098_v18  ;;  %v13416_v37 = vld [vmem:[%s13882_s18 + $0x278] sm:$0xff]  }
 0x12b   : > { %12731 = vmatprep.mubr.msk.bf16.mxu0 %vm13749_vm0, %v17197_v1  ;;  %v3700_v13 = vsel %vm3629_vm8, %v3690_v63, %v3699_v24 }
 0x12c   : > { %12798 = vmatmul.mubr.msk.bf16.gmra.mrb[132].mxu1 %vm576_vm2, %v3673_v32  ;;  %940 = vst.msk [vmem:[#allocation2 + $0x9c] sm:$0xf] %vm926_vm6, %v11521_v34 }
 0x12d   : > { %v718_v38 = vpop.f32.mrb[28].mxu0  ;;  %12801 = vmatprep.mubr.msk.bf16.mxu1 %vm13749_vm0, %v17197_v1  ;;  %v14449_v45 = vpop.f32.mrb[28].mxu1 }
 0x12e   : > { %v794_v21 = vmax.f32 %v718_v38, 0.0  ;;  %v12465_v41 = vpop.f32.mrb[29].mxu0  ;;  %v12535_v50 = vpop.f32.mrb[29].mxu1  ;;  %v3707_v38 = vrot.slane %v3705_v22, 3 }
 0x12f   : > { %v721_v46 = vpop.f32.mrb[30].mxu0  ;;  %v14452_v31 = vpop.f32.mrb[30].mxu1  ;;  %v3711_v41 = vshrl.u32 %v13416_v37, 16  ;;  %v13418_v50 = vld [vmem:[%s13882_s18 + $0x280] sm:$0xff]  }
 0x130   : > { %v11522_v48 = vpack.c.bf16 %v794_v21, %v794_v21  ;;  %v795_v49 = vmax.f32 %v721_v46, 0.0  ;;  %v12466_v52 = vpop.f32.mrb[31].mxu0  ;;  %v12536_v59 = vpop.f32.mrb[31].mxu1  ;;  %v3100_v21 = vrot.slane %v14483_v25, 2  ;;  %v3708_v44 = vor.u32 %v3707_v38, %v3704_v36 }
 0x131   : > { %v3714_v46 = vshll.u32 %v13416_v37, 16  ;;  %v3713_v55 = vrot.slane %v3711_v41, 2  ;;  %v13424_v37 = vld [vmem:[%s13882_s18 + $0x290] sm:$0xff]  }
 0x132   : > { %v11523_v58 = vpack.c.bf16 %v795_v49, %v795_v49  ;;  %12732 = vmatmul.mubr.msk.bf16.gmra.mrb[136].mxu0 %vm576_vm2, %v3095_v47  ;;  %941 = vst.msk [vmem:[#allocation2 + $0xa8] sm:$0xf] %vm926_vm6, %v11522_v48  ;;  %v13415_v49 = vld [vmem:[%s13882_s18 + $0x208] sm:$0xff]   ;;  %v3709_v62 = vsel %vm3629_vm8, %v3699_v24, %v3708_v44 }
 0x133   : > { %12735 = vmatprep.mubr.msk.bf16.mxu0 %vm13749_vm0, %v17197_v1 }
 0x134   : > { %12802 = vmatmul.mubr.msk.bf16.gmra.mrb[136].mxu1 %vm576_vm2, %v3682_v51  ;;  %942 = vst.msk [vmem:[#allocation2 + $0xb4] sm:$0xf] %vm926_vm6, %v11523_v58  ;;  %v3101_v51 = vsel %vm3084_vm7, %v3098_v18, %v3100_v21 }
 0x135   : > { %v726_v42 = vpop.f32.mrb[32].mxu0  ;;  %12805 = vmatprep.mubr.msk.bf16.mxu1 %vm13749_vm0, %v17197_v1  ;;  %v14467_v4 = vpop.f32.mrb[32].mxu1 }
 0x136   : > { %v796_v2 = vmax.f32 %v726_v42, 0.0  ;;  %v12469_v3 = vpop.f32.mrb[33].mxu0  ;;  %v12539_v7 = vpop.f32.mrb[33].mxu1  ;;  %v3716_v42 = vrot.slane %v3714_v46, 3 }
 0x137   : > { %v729_v5 = vpop.f32.mrb[34].mxu0  ;;  %v14470_v10 = vpop.f32.mrb[34].mxu1  ;;  %v3720_v3 = vshrl.u32 %v13418_v50, 16  ;;  %v13422_v7 = vld [vmem:[%s13882_s18 + $0x288] sm:$0xff]  }
 0x138   : > { %v11524_v53 = vpack.c.bf16 %v796_v2, %v796_v2  ;;  %v797_v6 = vmax.f32 %v729_v5, 0.0  ;;  %v12470_v8 = vpop.f32.mrb[35].mxu0  ;;  %v12540_v17 = vpop.f32.mrb[35].mxu1  ;;  %v3102_v2 = vrot.slane %v13415_v49, 2  ;;  %v3723_v5 = vshll.u32 %v13418_v50, 16 }
 0x13a   : > { %v11525_v16 = vpack.c.bf16 %v797_v6, %v797_v6  ;;  %12736 = vmatmul.mubr.msk.bf16.gmra.mrb[140].mxu0 %vm576_vm2, %v3097_v35  ;;  %943 = vst.msk [vmem:[#allocation2 + $0xc0] sm:$0xf] %vm926_vm6, %v11524_v53  ;;  %v14515_v35 = vld [vmem:[%s13882_s18 + $0x210] sm:$0xff]   ;;  %v3717_v6 = vor.u32 %v3716_v42, %v3713_v55  ;;  %v13426_v42 = vld [vmem:[%s13882_s18 + $0x298] sm:$0xff]  }
 0x13b   : > { %12739 = vmatprep.mubr.msk.bf16.mxu0 %vm13749_vm0, %v17197_v1 }
 0x13c   : > { %12806 = vmatmul.mubr.msk.bf16.gmra.mrb[140].mxu1 %vm576_vm2, %v3691_v11  ;;  %944 = vst.msk [vmem:[#allocation2 + $0xcc] sm:$0xf] %vm926_vm6, %v11525_v16  ;;  %v3103_v16 = vsel %vm3084_vm7, %v3100_v21, %v3102_v2  ;;  %v3718_v25 = vsel %vm3629_vm8, %v3708_v44, %v3717_v6 }
 0x13d   : > { %v734_v23 = vpop.f32.mrb[36].mxu0  ;;  %12809 = vmatprep.mubr.msk.bf16.mxu1 %vm13749_vm0, %v17197_v1  ;;  %v14485_v28 = vpop.f32.mrb[36].mxu1 }
 0x13e   : > { %v798_v26 = vmax.f32 %v734_v23, 0.0  ;;  %v12473_v27 = vpop.f32.mrb[37].mxu0  ;;  %v12543_v33 = vpop.f32.mrb[37].mxu1  ;;  %v3722_v23 = vrot.slane %v3720_v3, 2 }
 0x13f   : > { %v737_v14 = vpop.f32.mrb[38].mxu0  ;;  %v14489_v54 = vpop.f32.mrb[38].mxu1  ;;  %v14534_v33 = vld [vmem:[%s13882_s18 + $0x218] sm:$0xff]  }
 0x140   : > { %v11526_v29 = vpack.c.bf16 %v798_v26, %v798_v26  ;;  %v799_v32 = vmax.f32 %v737_v14, 0.0  ;;  %v12474_v34 = vpop.f32.mrb[39].mxu0  ;;  %v12544_v40 = vpop.f32.mrb[39].mxu1  ;;  %v3725_v26 = vrot.slane %v3723_v5, 3 }
 0x142   : > { %v11527_v39 = vpack.c.bf16 %v799_v32, %v799_v32  ;;  %12740 = vmatmul.mubr.msk.bf16.gmra.mrb[144].mxu0 %vm576_vm2, %v3099_v20  ;;  %945 = vst.msk [vmem:[#allocation2 + $0xd8] sm:$0xf] %vm926_vm6, %v11526_v29  ;;  %v3104_v20 = vrot.slane %v14515_v35, 2  ;;  %v3729_v29 = vshrl.u32 %v13422_v7, 16  ;;  %v3732_v32 = vshll.u32 %v13422_v7, 16 }
 0x143   : > { %12743 = vmatprep.mubr.msk.bf16.mxu0 %vm13749_vm0, %v17197_v1  ;;  %v3726_v36 = vor.u32 %v3725_v26, %v3722_v23  ;;  %v3750_v23 = vshll.u32 %v13426_v42, 16  ;;  %v958_v26 = vld [vmem:[#allocation2 + $0x150] sm:$0x1] }
 0x144   : > { %12810 = vmatmul.mubr.msk.bf16.gmra.mrb[144].mxu1 %vm576_vm2, %v3700_v13  ;;  %946 = vst.msk [vmem:[#allocation2 + $0xe4] sm:$0xf] %vm926_vm6, %v11527_v39  ;;  %v3105_v21 = vsel %vm3084_vm7, %v3102_v2, %v3104_v20  ;;  %v3734_v50 = vrot.slane %v3732_v32, 3 }
 0x145   : > { %v742_v43 = vpop.f32.mrb[40].mxu0  ;;  %12813 = vmatprep.mubr.msk.bf16.mxu1 %vm13749_vm0, %v17197_v1  ;;  %v14503_v52 = vpop.f32.mrb[40].mxu1  ;;  %v3727_v49 = vsel %vm3629_vm8, %v3717_v6, %v3726_v36 }
 0x146   : > { %v800_v47 = vmax.f32 %v742_v43, 0.0  ;;  %v12477_v48 = vpop.f32.mrb[41].mxu0  ;;  %v12547_v59 = vpop.f32.mrb[41].mxu1 }
 0x147   : > { %v745_v56 = vpop.f32.mrb[42].mxu0  ;;  %v14506_v61 = vpop.f32.mrb[42].mxu1  ;;  %v3741_v59 = vshll.u32 %v13424_v37, 16 }
 0x148   : > { %v11528_v57 = vpack.c.bf16 %v800_v47, %v800_v47  ;;  %v801_v58 = vmax.f32 %v745_v56, 0.0  ;;  %v12478_v60 = vpop.f32.mrb[43].mxu0  ;;  %v12548_v0 = vpop.f32.mrb[43].mxu1  ;;  %v3731_v47 = vrot.slane %v3729_v29, 2 }
 0x14a   : > { %v11529_v63 = vpack.c.bf16 %v801_v58, %v801_v58  ;;  %12744 = vmatmul.mubr.msk.bf16.gmra.mrb[148].mxu0 %vm576_vm2, %v3101_v51  ;;  %947 = vst.msk [vmem:[#allocation2 + $0xf0] sm:$0xf] %vm926_vm6, %v11528_v57  ;;  %v3106_v57 = vrot.slane %v14534_v33, 2  ;;  %v3738_v58 = vshrl.u32 %v13424_v37, 16  ;;  %v3735_v55 = vor.u32 %v3734_v50, %v3731_v47 }
 0x14b   : > { %12747 = vmatprep.mubr.msk.bf16.mxu0 %vm13749_vm0, %v17197_v1  ;;  %v17205_v33 = vmov 0 }
 0x14c   : > { %12814 = vmatmul.mubr.msk.bf16.gmra.mrb[148].mxu1 %vm576_vm2, %v3709_v62  ;;  %948 = vst.msk [vmem:[#allocation2 + $0xfc] sm:$0xf] %vm926_vm6, %v11529_v63  ;;  %v14556_v62 = vld [vmem:[%s13882_s18 + $0x220] sm:$0xff]   ;;  %v3107_v5 = vsel %vm3084_vm7, %v3104_v20, %v3106_v57  ;;  %v17206_v33 = vsel %vm14580_vm11, 4294967295, %v17205_v33 }
 0x14d   : > { %v750_v53 = vpop.f32.mrb[44].mxu0  ;;  %12817 = vmatprep.mubr.msk.bf16.mxu1 %vm13749_vm0, %v17197_v1  ;;  %v14521_v11 = vpop.f32.mrb[44].mxu1  ;;  %v13430_v20 = vld [vmem:[%s13882_s18 + $0x2a0] ss:$0 sps:$4 sm:$0x77]   ;;  %17207 = vst [vmem:[#allocation9_spill] sm:$0xff] %v17206_v33 }
 0x14e   : > { %v802_v8 = vmax.f32 %v750_v53, 0.0  ;;  %v12481_v9 = vpop.f32.mrb[45].mxu0  ;;  %v12551_v19 = vpop.f32.mrb[45].mxu1 }
 0x14f   : > { %v753_v15 = vpop.f32.mrb[46].mxu0  ;;  %v14524_v24 = vpop.f32.mrb[46].mxu1  ;;  %v3108_v19 = vrot.slane %v14556_v62, 2 }
 0x150   : > { %v11530_v17 = vpack.c.bf16 %v802_v8, %v802_v8  ;;  %v803_v18 = vmax.f32 %v753_v15, 0.0  ;;  %v12482_v22 = vpop.f32.mrb[47].mxu0  ;;  %v12552_v14 = vpop.f32.mrb[47].mxu1  ;;  %v3740_v8 = vrot.slane %v3738_v58, 2  ;;  %v3736_v15 = vsel %vm3629_vm8, %v3726_v36, %v3735_v55 }
 0x151   : > { %v3747_v22 = vshrl.u32 %v13426_v42, 16  ;;  %v14575_v14 = vld [vmem:[%s13882_s18 + $0x228] sm:$0xff]   ;;  %v3109_v37 = vsel %vm3084_vm7, %v3106_v57, %v3108_v19  ;;  %v14598_v57 = vld [vmem:[%s13882_s18 + $0x230] ss:$0 sps:$4 sm:$0x77]   ;;  %v3759_v58 = vshll.u32 %v13430_v20, 16 }
 0x152   : > { %v11531_v27 = vpack.c.bf16 %v803_v18, %v803_v18  ;;  %12748 = vmatmul.mubr.msk.bf16.gmra.mrb[152].mxu0 %vm576_vm2, %v3103_v16  ;;  %949 = vst.msk [vmem:[#allocation2 + $0x108] sm:$0xf] %vm926_vm6, %v11530_v17  ;;  %v3743_v16 = vrot.slane %v3741_v59, 3  ;;  %v3110_v50 = vrot.slane %v14575_v14, 2 }
 0x153   : > { %12751 = vmatprep.mubr.msk.bf16.mxu0 %vm13749_vm0, %v17197_v1 }
 0x154   : > { %12818 = vmatmul.mubr.msk.bf16.gmra.mrb[152].mxu1 %vm576_vm2, %v3718_v25  ;;  %950 = vst.msk [vmem:[#allocation2 + $0x114] sm:$0xf] %vm926_vm6, %v11531_v27  ;;  %v3744_v27 = vor.u32 %v3743_v16, %v3740_v8 }
 0x155   : > { %v758_v34 = vpop.f32.mrb[48].mxu0  ;;  %12821 = vmatprep.mubr.msk.bf16.mxu1 %vm13749_vm0, %v17197_v1  ;;  %v14540_v39 = vpop.f32.mrb[48].mxu1 }
 0x156   : > { %v804_v13 = vmax.f32 %v758_v34, 0.0  ;;  %v12485_v38 = vpop.f32.mrb[49].mxu0  ;;  %17201 = vst [vmem:[#allocation5_spill] sm:$0xff] %v14540_v39  ;;  %v12555_v44 = vpop.f32.mrb[49].mxu1 }
 0x157   : > { %v761_v40 = vpop.f32.mrb[50].mxu0  ;;  %v14543_v48 = vpop.f32.mrb[50].mxu1  ;;  %v3752_v44 = vrot.slane %v3750_v23, 3 }
 0x158   : > { %v11532_v41 = vpack.c.bf16 %v804_v13, %v804_v13  ;;  %v805_v43 = vmax.f32 %v761_v40, 0.0  ;;  %v12486_v46 = vpop.f32.mrb[51].mxu0  ;;  %17202 = vst [vmem:[#allocation6_spill] sm:$0xff] %v14543_v48  ;;  %v12556_v51 = vpop.f32.mrb[51].mxu1 }
 0x15a   : > { %v11533_v56 = vpack.c.bf16 %v805_v43, %v805_v43  ;;  %12752 = vmatmul.mubr.msk.bf16.gmra.mrb[156].mxu0 %vm576_vm2, %v3105_v21  ;;  %951 = vst.msk [vmem:[#allocation2 + $0x120] sm:$0xf] %vm926_vm6, %v11532_v41  ;;  %v3749_v21 = vrot.slane %v3747_v22, 2  ;;  %v3745_v43 = vsel %vm3629_vm8, %v3735_v55, %v3744_v27 }
 0x15b   : > { %12755 = vmatprep.mubr.msk.bf16.mxu0 %vm13749_vm0, %v17197_v1 }
 0x15c   : > { %12822 = vmatmul.mubr.msk.bf16.gmra.mrb[156].mxu1 %vm576_vm2, %v3727_v49  ;;  %952 = vst.msk [vmem:[#allocation2 + $0x12c] sm:$0xf] %vm926_vm6, %v11533_v56  ;;  %v3756_v49 = vshrl.u32 %v13430_v20, 16  ;;  %v3753_v51 = vor.u32 %v3752_v44, %v3749_v21 }
 0x15d   : > { %v766_v60 = vpop.f32.mrb[52].mxu0  ;;  %12825 = vmatprep.mubr.msk.bf16.mxu1 %vm13749_vm0, %v17197_v1  ;;  %v14559_v2 = vpop.f32.mrb[52].mxu1 }
 0x15e   : > { %v806_v63 = vmax.f32 %v766_v60, 0.0  ;;  %v12489_v0 = vpop.f32.mrb[53].mxu0  ;;  %17203 = vst [vmem:[#allocation7_spill] sm:$0xff] %v14559_v2  ;;  %v12559_v6 = vpop.f32.mrb[53].mxu1  ;;  %v14600_v62 = vrot.slane %v3756_v49, 2  ;;  %v3754_v8 = vsel %vm3629_vm8, %v3744_v27, %v3753_v51  ;;  %v13434_v49 = vld [vmem:[%s13882_s18 + $0x318] sm:$0xff]  }
 0x15f   : > { %v769_v3 = vpop.f32.mrb[54].mxu0  ;;  %v14562_v9 = vpop.f32.mrb[54].mxu1  ;;  %v3111_v0 = vsel %vm3084_vm7, %v3108_v19, %v3110_v50  ;;  %v3112_v19 = vrot.slane %v14598_v57, 2 }
 0x160   : > { %v11534_v35 = vpack.c.bf16 %v806_v63, %v806_v63  ;;  %v807_v53 = vmax.f32 %v769_v3, 0.0  ;;  %v12490_v7 = vpop.f32.mrb[55].mxu0  ;;  %17204 = vst [vmem:[#allocation8_spill] sm:$0xff] %v14562_v9  ;;  %v12560_v18 = vpop.f32.mrb[55].mxu1 }
 0x162   : > { %v11535_v17 = vpack.c.bf16 %v807_v53, %v807_v53  ;;  %12756 = vmatmul.mubr.msk.bf16.gmra.mrb[160].mxu0 %vm576_vm2, %v3107_v5  ;;  %953 = vst.msk [vmem:[#allocation2 + $0x138] sm:$0xf] %vm926_vm6, %v11534_v35 }
 0x163   : > { %12759 = vmatprep.mubr.msk.bf16.mxu0 %vm13749_vm0, %v17197_v1 }
 0x164   : > { %12826 = vmatmul.mubr.msk.bf16.gmra.mrb[160].mxu1 %vm576_vm2, %v3736_v15  ;;  %954 = vst.msk [vmem:[#allocation2 + $0x144] sm:$0xf] %vm926_vm6, %v11535_v17  ;;  %v3761_v15 = vrot.slane %v3759_v58, 3 }
 0x165   : > { %v774_v25 = vpop.f32.mrb[56].mxu0  ;;  %12829 = vmatprep.mubr.msk.bf16.mxu1 %vm13749_vm0, %v17197_v1  ;;  %v14584_v34 = vpop.f32.mrb[56].mxu1 }
 0x166   : > { %v808_v29 = vmax.f32 %v774_v25, 0.0  ;;  %v12493_v32 = vpop.f32.mrb[57].mxu0  ;;  %17208 = vst [vmem:[#allocation10_spill] sm:$0xff] %v14584_v34  ;;  %v12563_v38 = vpop.f32.mrb[57].mxu1 }
 0x167   : > { %v777_v36 = vpop.f32.mrb[58].mxu0  ;;  %v1415_v41 = vpop.f32.mrb[58].mxu1 }
 0x168   : > { %v11536_v13 = vpack.c.bf16 %v808_v29, %v808_v29  ;;  %v12494_v40 = vpop.f32.mrb[59].mxu0  ;;  %v12564_v47 = vpop.f32.mrb[59].mxu1 }
 0x169   : > { %v13433_v47 = vld [vmem:[%s13882_s18 + $0x310] sm:$0xf8]  }
 0x16a   : > { %v959_v46 = vsel %vm14580_vm11, %v11536_v13, %v958_v26  ;;  %12760 = vmatmul.mubr.msk.bf16.gmra.mrb[164].mxu0 %vm576_vm2, %v3109_v37  ;;  %v3762_v26 = vor.u32 %v3761_v15, %v14600_v62  ;;  %v3113_v37 = vsel %vm3084_vm7, %v3110_v50, %v3112_v19 }
 0x16b   : > { %960 = vst [vmem:[#allocation2 + $0x150] sm:$0x1] %v959_v46  ;;  %12763 = vmatprep.mubr.msk.bf16.mxu0 %vm13749_vm0, %v17197_v1 }
 0x16c   : > { %12830 = vmatmul.mubr.msk.bf16.gmra.mrb[164].mxu1 %vm576_vm2, %v3745_v43  ;;  %v1536_v59 = vpop.permute.xlu0 %1535  ;;  %v3763_v46 = vsel %vm3629_vm8, %v3753_v51, %v3762_v26 }
 0x16d   : > { %v1906_v56 = vpop.f32.mrb[60].mxu0  ;;  %12833 = vmatprep.mubr.msk.bf16.mxu1 %vm13749_vm0, %v17197_v1  ;;  %1623 = vst.msk [vmem:[#allocation2] sm:$0xf] %vm1622_vm12, %v1536_v59  ;;  %v2617_v42 = vpop.f32.mrb[60].mxu1 }
 0x16e   : > { %v2024_v60 = vmax.f32 %v1906_v56, 0.0  ;;  %v12577_v55 = vpop.f32.mrb[61].mxu0  ;;  %v2735_v3 = vmax.f32 %v2617_v42, 0.0  ;;  %v12647_v35 = vpop.f32.mrb[61].mxu1  ;;  %v4950_v42 = vshrl.u32 %v13434_v49, 16 }
 0x16f   : > { %v1909_v63 = vpop.f32.mrb[62].mxu0  ;;  %v2620_v7 = vpop.f32.mrb[62].mxu1  ;;  %v4945_v55 = vshll.u32 %v13433_v47, 16 }
 0x170   : > { %v2025_v5 = vmax.f32 %v1909_v63, 0.0  ;;  %v12578_v53 = vpop.f32.mrb[63].mxu0  ;;  %v11566_v6 = vpack.c.bf16 %v2024_v60, %v2024_v60  ;;  %v1538_v16 = vpop.permute.xlu0 %1537  ;;  %v2736_v17 = vmax.f32 %v2620_v7, 0.0  ;;  %v11595_v23 = vpack.c.bf16 %v2735_v3, %v2735_v3  ;;  %v13431_v7 = vld [vmem:[%s13882_s18 + $0x2a0] sm:$0xf8]  }
 0x171   : > { %v12648_v18 = vpop.f32.mrb[63].mxu1  ;;  %1624 = vst.msk [vmem:[#allocation2 + $0xc] sm:$0xf] %vm1622_vm12, %v1538_v16  ;;  %v4942_v60 = vshrl.u32 %v13433_v47, 16  ;;  %v4953_v63 = vshll.u32 %v13434_v49, 16  ;;  %v4952_v26 = vrot.slane %v4950_v42, 3 }
 0x172   : > { %12764 = vmatmul.mubr.msk.bf16.gmra.mrb[168].mxu0 %vm576_vm2, %v3111_v0  ;;  %2141 = vrot.lane.b32.xlu0 %v11566_v6, %s13751_s27  ;;  %v11567_v22 = vpack.c.bf16 %v2025_v5, %v2025_v5  ;;  %v11596_v29 = vpack.c.bf16 %v2736_v17, %v2736_v17  ;;  %v14660_v49 = vld [vmem:[%s13882_s18 + $0x2b0] sm:$0xff]  }
 0x173   : > { %12767 = vmatprep.mubr.msk.bf16.mxu0 %vm13749_vm0, %v17197_v1 }
 0x174   : > { %12834 = vmatmul.mubr.msk.bf16.gmra.mrb[168].mxu1 %vm576_vm2, %v3754_v8  ;;  %2143 = vrot.lane.b32.xlu1 %v11567_v22, %s13751_s27  ;;  %v1540_v20 = vpop.permute.xlu0 %1539  ;;  %v14638_v8 = vld [vmem:[%s13882_s18 + $0x2a8] sm:$0xff]  }
 0x175   : > { %v1914_v25 = vpop.f32.mrb[64].mxu0  ;;  %12837 = vmatprep.mubr.msk.bf16.mxu1 %vm13749_vm0, %v17197_v1  ;;  %v2625_v32 = vpop.f32.mrb[64].mxu1  ;;  %1625 = vst.msk [vmem:[#allocation2 + $0x18] sm:$0xf] %vm1622_vm12, %v1540_v20 }
 0x176   : > { %v2026_v27 = vmax.f32 %v1914_v25, 0.0  ;;  %2852 = vrot.lane.b32.xlu0 %v11595_v23, %s13752_s28  ;;  %v12581_v14 = vpop.f32.mrb[65].mxu0  ;;  %v2737_v13 = vmax.f32 %v2625_v32, 0.0  ;;  %v12651_v40 = vpop.f32.mrb[65].mxu1  ;;  %v4944_v23 = vrot.slane %v4942_v60, 3  ;;  %v4947_v25 = vrot.slane %v4945_v55, 4 }
 0x177   : > { %v1917_v36 = vpop.f32.mrb[66].mxu0  ;;  %v1542_v21 = vpop.permute.xlu1 %1541  ;;  %v13436_v14 = vld [vmem:[%s13882_s18 + $0x320] sm:$0xff]  }
 0x178   : > { %v2027_v38 = vmax.f32 %v1917_v36, 0.0  ;;  %2854 = vrot.lane.b32.xlu1 %v11596_v29, %s13752_s28  ;;  %v11568_v41 = vpack.c.bf16 %v2026_v27, %v2026_v27  ;;  %1626 = vst.msk [vmem:[#allocation2 + $0x24] sm:$0xf] %vm1622_vm12, %v1542_v21  ;;  %v2628_v43 = vpop.f32.mrb[66].mxu1  ;;  %v12582_v44 = vpop.f32.mrb[67].mxu0  ;;  %v11597_v56 = vpack.c.bf16 %v2737_v13, %v2737_v13  ;;  %v4955_v27 = vrot.slane %v4953_v63, 4 }
 0x179   : > { %v2738_v58 = vmax.f32 %v2628_v43, 0.0  ;;  %v12652_v59 = vpop.f32.mrb[67].mxu1  ;;  %v4338_v36 = vrot.slane %v13431_v7, 3  ;;  %v4948_v57 = vor.u32 %v4947_v25, %v4944_v23  ;;  %v4959_v40 = vshrl.u32 %v13436_v14, 16  ;;  %v13438_v55 = vld [vmem:[%s17185_s2] sm:$0xff]  }
 0x17a   : > { %12768 = vmatmul.mubr.msk.bf16.gmra.mrb[172].mxu0 %vm576_vm2, %v3113_v37  ;;  %2145 = vrot.lane.b32.xlu0 %v11568_v41, %s13751_s27  ;;  %v11569_v50 = vpack.c.bf16 %v2027_v38, %v2027_v38  ;;  %v4339_v37 = vrot.slane %v14638_v8, 3  ;;  %v4962_v21 = vshll.u32 %v13436_v14, 16  ;;  %v4341_v7 = vrot.slane %v14660_v49, 3 }
 0x17b   : > { %12771 = vmatprep.mubr.msk.bf16.mxu0 %vm13749_vm0, %v17197_v1  ;;  %v11598_v0 = vpack.c.bf16 %v2738_v58, %v2738_v58 }
 0x17c   : > { %12838 = vmatmul.mubr.msk.bf16.gmra.mrb[172].mxu1 %vm576_vm2, %v3763_v46  ;;  %2147 = vrot.lane.b32.xlu1 %v11569_v50, %s13751_s27  ;;  %v1544_v3 = vpop.permute.xlu0 %1543 }
 0x17d   : > { %v1922_v51 = vpop.f32.mrb[68].mxu0  ;;  %12841 = vmatprep.mubr.msk.bf16.mxu1 %vm13749_vm0, %v17197_v1  ;;  %1627 = vst.msk [vmem:[#allocation2 + $0x30] sm:$0xf] %vm1622_vm12, %v1544_v3  ;;  %v4961_v3 = vrot.slane %v4959_v40, 3 }
 0x17e   : > { %v2028_v5 = vmax.f32 %v1922_v51, 0.0  ;;  %2856 = vrot.lane.b32.xlu0 %v11597_v56, %s13752_s28  ;;  %v12585_v35 = vpop.f32.mrb[69].mxu0 }
 0x17f   : > { %v2633_v53 = vpop.f32.mrb[68].mxu1  ;;  %v1925_v6 = vpop.f32.mrb[70].mxu0  ;;  %v13440_v35 = vld [vmem:[%s13882_s18 + $0x328] sm:$0xff]  }
 0x180   : > { %v2739_v15 = vmax.f32 %v2633_v53, 0.0  ;;  %v12655_v16 = vpop.f32.mrb[69].mxu1  ;;  %2858 = vrot.lane.b32.xlu1 %v11598_v0, %s13752_s28  ;;  %v12586_v17 = vpop.f32.mrb[71].mxu0  ;;  %v11570_v18 = vpack.c.bf16 %v2028_v5, %v2028_v5  ;;  %v2029_v13 = vmax.f32 %v1925_v6, 0.0  ;;  %v4964_v5 = vrot.slane %v4962_v21, 4 }
 0x181   : > { %v2636_v22 = vpop.f32.mrb[70].mxu1  ;;  %v1546_v29 = vpop.permute.xlu0 %1545  ;;  %v13443_v16 = vld [vmem:[%s17185_s2 + $0x8] sm:$0xff]   ;;  %v4971_v23 = vshll.u32 %v13440_v35, 16 }
 0x182   : > { %v11599_v20 = vpack.c.bf16 %v2739_v15, %v2739_v15  ;;  %v12656_v32 = vpop.f32.mrb[71].mxu1  ;;  %12772 = vmatmul.mubr.msk.bf16.gmra.mrb[176].mxu0 %vm576_vm2, %v3112_v19  ;;  %2149 = vrot.lane.b32.xlu0 %v11570_v18, %s13751_s27  ;;  %1628 = vst.msk [vmem:[#allocation2 + $0x3c] sm:$0xf] %vm1622_vm12, %v1546_v29  ;;  %v14654_v19 = vor.u32 %v4955_v27, %v4952_v26  ;;  %v2740_v56 = vmax.f32 %v2636_v22, 0.0  ;;  %v4968_v22 = vshrl.u32 %v13440_v35, 16 }
 0x183   : > { %12855 = vmatprep.mubr.msk.bf16.mxu0 %vm13749_vm0, %v17197_v1  ;;  %v11571_v51 = vpack.c.bf16 %v2029_v13, %v2029_v13  ;;  %v14681_v18 = vor.u32 %v4964_v5, %v4961_v3  ;;  %v4342_v29 = vsel %vm4337_vm13, %v4339_v37, %v4341_v7  ;;  %v14691_v32 = vld [vmem:[%s13882_s18 + $0x2b8] sm:$0xff]  }
 0x184   : > { %12842 = vmatmul.mubr.msk.bf16.gmra.mrb[176].mxu1 %vm576_vm2, %v14600_v62  ;;  %v1548_v44 = vpop.permute.xlu1 %1547  ;;  %v4340_v62 = vsel %vm4337_vm13, %v4338_v36, %v4339_v37  ;;  %v4957_v0 = vsel %vm4940_vm14, %v4948_v57, %v14654_v19  ;;  %v11600_v8 = vpack.c.bf16 %v2740_v56, %v2740_v56 }
 0x185   : > { %v1930_v38 = vpop.f32.mrb[72].mxu0  ;;  %12925 = vmatprep.mubr.msk.bf16.mxu1 %vm13749_vm0, %v17197_v1  ;;  %1629 = vst.msk [vmem:[#allocation2 + $0x48] sm:$0xf] %vm1622_vm12, %v1548_v44  ;;  %v4966_v37 = vsel %vm4940_vm14, %v14654_v19, %v14681_v18 }
 0x186   : > { %v2030_v41 = vmax.f32 %v1930_v38, 0.0  ;;  %2860 = vrot.lane.b32.xlu0 %v11599_v20, %s13752_s28  ;;  %v12589_v43 = vpop.f32.mrb[73].mxu0  ;;  %v1550_v50 = vpop.permute.xlu0 %1549 }
 0x187   : > { %v2641_v46 = vpop.f32.mrb[72].mxu1  ;;  %v1933_v47 = vpop.f32.mrb[74].mxu0  ;;  %1630 = vst.msk [vmem:[#allocation2 + $0x54] sm:$0xf] %vm1622_vm12, %v1550_v50 }
 0x188   : > { %v2741_v58 = vmax.f32 %v2641_v46, 0.0  ;;  %v12659_v59 = vpop.f32.mrb[73].mxu1  ;;  %v11572_v60 = vpack.c.bf16 %v2030_v41, %v2030_v41  ;;  %v12590_v42 = vpop.f32.mrb[75].mxu0  ;;  %v2031_v15 = vmax.f32 %v1933_v47, 0.0  ;;  %v13448_v41 = vld [vmem:[%s17185_s2 + $0x10] sm:$0xff]   ;;  %v4970_v46 = vrot.slane %v4968_v22, 3 }
 0x189   : > { %v2644_v63 = vpop.f32.mrb[74].mxu1  ;;  %v4973_v47 = vrot.slane %v4971_v23, 4  ;;  %v4343_v59 = vrot.slane %v14691_v32, 3 }
 0x18a   : > { %v12660_v53 = vpop.f32.mrb[75].mxu1  ;;  %12856 = vmatmul.mubr.msk.bf16.vlgmr.msra.gmra.mrb[180].mxu0 %vm576_vm2, %v4340_v62  ;;  %2151 = vrot.lane.b32.xlu0 %v11571_v51, %s13751_s27  ;;  %v11601_v6 = vpack.c.bf16 %v2741_v58, %v2741_v58  ;;  %v2742_v36 = vmax.f32 %v2644_v63, 0.0  ;;  %v11573_v40 = vpack.c.bf16 %v2031_v15, %v2031_v15  ;;  %v13445_v62 = vld [vmem:[%s13882_s18 + $0x330] sm:$0xff]   ;;  %v13453_v51 = vld [vmem:[%s17185_s2 + $0x18] sm:$0xff]  }
 0x18b   : > { %2153 = vrot.lane.b32.xlu1 %v11572_v60, %s13751_s27  ;;  %12859 = vmatprep.mubr.msk.bf16.mxu0 %vm13749_vm0, %v17197_v1  ;;  %v13457_v60 = vld [vmem:[%s17185_s2 + $0x20] ss:$0 sps:$4 sm:$0x11]   ;;  %v4974_v42 = vor.u32 %v4973_v47, %v4970_v46  ;;  %v4977_v63 = vshrl.u32 %v13445_v62, 16 }
 0x18c   : > { %12926 = vmatmul.mubr.msk.bf16.vlgmr.msra.gmra.mrb[180].mxu1 %vm576_vm2, %v4957_v0  ;;  %12986 = vmatpush3.bf16.msra.mxu0 %v13438_v55  ;;  %v11602_v50 = vpack.c.bf16 %v2742_v36, %v2742_v36  ;;  %v4980_v0 = vshll.u32 %v13445_v62, 16  ;;  %v5721_v23 = vand.u32 %v13457_v60, %v13877_v12 }
 0x18d   : > { %v1938_v17 = vpop.f32.mrb[76].mxu0  ;;  %12929 = vmatprep.mubr.msk.bf16.mxu1 %vm13749_vm0, %v17197_v1  ;;  %12987 = vmatprep.subr.bf16.mxu0 %v17197_v1 }
 0x18e   : > { %v2032_v25 = vmax.f32 %v1938_v17, 0.0  ;;  %2862 = vrot.lane.b32.xlu0 %v11600_v8, %s13752_s28  ;;  %v12593_v26 = vpop.f32.mrb[77].mxu0  ;;  %v1552_v27 = vpop.permute.xlu1 %1551  ;;  %v13439_v8 = vld [vmem:[%s13882_s18 + $0x2c0] sm:$0xff]   ;;  %v4982_v49 = vrot.slane %v4980_v0, 4 }
 0x18f   : > { %v2649_v14 = vpop.f32.mrb[76].mxu1  ;;  %2864 = vrot.lane.b32.xlu1 %v11601_v6, %s13752_s28  ;;  %v1941_v20 = vpop.f32.mrb[78].mxu0  ;;  %1631 = vst.msk [vmem:[#allocation2 + $0x60] sm:$0xf] %vm1622_vm12, %v1552_v27  ;;  %v4344_v6 = vsel %vm4337_vm13, %v4341_v7, %v4343_v59  ;;  %v4975_v27 = vsel %vm4940_vm14, %v14681_v18, %v4974_v42  ;;  %v4345_v12 = vrot.slane %v13439_v8, 3 }
 0x190   : > { %v2743_v13 = vmax.f32 %v2649_v14, 0.0  ;;  %v12663_v38 = vpop.f32.mrb[77].mxu1  ;;  %v1554_v57 = vpop.permute.xlu0 %1553  ;;  %v11574_v21 = vpack.c.bf16 %v2032_v25, %v2032_v25  ;;  %12988 = vmatpush3.bf16.msra.mxu0 %v13443_v16  ;;  %v2033_v19 = vmax.f32 %v1941_v20, 0.0  ;;  %v4979_v14 = vrot.slane %v4977_v63, 3  ;;  %v13451_v20 = vld [vmem:[%s13882_s18 + $0x338] sm:$0xff]  }
 0x191   : > { %1632 = vst.msk [vmem:[#allocation2 + $0x6c] sm:$0xf] %vm1622_vm12, %v1554_v57  ;;  %v12594_v43 = vpop.f32.mrb[79].mxu0  ;;  %v2652_v44 = vpop.f32.mrb[78].mxu1  ;;  %12989 = vmatprep.subr.bf16.mxu0 %v17197_v1  ;;  %v4986_v36 = vshrl.u32 %v13451_v20, 16 }
 0x192   : > { %v12664_v56 = vpop.f32.mrb[79].mxu1  ;;  %12860 = vmatmul.mubr.msk.bf16.gmra.mrb[184].mxu0 %vm576_vm2, %v4342_v29  ;;  %2155 = vrot.lane.b32.xlu0 %v11573_v40, %s13751_s27  ;;  %v11603_v58 = vpack.c.bf16 %v2743_v13, %v2743_v13  ;;  %v2744_v15 = vmax.f32 %v2652_v44, 0.0  ;;  %v11575_v22 = vpack.c.bf16 %v2033_v19, %v2033_v19  ;;  %v4983_v32 = vor.u32 %v4982_v49, %v4979_v14  ;;  %v13441_v43 = vld [vmem:[%s13882_s18 + $0x2c8] sm:$0xff]  }
 0x193   : > { %2157 = vrot.lane.b32.xlu1 %v11574_v21, %s13751_s27  ;;  %12863 = vmatprep.mubr.msk.bf16.mxu0 %vm13749_vm0, %v17197_v1  ;;  %v4989_v13 = vshll.u32 %v13451_v20, 16  ;;  %v4988_v62 = vrot.slane %v4986_v36, 3  ;;  %v4347_v19 = vrot.slane %v13441_v43, 3 }
 0x194   : > { %12930 = vmatmul.mubr.msk.bf16.gmra.mrb[184].mxu1 %vm576_vm2, %v4966_v37  ;;  %12990 = vmatpush3.bf16.msra.mxu0 %v13448_v41  ;;  %v11604_v29 = vpack.c.bf16 %v2744_v15, %v2744_v15  ;;  %v4346_v41 = vsel %vm4337_vm13, %v4343_v59, %v4345_v12  ;;  %v4984_v47 = vsel %vm4940_vm14, %v4974_v42, %v4983_v32 }
 0x195   : > { %v14715_v55 = vpop.f32.mrb[80].mxu0  ;;  %12933 = vmatprep.mubr.msk.bf16.mxu1 %vm13749_vm0, %v17197_v1  ;;  %12991 = vmatprep.subr.bf16.mxu0 %v17197_v1  ;;  %v4991_v56 = vrot.slane %v4989_v13, 4 }
 0x196   : > { %2866 = vrot.lane.b32.xlu0 %v11602_v50, %s13752_s28  ;;  %v12597_v3 = vpop.f32.mrb[81].mxu0  ;;  %v1556_v5 = vpop.permute.xlu0 %1555 }
 0x197   : > { %v14721_v35 = vpop.f32.mrb[80].mxu1  ;;  %2868 = vrot.lane.b32.xlu1 %v11603_v58, %s13752_s28  ;;  %v14724_v53 = vpop.f32.mrb[82].mxu0  ;;  %1633 = vst.msk [vmem:[#allocation2 + $0x78] sm:$0xf] %vm1622_vm12, %v1556_v5  ;;  %v13454_v58 = vld [vmem:[%s13882_s18 + $0x340] sm:$0xff]   ;;  %v4348_v5 = vsel %vm4337_vm13, %v4345_v12, %v4347_v19 }
 0x198   : > { %v12667_v16 = vpop.f32.mrb[81].mxu1  ;;  %v1558_v17 = vpop.permute.xlu1 %1557  ;;  %12992 = vmatpush3.bf16.msra.mxu0 %v13453_v51  ;;  %v4992_v51 = vor.u32 %v4991_v56, %v4988_v62  ;;  %v4995_v60 = vshrl.u32 %v13454_v58, 16  ;;  %v4998_v42 = vshll.u32 %v13454_v58, 16  ;;  %v13461_v62 = vld [vmem:[%s13882_s18 + $0x350] sm:$0xff]  }
 0x199   : > { %1634 = vst.msk [vmem:[#allocation2 + $0x84] sm:$0xf] %vm1622_vm12, %v1558_v17  ;;  %v12598_v25 = vpop.f32.mrb[83].mxu0  ;;  %v14733_v26 = vpop.f32.mrb[82].mxu1  ;;  %12993 = vmatprep.subr.bf16.mxu0 %v17197_v1 }
 0x19a   : > { %v12668_v7 = vpop.f32.mrb[83].mxu1  ;;  %2159 = vrot.lane.b32.xlu0 %v11575_v22, %s13751_s27  ;;  %12864 = vmatmul.mubr.msk.bf16.gmra.mrb[188].mxu0 %vm576_vm2, %v4344_v6  ;;  %v13442_v6 = vld [vmem:[%s13882_s18 + $0x2d0] sm:$0xff]   ;;  %v4993_v17 = vsel %vm4940_vm14, %v4983_v32, %v4992_v51  ;;  %v4997_v22 = vrot.slane %v4995_v60, 3  ;;  %v13458_v25 = vld [vmem:[%s13882_s18 + $0x348] sm:$0xff]   ;;  %v5016_v60 = vshll.u32 %v13461_v62, 16 }
 0x19b   : > { %12867 = vmatprep.mubr.msk.bf16.mxu0 %vm13749_vm0, %v17197_v1  ;;  %v4349_v14 = vrot.slane %v13442_v6, 3  ;;  %v5004_v7 = vshrl.u32 %v13458_v25, 16  ;;  %v5007_v12 = vshll.u32 %v13458_v25, 16 }
 0x19c   : > { %12934 = vmatmul.mubr.msk.bf16.gmra.mrb[188].mxu1 %vm576_vm2, %v4975_v27  ;;  %12994 = vmatpush3.bf16.msra.mxu0 %v5721_v23  ;;  %v1560_v57 = vpop.permute.xlu0 %1559  ;;  %v5000_v23 = vrot.slane %v4998_v42, 4 }
 0x19d   : > { %v14744_v18 = vpop.f32.mrb[84].mxu0  ;;  %12937 = vmatprep.mubr.msk.bf16.mxu1 %vm13749_vm0, %v17197_v1  ;;  %1635 = vst.msk [vmem:[#allocation2 + $0x90] sm:$0xf] %vm1622_vm12, %v1560_v57  ;;  %v4350_v13 = vsel %vm4337_vm13, %v4347_v19, %v4349_v14 }
 0x19e   : > { %2870 = vrot.lane.b32.xlu0 %v11604_v29, %s13752_s28  ;;  %v12601_v38 = vpop.f32.mrb[85].mxu0  ;;  %v5001_v20 = vor.u32 %v5000_v23, %v4997_v22 }
 0x19f   : > { %v14749_v40 = vpop.f32.mrb[84].mxu1  ;;  %v14751_v21 = vpop.f32.mrb[86].mxu0  ;;  %v13444_v38 = vld [vmem:[%s13882_s18 + $0x2d8] sm:$0xff]  }
 0x1a0   : > { %v12671_v44 = vpop.f32.mrb[85].mxu1  ;;  %v12602_v37 = vpop.f32.mrb[87].mxu0  ;;  %v4351_v58 = vrot.slane %v13444_v38, 3 }
 0x1a1   : > { %v14756_v46 = vpop.f32.mrb[86].mxu1  ;;  %v5002_v44 = vsel %vm4940_vm14, %v4992_v51, %v5001_v20  ;;  %v5006_v37 = vrot.slane %v5004_v7, 3  ;;  %v5013_v51 = vshrl.u32 %v13461_v62, 16  ;;  %v13463_v7 = vld [vmem:[%s13882_s18 + $0x358] sm:$0xff]  }
 0x1a2   : > { %v12672_v50 = vpop.f32.mrb[87].mxu1  ;;  %12868 = vmatmul.mubr.msk.bf16.gmra.mrb[192].mxu0 %vm576_vm2, %v4346_v41  ;;  %v4352_v6 = vsel %vm4337_vm13, %v4349_v14, %v4351_v58  ;;  %v5025_v38 = vshll.u32 %v13463_v7, 16 }
 0x1a3   : > { %12871 = vmatprep.mubr.msk.bf16.mxu0 %vm13749_vm0, %v17197_v1  ;;  %v5015_v25 = vrot.slane %v5013_v51, 3 }
 0x1a4   : > { %12938 = vmatmul.mubr.msk.bf16.gmra.mrb[192].mxu1 %vm576_vm2, %v4984_v47  ;;  %v5009_v47 = vrot.slane %v5007_v12, 4 }
 0x1a5   : > { %v14764_v59 = vpop.f32.mrb[88].mxu0  ;;  %12941 = vmatprep.mubr.msk.bf16.mxu1 %vm13749_vm0, %v17197_v1 }
 0x1a6   : > { %v12605_v63 = vpop.f32.mrb[89].mxu0  ;;  %v5010_v19 = vor.u32 %v5009_v47, %v5006_v37  ;;  %v13447_v47 = vld [vmem:[%s13882_s18 + $0x2e8] sm:$0xff]  }
 0x1a7   : > { %v14768_v0 = vpop.f32.mrb[88].mxu1  ;;  %v14770_v3 = vpop.f32.mrb[90].mxu0 }
 0x1a8   : > { %v12675_v8 = vpop.f32.mrb[89].mxu1  ;;  %v12606_v15 = vpop.f32.mrb[91].mxu0  ;;  %v5011_v23 = vsel %vm4940_vm14, %v5001_v20, %v5010_v19 }
 0x1a9   : > { %v14774_v16 = vpop.f32.mrb[90].mxu1  ;;  %v13446_v8 = vld [vmem:[%s13882_s18 + $0x2e0] sm:$0xff]  }
 0x1aa   : > { %v12676_v27 = vpop.f32.mrb[91].mxu1  ;;  %12872 = vmatmul.mubr.msk.bf16.gmra.mrb[196].mxu0 %vm576_vm2, %v4348_v5 }
 0x1ab   : > { %12875 = vmatprep.mubr.msk.bf16.mxu0 %vm13749_vm0, %v17197_v1  ;;  %v5018_v27 = vrot.slane %v5016_v60, 4 }
 0x1ac   : > { %12942 = vmatmul.mubr.msk.bf16.gmra.mrb[196].mxu1 %vm576_vm2, %v4993_v17 }
 0x1ad   : > { %v14782_v49 = vpop.f32.mrb[92].mxu0  ;;  %12945 = vmatprep.mubr.msk.bf16.mxu1 %vm13749_vm0, %v17197_v1  ;;  %v5019_v20 = vor.u32 %v5018_v27, %v5015_v25 }
 0x1ae   : > { %v12609_v29 = vpop.f32.mrb[93].mxu0 }
 0x1af   : > { %v14786_v32 = vpop.f32.mrb[92].mxu1  ;;  %v14788_v36 = vpop.f32.mrb[94].mxu0  ;;  %v4353_v29 = vrot.slane %v13446_v8, 3  ;;  %v5020_v60 = vsel %vm4940_vm14, %v5010_v19, %v5019_v20  ;;  %v13465_v8 = vld [vmem:[%s13882_s18 + $0x360] sm:$0xff]  }
 0x1b0   : > { %v12679_v57 = vpop.f32.mrb[93].mxu1  ;;  %v12610_v41 = vpop.f32.mrb[95].mxu0  ;;  %v5034_v25 = vshll.u32 %v13465_v8, 16 }
 0x1b1   : > { %v14792_v43 = vpop.f32.mrb[94].mxu1  ;;  %v4354_v37 = vsel %vm4337_vm13, %v4351_v58, %v4353_v29 }
 0x1b2   : > { %v12680_v56 = vpop.f32.mrb[95].mxu1  ;;  %12876 = vmatmul.mubr.msk.bf16.gmra.mrb[200].mxu0 %vm576_vm2, %v4350_v13  ;;  %v5022_v13 = vshrl.u32 %v13463_v7, 16 }
 0x1b3   : > { %12879 = vmatprep.mubr.msk.bf16.mxu0 %vm13749_vm0, %v17197_v1 }
 0x1b4   : > { %12946 = vmatmul.mubr.msk.bf16.gmra.mrb[200].mxu1 %vm576_vm2, %v5002_v44 }
 0x1b5   : > { %v14800_v50 = vpop.f32.mrb[96].mxu0  ;;  %12949 = vmatprep.mubr.msk.bf16.mxu1 %vm13749_vm0, %v17197_v1 }
 0x1b6   : > { %v12613_v42 = vpop.f32.mrb[97].mxu0 }
 0x1b7   : > { %v14804_v63 = vpop.f32.mrb[96].mxu1  ;;  %v14806_v5 = vpop.f32.mrb[98].mxu0  ;;  %v5024_v42 = vrot.slane %v5022_v13, 3 }
 0x1b8   : > { %v12683_v15 = vpop.f32.mrb[97].mxu1  ;;  %v12614_v17 = vpop.f32.mrb[99].mxu0 }
 0x1b9   : > { %v14810_v22 = vpop.f32.mrb[98].mxu1  ;;  %v4355_v17 = vrot.slane %v13447_v47, 3 }
 0x1ba   : > { %v12684_v12 = vpop.f32.mrb[99].mxu1  ;;  %12880 = vmatmul.mubr.msk.bf16.gmra.mrb[204].mxu0 %vm576_vm2, %v4352_v6  ;;  %v5027_v6 = vrot.slane %v5025_v38, 4  ;;  %v13449_v38 = vld [vmem:[%s13882_s18 + $0x2f0] sm:$0xff]  }
 0x1bb   : > { %12883 = vmatprep.mubr.msk.bf16.mxu0 %vm13749_vm0, %v17197_v1  ;;  %v4356_v13 = vsel %vm4337_vm13, %v4353_v29, %v4355_v17 }
 0x1bc   : > { %12950 = vmatmul.mubr.msk.bf16.gmra.mrb[204].mxu1 %vm576_vm2, %v5011_v23  ;;  %v5028_v19 = vor.u32 %v5027_v6, %v5024_v42  ;;  %v5031_v23 = vshrl.u32 %v13465_v8, 16  ;;  %v13466_v42 = vld [vmem:[%s13882_s18 + $0x368] sm:$0xff]   ;;  %v4357_v8 = vrot.slane %v13449_v38, 3 }
 0x1bd   : > { %v14818_v14 = vpop.f32.mrb[100].mxu0  ;;  %12953 = vmatprep.mubr.msk.bf16.mxu1 %vm13749_vm0, %v17197_v1 }
 0x1be   : > { %v12617_v57 = vpop.f32.mrb[101].mxu0 }
 0x1bf   : > { %v14822_v41 = vpop.f32.mrb[100].mxu1  ;;  %v14824_v44 = vpop.f32.mrb[102].mxu0 }
 0x1c0   : > { %v12687_v62 = vpop.f32.mrb[101].mxu1  ;;  %v12618_v56 = vpop.f32.mrb[103].mxu0 }
 0x1c1   : > { %v14828_v51 = vpop.f32.mrb[102].mxu1  ;;  %v5029_v62 = vsel %vm4940_vm14, %v5019_v20, %v5028_v19  ;;  %v5033_v56 = vrot.slane %v5031_v23, 3  ;;  %v5043_v23 = vshll.u32 %v13466_v42, 16 }
 0x1c2   : > { %v12688_v15 = vpop.f32.mrb[103].mxu1  ;;  %12884 = vmatmul.mubr.msk.bf16.gmra.mrb[208].mxu0 %vm576_vm2, %v4354_v37 }
 0x1c3   : > { %12887 = vmatprep.mubr.msk.bf16.mxu0 %vm13749_vm0, %v17197_v1  ;;  %v5040_v15 = vshrl.u32 %v13466_v42, 16  ;;  %v5045_v48 = vrot.slane %v5043_v23, 4 }
 0x1c4   : > { %12954 = vmatmul.mubr.msk.bf16.gmra.mrb[208].mxu1 %vm576_vm2, %v5020_v60  ;;  %v5036_v60 = vrot.slane %v5034_v25, 4 }
 0x1c5   : > { %v14836_v58 = vpop.f32.mrb[104].mxu0  ;;  %12957 = vmatprep.mubr.msk.bf16.mxu1 %vm13749_vm0, %v17197_v1  ;;  %v5042_v2 = vrot.slane %v5040_v15, 3 }
 0x1c6   : > { %17209 = vst [vmem:[#allocation11_spill] sm:$0xff] %v14836_v58  ;;  %v12621_v27 = vpop.f32.mrb[105].mxu0  ;;  %v5037_v20 = vor.u32 %v5036_v60, %v5033_v56  ;;  %v13468_v56 = vld [vmem:[%s13882_s18 + $0x370] sm:$0xff]  }
 0x1c7   : > { %v14840_v7 = vpop.f32.mrb[104].mxu1  ;;  %v14842_v12 = vpop.f32.mrb[106].mxu0  ;;  %v5052_v15 = vshll.u32 %v13468_v56, 16 }
 0x1c8   : > { %17210 = vst [vmem:[#allocation12_spill] sm:$0xff] %v14840_v7  ;;  %17211 = vst [vmem:[#allocation13_spill] sm:$0xff] %v14842_v12  ;;  %v12691_v57 = vpop.f32.mrb[105].mxu1  ;;  %v12622_v37 = vpop.f32.mrb[107].mxu0  ;;  %v5038_v9 = vsel %vm4940_vm14, %v5028_v19, %v5037_v20  ;;  %v5049_v19 = vshrl.u32 %v13468_v56, 16  ;;  %v17221_v56 = vmov 0.0  }
 0x1c9   : > { %v14846_v47 = vpop.f32.mrb[106].mxu1  ;;  %v13450_v37 = vld [vmem:[%s13882_s18 + $0x2f8] sm:$0xff]  }
 0x1ca   : > { %17212 = vst [vmem:[#allocation14_spill] sm:$0xff] %v14846_v47  ;;  %v12692_v6 = vpop.f32.mrb[107].mxu1  ;;  %12888 = vmatmul.mubr.msk.bf16.gmra.mrb[212].mxu0 %vm576_vm2, %v4356_v13  ;;  %v4358_v13 = vsel %vm4337_vm13, %v4355_v17, %v4357_v8  ;;  %v4359_v42 = vrot.slane %v13450_v37, 3 }
 0x1cb   : > { %12891 = vmatprep.mubr.msk.bf16.mxu0 %vm13749_vm0, %v17197_v1 }
 0x1cc   : > { %12958 = vmatmul.mubr.msk.bf16.gmra.mrb[212].mxu1 %vm576_vm2, %v5029_v62 }
 0x1cd   : > { %v14854_v29 = vpop.f32.mrb[108].mxu0  ;;  %12961 = vmatprep.mubr.msk.bf16.mxu1 %vm13749_vm0, %v17197_v1 }
 0x1ce   : > { %17213 = vst [vmem:[#allocation15_spill] sm:$0xff] %v14854_v29  ;;  %v12625_v25 = vpop.f32.mrb[109].mxu0 }
 0x1cf   : > { %v14858_v27 = vpop.f32.mrb[108].mxu1  ;;  %v14860_v57 = vpop.f32.mrb[110].mxu0  ;;  %v5046_v25 = vor.u32 %v5045_v48, %v5042_v2  ;;  %v13469_v2 = vld [vmem:[%s13882_s18 + $0x378] sm:$0xff]  }
 0x1d0   : > { %17214 = vst [vmem:[#allocation16_spill] sm:$0xff] %v14858_v27  ;;  %17215 = vst [vmem:[#allocation17_spill] sm:$0xff] %v14860_v57  ;;  %v12695_v38 = vpop.f32.mrb[109].mxu1  ;;  %v12626_v6 = vpop.f32.mrb[111].mxu0  ;;  %v5051_v57 = vrot.slane %v5049_v19, 3  ;;  %v5061_v19 = vshll.u32 %v13469_v2, 16 }
 0x1d1   : > { %v14864_v62 = vpop.f32.mrb[110].mxu1 }
 0x1d2   : > { %17216 = vst [vmem:[#allocation18_spill] sm:$0xff] %v14864_v62  ;;  %v12696_v60 = vpop.f32.mrb[111].mxu1  ;;  %12892 = vmatmul.mubr.msk.bf16.gmra.mrb[216].mxu0 %vm576_vm2, %v4358_v13  ;;  %v4360_v13 = vsel %vm4337_vm13, %v4357_v8, %v4359_v42 }
 0x1d3   : > { %12895 = vmatprep.mubr.msk.bf16.mxu0 %vm13749_vm0, %v17197_v1  ;;  %v13452_v60 = vld [vmem:[%s13882_s18 + $0x300] sm:$0xff]  }
 0x1d4   : > { %12962 = vmatmul.mubr.msk.bf16.gmra.mrb[216].mxu1 %vm576_vm2, %v5038_v9 }
 0x1d5   : > { %v14872_v17 = vpop.f32.mrb[112].mxu0  ;;  %12965 = vmatprep.mubr.msk.bf16.mxu1 %vm13749_vm0, %v17197_v1  ;;  %v5054_v1 = vrot.slane %v5052_v15, 4 }
 0x1d6   : > { %17217 = vst [vmem:[#allocation19_spill] sm:$0xff] %v14872_v17  ;;  %v12629_v23 = vpop.f32.mrb[113].mxu0  ;;  %v5047_v17 = vsel %vm4940_vm14, %v5037_v20, %v5046_v25  ;;  %v5058_v20 = vshrl.u32 %v13469_v2, 16 }
 0x1d7   : > { %v14876_v38 = vpop.f32.mrb[112].mxu1  ;;  %v14878_v6 = vpop.f32.mrb[114].mxu0  ;;  %v4361_v23 = vrot.slane %v13452_v60, 3 }
 0x1d8   : > { %17218 = vst [vmem:[#allocation20_spill] sm:$0xff] %v14876_v38  ;;  %17219 = vst [vmem:[#allocation21_spill] sm:$0xff] %v14878_v6  ;;  %v12699_v37 = vpop.f32.mrb[113].mxu1  ;;  %v12630_v62 = vpop.f32.mrb[115].mxu0  ;;  %v5060_v34 = vrot.slane %v5058_v20, 3 }
 0x1d9   : > { %v14882_v9 = vpop.f32.mrb[114].mxu1  ;;  %v5055_v62 = vor.u32 %v5054_v1, %v5051_v57 }
 0x1da   : > { %17220 = vst [vmem:[#allocation22_spill] sm:$0xff] %v14882_v9  ;;  %v12700_v48 = vpop.f32.mrb[115].mxu1  ;;  %12896 = vmatmul.mubr.msk.bf16.gmra.mrb[220].mxu0 %vm576_vm2, %v4360_v13  ;;  %v4362_v13 = vsel %vm4337_vm13, %v4359_v42, %v4361_v23  ;;  %v13455_v9 = vld [vmem:[%s13882_s18 + $0x308] sm:$0xff]  }
 0x1db   : > { %12899 = vmatprep.mubr.msk.bf16.mxu0 %vm13749_vm0, %v17221_v56  ;;  %v4363_v1 = vrot.slane %v13455_v9, 3 }
 0x1dc   : > { %12966 = vmatmul.mubr.msk.bf16.gmra.mrb[220].mxu1 %vm576_vm2, %v5047_v17  ;;  %v5056_v17 = vsel %vm4940_vm14, %v5046_v25, %v5055_v62 }
 0x1dd   : > { %v14890_v8 = vpop.f32.mrb[116].mxu0  ;;  %12969 = vmatprep.mubr.msk.bf16.mxu1 %vm13749_vm0, %v17221_v56  ;;  %v4364_v9 = vsel %vm4337_vm13, %v4361_v23, %v4363_v1 }
 0x1de   : > { %17222 = vst [vmem:[#allocation23_spill] sm:$0xff] %v14890_v8  ;;  %v12633_v15 = vpop.f32.mrb[117].mxu0  ;;  %v5063_v8 = vrot.slane %v5061_v19, 4  ;;  %v14911_v19 = vld [vmem:[%s13882_s18 + $0x310] ss:$0 sps:$4 sm:$0xff]  }
 0x1df   : > { %v14894_v37 = vpop.f32.mrb[116].mxu1  ;;  %v2021_v48 = vpop.f32.mrb[118].mxu0 }
 0x1e0   : > { %17223 = vst [vmem:[#allocation24_spill] sm:$0xff] %v14894_v37  ;;  %v12703_v38 = vpop.f32.mrb[117].mxu1  ;;  %v12634_v6 = vpop.f32.mrb[119].mxu0  ;;  %v14906_v25 = vor.u32 %v5063_v8, %v5060_v34 }
 0x1e1   : > { %v2732_v60 = vpop.f32.mrb[118].mxu1 }
 0x1e2   : > { %v12704_v47 = vpop.f32.mrb[119].mxu1  ;;  %12900 = vmatmul.mubr.msk.bf16.gmra.mrb[224].mxu0 %vm576_vm2, %v4362_v13  ;;  %v5065_v8 = vsel %vm4940_vm14, %v5055_v62, %v14906_v25 }
 0x1e3   : > { %12903 = vmatprep.mubr.msk.bf16.mxu0 %vm13749_vm0, %v17221_v56 }
 0x1e4   : > { %v2142_v57 = vpop.permute.xlu0 %2141  ;;  %12970 = vmatmul.mubr.msk.bf16.gmra.mrb[224].mxu1 %vm576_vm2, %v5056_v17 }
 0x1e5   : > { %2229 = vst.msk [vmem:[#allocation2] sm:$0xf] %vm2228_vm15, %v2142_v57  ;;  %v3223_v42 = vpop.f32.mrb[120].mxu0  ;;  %12973 = vmatprep.mubr.msk.bf16.mxu1 %vm13749_vm0, %v17221_v56 }
 0x1e6   : > { %v3341_v47 = vmax.f32 %v3223_v42, 0.0  ;;  %v2144_v38 = vpop.permute.xlu1 %2143  ;;  %v12717_v6 = vpop.f32.mrb[121].mxu0 }
 0x1e7   : > { %v3873_v2 = vpop.f32.mrb[120].mxu1  ;;  %2230 = vst.msk [vmem:[#allocation2 + $0xc] sm:$0xf] %vm2228_vm15, %v2144_v38  ;;  %v3226_v20 = vpop.f32.mrb[122].mxu0 }
 0x1e8   : > { %v11624_v15 = vpack.c.bf16 %v3341_v47, %v3341_v47  ;;  %v3991_v48 = vmax.f32 %v3873_v2, 0.0  ;;  %v3342_v13 = vmax.f32 %v3226_v20, 0.0  ;;  %v12787_v60 = vpop.f32.mrb[121].mxu1  ;;  %v2853_v17 = vpop.permute.xlu0 %2852  ;;  %v4365_v47 = vrot.slane %v14911_v19, 3 }
 0x1e9   : > { %v3876_v57 = vpop.f32.mrb[122].mxu1  ;;  %2940 = vst.msk [vmem:[#allocation2] sm:$0xf] %vm2939_vm1, %v2853_v17  ;;  %v12718_v34 = vpop.f32.mrb[123].mxu0 }
 0x1ea   : > { %3487 = vst.msk [vmem:[#allocation2 + $0x4] sm:$0xf] %vm926_vm6, %v11624_v15  ;;  %v11653_v42 = vpack.c.bf16 %v3991_v48, %v3991_v48  ;;  %v11625_v38 = vpack.c.bf16 %v3342_v13, %v3342_v13  ;;  %v3992_v6 = vmax.f32 %v3876_v57, 0.0  ;;  %v12788_v23 = vpop.f32.mrb[123].mxu1  ;;  %v2855_v37 = vpop.permute.xlu1 %2854  ;;  %12904 = vmatmul.mubr.msk.bf16.gmra.mrb[228].mxu0 %vm576_vm2, %v4364_v9  ;;  %v4366_v13 = vsel %vm4337_vm13, %v4363_v1, %v4365_v47 }
 0x1eb   : > { %2941 = vst.msk [vmem:[#allocation2 + $0xc] sm:$0xf] %vm2939_vm1, %v2855_v37  ;;  %12907 = vmatprep.mubr.msk.bf16.mxu0 %vm13749_vm0, %v17221_v56 }
 0x1ec   : > { %3488 = vst.msk [vmem:[#allocation2 + $0x10] sm:$0xf] %vm926_vm6, %v11625_v38  ;;  %v11654_v2 = vpack.c.bf16 %v3992_v6, %v3992_v6  ;;  %4108 = vrot.lane.b32.xlu1 %v11653_v42, %s13750_s16  ;;  %v2146_v62 = vpop.permute.xlu0 %2145  ;;  %12974 = vmatmul.mubr.msk.bf16.gmra.mrb[228].mxu1 %vm576_vm2, %v5065_v8 }
 0x1ed   : > { %2231 = vst.msk [vmem:[#allocation2 + $0x18] sm:$0xf] %vm2228_vm15, %v2146_v62  ;;  %v3231_v20 = vpop.f32.mrb[124].mxu0  ;;  %12977 = vmatprep.mubr.msk.bf16.mxu1 %vm13749_vm0, %v17221_v56 }
 0x1ee   : > { %v3343_v37 = vmax.f32 %v3231_v20, 0.0  ;;  %v2148_v9 = vpop.permute.xlu1 %2147  ;;  %v12721_v15 = vpop.f32.mrb[125].mxu0 }
 0x1ef   : > { %v3881_v48 = vpop.f32.mrb[124].mxu1  ;;  %2232 = vst.msk [vmem:[#allocation2 + $0x24] sm:$0xf] %vm2228_vm15, %v2148_v9  ;;  %v3234_v19 = vpop.f32.mrb[126].mxu0 }
 0x1f0   : > { %v11626_v60 = vpack.c.bf16 %v3343_v37, %v3343_v37  ;;  %v3993_v17 = vmax.f32 %v3881_v48, 0.0  ;;  %4110 = vrot.lane.b32.xlu1 %v11654_v2, %s13750_s16  ;;  %v3344_v57 = vmax.f32 %v3234_v19, 0.0  ;;  %v12791_v34 = vpop.f32.mrb[125].mxu1  ;;  %v2857_v8 = vpop.permute.xlu0 %2856 }
 0x1f1   : > { %v3884_v42 = vpop.f32.mrb[126].mxu1  ;;  %2942 = vst.msk [vmem:[#allocation2 + $0x18] sm:$0xf] %vm2939_vm1, %v2857_v8  ;;  %v12722_v38 = vpop.f32.mrb[127].mxu0 }
 0x1f2   : > { %3489 = vst.msk [vmem:[#allocation2 + $0x1c] sm:$0xf] %vm926_vm6, %v11626_v60  ;;  %v11655_v6 = vpack.c.bf16 %v3993_v17, %v3993_v17  ;;  %v11627_v23 = vpack.c.bf16 %v3344_v57, %v3344_v57  ;;  %v3994_v62 = vmax.f32 %v3884_v42, 0.0  ;;  %v12792_v20 = vpop.f32.mrb[127].mxu1  ;;  %v2859_v9 = vpop.permute.xlu1 %2858  ;;  %12908 = vmatmul.mubr.msk.bf16.gmra.mrb[232].mxu0 %vm576_vm2, %v4366_v13 }
 0x1f3   : > { %2943 = vst.msk [vmem:[#allocation2 + $0x24] sm:$0xf] %vm2939_vm1, %v2859_v9  ;;  %12911 = vmatprep.mubr.msk.bf16.mxu0 %vm13749_vm0, %v17221_v56 }
 0x1f4   : > { %3490 = vst.msk [vmem:[#allocation2 + $0x28] sm:$0xf] %vm926_vm6, %v11627_v23  ;;  %v11656_v1 = vpack.c.bf16 %v3994_v62, %v3994_v62  ;;  %v2150_v2 = vpop.permute.xlu0 %2149  ;;  %4112 = vrot.lane.b32.xlu0 %v11655_v6, %s13750_s16 }
 0x1f5   : > { %2233 = vst.msk [vmem:[#allocation2 + $0x30] sm:$0xf] %vm2228_vm15, %v2150_v2  ;;  %v3239_v37 = vpop.f32.mrb[128].mxu0 }
 0x1f6   : > { %v3345_v15 = vmax.f32 %v3239_v37, 0.0  ;;  %4114 = vrot.lane.b32.xlu1 %v11656_v1, %s13750_s16  ;;  %v12725_v48 = vpop.f32.mrb[129].mxu0 }
 0x1f7   : > { %v3889_v19 = vpop.f32.mrb[128].mxu1  ;;  %v3242_v13 = vpop.f32.mrb[130].mxu0 }
 0x1f8   : > { %v11628_v60 = vpack.c.bf16 %v3345_v15, %v3345_v15  ;;  %v3995_v17 = vmax.f32 %v3889_v19, 0.0  ;;  %v3346_v57 = vmax.f32 %v3242_v13, 0.0  ;;  %v12795_v34 = vpop.f32.mrb[129].mxu1  ;;  %v2861_v8 = vpop.permute.xlu0 %2860  ;;  %v13475_v15 = vld [vmem:[%s13882_s18 + $0x380] ss:$0 sps:$4 sm:$0xff]   ;;  %v13459_v13 = vld [vmem:[%s13882_s18 + $0x384] sm:$0xff]  }
 0x1f9   : > { %v3892_v42 = vpop.f32.mrb[130].mxu1  ;;  %2944 = vst.msk [vmem:[#allocation2 + $0x30] sm:$0xf] %vm2939_vm1, %v2861_v8  ;;  %v12726_v38 = vpop.f32.mrb[131].mxu0  ;;  %v5070_v34 = vshll.u32 %v13475_v15, 16 }
 0x1fa   : > { %3491 = vst.msk [vmem:[#allocation2 + $0x34] sm:$0xf] %vm926_vm6, %v11628_v60  ;;  %v11657_v6 = vpack.c.bf16 %v3995_v17, %v3995_v17  ;;  %v11629_v23 = vpack.c.bf16 %v3346_v57, %v3346_v57  ;;  %v3996_v62 = vmax.f32 %v3892_v42, 0.0  ;;  %v12796_v20 = vpop.f32.mrb[131].mxu1  ;;  %12912 = vmatmul.mubr.msk.bf16.gmra.mrb[236].mxu0 %vm576_vm2, %v4365_v47  ;;  %v13473_v47 = vld [vmem:[%s17186_s3 + $0x40] sm:$0xff]   ;;  %v5067_v57 = vshrl.u32 %v13475_v15, 16 }
 0x1fb   : > { %12995 = vmatprep.mubr.msk.bf16.mxu0 %vm13749_vm0, %v17221_v56  ;;  %11985 = vmatprep.subr.bf16.mxu1 %v13473_v47 }
 0x1fc   : > { %3492 = vst.msk [vmem:[#allocation2 + $0x40] sm:$0xf] %vm926_vm6, %v11629_v23  ;;  %v11658_v9 = vpack.c.bf16 %v3996_v62, %v3996_v62  ;;  %4116 = vrot.lane.b32.xlu1 %v11657_v6, %s13750_s16  ;;  %v2152_v1 = vpop.permute.xlu0 %2151 }
 0x1fd   : > { %2234 = vst.msk [vmem:[#allocation2 + $0x3c] sm:$0xf] %vm2228_vm15, %v2152_v1  ;;  %v2154_v2 = vpop.permute.xlu1 %2153  ;;  %v3247_v37 = vpop.f32.mrb[132].mxu0  ;;  %v13474_v1 = vld [vmem:[%s17186_s3] sm:$0xff]  }
 0x1fe   : > { %2235 = vst.msk [vmem:[#allocation2 + $0x48] sm:$0xf] %vm2228_vm15, %v2154_v2  ;;  %v3347_v48 = vmax.f32 %v3247_v37, 0.0  ;;  %v12729_v19 = vpop.f32.mrb[133].mxu0  ;;  %v5069_v2 = vrot.slane %v5067_v57, 3  ;;  %v5072_v37 = vrot.slane %v5070_v34, 4  ;;  %11986 = vmatpush3.bf16.msra.mxu1 %v13474_v1 }
 0x1ff   : > { %v3897_v60 = vpop.f32.mrb[132].mxu1  ;;  %v3250_v17 = vpop.f32.mrb[134].mxu0 }
 0x200   : > { %v11630_v8 = vpack.c.bf16 %v3347_v48, %v3347_v48  ;;  %v3997_v42 = vmax.f32 %v3897_v60, 0.0  ;;  %4118 = vrot.lane.b32.xlu1 %v11658_v9, %s13750_s16  ;;  %v3348_v38 = vmax.f32 %v3250_v17, 0.0  ;;  %v12799_v6 = vpop.f32.mrb[133].mxu1  ;;  %v2863_v23 = vpop.permute.xlu0 %2862  ;;  %v5073_v47 = vor.u32 %v5072_v37, %v5069_v2 }
 0x201   : > { %v3900_v62 = vpop.f32.mrb[134].mxu1  ;;  %2945 = vst.msk [vmem:[#allocation2 + $0x3c] sm:$0xf] %vm2939_vm1, %v2863_v23  ;;  %v2865_v20 = vpop.permute.xlu1 %2864  ;;  %v13460_v6 = vld [vmem:[%s13882_s18 + $0x38c] sm:$0xff]  }
 0x202   : > { %3493 = vst.msk [vmem:[#allocation2 + $0x4c] sm:$0xf] %vm926_vm6, %v11630_v8  ;;  %v11659_v15 = vpack.c.bf16 %v3997_v42, %v3997_v42  ;;  %v11631_v48 = vpack.c.bf16 %v3348_v38, %v3348_v38  ;;  %v3998_v19 = vmax.f32 %v3900_v62, 0.0  ;;  %v12730_v9 = vpop.f32.mrb[135].mxu0  ;;  %v12800_v60 = vpop.f32.mrb[135].mxu1  ;;  %12996 = vmatmul.mubr.msk.bf16.vlgmr.msra.gmra.mrb[240].mxu0 %vm576_vm2, %v13459_v13  ;;  %v5074_v42 = vsel %vm4940_vm14, %v14906_v25, %v5073_v47 }
 0x203   : > { %2946 = vst.msk [vmem:[#allocation2 + $0x48] sm:$0xf] %vm2939_vm1, %v2865_v20  ;;  %12999 = vmatprep.mubr.msk.bf16.mxu0 %vm13749_vm0, %v17221_v56  ;;  %12978 = vmatmul.mubr.msk.bf16.gmra.mrb[232].mxu1 %vm576_vm2, %v5074_v42 }
 0x204   : > { %3494 = vst.msk [vmem:[#allocation2 + $0x58] sm:$0xf] %vm926_vm6, %v11631_v48  ;;  %v11660_v17 = vpack.c.bf16 %v3998_v19, %v3998_v19  ;;  %v2156_v57 = vpop.permute.xlu0 %2155  ;;  %4120 = vrot.lane.b32.xlu0 %v11659_v15, %s13750_s16  ;;  %12981 = vmatprep.mubr.msk.bf16.mxu1 %vm13749_vm0, %v17221_v56 }
 0x205   : > { %2236 = vst.msk [vmem:[#allocation2 + $0x54] sm:$0xf] %vm2228_vm15, %v2156_v57  ;;  %v2158_v34 = vpop.permute.xlu1 %2157  ;;  %v3255_v8 = vpop.f32.mrb[136].mxu0 }
 0x206   : > { %2237 = vst.msk [vmem:[#allocation2 + $0x60] sm:$0xf] %vm2228_vm15, %v2158_v34  ;;  %v3349_v13 = vmax.f32 %v3255_v8, 0.0  ;;  %4122 = vrot.lane.b32.xlu1 %v11660_v17, %s13750_s16  ;;  %v12733_v38 = vpop.f32.mrb[137].mxu0 }
 0x207   : > { %v3905_v23 = vpop.f32.mrb[136].mxu1  ;;  %v3258_v62 = vpop.f32.mrb[138].mxu0 }
 0x208   : > { %v11632_v20 = vpack.c.bf16 %v3349_v13, %v3349_v13  ;;  %v3999_v1 = vmax.f32 %v3905_v23, 0.0  ;;  %v3350_v37 = vmax.f32 %v3258_v62, 0.0  ;;  %v12803_v15 = vpop.f32.mrb[137].mxu1  ;;  %v2867_v48 = vpop.permute.xlu0 %2866  ;;  %v13462_v23 = vld [vmem:[%s13882_s18 + $0x394] sm:$0xff]   ;;  %v13479_v62 = vld [vmem:[%s17186_s3 + $0x8] sm:$0xff]  }
 0x209   : > { %v3908_v25 = vpop.f32.mrb[138].mxu1  ;;  %2947 = vst.msk [vmem:[#allocation2 + $0x54] sm:$0xf] %vm2939_vm1, %v2867_v48  ;;  %v2869_v19 = vpop.permute.xlu1 %2868 }
 0x20a   : > { %3495 = vst.msk [vmem:[#allocation2 + $0x64] sm:$0xf] %vm926_vm6, %v11632_v20  ;;  %v11661_v9 = vpack.c.bf16 %v3999_v1, %v3999_v1  ;;  %v11633_v60 = vpack.c.bf16 %v3350_v37, %v3350_v37  ;;  %v4000_v47 = vmax.f32 %v3908_v25, 0.0  ;;  %v12734_v17 = vpop.f32.mrb[139].mxu0  ;;  %v12804_v57 = vpop.f32.mrb[139].mxu1  ;;  %13000 = vmatmul.mubr.msk.bf16.gmra.mrb[244].mxu0 %vm576_vm2, %v13460_v6  ;;  %v13478_v6 = vld [vmem:[%s17186_s3 + $0x48] sm:$0xff]  }
 0x20b   : > { %2948 = vst.msk [vmem:[#allocation2 + $0x60] sm:$0xf] %vm2939_vm1, %v2869_v19  ;;  %13003 = vmatprep.mubr.msk.bf16.mxu0 %vm13749_vm0, %v17221_v56  ;;  %12982 = vmatmul.mubr.msk.bf16.gmra.mrb[236].mxu1 %vm576_vm2, %v5069_v2 }
 0x20c   : > { %3496 = vst.msk [vmem:[#allocation2 + $0x70] sm:$0xf] %vm926_vm6, %v11633_v60  ;;  %v11662_v34 = vpack.c.bf16 %v4000_v47, %v4000_v47  ;;  %v2160_v8 = vpop.permute.xlu0 %2159  ;;  %4124 = vrot.lane.b32.xlu0 %v11661_v9, %s13750_s16  ;;  %11987 = vmatprep.subr.bf16.mxu1 %v13478_v6 }
 0x20d   : > { %2238 = vst.msk [vmem:[#allocation2 + $0x6c] sm:$0xf] %vm2228_vm15, %v2160_v8  ;;  %v3263_v42 = vpop.f32.mrb[140].mxu0  ;;  %11988 = vmatpush3.bf16.msra.mxu1 %v13479_v62 }
 0x20e   : > { %v3351_v13 = vmax.f32 %v3263_v42, 0.0  ;;  %4126 = vrot.lane.b32.xlu1 %v11662_v34, %s13750_s16  ;;  %v12737_v38 = vpop.f32.mrb[141].mxu0  ;;  %v13464_v42 = vld [vmem:[%s13882_s18 + $0x39c] sm:$0xff]  }
 0x20f   : > { %v3913_v20 = vpop.f32.mrb[140].mxu1  ;;  %v3266_v1 = vpop.f32.mrb[142].mxu0 }
 0x210   : > { %v11634_v37 = vpack.c.bf16 %v3351_v13, %v3351_v13  ;;  %v4001_v15 = vmax.f32 %v3913_v20, 0.0  ;;  %v3352_v48 = vmax.f32 %v3266_v1, 0.0  ;;  %v12807_v25 = vpop.f32.mrb[141].mxu1  ;;  %v2871_v19 = vpop.permute.xlu0 %2870 }
 0x211   : > { %v14994_v9 = vpop.f32.mrb[142].mxu1  ;;  %2949 = vst.msk [vmem:[#allocation2 + $0x6c] sm:$0xf] %vm2939_vm1, %v2871_v19  ;;  %v12738_v60 = vpop.f32.mrb[143].mxu0 }
 0x212   : > { %3497 = vst.msk [vmem:[#allocation2 + $0x7c] sm:$0xf] %vm926_vm6, %v11634_v37  ;;  %v11663_v2 = vpack.c.bf16 %v4001_v15, %v4001_v15  ;;  %v11635_v47 = vpack.c.bf16 %v3352_v48, %v3352_v48  ;;  %v12808_v17 = vpop.f32.mrb[143].mxu1  ;;  %13004 = vmatmul.mubr.msk.bf16.gmra.mrb[248].mxu0 %vm576_vm2, %v13462_v23  ;;  %v13480_v48 = vld [vmem:[%s17186_s3 + $0x50] sm:$0xff]  }
 0x213   : > { %13007 = vmatprep.mubr.msk.bf16.mxu0 %vm13749_vm0, %v17221_v56  ;;  %11989 = vmatprep.subr.bf16.mxu1 %v13480_v48  ;;  %v13470_v48 = vld [vmem:[%s13882_s18 + $0x3ac] sm:$0xff]  }
 0x214   : > { %3498 = vst.msk [vmem:[#allocation2 + $0x88] sm:$0xf] %vm926_vm6, %v11635_v47  ;;  %4128 = vrot.lane.b32.xlu1 %v11663_v2, %s13750_s16  ;;  %v13467_v2 = vld [vmem:[%s13882_s18 + $0x3a4] sm:$0xff]   ;;  %v13481_v47 = vld [vmem:[%s17186_s3 + $0x10] sm:$0xff]  }
 0x215   : > { %v3271_v57 = vpop.f32.mrb[144].mxu0  ;;  %11990 = vmatpush3.bf16.msra.mxu1 %v13481_v47 }
 0x216   : > { %v3353_v34 = vmax.f32 %v3271_v57, 0.0  ;;  %v12741_v8 = vpop.f32.mrb[145].mxu0 }
 0x217   : > { %v15004_v13 = vpop.f32.mrb[144].mxu1  ;;  %v3274_v38 = vpop.f32.mrb[146].mxu0 }
 0x218   : > { %v11636_v6 = vpack.c.bf16 %v3353_v34, %v3353_v34  ;;  %v3354_v62 = vmax.f32 %v3274_v38, 0.0  ;;  %v12811_v20 = vpop.f32.mrb[145].mxu1  ;;  %v12742_v1 = vpop.f32.mrb[147].mxu0 }
 0x219   : > { %v15006_v23 = vpop.f32.mrb[146].mxu1 }
 0x21a   : > { %3499 = vst.msk [vmem:[#allocation2 + $0x94] sm:$0xf] %vm926_vm6, %v11636_v6  ;;  %v11637_v37 = vpack.c.bf16 %v3354_v62, %v3354_v62  ;;  %v12812_v15 = vpop.f32.mrb[147].mxu1  ;;  %13008 = vmatmul.mubr.msk.bf16.gmra.mrb[252].mxu0 %vm576_vm2, %v13464_v42 }
 0x21b   : > { %13011 = vmatprep.mubr.msk.bf16.mxu0 %vm13749_vm0, %v17221_v56 }
 0x21c   : > { %3500 = vst.msk [vmem:[#allocation2 + $0xa0] sm:$0xf] %vm926_vm6, %v11637_v37 }
 0x21d   : > { %v3279_v25 = vpop.f32.mrb[148].mxu0 }
 0x21e   : > { %v3355_v19 = vmax.f32 %v3279_v25, 0.0  ;;  %v12745_v60 = vpop.f32.mrb[149].mxu0 }
 0x21f   : > { %v15020_v17 = vpop.f32.mrb[148].mxu1  ;;  %v3282_v57 = vpop.f32.mrb[150].mxu0 }
 0x220   : > { %v11638_v34 = vpack.c.bf16 %v3355_v19, %v3355_v19  ;;  %v3356_v8 = vmax.f32 %v3282_v57, 0.0  ;;  %v12815_v42 = vpop.f32.mrb[149].mxu1  ;;  %v12746_v38 = vpop.f32.mrb[151].mxu0 }
 0x221   : > { %v15022_v6 = vpop.f32.mrb[150].mxu1  ;;  %v13483_v38 = vld [vmem:[%s17186_s3 + $0x58] sm:$0xff]  }
 0x222   : > { %3501 = vst.msk [vmem:[#allocation2 + $0xac] sm:$0xf] %vm926_vm6, %v11638_v34  ;;  %v11639_v62 = vpack.c.bf16 %v3356_v8, %v3356_v8  ;;  %v12816_v20 = vpop.f32.mrb[151].mxu1  ;;  %13012 = vmatmul.mubr.msk.bf16.gmra.mrb[0].mxu0 %vm576_vm2, %v13467_v2  ;;  %11991 = vmatprep.subr.bf16.mxu1 %v13483_v38 }
 0x223   : > { %13015 = vmatprep.mubr.msk.bf16.mxu0 %vm13749_vm0, %v17221_v56 }
 0x224   : > { %3502 = vst.msk [vmem:[#allocation2 + $0xb8] sm:$0xf] %vm926_vm6, %v11639_v62  ;;  %v13484_v62 = vld [vmem:[%s17186_s3 + $0x18] sm:$0xff]  }
 0x225   : > { %v3287_v1 = vpop.f32.mrb[152].mxu0  ;;  %11992 = vmatpush3.bf16.msra.mxu1 %v13484_v62 }
 0x226   : > { %v3357_v37 = vmax.f32 %v3287_v1, 0.0  ;;  %v12749_v15 = vpop.f32.mrb[153].mxu0 }
 0x227   : > { %v15030_v25 = vpop.f32.mrb[152].mxu1  ;;  %v3290_v19 = vpop.f32.mrb[154].mxu0  ;;  %v13471_v15 = vld [vmem:[%s13882_s18 + $0x3b4] sm:$0xff]  }
 0x228   : > { %v11640_v60 = vpack.c.bf16 %v3357_v37, %v3357_v37  ;;  %v3358_v47 = vmax.f32 %v3290_v19, 0.0  ;;  %v12819_v57 = vpop.f32.mrb[153].mxu1  ;;  %v12750_v34 = vpop.f32.mrb[155].mxu0 }
 0x229   : > { %v15032_v8 = vpop.f32.mrb[154].mxu1 }
 0x22a   : > { %3503 = vst.msk [vmem:[#allocation2 + $0xc4] sm:$0xf] %vm926_vm6, %v11640_v60  ;;  %v11641_v2 = vpack.c.bf16 %v3358_v47, %v3358_v47  ;;  %v12820_v42 = vpop.f32.mrb[155].mxu1  ;;  %13016 = vmatmul.mubr.msk.bf16.gmra.mrb[4].mxu0 %vm576_vm2, %v13470_v48 }
 0x22b   : > { %13019 = vmatprep.mubr.msk.bf16.mxu0 %vm13749_vm0, %v17221_v56 }
 0x22c   : > { %3504 = vst.msk [vmem:[#allocation2 + $0xd0] sm:$0xf] %vm926_vm6, %v11641_v2 }
 0x22d   : > { %v3295_v20 = vpop.f32.mrb[156].mxu0 }
 0x22e   : > { %v3359_v1 = vmax.f32 %v3295_v20, 0.0  ;;  %v12753_v37 = vpop.f32.mrb[157].mxu0 }
 0x22f   : > { %v15046_v19 = vpop.f32.mrb[156].mxu1  ;;  %v3298_v48 = vpop.f32.mrb[158].mxu0 }
 0x230   : > { %v11642_v60 = vpack.c.bf16 %v3359_v1, %v3359_v1  ;;  %v3360_v47 = vmax.f32 %v3298_v48, 0.0  ;;  %v12823_v57 = vpop.f32.mrb[157].mxu1  ;;  %v12754_v34 = vpop.f32.mrb[159].mxu0  ;;  %v13472_v1 = vld [vmem:[%s13882_s18 + $0x3bc] sm:$0xff]  }
 0x231   : > { %v15048_v2 = vpop.f32.mrb[158].mxu1 }
 0x232   : > { %3505 = vst.msk [vmem:[#allocation2 + $0xdc] sm:$0xf] %vm926_vm6, %v11642_v60  ;;  %v11643_v42 = vpack.c.bf16 %v3360_v47, %v3360_v47  ;;  %v12824_v27 = vpop.f32.mrb[159].mxu1  ;;  %13020 = vmatmul.mubr.msk.bf16.gmra.mrb[8].mxu0 %vm576_vm2, %v13471_v15 }
 0x233   : > { %13023 = vmatprep.mubr.msk.bf16.mxu0 %vm13749_vm0, %v17221_v56 }
 0x234   : > { %3506 = vst.msk [vmem:[#allocation2 + $0xe8] sm:$0xf] %vm926_vm6, %v11643_v42  ;;  %v13487_v42 = vld [vmem:[%s17186_s3 + $0x60] sm:$0xff]  }
 0x235   : > { %v3303_v38 = vpop.f32.mrb[160].mxu0  ;;  %11993 = vmatprep.subr.bf16.mxu1 %v13487_v42 }
 0x236   : > { %v3361_v20 = vmax.f32 %v3303_v38, 0.0  ;;  %v12757_v62 = vpop.f32.mrb[161].mxu0  ;;  %v13488_v38 = vld [vmem:[%s17186_s3 + $0x20] sm:$0xff]  }
 0x237   : > { %v15056_v37 = vpop.f32.mrb[160].mxu1  ;;  %v3306_v48 = vpop.f32.mrb[162].mxu0  ;;  %11994 = vmatpush3.bf16.msra.mxu1 %v13488_v38 }
 0x238   : > { %v11644_v57 = vpack.c.bf16 %v3361_v20, %v3361_v20  ;;  %v3362_v34 = vmax.f32 %v3306_v48, 0.0  ;;  %v12827_v60 = vpop.f32.mrb[161].mxu1  ;;  %v12758_v47 = vpop.f32.mrb[163].mxu0 }
 0x239   : > { %v15058_v27 = vpop.f32.mrb[162].mxu1 }
 0x23a   : > { %3507 = vst.msk [vmem:[#allocation2 + $0xf4] sm:$0xf] %vm926_vm6, %v11644_v57  ;;  %v11645_v15 = vpack.c.bf16 %v3362_v34, %v3362_v34  ;;  %v12828_v12 = vpop.f32.mrb[163].mxu1  ;;  %13024 = vmatmul.mubr.msk.bf16.gmra.mrb[12].mxu0 %vm576_vm2, %v13472_v1 }
 0x23b   : > { %13027 = vmatprep.mubr.msk.bf16.mxu0 %vm13749_vm0, %v17221_v56  ;;  %v13476_v12 = vld [vmem:[%s13882_s18 + $0x3c4] sm:$0xff]  }
 0x23c   : > { %3508 = vst.msk [vmem:[#allocation2 + $0x100] sm:$0xf] %vm926_vm6, %v11645_v15 }
 0x23d   : > { %v3311_v20 = vpop.f32.mrb[164].mxu0 }
 0x23e   : > { %v3363_v62 = vmax.f32 %v3311_v20, 0.0  ;;  %v12761_v48 = vpop.f32.mrb[165].mxu0 }
 0x23f   : > { %v15072_v1 = vpop.f32.mrb[164].mxu1  ;;  %v3314_v57 = vpop.f32.mrb[166].mxu0 }
 0x240   : > { %17224 = vst [vmem:[#allocation25_spill] sm:$0xff] %v15072_v1  ;;  %v11646_v34 = vpack.c.bf16 %v3363_v62, %v3363_v62  ;;  %v3364_v60 = vmax.f32 %v3314_v57, 0.0  ;;  %v12831_v47 = vpop.f32.mrb[165].mxu1  ;;  %v12762_v7 = vpop.f32.mrb[167].mxu0  ;;  %v13477_v62 = vld [vmem:[%s13882_s18 + $0x3cc] sm:$0xff]  }
 0x241   : > { %v15074_v29 = vpop.f32.mrb[166].mxu1 }
 0x242   : > { %17225 = vst [vmem:[#allocation26_spill] sm:$0xff] %v15074_v29  ;;  %3509 = vst.msk [vmem:[#allocation2 + $0x10c] sm:$0xf] %vm926_vm6, %v11646_v34  ;;  %v11647_v15 = vpack.c.bf16 %v3364_v60, %v3364_v60  ;;  %v12832_v42 = vpop.f32.mrb[167].mxu1  ;;  %13028 = vmatmul.mubr.msk.bf16.gmra.mrb[16].mxu0 %vm576_vm2, %v13476_v12 }
 0x243   : > { %13031 = vmatprep.mubr.msk.bf16.mxu0 %vm13749_vm0, %v17221_v56 }
 0x244   : > { %3510 = vst.msk [vmem:[#allocation2 + $0x118] sm:$0xf] %vm926_vm6, %v11647_v15  ;;  %v13489_v15 = vld [vmem:[%s17186_s3 + $0x68] sm:$0xff]  }
 0x245   : > { %v3319_v38 = vpop.f32.mrb[168].mxu0  ;;  %11995 = vmatprep.subr.bf16.mxu1 %v13489_v15 }
 0x246   : > { %v3365_v20 = vmax.f32 %v3319_v38, 0.0  ;;  %v12765_v48 = vpop.f32.mrb[169].mxu0  ;;  %v13490_v38 = vld [vmem:[%s17186_s3 + $0x28] sm:$0xff]  }
 0x247   : > { %v15082_v57 = vpop.f32.mrb[168].mxu1  ;;  %v3322_v7 = vpop.f32.mrb[170].mxu0  ;;  %11996 = vmatpush3.bf16.msra.mxu1 %v13490_v38  ;;  %v13482_v48 = vld [vmem:[%s13882_s18 + $0x3d4] sm:$0xff]  }
 0x248   : > { %17226 = vst [vmem:[#allocation27_spill] sm:$0xff] %v15082_v57  ;;  %v11648_v47 = vpack.c.bf16 %v3365_v20, %v3365_v20  ;;  %v3366_v58 = vmax.f32 %v3322_v7, 0.0  ;;  %v12835_v29 = vpop.f32.mrb[169].mxu1  ;;  %v12766_v34 = vpop.f32.mrb[171].mxu0 }
 0x249   : > { %v15084_v60 = vpop.f32.mrb[170].mxu1 }
 0x24a   : > { %17227 = vst [vmem:[#allocation28_spill] sm:$0xff] %v15084_v60  ;;  %3511 = vst.msk [vmem:[#allocation2 + $0x124] sm:$0xf] %vm926_vm6, %v11648_v47  ;;  %v11649_v12 = vpack.c.bf16 %v3366_v58, %v3366_v58  ;;  %v12836_v42 = vpop.f32.mrb[171].mxu1  ;;  %13032 = vmatmul.mubr.msk.bf16.gmra.mrb[20].mxu0 %vm576_vm2, %v13477_v62 }
 0x24b   : > { %13035 = vmatprep.mubr.msk.bf16.mxu0 %vm13749_vm0, %v17221_v56 }
 0x24c   : > { %3512 = vst.msk [vmem:[#allocation2 + $0x130] sm:$0xf] %vm926_vm6, %v11649_v12 }
 0x24d   : > { %v3327_v29 = vpop.f32.mrb[172].mxu0 }
 0x24e   : > { %v3367_v58 = vmax.f32 %v3327_v29, 0.0  ;;  %v12769_v20 = vpop.f32.mrb[173].mxu0 }
 0x24f   : > { %v15098_v62 = vpop.f32.mrb[172].mxu1  ;;  %v3330_v7 = vpop.f32.mrb[174].mxu0  ;;  %v3515_v20 = vld [vmem:[#allocation2 + $0x154] sm:$0x1] }
 0x250   : > { %17228 = vst [vmem:[#allocation29_spill] sm:$0xff] %v15098_v62  ;;  %v11650_v47 = vpack.c.bf16 %v3367_v58, %v3367_v58  ;;  %v3368_v34 = vmax.f32 %v3330_v7, 0.0  ;;  %v12839_v42 = vpop.f32.mrb[173].mxu1  ;;  %v12770_v60 = vpop.f32.mrb[175].mxu0  ;;  %v13485_v58 = vld [vmem:[%s13882_s18 + $0x3dc] sm:$0xff]  }
 0x251   : > { %v15100_v57 = vpop.f32.mrb[174].mxu1 }
 0x252   : > { %17229 = vst [vmem:[#allocation30_spill] sm:$0xff] %v15100_v57  ;;  %3513 = vst.msk [vmem:[#allocation2 + $0x13c] sm:$0xf] %vm926_vm6, %v11650_v47  ;;  %v11651_v1 = vpack.c.bf16 %v3368_v34, %v3368_v34  ;;  %v12840_v12 = vpop.f32.mrb[175].mxu1  ;;  %13036 = vmatmul.mubr.msk.bf16.gmra.mrb[24].mxu0 %vm576_vm2, %v13482_v48  ;;  %v13491_v48 = vld [vmem:[%s17186_s3 + $0x70] sm:$0xff]  }
 0x253   : > { %13039 = vmatprep.mubr.msk.bf16.mxu0 %vm13749_vm0, %v17221_v56  ;;  %11997 = vmatprep.subr.bf16.mxu1 %v13491_v48 }
 0x254   : > { %3514 = vst.msk [vmem:[#allocation2 + $0x148] sm:$0xf] %vm926_vm6, %v11651_v1 }
 0x255   : > { %v3335_v15 = vpop.f32.mrb[176].mxu0 }
 0x256   : > { %v3369_v38 = vmax.f32 %v3335_v15, 0.0  ;;  %v12773_v29 = vpop.f32.mrb[177].mxu0 }
 0x257   : > { %v15108_v7 = vpop.f32.mrb[176].mxu1  ;;  %v3338_v60 = vpop.f32.mrb[178].mxu0 }
 0x258   : > { %17230 = vst [vmem:[#allocation31_spill] sm:$0xff] %v15108_v7  ;;  %v11652_v42 = vpack.c.bf16 %v3369_v38, %v3369_v38  ;;  %v12843_v57 = vpop.f32.mrb[177].mxu1  ;;  %v12774_v47 = vpop.f32.mrb[179].mxu0  ;;  %v13494_v7 = vld [vmem:[%s17186_s3 + $0x78] sm:$0xff]  }
 0x259   : > { %v3988_v34 = vpop.f32.mrb[178].mxu1  ;;  %v13492_v57 = vld [vmem:[%s17186_s3 + $0x30] sm:$0xff]   ;;  %v13486_v47 = vld [vmem:[%s13882_s18 + $0x3e4] sm:$0xff]  }
 0x25a   : > { %v3516_v1 = vsel %vm14580_vm11, %v11652_v42, %v3515_v20  ;;  %v12844_v12 = vpop.f32.mrb[179].mxu1  ;;  %13040 = vmatmul.mubr.msk.bf16.gmra.mrb[28].mxu0 %vm576_vm2, %v13485_v58  ;;  %11998 = vmatpush3.bf16.msra.mxu1 %v13492_v57 }
 0x25b   : > { %3517 = vst [vmem:[#allocation2 + $0x154] sm:$0x1] %v3516_v1  ;;  %13043 = vmatprep.mubr.msk.bf16.mxu0 %vm13749_vm0, %v17221_v56  ;;  %11999 = vmatprep.subr.bf16.mxu1 %v13494_v7 }
 0x25d   : > { %v4476_v15 = vpop.f32.mrb[180].mxu0 }
 0x25e   : > { %v4109_v38 = vpop.permute.xlu1 %4108  ;;  %v4594_v29 = vmax.f32 %v4476_v15, 0.0  ;;  %v12857_v60 = vpop.f32.mrb[181].mxu0 }
 0x25f   : > { %4195 = vst.msk [vmem:[#allocation2 + $0x4] sm:$0xf] %vm1622_vm12, %v4109_v38  ;;  %v5184_v20 = vpop.f32.mrb[180].mxu1  ;;  %v4479_v42 = vpop.f32.mrb[182].mxu0  ;;  %v13495_v38 = vld [vmem:[%s17186_s3 + $0x38] sm:$0xff]  }
 0x260   : > { %v11682_v58 = vpack.c.bf16 %v4594_v29, %v4594_v29  ;;  %v5302_v34 = vmax.f32 %v5184_v20, 0.0  ;;  %v4595_v1 = vmax.f32 %v4479_v42, 0.0  ;;  %v12927_v12 = vpop.f32.mrb[181].mxu1  ;;  %v12858_v33 = vpop.f32.mrb[183].mxu0  ;;  %12000 = vmatpush3.bf16.msra.mxu1 %v13495_v38  ;;  %v4003_v29 = vmax.f32 %v15004_v13, 0.0 }
 0x261   : > { %v5187_v48 = vpop.f32.mrb[182].mxu1  ;;  %v2035_v13 = vmax.f32 %v14724_v53, 0.0  ;;  %v2746_v53 = vmax.f32 %v14733_v26, 0.0  ;;  %v1432_v26 = vmax.f32 %v14449_v45, 0.0 }
 0x262   : > { %v11711_v62 = vpack.c.bf16 %v5302_v34, %v5302_v34  ;;  %v11683_v57 = vpack.c.bf16 %v4595_v1, %v4595_v1  ;;  %v5303_v39 = vmax.f32 %v5187_v48, 0.0  ;;  %v4111_v15 = vpop.permute.xlu1 %4110  ;;  %v12928_v60 = vpop.f32.mrb[183].mxu1  ;;  %4711 = vrot.lane.b32.xlu0 %v11682_v58, %s13751_s27  ;;  %13044 = vmatmul.mubr.msk.bf16.gmra.mrb[32].mxu0 %vm576_vm2, %v13486_v47  ;;  %v13493_v34 = vld [vmem:[%s13882_s18 + $0x3ec] sm:$0xff]  }
 0x263   : > { %4196 = vst.msk [vmem:[#allocation2 + $0x10] sm:$0xf] %vm1622_vm12, %v4111_v15  ;;  %13047 = vmatprep.mubr.msk.bf16.mxu0 %vm13749_vm0, %v17221_v56 }
 0x264   : > { %4713 = vrot.lane.b32.xlu1 %v11683_v57, %s13751_s27  ;;  %v11712_v20 = vpack.c.bf16 %v5303_v39, %v5303_v39 }
 0x265   : > { %v4484_v33 = vpop.f32.mrb[184].mxu0 }
 0x266   : > { %v4596_v42 = vmax.f32 %v4484_v33, 0.0  ;;  %5419 = vrot.lane.b32.xlu0 %v11711_v62, %s13752_s28  ;;  %v4113_v47 = vpop.permute.xlu0 %4112  ;;  %v12861_v58 = vpop.f32.mrb[185].mxu0  ;;  %v11665_v62 = vpack.c.bf16 %v4003_v29, %v4003_v29 }
 0x267   : > { %4197 = vst.msk [vmem:[#allocation2 + $0x1c] sm:$0xf] %vm1622_vm12, %v4113_v47  ;;  %v5192_v1 = vpop.f32.mrb[184].mxu1  ;;  %v15139_v12 = vpop.f32.mrb[186].mxu0  ;;  %v11577_v47 = vpack.c.bf16 %v2035_v13, %v2035_v13 }
 0x268   : > { %v11684_v48 = vpack.c.bf16 %v4596_v42, %v4596_v42  ;;  %v4115_v7 = vpop.permute.xlu1 %4114  ;;  %5421 = vrot.lane.b32.xlu1 %v11712_v20, %s13752_s28  ;;  %v5304_v57 = vmax.f32 %v5192_v1, 0.0  ;;  %v12862_v15 = vpop.f32.mrb[187].mxu0  ;;  %v4002_v20 = vmax.f32 %v14994_v9, 0.0 }
 0x269   : > { %4198 = vst.msk [vmem:[#allocation2 + $0x28] sm:$0xf] %vm1622_vm12, %v4115_v7  ;;  %v12931_v39 = vpop.f32.mrb[185].mxu1 }
 0x26a   : > { %v11713_v60 = vpack.c.bf16 %v5304_v57, %v5304_v57  ;;  %4715 = vrot.lane.b32.xlu0 %v11684_v48, %s13751_s27  ;;  %v15145_v38 = vpop.f32.mrb[186].mxu1  ;;  %13048 = vmatmul.mubr.msk.bf16.gmra.mrb[36].mxu0 %vm576_vm2, %v13493_v34  ;;  %v2034_v48 = vmax.f32 %v14715_v55, 0.0  ;;  %v11664_v9 = vpack.c.bf16 %v4002_v20, %v4002_v20  ;;  %v11606_v39 = vpack.c.bf16 %v2746_v53, %v2746_v53  ;;  %v13499_v55 = vld [vmem:[%s17186_s3 + $0x40] sm:$0xff]  }
 0x26b   : > { %v12932_v33 = vpop.f32.mrb[187].mxu1  ;;  %13051 = vmatprep.mubr.msk.bf16.mxu0 %vm13749_vm0, %v17221_v56  ;;  %12081 = vmatprep.subr.bf16.mxu0 %v13499_v55  ;;  %v4597_v53 = vmax.f32 %v15139_v12, 0.0 }
 0x26c   : > { %4132 = vrot.lane.b32.xlu1 %v11665_v62, %s13750_s16  ;;  %v2036_v33 = vmax.f32 %v14744_v18, 0.0  ;;  %v11576_v45 = vpack.c.bf16 %v2034_v48, %v2034_v48  ;;  %v15188_v18 = vld [vmem:[%s17186_s3 + $0x80] sm:$0xff]   ;;  %v2745_v48 = vmax.f32 %v14721_v35, 0.0  ;;  %v2747_v35 = vmax.f32 %v14749_v40, 0.0 }
 0x26d   : > { %v15152_v42 = vpop.f32.mrb[188].mxu0  ;;  %13055 = vmatprep.subr.bf16.mxu1 %v15188_v18  ;;  %v1431_v40 = vmax.f32 %v14434_v30, 0.0 }
 0x26e   : > { %v4117_v29 = vpop.permute.xlu1 %4116  ;;  %5423 = vrot.lane.b32.xlu0 %v11713_v60, %s13752_s28  ;;  %v12865_v58 = vpop.f32.mrb[189].mxu0  ;;  %v13500_v60 = vld [vmem:[%s17186_s3] sm:$0xff]  }
 0x26f   : > { %4199 = vst.msk [vmem:[#allocation2 + $0x34] sm:$0xf] %vm1622_vm12, %v4117_v29  ;;  %v15157_v34 = vpop.f32.mrb[190].mxu0  ;;  %v15159_v1 = vpop.f32.mrb[188].mxu1  ;;  %12082 = vmatpush3.bf16.msra.mxu0 %v13500_v60 }
 0x270   : > { %2163 = vrot.lane.b32.xlu1 %v11577_v47, %s13751_s27  ;;  %v12866_v7 = vpop.f32.mrb[191].mxu0  ;;  %v12935_v57 = vpop.f32.mrb[189].mxu1  ;;  %v11551_v47 = vpack.c.bf16 %v1432_v26, %v1432_v26 }
 0x271   : > { %v15163_v15 = vpop.f32.mrb[190].mxu1  ;;  %v11578_v57 = vpack.c.bf16 %v2036_v33, %v2036_v33 }
 0x272   : > { %v4119_v13 = vpop.permute.xlu1 %4118  ;;  %4130 = vrot.lane.b32.xlu0 %v11664_v9, %s13750_s16  ;;  %v12936_v62 = vpop.f32.mrb[191].mxu1 }
 0x273   : > { %4200 = vst.msk [vmem:[#allocation2 + $0x40] sm:$0xf] %vm1622_vm12, %v4119_v13  ;;  %v11685_v13 = vpack.c.bf16 %v4597_v53, %v4597_v53  ;;  %v5305_v62 = vmax.f32 %v15145_v38, 0.0 }
 0x274   : > { %2874 = vrot.lane.b32.xlu1 %v11606_v39, %s13752_s28 }
 0x275   : > { %v15176_v20 = vpop.f32.mrb[192].mxu0 }
 0x276   : > { %2161 = vrot.lane.b32.xlu0 %v11576_v45, %s13751_s27  ;;  %v4121_v29 = vpop.permute.xlu0 %4120  ;;  %v12869_v58 = vpop.f32.mrb[193].mxu0  ;;  %v11605_v45 = vpack.c.bf16 %v2745_v48, %v2745_v48  ;;  %v11607_v48 = vpack.c.bf16 %v2747_v35, %v2747_v35  ;;  %v1433_v35 = vmax.f32 %v14452_v31, 0.0  ;;  %v4599_v31 = vmax.f32 %v15157_v34, 0.0 }
 0x277   : > { %4201 = vst.msk [vmem:[#allocation2 + $0x4c] sm:$0xf] %vm1622_vm12, %v4121_v29  ;;  %v15181_v9 = vpop.f32.mrb[194].mxu0  ;;  %v15183_v7 = vpop.f32.mrb[192].mxu1  ;;  %v4004_v29 = vmax.f32 %v15006_v23, 0.0  ;;  %v2038_v34 = vmax.f32 %v14764_v59, 0.0 }
 0x278   : > { %v4123_v12 = vpop.permute.xlu1 %4122  ;;  %1563 = vrot.lane.b32.xlu1 %v11551_v47, %s13750_s16  ;;  %v12870_v26 = vpop.f32.mrb[195].mxu0  ;;  %v11714_v47 = vpack.c.bf16 %v5305_v62, %v5305_v62  ;;  %v13508_v62 = vld [vmem:[%s17186_s3 + $0x48] sm:$0xff]   ;;  %v13517_v59 = vld [vmem:[%s17186_s3 + $0x50] sm:$0xff]  }
 0x279   : > { %4202 = vst.msk [vmem:[#allocation2 + $0x58] sm:$0xf] %vm1622_vm12, %v4123_v12  ;;  %v12939_v39 = vpop.f32.mrb[193].mxu1  ;;  %v4598_v26 = vmax.f32 %v15152_v42, 0.0  ;;  %12083 = vmatprep.subr.bf16.mxu0 %v13508_v62  ;;  %v13509_v42 = vld [vmem:[%s17186_s3 + $0x8] sm:$0xff]  }
 0x27a   : > { %2165 = vrot.lane.b32.xlu0 %v11578_v57, %s13751_s27  ;;  %v15196_v55 = vpop.f32.mrb[194].mxu1  ;;  %v13507_v39 = vld [vmem:[%s13882_s18 + $0x3f4] ss:$0 sps:$4 sm:$0x11]   ;;  %12084 = vmatpush3.bf16.msra.mxu0 %v13509_v42  ;;  %v11687_v42 = vpack.c.bf16 %v4599_v31, %v4599_v31 }
 0x27b   : > { %v12940_v60 = vpop.f32.mrb[195].mxu1  ;;  %13052 = vmatmul.mubr.msk.bf16.gmra.mrb[40].mxu0 %vm576_vm2, %v13507_v39  ;;  %12085 = vmatprep.subr.bf16.mxu0 %v13517_v59  ;;  %vm6241_vm2 = vcmask 261120  }
 0x27c   : > { %4717 = vrot.lane.b32.xlu1 %v11685_v13, %s13751_s27  ;;  %v11666_v60 = vpack.c.bf16 %v4004_v29, %v4004_v29  ;;  %v11550_v29 = vpack.c.bf16 %v1431_v40, %v1431_v40 }
 0x27d   : > { %v15200_v33 = vpop.f32.mrb[196].mxu0 }
 0x27e   : > { %2872 = vrot.lane.b32.xlu0 %v11605_v45, %s13752_s28  ;;  %v4125_v53 = vpop.permute.xlu0 %4124  ;;  %v12873_v38 = vpop.f32.mrb[197].mxu0 }
 0x27f   : > { %4203 = vst.msk [vmem:[#allocation2 + $0x64] sm:$0xf] %vm1622_vm12, %v4125_v53  ;;  %v15205_v58 = vpop.f32.mrb[198].mxu0  ;;  %v15207_v12 = vpop.f32.mrb[196].mxu1  ;;  %v5306_v53 = vmax.f32 %v15159_v1, 0.0  ;;  %v11552_v1 = vpack.c.bf16 %v1433_v35, %v1433_v35 }
 0x280   : > { %v4127_v57 = vpop.permute.xlu1 %4126  ;;  %5425 = vrot.lane.b32.xlu1 %v11714_v47, %s13752_s28  ;;  %v12874_v23 = vpop.f32.mrb[199].mxu0  ;;  %v11686_v47 = vpack.c.bf16 %v4598_v26, %v4598_v26 }
 0x281   : > { %4204 = vst.msk [vmem:[#allocation2 + $0x70] sm:$0xf] %vm1622_vm12, %v4127_v57  ;;  %v12943_v13 = vpop.f32.mrb[197].mxu1  ;;  %v11715_v26 = vpack.c.bf16 %v5306_v53, %v5306_v53 }
 0x282   : > { %2876 = vrot.lane.b32.xlu0 %v11607_v48, %s13752_s28  ;;  %v15218_v45 = vpop.f32.mrb[198].mxu1 }
 0x283   : > { %v12944_v30 = vpop.f32.mrb[199].mxu1 }
 0x284   : > { %4134 = vrot.lane.b32.xlu1 %v11666_v60, %s13750_s16  ;;  %v4006_v60 = vmax.f32 %v15022_v6, 0.0  ;;  %v4005_v6 = vmax.f32 %v15020_v17, 0.0  ;;  %v11580_v17 = vpack.c.bf16 %v2038_v34, %v2038_v34  ;;  %v2039_v34 = vmax.f32 %v14770_v3, 0.0 }
 0x285   : > { %v15227_v38 = vpop.f32.mrb[200].mxu0 }
 0x286   : > { %1561 = vrot.lane.b32.xlu0 %v11550_v29, %s13750_s16  ;;  %v4129_v48 = vpop.permute.xlu1 %4128  ;;  %v12877_v57 = vpop.f32.mrb[201].mxu0  ;;  %v5307_v29 = vmax.f32 %v15163_v15, 0.0  ;;  %v11581_v3 = vpack.c.bf16 %v2039_v34, %v2039_v34 }
 0x287   : > { %4205 = vst.msk [vmem:[#allocation2 + $0x7c] sm:$0xf] %vm1622_vm12, %v4129_v48  ;;  %v15231_v23 = vpop.f32.mrb[202].mxu0  ;;  %v15233_v39 = vpop.f32.mrb[200].mxu1 }
 0x288   : > { %4719 = vrot.lane.b32.xlu1 %v11686_v47, %s13751_s27  ;;  %v12878_v40 = vpop.f32.mrb[203].mxu0  ;;  %v12947_v13 = vpop.f32.mrb[201].mxu1  ;;  %v11668_v47 = vpack.c.bf16 %v4006_v60, %v4006_v60 }
 0x289   : > { %v15237_v62 = vpop.f32.mrb[202].mxu1  ;;  %v13518_v40 = vld [vmem:[%s17186_s3 + $0x10] sm:$0xff]   ;;  %v2749_v13 = vmax.f32 %v14768_v0, 0.0 }
 0x28a   : > { %1565 = vrot.lane.b32.xlu0 %v11552_v1, %s13750_s16  ;;  %v12948_v30 = vpop.f32.mrb[203].mxu1  ;;  %v11716_v1 = vpack.c.bf16 %v5307_v29, %v5307_v29  ;;  %12086 = vmatpush3.bf16.msra.mxu0 %v13518_v40  ;;  %v4600_v40 = vmax.f32 %v15176_v20, 0.0 }
 0x28b   : > { %v2037_v30 = vmax.f32 %v14751_v21, 0.0 }
 0x28c   : > { %5427 = vrot.lane.b32.xlu1 %v11715_v26, %s13752_s28 }
 0x28d   : > { %v15243_v48 = vpop.f32.mrb[204].mxu0  ;;  %v11579_v21 = vpack.c.bf16 %v2037_v30, %v2037_v30  ;;  %v11688_v30 = vpack.c.bf16 %v4600_v40, %v4600_v40  ;;  %v13528_v40 = vld [vmem:[%s17186_s3 + $0x18] sm:$0xff]  }
 0x28e   : > { %4721 = vrot.lane.b32.xlu0 %v11687_v42, %s13751_s27  ;;  %v12881_v35 = vpop.f32.mrb[205].mxu0  ;;  %v11667_v42 = vpack.c.bf16 %v4005_v6, %v4005_v6 }
 0x28f   : > { %v15247_v53 = vpop.f32.mrb[206].mxu0  ;;  %v15249_v57 = vpop.f32.mrb[204].mxu1  ;;  %v11609_v35 = vpack.c.bf16 %v2749_v13, %v2749_v13 }
 0x290   : > { %4138 = vrot.lane.b32.xlu1 %v11668_v47, %s13750_s16  ;;  %v12882_v15 = vpop.f32.mrb[207].mxu0  ;;  %v12951_v31 = vpop.f32.mrb[205].mxu1  ;;  %v1435_v47 = vmax.f32 %v14470_v10, 0.0 }
 0x291   : > { %v15253_v26 = vpop.f32.mrb[206].mxu1 }
 0x292   : > { %5429 = vrot.lane.b32.xlu0 %v11716_v1, %s13752_s28  ;;  %v12952_v60 = vpop.f32.mrb[207].mxu1  ;;  %v11554_v10 = vpack.c.bf16 %v1435_v47, %v1435_v47  ;;  %v13526_v47 = vld [vmem:[%s17186_s3 + $0x58] sm:$0xff]  }
 0x293   : > { %v5308_v60 = vmax.f32 %v15183_v7, 0.0  ;;  %v2750_v7 = vmax.f32 %v14774_v16, 0.0  ;;  %12087 = vmatprep.subr.bf16.mxu0 %v13526_v47  ;;  %v1434_v16 = vmax.f32 %v14467_v4, 0.0 }
 0x294   : > { %2169 = vrot.lane.b32.xlu1 %v11580_v17, %s13751_s27  ;;  %v2748_v17 = vmax.f32 %v14756_v46, 0.0  ;;  %12088 = vmatpush3.bf16.msra.mxu0 %v13528_v40 }
 0x295   : > { %v15265_v29 = vpop.f32.mrb[208].mxu0  ;;  %v11553_v4 = vpack.c.bf16 %v1434_v16, %v1434_v16 }
 0x296   : > { %4136 = vrot.lane.b32.xlu0 %v11667_v42, %s13750_s16  ;;  %v12885_v15 = vpop.f32.mrb[209].mxu0  ;;  %v11608_v46 = vpack.c.bf16 %v2748_v17, %v2748_v17  ;;  %v11610_v17 = vpack.c.bf16 %v2750_v7, %v2750_v7 }
 0x297   : > { %v15269_v0 = vpop.f32.mrb[210].mxu0  ;;  %v15271_v1 = vpop.f32.mrb[208].mxu1 }
 0x298   : > { %2880 = vrot.lane.b32.xlu1 %v11609_v35, %s13752_s28  ;;  %v12886_v6 = vpop.f32.mrb[211].mxu0  ;;  %v12955_v31 = vpop.f32.mrb[209].mxu1 }
 0x299   : > { %v15275_v59 = vpop.f32.mrb[210].mxu1 }
 0x29a   : > { %2167 = vrot.lane.b32.xlu0 %v11579_v21, %s13751_s27  ;;  %v12956_v13 = vpop.f32.mrb[211].mxu1  ;;  %v11717_v21 = vpack.c.bf16 %v5308_v60, %v5308_v60 }
 0x29c   : > { %1569 = vrot.lane.b32.xlu1 %v11554_v10, %s13750_s16  ;;  %v4007_v10 = vmax.f32 %v15030_v25, 0.0 }
 0x29d   : > { %v15282_v42 = vpop.f32.mrb[212].mxu0 }
 0x29e   : > { %2171 = vrot.lane.b32.xlu0 %v11581_v3, %s13751_s27  ;;  %v12889_v35 = vpop.f32.mrb[213].mxu0  ;;  %v11669_v3 = vpack.c.bf16 %v4007_v10, %v4007_v10  ;;  %v4008_v10 = vmax.f32 %v15032_v8, 0.0  ;;  %v13540_v8 = vld [vmem:[%s17186_s3 + $0x20] sm:$0xff]  }
 0x29f   : > { %v15285_v15 = vpop.f32.mrb[214].mxu0  ;;  %v15287_v20 = vpop.f32.mrb[212].mxu1 }
 0x2a0   : > { %4723 = vrot.lane.b32.xlu1 %v11688_v30, %s13751_s27  ;;  %v12890_v34 = vpop.f32.mrb[215].mxu0  ;;  %v12959_v6 = vpop.f32.mrb[213].mxu1  ;;  %v4009_v30 = vmax.f32 %v15046_v19, 0.0 }
 0x2a1   : > { %v15294_v31 = vpop.f32.mrb[214].mxu1  ;;  %v2041_v6 = vmax.f32 %v14788_v36, 0.0 }
 0x2a2   : > { %2878 = vrot.lane.b32.xlu0 %v11608_v46, %s13752_s28  ;;  %v12960_v13 = vpop.f32.mrb[215].mxu1  ;;  %v1436_v46 = vmax.f32 %v14485_v28, 0.0  ;;  %v11671_v40 = vpack.c.bf16 %v4009_v30, %v4009_v30  ;;  %v4601_v28 = vmax.f32 %v15181_v9, 0.0  ;;  %v13539_v30 = vld [vmem:[%s17186_s3 + $0x60] sm:$0xff]  }
 0x2a3   : > { %v11583_v16 = vpack.c.bf16 %v2041_v6, %v2041_v6  ;;  %12089 = vmatprep.subr.bf16.mxu0 %v13539_v30 }
 0x2a4   : > { %5431 = vrot.lane.b32.xlu1 %v11717_v21, %s13752_s28  ;;  %v11555_v13 = vpack.c.bf16 %v1436_v46, %v1436_v46  ;;  %v2040_v46 = vmax.f32 %v14782_v49, 0.0  ;;  %v11689_v6 = vpack.c.bf16 %v4601_v28, %v4601_v28  ;;  %12090 = vmatpush3.bf16.msra.mxu0 %v13540_v8  ;;  %v4602_v8 = vmax.f32 %v15200_v33, 0.0  ;;  %v13547_v33 = vld [vmem:[%s17186_s3 + $0x68] sm:$0xff]  }
 0x2a5   : > { %v15303_v60 = vpop.f32.mrb[216].mxu0  ;;  %12091 = vmatprep.subr.bf16.mxu0 %v13547_v33 }
 0x2a6   : > { %2882 = vrot.lane.b32.xlu0 %v11610_v17, %s13752_s28  ;;  %v12893_v35 = vpop.f32.mrb[217].mxu0  ;;  %v11582_v49 = vpack.c.bf16 %v2040_v46, %v2040_v46 }
 0x2a7   : > { %v15307_v47 = vpop.f32.mrb[218].mxu0  ;;  %v15309_v25 = vpop.f32.mrb[216].mxu1 }
 0x2a8   : > { %4140 = vrot.lane.b32.xlu1 %v11669_v3, %s13750_s16  ;;  %v12894_v7 = vpop.f32.mrb[219].mxu0  ;;  %v12963_v34 = vpop.f32.mrb[217].mxu1 }
 0x2a9   : > { %v15313_v21 = vpop.f32.mrb[218].mxu1 }
 0x2aa   : > { %1567 = vrot.lane.b32.xlu0 %v11553_v4, %s13750_s16  ;;  %v12964_v19 = vpop.f32.mrb[219].mxu1  ;;  %v11670_v4 = vpack.c.bf16 %v4008_v10, %v4008_v10 }
 0x2ac   : > { %4144 = vrot.lane.b32.xlu1 %v11671_v40, %s13750_s16  ;;  %v5309_v40 = vmax.f32 %v15196_v55, 0.0 }
 0x2ad   : > { %v15319_v17 = vpop.f32.mrb[220].mxu0 }
 0x2ae   : > { %1571 = vrot.lane.b32.xlu0 %v11555_v13, %s13750_s16  ;;  %v12897_v3 = vpop.f32.mrb[221].mxu0  ;;  %v2042_v13 = vmax.f32 %v14800_v50, 0.0 }
 0x2af   : > { %v15323_v35 = vpop.f32.mrb[222].mxu0  ;;  %v15325_v36 = vpop.f32.mrb[220].mxu1  ;;  %v11718_v3 = vpack.c.bf16 %v5309_v40, %v5309_v40 }
 0x2b0   : > { %2175 = vrot.lane.b32.xlu1 %v11583_v16, %s13751_s27  ;;  %v12898_v9 = vpop.f32.mrb[223].mxu0  ;;  %v12967_v7 = vpop.f32.mrb[221].mxu1  ;;  %v2752_v16 = vmax.f32 %v14792_v43, 0.0  ;;  %v4603_v43 = vmax.f32 %v15205_v58, 0.0 }
 0x2b1   : > { %v15335_v34 = vpop.f32.mrb[222].mxu1 }
 0x2b2   : > { %4142 = vrot.lane.b32.xlu0 %v11670_v4, %s13750_s16  ;;  %v12968_v19 = vpop.f32.mrb[223].mxu1  ;;  %v11584_v4 = vpack.c.bf16 %v2042_v13, %v2042_v13  ;;  %v11612_v7 = vpack.c.bf16 %v2752_v16, %v2752_v16  ;;  %v5311_v16 = vmax.f32 %v15218_v45, 0.0  ;;  %v4604_v45 = vmax.f32 %v15227_v38, 0.0 }
 0x2b3   : > { %v11690_v19 = vpack.c.bf16 %v4602_v8, %v4602_v8  ;;  %v2751_v8 = vmax.f32 %v14786_v32, 0.0  ;;  %v5312_v32 = vmax.f32 %v15233_v39, 0.0 }
 0x2b4   : > { %4725 = vrot.lane.b32.xlu1 %v11689_v6, %s13751_s27  ;;  %v5310_v6 = vmax.f32 %v15207_v12, 0.0 }
 0x2b5   : > { %v15341_v10 = vpop.f32.mrb[224].mxu0 }
 0x2b6   : > { %2173 = vrot.lane.b32.xlu0 %v11582_v49, %s13751_s27  ;;  %v12901_v30 = vpop.f32.mrb[225].mxu0  ;;  %v11691_v49 = vpack.c.bf16 %v4603_v43, %v4603_v43  ;;  %v11720_v43 = vpack.c.bf16 %v5311_v16, %v5311_v16  ;;  %v4605_v16 = vmax.f32 %v15231_v23, 0.0  ;;  %v13564_v23 = vld [vmem:[%s17186_s3 + $0x30] sm:$0xff]  }
 0x2b7   : > { %v15345_v28 = vpop.f32.mrb[226].mxu0  ;;  %v15347_v55 = vpop.f32.mrb[224].mxu1 }
 0x2b8   : > { %5433 = vrot.lane.b32.xlu1 %v11718_v3, %s13752_s28  ;;  %v12902_v50 = vpop.f32.mrb[227].mxu0  ;;  %v12971_v9 = vpop.f32.mrb[225].mxu1  ;;  %v11719_v3 = vpack.c.bf16 %v5310_v6, %v5310_v6  ;;  %v11693_v39 = vpack.c.bf16 %v4605_v16, %v4605_v16 }
 0x2b9   : > { %v15351_v46 = vpop.f32.mrb[226].mxu1 }
 0x2ba   : > { %2177 = vrot.lane.b32.xlu0 %v11584_v4, %s13751_s27  ;;  %v12972_v40 = vpop.f32.mrb[227].mxu1  ;;  %v13550_v4 = vld [vmem:[%s17186_s3 + $0x28] sm:$0xff]  }
 0x2bb   : > { %12092 = vmatpush3.bf16.msra.mxu0 %v13550_v4  ;;  %v11611_v40 = vpack.c.bf16 %v2751_v8, %v2751_v8 }
 0x2bc   : > { %2886 = vrot.lane.b32.xlu1 %v11612_v7, %s13752_s28 }
 0x2bd   : > { %v15357_v13 = vpop.f32.mrb[228].mxu0 }
 0x2be   : > { %4727 = vrot.lane.b32.xlu0 %v11690_v19, %s13751_s27  ;;  %v12905_v58 = vpop.f32.mrb[229].mxu0  ;;  %v2753_v19 = vmax.f32 %v14804_v63, 0.0  ;;  %v1438_v63 = vmax.f32 %v14503_v52, 0.0 }
 0x2bf   : > { %v15364_v30 = vpop.f32.mrb[230].mxu0  ;;  %v15366_v12 = vpop.f32.mrb[228].mxu1 }
 0x2c0   : > { %4729 = vrot.lane.b32.xlu1 %v11691_v49, %s13751_s27  ;;  %v12906_v50 = vpop.f32.mrb[231].mxu0  ;;  %v12975_v9 = vpop.f32.mrb[229].mxu1  ;;  %v11692_v49 = vpack.c.bf16 %v4604_v45, %v4604_v45  ;;  %v11613_v38 = vpack.c.bf16 %v2753_v19, %v2753_v19  ;;  %v13563_v45 = vld [vmem:[%s17186_s3 + $0x70] sm:$0xff]   ;;  %v11557_v52 = vpack.c.bf16 %v1438_v63, %v1438_v63 }
 0x2c1   : > { %v15373_v7 = vpop.f32.mrb[230].mxu1  ;;  %v5313_v50 = vmax.f32 %v15237_v62, 0.0  ;;  %12093 = vmatprep.subr.bf16.mxu0 %v13563_v45  ;;  %v1437_v62 = vmax.f32 %v14489_v54, 0.0  ;;  %v2044_v54 = vmax.f32 %v14818_v14, 0.0 }
 0x2c2   : > { %5435 = vrot.lane.b32.xlu0 %v11719_v3, %s13752_s28  ;;  %v12976_v6 = vpop.f32.mrb[231].mxu1  ;;  %v11721_v3 = vpack.c.bf16 %v5312_v32, %v5312_v32  ;;  %12094 = vmatpush3.bf16.msra.mxu0 %v13564_v23 }
 0x2c3   : > { %v11722_v19 = vpack.c.bf16 %v5313_v50, %v5313_v50 }
 0x2c4   : > { %5437 = vrot.lane.b32.xlu1 %v11720_v43, %s13752_s28  ;;  %v4010_v43 = vmax.f32 %v15048_v2, 0.0  ;;  %v1439_v2 = vmax.f32 %v14506_v61, 0.0  ;;  %v4011_v61 = vmax.f32 %v15056_v37, 0.0 }
 0x2c5   : > { %v15380_v33 = vpop.f32.mrb[232].mxu0 }
 0x2c6   : > { %2884 = vrot.lane.b32.xlu0 %v11611_v40, %s13752_s28  ;;  %v12909_v58 = vpop.f32.mrb[233].mxu0  ;;  %v11558_v45 = vpack.c.bf16 %v1439_v2, %v1439_v2 }
 0x2c7   : > { %v15383_v4 = vpop.f32.mrb[234].mxu0  ;;  %v4012_v58 = vmax.f32 %v15058_v27, 0.0 }
 0x2c8   : > { %4731 = vrot.lane.b32.xlu1 %v11692_v49, %s13751_s27  ;;  %v12910_v8 = vpop.f32.mrb[235].mxu0  ;;  %v11672_v49 = vpack.c.bf16 %v4010_v43, %v4010_v43 }
 0x2c9   : > { %v11674_v8 = vpack.c.bf16 %v4012_v58, %v4012_v58  ;;  %v13570_v58 = vld [vmem:[%s17186_s3 + $0x78] sm:$0xff]  }
 0x2ca   : > { %2888 = vrot.lane.b32.xlu0 %v11613_v38, %s13752_s28  ;;  %v11556_v38 = vpack.c.bf16 %v1437_v62, %v1437_v62  ;;  %v4606_v62 = vmax.f32 %v15243_v48, 0.0  ;;  %v5314_v48 = vmax.f32 %v15249_v57, 0.0  ;;  %12095 = vmatprep.subr.bf16.mxu0 %v13570_v58 }
 0x2cc   : > { %5439 = vrot.lane.b32.xlu1 %v11721_v3, %s13752_s28 }
 0x2cd   : > { %v15391_v9 = vpop.f32.mrb[236].mxu0 }
 0x2ce   : > { %4733 = vrot.lane.b32.xlu0 %v11693_v39, %s13751_s27  ;;  %v12913_v6 = vpop.f32.mrb[237].mxu0 }
 0x2cf   : > { %v4591_v40 = vpop.f32.mrb[238].mxu0 }
 0x2d0   : > { %1575 = vrot.lane.b32.xlu1 %v11557_v52, %s13750_s16  ;;  %v12914_v32 = vpop.f32.mrb[239].mxu0  ;;  %v11586_v40 = vpack.c.bf16 %v2044_v54, %v2044_v54 }
 0x2d2   : > { %5441 = vrot.lane.b32.xlu0 %v11722_v19, %s13752_s28 }
 0x2d4   : > { %v4712_v16 = vpop.permute.xlu0 %4711  ;;  %4146 = vrot.lane.b32.xlu1 %v11672_v49, %s13750_s16  ;;  %v2043_v49 = vmax.f32 %v14806_v5, 0.0  ;;  %v13571_v5 = vld [vmem:[%s17186_s3 + $0x38] sm:$0xff]  }
 0x2d5   : > { %4798 = vst.msk [vmem:[#allocation2 + $0x4] sm:$0xf] %vm2228_vm15, %v4712_v16  ;;  %v5757_v3 = vpop.f32.mrb[240].mxu0  ;;  %12096 = vmatpush3.bf16.msra.mxu0 %v13571_v5  ;;  %v4607_v5 = vmax.f32 %v15247_v53, 0.0 }
 0x2d6   : > { %v4714_v63 = vpop.permute.xlu1 %4713  ;;  %1573 = vrot.lane.b32.xlu0 %v11556_v38, %s13750_s16  ;;  %v5875_v39 = vmax.f32 %v5757_v3, 0.0  ;;  %v12997_v50 = vpop.f32.mrb[241].mxu0  ;;  %v11673_v38 = vpack.c.bf16 %v4011_v61, %v4011_v61  ;;  %v11694_v3 = vpack.c.bf16 %v4606_v62, %v4606_v62  ;;  %v13496_v62 = vld [vmem:[#allocation2] ss:$12 sps:$4 sm:$0xff]  }
 0x2d7   : > { %4799 = vst.msk [vmem:[#allocation2 + $0x10] sm:$0xf] %vm2228_vm15, %v4714_v63  ;;  %v5760_v27 = vpop.f32.mrb[242].mxu0  ;;  %v15414_v14 = vpop.f32.mrb[232].mxu1  ;;  %v2045_v50 = vmax.f32 %v14824_v44, 0.0 }
 0x2d8   : > { %v5420_v23 = vpop.permute.xlu0 %5419  ;;  %4150 = vrot.lane.b32.xlu1 %v11674_v8, %s13750_s16  ;;  %v11740_v43 = vpack.c.bf16 %v5875_v39, %v5875_v39  ;;  %v5876_v52 = vmax.f32 %v5760_v27, 0.0  ;;  %v12998_v6 = vpop.f32.mrb[243].mxu0  ;;  %v11585_v39 = vpack.c.bf16 %v2043_v49, %v2043_v49  ;;  %v11723_v27 = vpack.c.bf16 %v5314_v48, %v5314_v48 }
 0x2d9   : > { %5506 = vst.msk [vmem:[#allocation2 + $0x4] sm:$0xf] %vm2939_vm1, %v5420_v23  ;;  %v12979_v37 = vpop.f32.mrb[233].mxu1  ;;  %v2755_v6 = vmax.f32 %v14822_v41, 0.0  ;;  %v2754_v49 = vmax.f32 %v14810_v22, 0.0  ;;  %v11587_v58 = vpack.c.bf16 %v2045_v50, %v2045_v50  ;;  %v2756_v50 = vmax.f32 %v14828_v51, 0.0 }
 0x2da   : > { %v5422_v19 = vpop.permute.xlu1 %5421  ;;  %1577 = vrot.lane.b32.xlu0 %v11558_v45, %s13750_s16  ;;  %6021 = vst.msk [vmem:[#allocation2 + $0x8] sm:$0xf] %vm926_vm6, %v11740_v43  ;;  %v11741_v32 = vpack.c.bf16 %v5876_v52, %v5876_v52  ;;  %v15436_v52 = vpop.f32.mrb[234].mxu1 }
 0x2db   : > { %5507 = vst.msk [vmem:[#allocation2 + $0x10] sm:$0xf] %vm2939_vm1, %v5422_v19  ;;  %v12980_v37 = vpop.f32.mrb[235].mxu1  ;;  %v11616_v51 = vpack.c.bf16 %v2756_v50, %v2756_v50 }
 0x2dc   : > { %v4716_v2 = vpop.permute.xlu0 %4715  ;;  %2181 = vrot.lane.b32.xlu1 %v11586_v40, %s13751_s27  ;;  %6022 = vst.msk [vmem:[#allocation2 + $0x14] sm:$0xf] %vm926_vm6, %v11741_v32  ;;  %v13506_v32 = vld [vmem:[%s17186_s3 + $0x88] sm:$0xff]   ;;  %v4609_v37 = vmax.f32 %v15269_v0, 0.0 }
 0x2dd   : > { %4800 = vst.msk [vmem:[#allocation2 + $0x1c] sm:$0xf] %vm2228_vm15, %v4716_v2  ;;  %v5765_v16 = vpop.f32.mrb[244].mxu0 }
 0x2de   : > { %v4133_v54 = vpop.permute.xlu1 %4132  ;;  %4148 = vrot.lane.b32.xlu0 %v11673_v38, %s13750_s16  ;;  %v5877_v8 = vmax.f32 %v5765_v16, 0.0  ;;  %v13001_v63 = vpop.f32.mrb[245].mxu0  ;;  %v11615_v16 = vpack.c.bf16 %v2755_v6, %v2755_v6  ;;  %v5315_v6 = vmax.f32 %v15253_v26, 0.0  ;;  %v11697_v0 = vpack.c.bf16 %v4609_v37, %v4609_v37 }
 0x2df   : > { %4207 = vst.msk [vmem:[#allocation2 + $0x94] sm:$0xf] %vm1622_vm12, %v4133_v54  ;;  %v5768_v57 = vpop.f32.mrb[246].mxu0  ;;  %v15448_v41 = vpop.f32.mrb[236].mxu1  ;;  %v13511_v63 = vld [vmem:[%s17186_s3 + $0x40] sm:$0xff]  }
 0x2e0   : > { %v5424_v45 = vpop.permute.xlu0 %5423  ;;  %4735 = vrot.lane.b32.xlu1 %v11694_v3, %s13751_s27  ;;  %v11742_v61 = vpack.c.bf16 %v5877_v8, %v5877_v8  ;;  %v5878_v23 = vmax.f32 %v5768_v57, 0.0  ;;  %v13002_v43 = vpop.f32.mrb[247].mxu0  ;;  %v11614_v57 = vpack.c.bf16 %v2754_v49, %v2754_v49  ;;  %v11724_v49 = vpack.c.bf16 %v5315_v6, %v5315_v6 }
 0x2e1   : > { %5508 = vst.msk [vmem:[#allocation2 + $0x1c] sm:$0xf] %vm2939_vm1, %v5424_v45  ;;  %v12983_v48 = vpop.f32.mrb[237].mxu1  ;;  %v11695_v43 = vpack.c.bf16 %v4607_v5, %v4607_v5 }
 0x2e2   : > { %v2164_v40 = vpop.permute.xlu1 %2163  ;;  %2179 = vrot.lane.b32.xlu0 %v11585_v39, %s13751_s27  ;;  %v13498_v19 = vld [vmem:[#allocation2 + $0x4] ss:$12 sps:$4 sm:$0xff]   ;;  %6023 = vst.msk [vmem:[#allocation2 + $0x20] sm:$0xf] %vm926_vm6, %v11742_v61  ;;  %v11743_v44 = vpack.c.bf16 %v5878_v23, %v5878_v23  ;;  %v5299_v53 = vpop.f32.mrb[238].mxu1 }
 0x2e3   : > { %2240 = vst.msk [vmem:[#allocation2 + $0x84] sm:$0xf] %vm2228_vm15, %v2164_v40  ;;  %6280 = vmatprep.mubr.bf16.mxu1 %v13498_v19  ;;  %v13584_v39 = vld [vmem:[%s17186_s3 + $0x40] sm:$0xff]   ;;  %v12984_v23 = vpop.f32.mrb[239].mxu1  ;;  %v4608_v19 = vmax.f32 %v15265_v29, 0.0 }
 0x2e4   : > { %v4131_v38 = vpop.permute.xlu0 %4130  ;;  %5443 = vrot.lane.b32.xlu1 %v11723_v27, %s13752_s28  ;;  %6024 = vst.msk [vmem:[#allocation2 + $0x2c] sm:$0xf] %vm926_vm6, %v11743_v44  ;;  %6281 = vmatmul.mubr.bf16.vlgmr.msra.gmra.mrb[240].mxu1 %v13496_v62 }
 0x2e5   : > { %4206 = vst.msk [vmem:[#allocation2 + $0x88] sm:$0xf] %vm1622_vm12, %v4131_v38  ;;  %v5773_v2 = vpop.f32.mrb[248].mxu0  ;;  %13056 = vmatpush3.bf16.msra.mxu1 %v15188_v18  ;;  %12113 = vmatprep.subr.bf16.mxu0 %v13584_v39  ;;  %v11696_v48 = vpack.c.bf16 %v4608_v19, %v4608_v19  ;;  %v4611_v39 = vmax.f32 %v15285_v15, 0.0 }
 0x2e6   : > { %v2875_v3 = vpop.permute.xlu1 %2874  ;;  %2183 = vrot.lane.b32.xlu0 %v11587_v58, %s13751_s27  ;;  %v5879_v22 = vmax.f32 %v5773_v2, 0.0  ;;  %v13005_v54 = vpop.f32.mrb[249].mxu0  ;;  %13057 = vmatprep.subr.bf16.mxu1 %v13506_v32 }
 0x2e7   : > { %2951 = vst.msk [vmem:[#allocation2 + $0x84] sm:$0xf] %vm2939_vm1, %v2875_v3  ;;  %v5776_v8 = vpop.f32.mrb[250].mxu0  ;;  %v11699_v23 = vpack.c.bf16 %v4611_v39, %v4611_v39  ;;  %v17232_v39 = vld [vmem:[#allocation25_spill] sm:$0xff] }
 0x2e8   : > { %v2162_v27 = vpop.permute.xlu0 %2161  ;;  %2892 = vrot.lane.b32.xlu1 %v11615_v16, %s13752_s28  ;;  %v11744_v18 = vpack.c.bf16 %v5879_v22, %v5879_v22  ;;  %v5880_v45 = vmax.f32 %v5776_v8, 0.0  ;;  %v13006_v61 = vpop.f32.mrb[251].mxu0  ;;  %v5317_v8 = vmax.f32 %v15275_v59, 0.0  ;;  %v4610_v59 = vmax.f32 %v15282_v42, 0.0 }
 0x2e9   : > { %2239 = vst.msk [vmem:[#allocation2 + $0x78] sm:$0xf] %vm2228_vm15, %v2162_v27  ;;  %13058 = vmatpush3.bf16.msra.mxu1 %v13506_v32  ;;  %v5316_v32 = vmax.f32 %v15271_v1, 0.0 }
 0x2ea   : > { %v1564_v40 = vpop.permute.xlu1 %1563  ;;  %2890 = vrot.lane.b32.xlu0 %v11614_v57, %s13752_s28  ;;  %6025 = vst.msk [vmem:[#allocation2 + $0x38] sm:$0xf] %vm926_vm6, %v11744_v18  ;;  %v11745_v62 = vpack.c.bf16 %v5880_v45, %v5880_v45  ;;  %12017 = vmatprep.subr.bf16.mxu1 %v13511_v63  ;;  %v11726_v50 = vpack.c.bf16 %v5317_v8, %v5317_v8  ;;  %v5319_v18 = vmax.f32 %v15294_v31, 0.0 }
 0x2eb   : > { %1637 = vst.msk [vmem:[#allocation2 + $0xa8] sm:$0xf] %vm1622_vm12, %v1564_v40  ;;  %v11725_v54 = vpack.c.bf16 %v5316_v32, %v5316_v32  ;;  %v11698_v19 = vpack.c.bf16 %v4610_v59, %v4610_v59  ;;  %v13512_v59 = vld [vmem:[%s17186_s3] sm:$0xff]  }
 0x2ec   : > { %v2166_v44 = vpop.permute.xlu0 %2165  ;;  %4737 = vrot.lane.b32.xlu1 %v11695_v43, %s13751_s27  ;;  %6026 = vst.msk [vmem:[#allocation2 + $0x44] sm:$0xf] %vm926_vm6, %v11745_v62  ;;  %v5318_v43 = vmax.f32 %v15287_v20, 0.0  ;;  %v13504_v20 = vld [vmem:[#allocation2 + $0x18] ss:$12 sps:$4 sm:$0x1f]  }
 0x2ed   : > { %2241 = vst.msk [vmem:[#allocation2 + $0x90] sm:$0xf] %vm2228_vm15, %v2166_v44  ;;  %v5781_v26 = vpop.f32.mrb[252].mxu0  ;;  %v11728_v44 = vpack.c.bf16 %v5319_v18, %v5319_v18 }
 0x2ee   : > { %v4718_v58 = vpop.permute.xlu1 %4717  ;;  %2894 = vrot.lane.b32.xlu0 %v11616_v51, %s13752_s28  ;;  %v5881_v38 = vmax.f32 %v5781_v26, 0.0  ;;  %v13009_v2 = vpop.f32.mrb[253].mxu0  ;;  %v13505_v51 = vld [vmem:[#allocation2 + $0x8] ss:$12 sps:$4 sm:$0xff]  }
 0x2ef   : > { %4801 = vst.msk [vmem:[#allocation2 + $0x28] sm:$0xf] %vm2228_vm15, %v4718_v58  ;;  %v5784_v29 = vpop.f32.mrb[254].mxu0  ;;  %v11727_v58 = vpack.c.bf16 %v5318_v43, %v5318_v43  ;;  %v1441_v2 = vmax.f32 %v14524_v24, 0.0 }
 0x2f0   : > { %v2873_v16 = vpop.permute.xlu0 %2872  ;;  %5445 = vrot.lane.b32.xlu1 %v11724_v49, %s13752_s28  ;;  %v11746_v5 = vpack.c.bf16 %v5881_v38, %v5881_v38  ;;  %v5882_v3 = vmax.f32 %v5784_v29, 0.0  ;;  %v13010_v22 = vpop.f32.mrb[255].mxu0  ;;  %v1440_v49 = vmax.f32 %v14521_v11, 0.0  ;;  %v13510_v24 = vld [vmem:[#allocation2 + $0x20] ss:$12 sps:$4 sm:$0x1f]  }
 0x2f1   : > { %2950 = vst.msk [vmem:[#allocation2 + $0x78] sm:$0xf] %vm2939_vm1, %v2873_v16 }
 0x2f2   : > { %v5426_v63 = vpop.permute.xlu1 %5425  ;;  %4739 = vrot.lane.b32.xlu0 %v11696_v48, %s13751_s27  ;;  %6027 = vst.msk [vmem:[#allocation2 + $0x50] sm:$0xf] %vm926_vm6, %v11746_v5  ;;  %v11747_v1 = vpack.c.bf16 %v5882_v3, %v5882_v3  ;;  %v11559_v5 = vpack.c.bf16 %v1440_v49, %v1440_v49  ;;  %v17231_v3 = vld [vmem:[#allocation5_spill] sm:$0xff] }
 0x2f3   : > { %5509 = vst.msk [vmem:[#allocation2 + $0x28] sm:$0xf] %vm2939_vm1, %v5426_v63  ;;  %v1442_v22 = vmax.f32 %v17231_v3, 0.0 }
 0x2f4   : > { %v2877_v53 = vpop.permute.xlu0 %2876  ;;  %4741 = vrot.lane.b32.xlu1 %v11697_v0, %s13751_s27  ;;  %6028 = vst.msk [vmem:[#allocation2 + $0x5c] sm:$0xf] %vm926_vm6, %v11747_v1  ;;  %v11560_v1 = vpack.c.bf16 %v1441_v2, %v1441_v2 }
 0x2f5   : > { %2952 = vst.msk [vmem:[#allocation2 + $0x90] sm:$0xf] %vm2939_vm1, %v2877_v53  ;;  %v5789_v57 = vpop.f32.mrb[0].mxu0  ;;  %v4013_v53 = vmax.f32 %v17232_v39, 0.0  ;;  %v11561_v18 = vpack.c.bf16 %v1442_v22, %v1442_v22 }
 0x2f6   : > { %v4135_v27 = vpop.permute.xlu1 %4134  ;;  %5447 = vrot.lane.b32.xlu0 %v11725_v54, %s13752_s28  ;;  %v5883_v45 = vmax.f32 %v5789_v57, 0.0  ;;  %v13013_v61 = vpop.f32.mrb[1].mxu0 }
 0x2f7   : > { %4208 = vst.msk [vmem:[#allocation2 + $0xa0] sm:$0xf] %vm1622_vm12, %v4135_v27  ;;  %v5792_v15 = vpop.f32.mrb[2].mxu0  ;;  %v13513_v27 = vld [vmem:[%s17186_s3 + $0x48] sm:$0xff]   ;;  %v11675_v43 = vpack.c.bf16 %v4013_v53, %v4013_v53  ;;  %v13521_v53 = vld [vmem:[%s17186_s3 + $0x60] sm:$0xff]  }
 0x2f8   : > { %v1562_v6 = vpop.permute.xlu0 %1561  ;;  %5449 = vrot.lane.b32.xlu1 %v11726_v50, %s13752_s28  ;;  %v11748_v40 = vpack.c.bf16 %v5883_v45, %v5883_v45  ;;  %v5884_v62 = vmax.f32 %v5792_v15, 0.0  ;;  %v13014_v42 = vpop.f32.mrb[3].mxu0  ;;  %v17233_v45 = vld [vmem:[#allocation26_spill] sm:$0xff] }
 0x2f9   : > { %1636 = vst.msk [vmem:[#allocation2 + $0x9c] sm:$0xf] %vm1622_vm12, %v1562_v6  ;;  %v4014_v61 = vmax.f32 %v17233_v45, 0.0  ;;  %v4612_v6 = vmax.f32 %v15303_v60, 0.0 }
 0x2fa   : > { %v4720_v31 = vpop.permute.xlu1 %4719  ;;  %4745 = vrot.lane.b32.xlu0 %v11699_v23, %s13751_s27  ;;  %v13502_v26 = vld [vmem:[#allocation2 + $0x1c] ss:$12 sps:$4 sm:$0x1f]   ;;  %6029 = vst.msk [vmem:[#allocation2 + $0x68] sm:$0xf] %vm926_vm6, %v11748_v40  ;;  %v11749_v37 = vpack.c.bf16 %v5884_v62, %v5884_v62 }
 0x2fb   : > { %4802 = vst.msk [vmem:[#allocation2 + $0x34] sm:$0xf] %vm2228_vm15, %v4720_v31  ;;  %6288 = vmatprep.mubr.bf16.mxu1 %v13502_v26  ;;  %v13514_v62 = vld [vmem:[%s17186_s3 + $0x8] sm:$0xff]   ;;  %v11676_v60 = vpack.c.bf16 %v4014_v61, %v4014_v61 }
 0x2fc   : > { %v1566_v32 = vpop.permute.xlu0 %1565  ;;  %4743 = vrot.lane.b32.xlu1 %v11698_v19, %s13751_s27  ;;  %6030 = vst.msk [vmem:[#allocation2 + $0x74] sm:$0xf] %vm926_vm6, %v11749_v37  ;;  %6289 = vmatmul.mubr.bf16.gmra.mrb[244].mxu1 %v13504_v20  ;;  %v5320_v37 = vmax.f32 %v15309_v25, 0.0  ;;  %v13519_v25 = vld [vmem:[%s17186_s3 + $0x58] sm:$0xff]  }
 0x2fd   : > { %1638 = vst.msk [vmem:[#allocation2 + $0xb4] sm:$0xf] %vm1622_vm12, %v1566_v32  ;;  %v5797_v38 = vpop.f32.mrb[4].mxu0  ;;  %13059 = vmatprep.mubr.msk.bf16.mxu1 %vm6241_vm2, %v13505_v51  ;;  %v13515_v51 = vld [vmem:[%s17186_s3 + $0x50] sm:$0xff]  }
 0x2fe   : > { %v5428_v29 = vpop.permute.xlu1 %5427  ;;  %5453 = vrot.lane.b32.xlu0 %v11728_v44, %s13752_s28  ;;  %v5885_v48 = vmax.f32 %v5797_v38, 0.0  ;;  %v13017_v11 = vpop.f32.mrb[5].mxu0  ;;  %v17234_v44 = vld [vmem:[#allocation11_spill] sm:$0xff]  ;;  %v11700_v38 = vpack.c.bf16 %v4612_v6, %v4612_v6  ;;  %v11729_v3 = vpack.c.bf16 %v5320_v37, %v5320_v37 }
 0x2ff   : > { %5510 = vst.msk [vmem:[#allocation2 + $0x34] sm:$0xf] %vm2939_vm1, %v5428_v29  ;;  %v5800_v16 = vpop.f32.mrb[6].mxu0  ;;  %v2046_v31 = vmax.f32 %v17234_v44, 0.0  ;;  %v13516_v29 = vld [vmem:[%s17186_s3 + $0x10] sm:$0xff]  }
 0x300   : > { %v4722_v0 = vpop.permute.xlu0 %4721  ;;  %5451 = vrot.lane.b32.xlu1 %v11727_v58, %s13752_s28  ;;  %v11750_v54 = vpack.c.bf16 %v5885_v48, %v5885_v48  ;;  %v5886_v8 = vmax.f32 %v5800_v16, 0.0  ;;  %v13018_v63 = vpop.f32.mrb[7].mxu0  ;;  %v17235_v16 = vld [vmem:[#allocation15_spill] sm:$0xff]  ;;  %v17239_v44 = vld [vmem:[#allocation16_spill] sm:$0xff] }
 0x301   : > { %4803 = vst.msk [vmem:[#allocation2 + $0x40] sm:$0xf] %vm2228_vm15, %v4722_v0  ;;  %v11588_v11 = vpack.c.bf16 %v2046_v31, %v2046_v31  ;;  %v2759_v31 = vmax.f32 %v17239_v44, 0.0  ;;  %v15576_v37 = vld [vmem:[#allocation2 + $0x24] ss:$12 sps:$4 sm:$0xff]   ;;  %v5325_v44 = vmax.f32 %v15351_v46, 0.0 }
 0x302   : > { %v4139_v57 = vpop.permute.xlu1 %4138  ;;  %1579 = vrot.lane.b32.xlu0 %v11559_v5, %s13750_s16  ;;  %6031 = vst.msk [vmem:[#allocation2 + $0x80] sm:$0xf] %vm926_vm6, %v11750_v54  ;;  %v11751_v50 = vpack.c.bf16 %v5886_v8, %v5886_v8  ;;  %v2048_v5 = vmax.f32 %v17235_v16, 0.0  ;;  %v17236_v54 = vld [vmem:[#allocation27_spill] sm:$0xff] }
 0x303   : > { %4210 = vst.msk [vmem:[#allocation2 + $0xb8] sm:$0xf] %vm1622_vm12, %v4139_v57  ;;  %v4015_v8 = vmax.f32 %v17236_v54, 0.0  ;;  %v11619_v16 = vpack.c.bf16 %v2759_v31, %v2759_v31 }
 0x304   : > { %v5430_v15 = vpop.permute.xlu0 %5429  ;;  %1581 = vrot.lane.b32.xlu1 %v11560_v1, %s13750_s16  ;;  %6032 = vst.msk [vmem:[#allocation2 + $0x8c] sm:$0xf] %vm926_vm6, %v11751_v50  ;;  %13060 = vmatmul.mubr.msk.bf16.vlgmr.msra.gmra.mrb[248].mxu1 %vm6241_vm2, %v13510_v24  ;;  %v13520_v24 = vld [vmem:[%s17186_s3 + $0x18] sm:$0xff]  }
 0x305   : > { %5511 = vst.msk [vmem:[#allocation2 + $0x40] sm:$0xf] %vm2939_vm1, %v5430_v15  ;;  %v5805_v23 = vpop.f32.mrb[8].mxu0  ;;  %12018 = vmatpush3.bf16.msra.mxu1 %v13512_v59  ;;  %v17237_v59 = vld [vmem:[#allocation12_spill] sm:$0xff]  ;;  %v11677_v6 = vpack.c.bf16 %v4015_v8, %v4015_v8 }
 0x306   : > { %v2170_v40 = vpop.permute.xlu1 %2169  ;;  %1583 = vrot.lane.b32.xlu0 %v11561_v18, %s13750_s16  ;;  %v5887_v42 = vmax.f32 %v5805_v23, 0.0  ;;  %12019 = vmatprep.subr.bf16.mxu1 %v13513_v27  ;;  %v13021_v19 = vpop.f32.mrb[9].mxu0  ;;  %v2757_v50 = vmax.f32 %v17237_v59, 0.0  ;;  %v11590_v27 = vpack.c.bf16 %v2048_v5, %v2048_v5  ;;  %v17238_v23 = vld [vmem:[#allocation13_spill] sm:$0xff]  ;;  %v4614_v5 = vmax.f32 %v15319_v17, 0.0 }
 0x307   : > { %2243 = vst.msk [vmem:[#allocation2 + $0xa8] sm:$0xf] %vm2228_vm15, %v2170_v40  ;;  %v5808_v20 = vpop.f32.mrb[10].mxu0  ;;  %v5322_v17 = vmax.f32 %v15325_v36, 0.0 }
 0x308   : > { %v4137_v26 = vpop.permute.xlu0 %4136  ;;  %4152 = vrot.lane.b32.xlu1 %v11675_v43, %s13750_s16  ;;  %v11752_v49 = vpack.c.bf16 %v5887_v42, %v5887_v42  ;;  %v5888_v58 = vmax.f32 %v5808_v20, 0.0  ;;  %v13022_v32 = vpop.f32.mrb[11].mxu0  ;;  %v2047_v43 = vmax.f32 %v17238_v23, 0.0  ;;  %v11617_v19 = vpack.c.bf16 %v2757_v50, %v2757_v50 }
 0x309   : > { %4209 = vst.msk [vmem:[#allocation2 + $0xac] sm:$0xf] %vm1622_vm12, %v4137_v26  ;;  %12020 = vmatpush3.bf16.msra.mxu1 %v13514_v62  ;;  %v13522_v62 = vld [vmem:[%s17186_s3 + $0x20] sm:$0xff]   ;;  %v15574_v26 = vld [vmem:[#allocation2 + $0x28] ss:$12 sps:$4 sm:$0xff]   ;;  %v11702_v59 = vpack.c.bf16 %v4614_v5, %v4614_v5  ;;  %v4615_v50 = vmax.f32 %v15323_v35, 0.0 }
 0x30a   : > { %v2881_v2 = vpop.permute.xlu1 %2880  ;;  %4154 = vrot.lane.b32.xlu0 %v11676_v60, %s13750_s16  ;;  %12021 = vmatprep.subr.bf16.mxu1 %v13515_v51  ;;  %6033 = vst.msk [vmem:[#allocation2 + $0x98] sm:$0xf] %vm926_vm6, %v11752_v49  ;;  %v11753_v48 = vpack.c.bf16 %v5888_v58, %v5888_v58  ;;  %v13523_v51 = vld [vmem:[%s17186_s3 + $0x68] sm:$0xff]   ;;  %v11589_v49 = vpack.c.bf16 %v2047_v43, %v2047_v43  ;;  %v17240_v58 = vld [vmem:[#allocation14_spill] sm:$0xff]  ;;  %v6492_v8 = vshll.u32 %v15574_v26, 16  ;;  %v6490_v31 = vshrl.u32 %v15574_v26, 16 }
 0x30b   : > { %2954 = vst.msk [vmem:[#allocation2 + $0xa8] sm:$0xf] %vm2939_vm1, %v2881_v2  ;;  %v2758_v32 = vmax.f32 %v17240_v58, 0.0  ;;  %v13524_v2 = vld [vmem:[%s17186_s3 + $0x28] sm:$0xff]   ;;  %v15615_v35 = vld [vmem:[%s17186_s3 + $0x80] sm:$0xff]  }
 0x30c   : > { %v2168_v22 = vpop.permute.xlu0 %2167  ;;  %4747 = vrot.lane.b32.xlu1 %v11700_v38, %s13751_s27  ;;  %6034 = vst.msk [vmem:[#allocation2 + $0xa4] sm:$0xf] %vm926_vm6, %v11753_v48  ;;  %v13525_v48 = vld [vmem:[%s17186_s3 + $0x70] sm:$0xff]  }
 0x30d   : > { %2242 = vst.msk [vmem:[#allocation2 + $0x9c] sm:$0xf] %vm2228_vm15, %v2168_v22  ;;  %v5813_v0 = vpop.f32.mrb[12].mxu0  ;;  %12022 = vmatpush3.bf16.msra.mxu1 %v13516_v29  ;;  %v15630_v26 = vld [vmem:[#allocation2 + $0x44] ss:$12 sps:$4 sm:$0x1f]  }
 0x30e   : > { %v1570_v63 = vpop.permute.xlu1 %1569  ;;  %2185 = vrot.lane.b32.xlu0 %v11588_v11, %s13751_s27  ;;  %v5889_v1 = vmax.f32 %v5813_v0, 0.0  ;;  %v13025_v39 = vpop.f32.mrb[13].mxu0  ;;  %12023 = vmatprep.subr.bf16.mxu1 %v13519_v25 }
 0x30f   : > { %1640 = vst.msk [vmem:[#allocation2 + $0xcc] sm:$0xf] %vm1622_vm12, %v1570_v63  ;;  %v5816_v57 = vpop.f32.mrb[14].mxu0  ;;  %v6480_v63 = vshll.u32 %v15576_v37, 16 }
 0x310   : > { %v2172_v18 = vpop.permute.xlu0 %2171  ;;  %5455 = vrot.lane.b32.xlu1 %v11729_v3, %s13752_s28  ;;  %v11754_v45 = vpack.c.bf16 %v5889_v1, %v5889_v1  ;;  %v5890_v61 = vmax.f32 %v5816_v57, 0.0  ;;  %v13026_v15 = vpop.f32.mrb[15].mxu0  ;;  %v4613_v1 = vmax.f32 %v15307_v47, 0.0  ;;  %v13529_v47 = vld [vmem:[%s17186_s3 + $0x78] sm:$0xff]  }
 0x311   : > { %2244 = vst.msk [vmem:[#allocation2 + $0xb4] sm:$0xf] %vm2228_vm15, %v2172_v18  ;;  %12024 = vmatpush3.bf16.msra.mxu1 %v13520_v24  ;;  %v11618_v24 = vpack.c.bf16 %v2758_v32, %v2758_v32  ;;  %v13530_v18 = vld [vmem:[%s17186_s3 + $0x38] sm:$0xff]   ;;  %v6482_v15 = vrot.slane %v6480_v63, 1  ;;  %v6478_v32 = vshrl.u32 %v15576_v37, 16  ;;  %v13538_v63 = vld [vmem:[%s17186_s3 + $0x88] sm:$0xff]  }
 0x312   : > { %v4724_v40 = vpop.permute.xlu1 %4723  ;;  %2189 = vrot.lane.b32.xlu0 %v11590_v27, %s13751_s27  ;;  %6035 = vst.msk [vmem:[#allocation2 + $0xb0] sm:$0xf] %vm926_vm6, %v11754_v45  ;;  %v11755_v42 = vpack.c.bf16 %v5890_v61, %v5890_v61  ;;  %12025 = vmatprep.subr.bf16.mxu1 %v13521_v53  ;;  %v13527_v53 = vld [vmem:[%s17186_s3 + $0x30] sm:$0xff]   ;;  %v5321_v27 = vmax.f32 %v15313_v21, 0.0  ;;  %v4617_v45 = vmax.f32 %v15345_v28, 0.0  ;;  %v6494_v61 = vrot.slane %v6492_v8, 1 }
 0x313   : > { %4804 = vst.msk [vmem:[#allocation2 + $0x4c] sm:$0xf] %vm2228_vm15, %v4724_v40  ;;  %v15617_v21 = vld [vmem:[#allocation2 + $0x2c] ss:$12 sps:$4 sm:$0xff]   ;;  %v11701_v43 = vpack.c.bf16 %v4613_v1, %v4613_v1  ;;  %v6483_v37 = vor.u32 %v6482_v15, %v6478_v32  ;;  %v5323_v1 = vmax.f32 %v15335_v34, 0.0  ;;  %v13543_v15 = vld [vmem:[%s17186_s3 + $0x40] sm:$0xff]  }
 0x314   : > { %v2879_v60 = vpop.permute.xlu0 %2878  ;;  %4156 = vrot.lane.b32.xlu1 %v11677_v6, %s13750_s16  ;;  %6036 = vst.msk [vmem:[#allocation2 + $0xbc] sm:$0xf] %vm926_vm6, %v11755_v42  ;;  %v11731_v6 = vpack.c.bf16 %v5322_v17, %v5322_v17  ;;  %v15621_v42 = vld [vmem:[#allocation2 + $0x3c] ss:$12 sps:$4 sm:$0x1f]   ;;  %v11730_v58 = vpack.c.bf16 %v5321_v27, %v5321_v27 }
 0x315   : > { %2953 = vst.msk [vmem:[#allocation2 + $0x9c] sm:$0xf] %vm2939_vm1, %v2879_v60  ;;  %v5821_v20 = vpop.f32.mrb[16].mxu0  ;;  %12026 = vmatpush3.bf16.msra.mxu1 %v13522_v62 }
 0x316   : > { %v5432_v38 = vpop.permute.xlu1 %5431  ;;  %2896 = vrot.lane.b32.xlu0 %v11617_v19, %s13752_s28  ;;  %v5891_v29 = vmax.f32 %v5821_v20, 0.0  ;;  %v13029_v25 = vpop.f32.mrb[17].mxu0  ;;  %12027 = vmatprep.subr.bf16.mxu1 %v13523_v51 }
 0x317   : > { %5512 = vst.msk [vmem:[#allocation2 + $0x4c] sm:$0xf] %vm2939_vm1, %v5432_v38  ;;  %v5824_v11 = vpop.f32.mrb[18].mxu0  ;;  %v6485_v38 = vshll.u32 %v15621_v42, 16 }
 0x318   : > { %v2883_v3 = vpop.permute.xlu0 %2882  ;;  %2187 = vrot.lane.b32.xlu1 %v11589_v49, %s13751_s27  ;;  %v11756_v22 = vpack.c.bf16 %v5891_v29, %v5891_v29  ;;  %v5892_v0 = vmax.f32 %v5824_v11, 0.0  ;;  %v13030_v54 = vpop.f32.mrb[19].mxu0 }
 0x319   : > { %2955 = vst.msk [vmem:[#allocation2 + $0xb4] sm:$0xf] %vm2939_vm1, %v2883_v3  ;;  %12028 = vmatpush3.bf16.msra.mxu1 %v13524_v2  ;;  %v6487_v5 = vrot.slane %v6485_v38, 1 }
 0x31a   : > { %v4141_v39 = vpop.permute.xlu1 %4140  ;;  %2900 = vrot.lane.b32.xlu0 %v11619_v16, %s13752_s28  ;;  %6037 = vst.msk [vmem:[#allocation2 + $0xc8] sm:$0xf] %vm926_vm6, %v11756_v22  ;;  %v11757_v57 = vpack.c.bf16 %v5892_v0, %v5892_v0  ;;  %12029 = vmatprep.subr.bf16.mxu1 %v13525_v48  ;;  %v6495_v48 = vor.u32 %v6494_v61, %v6490_v31  ;;  %v6504_v16 = vshll.u32 %v15617_v21, 16 }
 0x31b   : > { %4211 = vst.msk [vmem:[#allocation2 + $0xc4] sm:$0xf] %vm1622_vm12, %v4141_v39  ;;  %v11705_v22 = vpack.c.bf16 %v4617_v45, %v4617_v45  ;;  %v11734_v39 = vpack.c.bf16 %v5325_v44, %v5325_v44  ;;  %v6488_v17 = vsel %vm1072_vm3, %v6483_v37, %v6487_v5  ;;  %v17242_v44 = vld [vmem:[#allocation6_spill] sm:$0xff]  ;;  %v6519_v37 = vshrl.u32 %v15630_v26, 16 }
 0x31c   : > { %v1568_v36 = vpop.permute.xlu0 %1567  ;;  %2898 = vrot.lane.b32.xlu1 %v11618_v24, %s13752_s28  ;;  %6038 = vst.msk [vmem:[#allocation2 + $0xd4] sm:$0xf] %vm926_vm6, %v11757_v57  ;;  %v11703_v24 = vpack.c.bf16 %v4615_v50, %v4615_v50  ;;  %v6509_v50 = vshll.u32 %v15630_v26, 16  ;;  %v1443_v31 = vmax.f32 %v17242_v44, 0.0  ;;  %v17247_v44 = vld [vmem:[#allocation18_spill] sm:$0xff] }
 0x31d   : > { %1639 = vst.msk [vmem:[#allocation2 + $0xc0] sm:$0xf] %vm1622_vm12, %v1568_v36  ;;  %v5829_v23 = vpop.f32.mrb[20].mxu0  ;;  %12030 = vmatpush3.bf16.msra.mxu1 %v13527_v53 }
 0x31e   : > { %v4145_v40 = vpop.permute.xlu1 %4144  ;;  %4751 = vrot.lane.b32.xlu0 %v11702_v59, %s13751_s27  ;;  %v13533_v62 = vld [vmem:[#allocation2 + $0x40] ss:$12 sps:$4 sm:$0x1f]   ;;  %v5893_v28 = vmax.f32 %v5829_v23, 0.0  ;;  %12031 = vmatprep.subr.bf16.mxu1 %v13529_v47  ;;  %v13033_v51 = vpop.f32.mrb[21].mxu0  ;;  %v6502_v47 = vshrl.u32 %v15617_v21, 16 }
 0x31f   : > { %4213 = vst.msk [vmem:[#allocation2 + $0xdc] sm:$0xf] %vm1622_vm12, %v4145_v40  ;;  %v6497_v60 = vshll.u32 %v13533_v62, 16  ;;  %v5832_v49 = vpop.f32.mrb[22].mxu0  ;;  %v6516_v11 = vshrl.u32 %v13533_v62, 16  ;;  %v6506_v59 = vrot.slane %v6504_v16, 1  ;;  %v11732_v40 = vpack.c.bf16 %v5323_v1, %v5323_v1 }
 0x320   : > { %v1572_v19 = vpop.permute.xlu0 %1571  ;;  %4749 = vrot.lane.b32.xlu1 %v11701_v43, %s13751_s27  ;;  %v11758_v20 = vpack.c.bf16 %v5893_v28, %v5893_v28  ;;  %v5894_v2 = vmax.f32 %v5832_v49, 0.0  ;;  %v13034_v29 = vpop.f32.mrb[23].mxu0  ;;  %v6511_v51 = vrot.slane %v6509_v50, 1 }
 0x321   : > { %1641 = vst.msk [vmem:[#allocation2 + $0xd8] sm:$0xf] %vm1622_vm12, %v1572_v19  ;;  %12032 = vmatpush3.bf16.msra.mxu1 %v13530_v18  ;;  %v6499_v46 = vrot.slane %v6497_v60, 1  ;;  %v17241_v18 = vld [vmem:[#allocation10_spill] sm:$0xff]  ;;  %v6507_v28 = vor.u32 %v6506_v59, %v6502_v47 }
 0x322   : > { %v2176_v25 = vpop.permute.xlu1 %2175  ;;  %5459 = vrot.lane.b32.xlu0 %v11731_v6, %s13752_s28  ;;  %6039 = vst.msk [vmem:[#allocation2 + $0xe0] sm:$0xf] %vm926_vm6, %v11758_v20  ;;  %13063 = vmatprep.subr.bf16.mxu1 %v15615_v35  ;;  %v11759_v3 = vpack.c.bf16 %v5894_v2, %v5894_v2  ;;  %v1446_v45 = vmax.f32 %v17241_v18, 0.0  ;;  %v4616_v6 = vmax.f32 %v15341_v10, 0.0  ;;  %v5324_v10 = vmax.f32 %v15347_v55, 0.0 }
 0x323   : > { %2246 = vst.msk [vmem:[#allocation2 + $0xcc] sm:$0xf] %vm2228_vm15, %v2176_v25  ;;  %v6500_v54 = vsel %vm1072_vm3, %v6495_v48, %v6499_v46  ;;  %v6518_v8 = vor.u32 %v6516_v11, %v6499_v46  ;;  %v6512_v38 = vsel %vm1072_vm3, %v6507_v28, %v6511_v51  ;;  %v11562_v55 = vpack.c.bf16 %v1443_v31, %v1443_v31  ;;  %v17243_v25 = vld [vmem:[#allocation23_spill] sm:$0xff] }
 0x324   : > { %v4143_v0 = vpop.permute.xlu0 %4142  ;;  %5457 = vrot.lane.b32.xlu1 %v11730_v58, %s13752_s28  ;;  %6672 = vmatprep.mubr.bf16.mxu1 %v6500_v54  ;;  %6040 = vst.msk [vmem:[#allocation2 + $0xec] sm:$0xf] %vm926_vm6, %v11759_v3  ;;  %v11565_v60 = vpack.c.bf16 %v1446_v45, %v1446_v45  ;;  %v11704_v58 = vpack.c.bf16 %v4616_v6, %v4616_v6  ;;  %v2052_v48 = vmax.f32 %v17243_v25, 0.0  ;;  %v2760_v31 = vmax.f32 %v17247_v44, 0.0  ;;  %v17249_v25 = vld [vmem:[#allocation8_spill] sm:$0xff] }
 0x325   : > { %4212 = vst.msk [vmem:[#allocation2 + $0xd0] sm:$0xf] %vm1622_vm12, %v4143_v0  ;;  %v5837_v53 = vpop.f32.mrb[24].mxu0  ;;  %6673 = vmatmul.mubr.bf16.vlgmr.msra.gmra.mrb[252].mxu1 %v6488_v17  ;;  %v11733_v11 = vpack.c.bf16 %v5324_v10, %v5324_v10  ;;  %v4618_v0 = vmax.f32 %v15357_v13, 0.0  ;;  %v5326_v13 = vmax.f32 %v15366_v12, 0.0  ;;  %v13546_v12 = vld [vmem:[%s17186_s3 + $0x8] sm:$0xff]  }
 0x326   : > { %v4726_v57 = vpop.permute.xlu1 %4725  ;;  %4757 = vrot.lane.b32.xlu0 %v11705_v22, %s13751_s27  ;;  %v5895_v27 = vmax.f32 %v5837_v53, 0.0  ;;  %v13037_v34 = vpop.f32.mrb[25].mxu0  ;;  %6680 = vmatprep.mubr.bf16.mxu1 %v6518_v8  ;;  %v11594_v26 = vpack.c.bf16 %v2052_v48, %v2052_v48  ;;  %v13545_v53 = vld [vmem:[%s17186_s3 + $0x48] sm:$0xff]   ;;  %v13551_v10 = vld [vmem:[%s17186_s3 + $0x58] sm:$0xff]   ;;  %v1445_v48 = vmax.f32 %v17249_v25, 0.0  ;;  %vm1651_vm3 = vcmask 516352  }
 0x327   : > { %4805 = vst.msk [vmem:[#allocation2 + $0x58] sm:$0xf] %vm2228_vm15, %v4726_v57  ;;  %13064 = vmatpush3.bf16.msra.mxu1 %v15615_v35  ;;  %v5840_v36 = vpop.f32.mrb[26].mxu0  ;;  %v6513_v35 = vshrl.u32 %v15621_v42, 16  ;;  %v11706_v47 = vpack.c.bf16 %v4618_v0, %v4618_v0  ;;  %v17245_v34 = vld [vmem:[#allocation17_spill] sm:$0xff] }
 0x328   : > { %v2174_v61 = vpop.permute.xlu0 %2173  ;;  %4753 = vrot.lane.b32.xlu1 %v11703_v24, %s13751_s27  ;;  %13065 = vmatprep.subr.bf16.mxu1 %v13538_v63  ;;  %v11760_v21 = vpack.c.bf16 %v5895_v27, %v5895_v27  ;;  %v5896_v23 = vmax.f32 %v5840_v36, 0.0  ;;  %v13038_v43 = vpop.f32.mrb[27].mxu0  ;;  %v17244_v24 = vld [vmem:[#allocation29_spill] sm:$0xff]  ;;  %v2049_v36 = vmax.f32 %v17245_v34, 0.0 }
 0x329   : > { %2245 = vst.msk [vmem:[#allocation2 + $0xc0] sm:$0xf] %vm2228_vm15, %v2174_v61  ;;  %v6515_v20 = vor.u32 %v6513_v35, %v6487_v5  ;;  %v4017_v1 = vmax.f32 %v17244_v24, 0.0  ;;  %v11735_v61 = vpack.c.bf16 %v5326_v13, %v5326_v13  ;;  %v13560_v24 = vld [vmem:[%s17186_s3 + $0x20] sm:$0xff]  }
 0x32a   : > { %v5434_v62 = vpop.permute.xlu1 %5433  ;;  %5465 = vrot.lane.b32.xlu0 %v11734_v39, %s13752_s28  ;;  %6041 = vst.msk [vmem:[#allocation2 + $0xf8] sm:$0xf] %vm926_vm6, %v11760_v21  ;;  %v11761_v19 = vpack.c.bf16 %v5896_v23, %v5896_v23  ;;  %v6521_v39 = vor.u32 %v6519_v37, %v6511_v51  ;;  %v13548_v21 = vld [vmem:[%s17186_s3 + $0x50] sm:$0xff]  }
 0x32b   : > { %5513 = vst.msk [vmem:[#allocation2 + $0x58] sm:$0xf] %vm2939_vm1, %v5434_v62  ;;  %13066 = vmatpush3.bf16.msra.mxu1 %v13538_v63  ;;  %v13544_v63 = vld [vmem:[%s17186_s3] sm:$0xff]   ;;  %v11679_v45 = vpack.c.bf16 %v4017_v1, %v4017_v1  ;;  %v13549_v51 = vld [vmem:[%s17186_s3 + $0x10] sm:$0xff]   ;;  %v11564_v1 = vpack.c.bf16 %v1445_v48, %v1445_v48 }
 0x32c   : > { %v2178_v49 = vpop.permute.xlu0 %2177  ;;  %5461 = vrot.lane.b32.xlu1 %v11732_v40, %s13752_s28  ;;  %12049 = vmatprep.subr.bf16.mxu1 %v13543_v15  ;;  %6042 = vst.msk [vmem:[#allocation2 + $0x104] sm:$0xf] %vm926_vm6, %v11761_v19  ;;  %v17246_v40 = vld [vmem:[#allocation31_spill] sm:$0xff]  ;;  %v11591_v19 = vpack.c.bf16 %v2049_v36, %v2049_v36  ;;  %v4619_v36 = vmax.f32 %v15364_v30, 0.0  ;;  %v13566_v30 = vld [vmem:[%s17186_s3 + $0x30] sm:$0xff]  }
 0x32d   : > { %2247 = vst.msk [vmem:[#allocation2 + $0xd8] sm:$0xf] %vm2228_vm15, %v2178_v49  ;;  %v5845_v42 = vpop.f32.mrb[28].mxu0  ;;  %6681 = vmatmul.mubr.bf16.gmra.mrb[0].mxu1 %v6515_v20  ;;  %v4019_v35 = vmax.f32 %v17246_v40, 0.0  ;;  %v13567_v40 = vld [vmem:[%s17186_s3 + $0x78] sm:$0xff]  }
 0x32e   : > { %v2887_v32 = vpop.permute.xlu1 %2886  ;;  %1591 = vrot.lane.b32.xlu0 %v11565_v60, %s13750_s16  ;;  %v5897_v2 = vmax.f32 %v5845_v42, 0.0  ;;  %v13041_v29 = vpop.f32.mrb[29].mxu0  ;;  %13067 = vmatprep.mubr.msk.bf16.mxu1 %vm6241_vm2, %v6512_v38  ;;  %v17248_v42 = vld [vmem:[#allocation7_spill] sm:$0xff] }
 0x32f   : > { %2957 = vst.msk [vmem:[#allocation2 + $0xcc] sm:$0xf] %vm2939_vm1, %v2887_v32  ;;  %v5848_v46 = vpop.f32.mrb[30].mxu0  ;;  %v11681_v32 = vpack.c.bf16 %v4019_v35, %v4019_v35  ;;  %v13552_v29 = vld [vmem:[%s17186_s3 + $0x18] sm:$0xff]  }
 0x330   : > { %v4728_v16 = vpop.permute.xlu0 %4727  ;;  %4755 = vrot.lane.b32.xlu1 %v11704_v58, %s13751_s27  ;;  %v11762_v5 = vpack.c.bf16 %v5897_v2, %v5897_v2  ;;  %v5898_v3 = vmax.f32 %v5848_v46, 0.0  ;;  %v13042_v22 = vpop.f32.mrb[31].mxu0  ;;  %v1444_v58 = vmax.f32 %v17248_v42, 0.0  ;;  %v11620_v46 = vpack.c.bf16 %v2760_v31, %v2760_v31  ;;  %v15769_v35 = vld [vmem:[#allocation2 + $0x60] ss:$12 sps:$4 sm:$0x3f]  }
 0x331   : > { %4806 = vst.msk [vmem:[#allocation2 + $0x64] sm:$0xf] %vm2228_vm15, %v4728_v16  ;;  %v13559_v22 = vld [vmem:[%s17186_s3 + $0x60] sm:$0xff]   ;;  %v13553_v44 = vld [vmem:[#allocation2 + $0x48] ss:$12 sps:$4 sm:$0xfe]  }
 0x332   : > { %v4730_v54 = vpop.permute.xlu1 %4729  ;;  %1585 = vrot.lane.b32.xlu0 %v11562_v55, %s13750_s16  ;;  %6043 = vst.msk [vmem:[#allocation2 + $0x110] sm:$0xf] %vm926_vm6, %v11762_v5  ;;  %v11763_v8 = vpack.c.bf16 %v5898_v3, %v5898_v3  ;;  %v13555_v20 = vld [vmem:[#allocation2 + $0x4c] ss:$12 sps:$4 sm:$0xfe]   ;;  %v11563_v0 = vpack.c.bf16 %v1444_v58, %v1444_v58  ;;  %v4621_v31 = vmax.f32 %v15383_v4, 0.0 }
 0x333   : > { %4807 = vst.msk [vmem:[#allocation2 + $0x70] sm:$0xf] %vm2228_vm15, %v4730_v54  ;;  %v6880_v5 = vrot.slane %v13555_v20, 1  ;;  %v17250_v54 = vld [vmem:[#allocation28_spill] sm:$0xff]  ;;  %v13569_v20 = vld [vmem:[%s17186_s3 + $0x80] sm:$0xff]   ;;  %v4620_v58 = vmax.f32 %v15380_v33, 0.0 }
 0x334   : > { %v5436_v17 = vpop.permute.xlu0 %5435  ;;  %5463 = vrot.lane.b32.xlu1 %v11733_v11, %s13752_s28  ;;  %6044 = vst.msk [vmem:[#allocation2 + $0x11c] sm:$0xf] %vm926_vm6, %v11763_v8  ;;  %v4016_v8 = vmax.f32 %v17250_v54, 0.0  ;;  %v17255_v4 = vld [vmem:[#allocation22_spill] sm:$0xff]  ;;  %v11709_v48 = vpack.c.bf16 %v4621_v31, %v4621_v31  ;;  %v13572_v33 = vld [vmem:[%s17186_s3 + $0x88] sm:$0xff]  }
 0x335   : > { %5514 = vst.msk [vmem:[#allocation2 + $0x64] sm:$0xf] %vm2939_vm1, %v5436_v17  ;;  %v5853_v57 = vpop.f32.mrb[32].mxu0  ;;  %13068 = vmatmul.mubr.msk.bf16.vlgmr.msra.gmra.mrb[4].mxu1 %vm6241_vm2, %v6521_v39  ;;  %v17251_v39 = vld [vmem:[#allocation21_spill] sm:$0xff]  ;;  %v11708_v54 = vpack.c.bf16 %v4620_v58, %v4620_v58 }
 0x336   : > { %v5438_v59 = vpop.permute.xlu1 %5437  ;;  %2197 = vrot.lane.b32.xlu0 %v11594_v26, %s13751_s27  ;;  %v5899_v50 = vmax.f32 %v5853_v57, 0.0  ;;  %v13045_v27 = vpop.f32.mrb[33].mxu0  ;;  %12050 = vmatpush3.bf16.msra.mxu1 %v13544_v63  ;;  %v2051_v17 = vmax.f32 %v17251_v39, 0.0  ;;  %v17252_v57 = vld [vmem:[#allocation19_spill] sm:$0xff]  ;;  %v6049_v39 = vld [vmem:[#allocation2 + $0x158] sm:$0x1] }
 0x337   : > { %5515 = vst.msk [vmem:[#allocation2 + $0x70] sm:$0xf] %vm2939_vm1, %v5438_v59  ;;  %v5856_v18 = vpop.f32.mrb[34].mxu0  ;;  %12051 = vmatprep.subr.bf16.mxu1 %v13545_v53  ;;  %v13561_v53 = vld [vmem:[%s17186_s3 + $0x68] sm:$0xff]   ;;  %v11678_v59 = vpack.c.bf16 %v4016_v8, %v4016_v8 }
 0x338   : > { %v2885_v15 = vpop.permute.xlu0 %2884  ;;  %4759 = vrot.lane.b32.xlu1 %v11706_v47, %s13751_s27  ;;  %v11764_v23 = vpack.c.bf16 %v5899_v50, %v5899_v50  ;;  %v5900_v43 = vmax.f32 %v5856_v18, 0.0  ;;  %v13046_v6 = vpop.f32.mrb[35].mxu0  ;;  %v2050_v47 = vmax.f32 %v17252_v57, 0.0  ;;  %v13562_v27 = vld [vmem:[%s17186_s3 + $0x28] sm:$0xff]   ;;  %v11593_v34 = vpack.c.bf16 %v2051_v17, %v2051_v17  ;;  %v13565_v18 = vld [vmem:[%s17186_s3 + $0x70] sm:$0xff]  }
 0x339   : > { %2956 = vst.msk [vmem:[#allocation2 + $0xc0] sm:$0xf] %vm2939_vm1, %v2885_v15  ;;  %v13581_v58 = vld [vmem:[#allocation2 + $0x84] ss:$12 sps:$4 sm:$0x3f]  }
 0x33a   : > { %v4732_v62 = vpop.permute.xlu1 %4731  ;;  %4160 = vrot.lane.b32.xlu0 %v11679_v45, %s13750_s16  ;;  %6045 = vst.msk [vmem:[#allocation2 + $0x128] sm:$0xf] %vm926_vm6, %v11764_v23  ;;  %v11765_v28 = vpack.c.bf16 %v5900_v43, %v5900_v43  ;;  %12052 = vmatpush3.bf16.msra.mxu1 %v13546_v12  ;;  %v11592_v45 = vpack.c.bf16 %v2050_v47, %v2050_v47  ;;  %v5327_v43 = vmax.f32 %v15373_v7, 0.0  ;;  %v13568_v7 = vld [vmem:[%s17186_s3 + $0x38] sm:$0xff]   ;;  %v15810_v47 = vld [vmem:[%s17186_s3 + $0x80] sm:$0xff]  }
 0x33b   : > { %4808 = vst.msk [vmem:[#allocation2 + $0x7c] sm:$0xf] %vm2228_vm15, %v4732_v62  ;;  %12053 = vmatprep.subr.bf16.mxu1 %v13548_v21  ;;  %v11707_v23 = vpack.c.bf16 %v4619_v36, %v4619_v36 }
 0x33c   : > { %v2889_v60 = vpop.permute.xlu0 %2888  ;;  %5467 = vrot.lane.b32.xlu1 %v11735_v61, %s13752_s28  ;;  %6046 = vst.msk [vmem:[#allocation2 + $0x134] sm:$0xf] %vm926_vm6, %v11765_v28  ;;  %v17253_v61 = vld [vmem:[#allocation20_spill] sm:$0xff]  ;;  %v17254_v28 = vld [vmem:[#allocation30_spill] sm:$0xff] }
 0x33d   : > { %2958 = vst.msk [vmem:[#allocation2 + $0xd8] sm:$0xf] %vm2939_vm1, %v2889_v60  ;;  %v5861_v49 = vpop.f32.mrb[36].mxu0  ;;  %v2761_v15 = vmax.f32 %v17253_v61, 0.0  ;;  %v11736_v60 = vpack.c.bf16 %v5327_v43, %v5327_v43 }
 0x33e   : > { %v5440_v38 = vpop.permute.xlu1 %5439  ;;  %2191 = vrot.lane.b32.xlu0 %v11591_v19, %s13751_s27  ;;  %v5901_v2 = vmax.f32 %v5861_v49, 0.0  ;;  %12054 = vmatpush3.bf16.msra.mxu1 %v13549_v51  ;;  %v15721_v55 = vld [vmem:[#allocation2 + $0x64] ss:$12 sps:$4 sm:$0x3f]   ;;  %v13049_v37 = vpop.f32.mrb[37].mxu0  ;;  %v4018_v51 = vmax.f32 %v17254_v28, 0.0 }
 0x33f   : > { %5516 = vst.msk [vmem:[#allocation2 + $0x7c] sm:$0xf] %vm2939_vm1, %v5440_v38  ;;  %12055 = vmatprep.subr.bf16.mxu1 %v13551_v10  ;;  %v6881_v3 = vrot.slane %v15721_v55, 1  ;;  %v11621_v62 = vpack.c.bf16 %v2761_v15, %v2761_v15  ;;  %v6878_v49 = vrot.slane %v15769_v35, 1  ;;  %v2762_v38 = vmax.f32 %v17255_v4, 0.0  ;;  %v5864_v25 = vpop.f32.mrb[38].mxu0 }
 0x340   : > { %v4734_v11 = vpop.permute.xlu0 %4733  ;;  %4164 = vrot.lane.b32.xlu1 %v11681_v32, %s13750_s16  ;;  %v11766_v16 = vpack.c.bf16 %v5901_v2, %v5901_v2  ;;  %v11680_v42 = vpack.c.bf16 %v4018_v51, %v4018_v51  ;;  %v6877_v2 = vrot.slane %v13553_v44, 1  ;;  %v5902_v37 = vmax.f32 %v5864_v25, 0.0  ;;  %v6743_v51 = vld [vmem:[%s17184_s1 + $0x21] sm:$0xff] }
 0x341   : > { %4809 = vst.msk [vmem:[#allocation2 + $0x88] sm:$0xf] %vm2228_vm15, %v4734_v11  ;;  %v6882_v26 = vsel %vm1767_vm4, %v6880_v5, %v6881_v3  ;;  %v15794_v11 = vld [vmem:[#allocation2 + $0x50] ss:$12 sps:$4 sm:$0xfe]   ;;  %v13050_v5 = vpop.f32.mrb[39].mxu0 }
 0x342   : > { %v1576_v63 = vpop.permute.xlu1 %1575  ;;  %2902 = vrot.lane.b32.xlu0 %v11620_v46, %s13752_s28  ;;  %6047 = vst.msk [vmem:[#allocation2 + $0x140] sm:$0xf] %vm926_vm6, %v11766_v16  ;;  %12056 = vmatpush3.bf16.msra.mxu1 %v13552_v29  ;;  %v5328_v29 = vmax.f32 %v15414_v14, 0.0  ;;  %v13576_v16 = vld [vmem:[#allocation2 + $0x74] ss:$12 sps:$4 sm:$0xfe]  }
 0x343   : > { %1643 = vst.msk [vmem:[#allocation2 + $0xf0] sm:$0xf] %vm1622_vm12, %v1576_v63  ;;  %7036 = vmatprep.mubr.bf16.mxu1 %v6882_v26  ;;  %12057 = vmatprep.subr.bf16.mxu1 %v13559_v22  ;;  %v6879_v22 = vsel %vm1767_vm4, %v6877_v2, %v6878_v49  ;;  %v13577_v14 = vld [vmem:[#allocation2 + $0x8c] ss:$12 sps:$4 sm:$0x3f]   ;;  %v11767_v26 = vpack.c.bf16 %v5902_v37, %v5902_v37  ;;  %v5330_v4 = vmax.f32 %v15448_v41, 0.0 }
 0x344   : > { %v5442_v13 = vpop.permute.xlu0 %5441  ;;  %1587 = vrot.lane.b32.xlu1 %v11563_v0, %s13750_s16  ;;  %v15801_v63 = vld [vmem:[#allocation2 + $0x68] ss:$12 sps:$4 sm:$0x3f]   ;;  %v7284_v36 = vshrl.u32 %v13577_v14, 16  ;;  %v7287_v15 = vshll.u32 %v13577_v14, 16  ;;  %v7253_v25 = vshll.u32 %v13581_v58, 16 }
 0x345   : > { %5517 = vst.msk [vmem:[#allocation2 + $0x88] sm:$0xf] %vm2939_vm1, %v5442_v13  ;;  %v11622_v13 = vpack.c.bf16 %v2762_v38, %v2762_v38  ;;  %v6884_v61 = vrot.slane %v15801_v63, 1  ;;  %v8274_v14 = vld [vmem:[%s17184_s1 + $0x7d] sm:$0xff] }
 0x346   : > { %v4147_v50 = vpop.permute.xlu1 %4146  ;;  %1589 = vrot.lane.b32.xlu0 %v11564_v1, %s13750_s16  ;;  %12058 = vmatpush3.bf16.msra.mxu1 %v13560_v24  ;;  %6048 = vst.msk [vmem:[#allocation2 + $0x14c] sm:$0xf] %vm926_vm6, %v11767_v26  ;;  %v7286_v44 = vrot.slane %v7284_v36, 1  ;;  %v7255_v41 = vrot.slane %v7253_v25, 2  ;;  %v11739_v26 = vpack.c.bf16 %v5330_v4, %v5330_v4  ;;  %v8641_v36 = vld [vmem:[%s17184_s1 + $0xae] sm:$0x1] }
 0x347   : > { %4214 = vst.msk [vmem:[#allocation2 + $0xe8] sm:$0xf] %vm1622_vm12, %v4147_v50  ;;  %12059 = vmatprep.subr.bf16.mxu1 %v13561_v53  ;;  %v11737_v53 = vpack.c.bf16 %v5328_v29, %v5328_v29  ;;  %v13578_v50 = vld [vmem:[#allocation2 + $0x6c] ss:$12 sps:$4 sm:$0xfe]  }
 0x348   : > { %v1574_v12 = vpop.permute.xlu0 %1573  ;;  %4158 = vrot.lane.b32.xlu1 %v11678_v59, %s13750_s16  ;;  %v7276_v59 = vshrl.u32 %v13576_v16, 16  ;;  %v7245_v28 = vshll.u32 %v13578_v50, 16  ;;  %v15863_v63 = vld [vmem:[#allocation2 + $0xb0] ss:$12 sps:$4 sm:$0x7f]  }
 0x349   : > { %1642 = vst.msk [vmem:[#allocation2 + $0xe4] sm:$0xf] %vm1622_vm12, %v1574_v12  ;;  %v13580_v12 = vld [vmem:[#allocation2 + $0x70] ss:$12 sps:$4 sm:$0xfe]  }
 0x34a   : > { %v4151_v21 = vpop.permute.xlu1 %4150  ;;  %2195 = vrot.lane.b32.xlu0 %v11593_v34, %s13751_s27  ;;  %12060 = vmatpush3.bf16.msra.mxu1 %v13562_v27  ;;  %v4622_v27 = vmax.f32 %v15391_v9, 0.0  ;;  %v7279_v34 = vshll.u32 %v13576_v16, 16  ;;  %v6745_v9 = vld [vmem:[%s17184_s1 + $0x31] sm:$0x1]  ;;  %v7262_v31 = vshll.u32 %v13580_v12, 16  ;;  %v7247_v35 = vrot.slane %v7245_v28, 2 }
 0x34b   : > { %4216 = vst.msk [vmem:[#allocation2 + $0x100] sm:$0xf] %vm1622_vm12, %v4151_v21  ;;  %12061 = vmatprep.subr.bf16.mxu1 %v13565_v18  ;;  %v7513_v4 = vld [vmem:[%s17184_s1 + $0x53] sm:$0xff]  ;;  %v7109_v25 = vld [vmem:[%s17184_s1 + $0x4a] sm:$0x1] }
 0x34c   : > { %v1578_v6 = vpop.permute.xlu0 %1577  ;;  %2193 = vrot.lane.b32.xlu1 %v11592_v45, %s13751_s27  ;;  %v6883_v45 = vrot.slane %v15794_v11, 1 }
 0x34d   : > { %1644 = vst.msk [vmem:[#allocation2 + $0xfc] sm:$0xf] %vm1622_vm12, %v1578_v6 }
 0x34e   : > { %v2182_v19 = vpop.permute.xlu1 %2181  ;;  %4761 = vrot.lane.b32.xlu0 %v11707_v23, %s13751_s27  ;;  %12062 = vmatpush3.bf16.msra.mxu1 %v13566_v30  ;;  %v5869_v0 = vpop.f32.mrb[40].mxu0  ;;  %v17257_v23 = vld [vmem:[#allocation24_spill] sm:$0xff] }
 0x34f   : > { %2249 = vst.msk [vmem:[#allocation2 + $0xf0] sm:$0xf] %vm2228_vm15, %v2182_v19  ;;  %12063 = vmatprep.subr.bf16.mxu1 %v13567_v40  ;;  %v5903_v24 = vmax.f32 %v5869_v0, 0.0  ;;  %v13053_v1 = vpop.f32.mrb[41].mxu0  ;;  %v2763_v43 = vmax.f32 %v17257_v23, 0.0  ;;  %v7278_v40 = vrot.slane %v7276_v59, 1 }
 0x350   : > { %v4149_v10 = vpop.permute.xlu0 %4148  ;;  %2904 = vrot.lane.b32.xlu1 %v11621_v62, %s13752_s28  ;;  %v5872_v17 = vpop.f32.mrb[42].mxu0  ;;  %v7242_v62 = vshrl.u32 %v13578_v50, 16  ;;  %v7281_v19 = vrot.slane %v7279_v34, 2  ;;  %v13586_v50 = vld [vmem:[%s17186_s3] sm:$0xff]  }
 0x351   : > { %4215 = vst.msk [vmem:[#allocation2 + $0xf4] sm:$0xf] %vm1622_vm12, %v4149_v10  ;;  %v11768_v55 = vpack.c.bf16 %v5903_v24, %v5903_v24  ;;  %v7107_v23 = vld [vmem:[%s17184_s1 + $0x3a] sm:$0xff] }
 0x352   : > { %v4736_v32 = vpop.permute.xlu1 %4735  ;;  %5469 = vrot.lane.b32.xlu0 %v11736_v60, %s13752_s28  ;;  %12064 = vmatpush3.bf16.msra.mxu1 %v13568_v7  ;;  %v7259_v7 = vshrl.u32 %v13580_v12, 16  ;;  %v11710_v60 = vpack.c.bf16 %v4622_v27, %v4622_v27  ;;  %v7244_v29 = vrot.slane %v7242_v62, 1  ;;  %v7282_v37 = vor.u32 %v7281_v19, %v7278_v40  ;;  %v13589_v12 = vld [vmem:[%s17186_s3 + $0x80] sm:$0xff]   ;;  %v13593_v40 = vld [vmem:[%s17186_s3 + $0x10] sm:$0xff]   ;;  %v13594_v62 = vld [vmem:[%s17186_s3 + $0x88] sm:$0xff]  }
 0x353   : > { %4810 = vst.msk [vmem:[#allocation2 + $0x94] sm:$0xf] %vm2228_vm15, %v4736_v32  ;;  %13071 = vmatprep.subr.bf16.mxu1 %v13569_v20  ;;  %v6050_v30 = vsel %vm14580_vm11, %v11768_v55, %v6049_v39  ;;  %v11623_v32 = vpack.c.bf16 %v2763_v43, %v2763_v43  ;;  %v13592_v43 = vld [vmem:[%s17186_s3 + $0x50] sm:$0xff]  }
 0x354   : > { %v2180_v46 = vpop.permute.xlu0 %2179  ;;  %4162 = vrot.lane.b32.xlu1 %v11680_v42, %s13750_s16  ;;  %6051 = vst [vmem:[#allocation2 + $0x158] sm:$0x1] %v6050_v30  ;;  %v7289_v42 = vrot.slane %v7287_v15, 2  ;;  %v7248_v1 = vor.u32 %v7247_v35, %v7244_v29  ;;  %v7654_v15 = vrot.slane %v15863_v63, 2  ;;  %v13607_v35 = vld [vmem:[%s17186_s3 + $0x48] sm:$0xff]   ;;  %v13618_v63 = vld [vmem:[%s17186_s3 + $0x38] sm:$0xff]  }
 0x355   : > { %2248 = vst.msk [vmem:[#allocation2 + $0xe4] sm:$0xf] %vm2228_vm15, %v2180_v46  ;;  %7037 = vmatmul.mubr.bf16.vlgmr.msra.gmra.mrb[8].mxu1 %v6879_v22  ;;  %v7264_v46 = vrot.slane %v7262_v31, 2 }
 0x356   : > { %v5444_v8 = vpop.permute.xlu1 %5443  ;;  %4765 = vrot.lane.b32.xlu0 %v11709_v48, %s13751_s27  ;;  %7044 = vmatprep.mubr.bf16.mxu1 %v6881_v3  ;;  %v13054_v3 = vpop.f32.mrb[43].mxu0  ;;  %v7261_v48 = vrot.slane %v7259_v7, 1  ;;  %v7290_v5 = vor.u32 %v7289_v42, %v7286_v44  ;;  %v13595_v44 = vld [vmem:[%s17186_s3 + $0x58] sm:$0xff]   ;;  %v13597_v7 = vld [vmem:[%s17186_s3 + $0x40] sm:$0xff]  }
 0x357   : > { %5518 = vst.msk [vmem:[#allocation2 + $0x94] sm:$0xf] %vm2939_vm1, %v5444_v8  ;;  %13072 = vmatpush3.bf16.msra.mxu1 %v13569_v20  ;;  %v6885_v20 = vsel %vm1767_vm4, %v6883_v45, %v6884_v61  ;;  %v5329_v8 = vmax.f32 %v15436_v52, 0.0  ;;  %v13590_v3 = vld [vmem:[#allocation2 + $0x98] ss:$12 sps:$4 sm:$0xfc]   ;;  %vm16144_vm4 = vmand %vm1651_vm3, %vm956_vm9 }
 0x358   : > { %v2184_v57 = vpop.permute.xlu0 %2183  ;;  %4763 = vrot.lane.b32.xlu1 %v11708_v54, %s13751_s27  ;;  %13073 = vmatprep.subr.bf16.mxu1 %v13572_v33  ;;  %v7265_v17 = vor.u32 %v7264_v46, %v7261_v48  ;;  %v7291_v52 = vsel %vm2373_vm5, %v7282_v37, %v7290_v5  ;;  %v13588_v45 = vld [vmem:[%s17186_s3 + $0x8] sm:$0xff]   ;;  %v13598_v42 = vld [vmem:[%s17186_s3] sm:$0xff]  }
 0x359   : > { %2250 = vst.msk [vmem:[#allocation2 + $0xfc] sm:$0xf] %vm2228_vm15, %v2184_v57  ;;  %v11738_v27 = vpack.c.bf16 %v5329_v8, %v5329_v8  ;;  %v13606_v48 = vld [vmem:[%s17186_s3 + $0x20] sm:$0xff]   ;;  %v13609_v37 = vld [vmem:[%s17186_s3 + $0x68] sm:$0xff]  }
 0x35a   : > { %v2893_v18 = vpop.permute.xlu1 %2892  ;;  %2906 = vrot.lane.b32.xlu0 %v11622_v13, %s13752_s28  ;;  %v8276_v8 = vld [vmem:[%s17184_s1 + $0x8d] sm:$0xff] }
 0x35b   : > { %2960 = vst.msk [vmem:[#allocation2 + $0xf0] sm:$0xf] %vm2939_vm1, %v2893_v18  ;;  %13074 = vmatpush3.bf16.msra.mxu1 %v13572_v33 }
 0x35c   : > { %v2891_v6 = vpop.permute.xlu0 %2890  ;;  %5471 = vrot.lane.b32.xlu1 %v11737_v53, %s13752_s28  ;;  %13079 = vmatprep.subr.bf16.mxu1 %v15810_v47  ;;  %v13585_v53 = vld [vmem:[%s17186_s3 + $0x88] sm:$0xff]  }
 0x35d   : > { %2959 = vst.msk [vmem:[#allocation2 + $0xe4] sm:$0xf] %vm2939_vm1, %v2891_v6  ;;  %7045 = vmatmul.mubr.bf16.gmra.mrb[12].mxu1 %v6878_v49  ;;  %v7250_v49 = vshrl.u32 %v13581_v58, 16  ;;  %v8277_v6 = vld [vmem:[%s17184_s1 + $0x95] sm:$0x1] }
 0x35e   : > { %v4738_v10 = vpop.permute.xlu1 %4737  ;;  %6763 = vperm.xlu0 %13299, %v6745_v9   ;;  %13075 = vmatprep.mubr.msk.bf16.mxu1 %vm6241_vm2, %v6885_v20  ;;  %v13583_v38 = vld [vmem:[#allocation2 + $0x88] ss:$12 sps:$4 sm:$0x3f]   ;;  %v13596_v20 = vld [vmem:[%s17186_s3 + $0x18] sm:$0xff]  }
 0x35f   : > { %4811 = vst.msk [vmem:[#allocation2 + $0xa0] sm:$0xf] %vm2228_vm15, %v4738_v10  ;;  %v7267_v33 = vshrl.u32 %v13583_v38, 16  ;;  %v7270_v11 = vshll.u32 %v13583_v38, 16  ;;  %v7252_v22 = vrot.slane %v7250_v49, 1  ;;  %v6742_v10 = vld [vmem:[%s17184_s1 + $0x19] sm:$0xff] }
 0x360   : > { %v2895_v2 = vpop.permute.xlu0 %2894  ;;  %4767 = vrot.lane.b32.xlu1 %v11710_v60, %s13751_s27  ;;  %v13599_v38 = vld [vmem:[%s17186_s3 + $0x60] sm:$0xff]  }
 0x361   : > { %2961 = vst.msk [vmem:[#allocation2 + $0xfc] sm:$0xf] %vm2939_vm1, %v2895_v2  ;;  %v7269_v0 = vrot.slane %v7267_v33, 1  ;;  %v7272_v54 = vrot.slane %v7270_v11, 2  ;;  %v7256_v39 = vor.u32 %v7255_v41, %v7252_v22  ;;  %v9045_v33 = vld [vmem:[%s17184_s1 + $0xb7] sm:$0xff]  ;;  %v13608_v11 = vld [vmem:[%s17186_s3 + $0x8] sm:$0xff]  }
 0x362   : > { %v5446_v16 = vpop.permute.xlu1 %5445  ;;  %6753 = vperm.xlu0 %13299, %v6743_v51   ;;  %v8639_v51 = vld [vmem:[%s17184_s1 + $0x9e] sm:$0xff] }
 0x363   : > { %5519 = vst.msk [vmem:[#allocation2 + $0xa0] sm:$0xf] %vm2939_vm1, %v5446_v16  ;;  %v7273_v13 = vor.u32 %v7272_v54, %v7269_v0  ;;  %v7257_v59 = vsel %vm2373_vm5, %v7248_v1, %v7256_v39  ;;  %v8275_v41 = vld [vmem:[%s17184_s1 + $0x85] sm:$0xff]  ;;  %v13612_v0 = vld [vmem:[%s17186_s3 + $0x10] sm:$0xff]  }
 0x364   : > { %v4740_v24 = vpop.permute.xlu0 %4739  ;;  %2908 = vrot.lane.b32.xlu1 %v11623_v32, %s13752_s28  ;;  %v13614_v1 = vld [vmem:[%s17186_s3 + $0x30] sm:$0xff]  }
 0x365   : > { %4812 = vst.msk [vmem:[#allocation2 + $0xac] sm:$0xf] %vm2228_vm15, %v4740_v24  ;;  %13076 = vmatmul.mubr.msk.bf16.vlgmr.msra.gmra.mrb[16].mxu1 %vm6241_vm2, %v6884_v61  ;;  %v7274_v55 = vsel %vm2373_vm5, %v7265_v17, %v7273_v13  ;;  %v7653_v61 = vrot.slane %v13590_v3, 2  ;;  %v13615_v24 = vld [vmem:[%s17186_s3 + $0x58] sm:$0xff]   ;;  %v13619_v3 = vld [vmem:[%s17186_s3 + $0x60] sm:$0xff]   ;;  %vm2257_vm5 = vcmask 778752  }
 0x366   : > { %v4742_v57 = vpop.permute.xlu1 %4741  ;;  %8280 = vperm.xlu0 %13299, %v8274_v14   ;;  %13080 = vmatpush3.bf16.msra.mxu1 %v15810_v47  ;;  %v13587_v47 = vld [vmem:[%s17186_s3 + $0x48] sm:$0xff]   ;;  %v7106_v17 = vld [vmem:[%s17184_s1 + $0x32] sm:$0xff] }
 0x367   : > { %4813 = vst.msk [vmem:[#allocation2 + $0xb8] sm:$0xf] %vm2228_vm15, %v4742_v57  ;;  %13083 = vmatprep.mubr.msk.bf16.mxu1 %vm6241_vm2, %v7291_v52  ;;  %7442 = vmatprep.mubr.bf16.mxu0 %v7274_v55  ;;  %v7655_v28 = vsel %vm3084_vm7, %v7653_v61, %v7654_v15  ;;  %v13610_v14 = vld [vmem:[%s17186_s3 + $0x28] sm:$0xff]   ;;  %v13628_v52 = vld [vmem:[#allocation2 + $0xd4] ss:$12 sps:$4 sm:$0x7f]  }
 0x368   : > { %v5448_v34 = vpop.permute.xlu0 %5447  ;;  %5475 = vrot.lane.b32.xlu1 %v11739_v26, %s13752_s28  ;;  %7443 = vmatmul.mubr.bf16.vlgmr.msra.gmra.mrb[44].mxu0 %v7257_v59  ;;  %v13613_v26 = vld [vmem:[%s17186_s3 + $0x70] sm:$0xff]   ;;  %v13627_v57 = vld [vmem:[#allocation2 + $0xbc] ss:$12 sps:$4 sm:$0xfc]   ;;  %v7515_v55 = vld [vmem:[%s17184_s1 + $0x63] sm:$0x1] }
 0x369   : > { %5520 = vst.msk [vmem:[#allocation2 + $0xac] sm:$0xf] %vm2939_vm1, %v5448_v34  ;;  %13081 = vmatprep.subr.bf16.mxu1 %v13585_v53  ;;  %12114 = vmatpush3.bf16.msra.mxu0 %v13586_v50  ;;  %v15992_v59 = vld [vmem:[#allocation2 + $0xa8] ss:$12 sps:$4 sm:$0x7f]   ;;  %v8046_v61 = vshrl.u32 %v13628_v52, 16 }
 0x36a   : > { %7450 = vmatprep.mubr.bf16.mxu0 %v7273_v13  ;;  %v5450_v18 = vpop.permute.xlu1 %5449  ;;  %8659 = vperm.xlu0 %13299, %v8641_v36   ;;  %v13602_v31 = vld [vmem:[#allocation2 + $0x94] ss:$12 sps:$4 sm:$0xfc]   ;;  %v13616_v13 = vld [vmem:[%s17186_s3 + $0x18] sm:$0xff]  }
 0x36b   : > { %5521 = vst.msk [vmem:[#allocation2 + $0xb8] sm:$0xf] %vm2939_vm1, %v5450_v18  ;;  %13082 = vmatpush3.bf16.msra.mxu1 %v13585_v53  ;;  %12115 = vmatprep.subr.bf16.mxu0 %v13587_v47  ;;  %v7650_v2 = vrot.slane %v13602_v31, 2  ;;  %v13617_v53 = vld [vmem:[%s17186_s3 + $0x78] sm:$0xff]   ;;  %v13620_v47 = vld [vmem:[%s17186_s3 + $0x20] sm:$0xff]   ;;  %v8038_v18 = vshrl.u32 %v13627_v57, 16 }
 0x36c   : > { %v4746_v30 = vpop.permute.xlu0 %4745  ;;  %5473 = vrot.lane.b32.xlu1 %v11738_v27, %s13752_s28  ;;  %13087 = vmatprep.subr.bf16.mxu1 %v13589_v12  ;;  %v13600_v27 = vld [vmem:[#allocation2 + $0x90] ss:$12 sps:$4 sm:$0xfc]   ;;  %v8048_v31 = vrot.slane %v8046_v61, 2 }
 0x36d   : > { %4815 = vst.msk [vmem:[#allocation2 + $0xd0] sm:$0xf] %vm2228_vm15, %v4746_v30  ;;  %12116 = vmatpush3.bf16.msra.mxu0 %v13588_v45  ;;  %v8638_v36 = vld [vmem:[%s17184_s1 + $0x96] sm:$0xff]  ;;  %v8041_v45 = vshll.u32 %v13627_v57, 16  ;;  %v7648_v30 = vrot.slane %v15992_v59, 2 }
 0x36e   : > { %v4744_v9 = vpop.permute.xlu1 %4743  ;;  %13084 = vmatmul.mubr.msk.bf16.vlgmr.msra.gmra.mrb[20].mxu1 %vm6241_vm2, %v7290_v5  ;;  %7117 = vperm.xlu0 %13299, %v7107_v23   ;;  %v13611_v5 = vld [vmem:[%s17186_s3 + $0x50] sm:$0xff]   ;;  %v13630_v57 = vld [vmem:[%s17186_s3 + $0x38] sm:$0xff]  }
 0x36f   : > { %4814 = vst.msk [vmem:[#allocation2 + $0xc4] sm:$0xf] %vm2228_vm15, %v4744_v9  ;;  %13088 = vmatpush3.bf16.msra.mxu1 %v13589_v12  ;;  %13091 = vmatprep.mubr.msk.bf16.mxu1 %vm6241_vm2, %v7655_v28  ;;  %v9047_v12 = vld [vmem:[%s17184_s1 + $0xc7] sm:$0x1] }
 0x370   : > { %12117 = vmatprep.subr.bf16.mxu0 %v13592_v43  ;;  %v5454_v19 = vpop.permute.xlu0 %5453  ;;  %8295 = vperm.xlu1 %13300, %v8277_v6   ;;  %v13621_v43 = vld [vmem:[%s17186_s3 + $0x68] sm:$0xff]   ;;  %v13622_v9 = vld [vmem:[%s17186_s3 + $0x80] sm:$0xff]  }
 0x371   : > { %5523 = vst.msk [vmem:[#allocation2 + $0xd0] sm:$0xf] %vm2939_vm1, %v5454_v19  ;;  %7451 = vmatmul.mubr.bf16.gmra.mrb[48].mxu0 %v7256_v39  ;;  %13089 = vmatprep.subr.bf16.mxu1 %v13594_v62  ;;  %v13631_v6 = vld [vmem:[#allocation2 + $0xb4] ss:$12 sps:$4 sm:$0xfc]   ;;  %v13623_v19 = vld [vmem:[%s17186_s3 + $0x28] sm:$0xff]  }
 0x372   : > { %12118 = vmatpush3.bf16.msra.mxu0 %v13593_v40  ;;  %v5452_v60 = vpop.permute.xlu1 %5451  ;;  %8649 = vperm.xlu0 %13299, %v8639_v51   ;;  %v15922_v58 = vld [vmem:[#allocation2 + $0xac] ss:$12 sps:$4 sm:$0x7f]  }
 0x373   : > { %5522 = vst.msk [vmem:[#allocation2 + $0xc4] sm:$0xf] %vm2939_vm1, %v5452_v60  ;;  %13090 = vmatpush3.bf16.msra.mxu1 %v13594_v62  ;;  %12119 = vmatprep.subr.bf16.mxu0 %v13595_v44  ;;  %v7651_v29 = vrot.slane %v15922_v58, 2  ;;  %v7647_v62 = vrot.slane %v13600_v27, 2  ;;  %v7512_v51 = vld [vmem:[%s17184_s1 + $0x4b] sm:$0xff]  ;;  %v8040_v44 = vrot.slane %v8038_v18, 2 }
 0x374   : > { %v1580_v32 = vpop.permute.xlu0 %1579  ;;  %12145 = vmatprep.subr.bf16.mxu1 %v13597_v7  ;;  %6748 = vperm.xlu1 %13300, %v6742_v10   ;;  %v8043_v7 = vrot.slane %v8041_v45, 3  ;;  %v13625_v58 = vld [vmem:[%s17186_s3 + $0x30] sm:$0xff]   ;;  %v13641_v18 = vld [vmem:[#allocation2 + $0xe0] ss:$12 sps:$4 sm:$0xf8]  }
 0x375   : > { %1645 = vst.msk [vmem:[#allocation2 + $0x108] sm:$0xf] %vm1622_vm12, %v1580_v32  ;;  %v7652_v46 = vsel %vm3084_vm7, %v7650_v2, %v7651_v29  ;;  %v7649_v10 = vsel %vm3084_vm7, %v7647_v62, %v7648_v30  ;;  %v13624_v32 = vld [vmem:[%s17186_s3 + $0x70] sm:$0xff]   ;;  %v8007_v2 = vshll.u32 %v13631_v6, 16  ;;  %v16086_v45 = vld [vmem:[#allocation2 + $0xf8] ss:$12 sps:$4 sm:$0xff]   ;;  %vm16201_vm7 = vmand %vm2257_vm5, %vm956_vm9 }
 0x376   : > { %12120 = vmatpush3.bf16.msra.mxu0 %v13596_v20  ;;  %v1582_v49 = vpop.permute.xlu1 %1581  ;;  %13092 = vmatmul.mubr.msk.bf16.vlgmr.msra.gmra.mrb[24].mxu1 %vm6241_vm2, %v7654_v15  ;;  %v8049_v15 = vshll.u32 %v13628_v52, 16  ;;  %v7877_v62 = vld [vmem:[%s17184_s1 + $0x6c] sm:$0xff] }
 0x377   : > { %1646 = vst.msk [vmem:[#allocation2 + $0x114] sm:$0xf] %vm1622_vm12, %v1582_v49  ;;  %7523 = vperm.xlu0 %13299, %v7513_v4   ;;  %12146 = vmatpush3.bf16.msra.mxu1 %v13598_v42  ;;  %v9046_v42 = vld [vmem:[%s17184_s1 + $0xbf] sm:$0xff]  ;;  %v13629_v4 = vld [vmem:[%s17186_s3 + $0x88] sm:$0xff]  }
 0x378   : > { %12121 = vmatprep.subr.bf16.mxu0 %v13599_v38  ;;  %7806 = vmatprep.mubr.bf16.mxu0 %v7652_v46  ;;  %v1584_v16 = vpop.permute.xlu0 %1583  ;;  %v8051_v60 = vrot.slane %v8049_v15, 3  ;;  %v8004_v38 = vshrl.u32 %v13631_v6, 16  ;;  %v7879_v46 = vld [vmem:[%s17184_s1 + $0x7c] sm:$0x1]  ;;  %v7108_v15 = vld [vmem:[%s17184_s1 + $0x42] sm:$0xff]  ;;  %v8415_v6 = vrot.slane %v13641_v18, 3 }
 0x379   : > { %1647 = vst.msk [vmem:[#allocation2 + $0x120] sm:$0xf] %vm1622_vm12, %v1584_v16  ;;  %7127 = vperm.xlu1 %13300, %v7109_v25   ;;  %12147 = vmatprep.subr.bf16.mxu1 %v13607_v35  ;;  %v13667_v18 = vld [vmem:[%s17186_s3 + $0x18] sm:$0xff]  }
 0x37a   : > { %12122 = vmatpush3.bf16.msra.mxu0 %v13606_v48  ;;  %v4153_v22 = vpop.permute.xlu1 %4152  ;;  %v13633_v40 = vld [vmem:[#allocation2 + $0xb8] ss:$12 sps:$4 sm:$0xfc]   ;;  %v9044_v48 = vld [vmem:[%s17184_s1 + $0xaf] sm:$0xff] }
 0x37b   : > { %4217 = vst.msk [vmem:[#allocation2 + $0x10c] sm:$0xf] %vm1622_vm12, %v4153_v22  ;;  %9055 = vperm.xlu0 %13299, %v9045_v33   ;;  %12148 = vmatpush3.bf16.msra.mxu1 %v13608_v11  ;;  %v8021_v35 = vshrl.u32 %v13633_v40, 16  ;;  %v8024_v49 = vshll.u32 %v13633_v40, 16  ;;  %v16054_v11 = vor.u32 %v8051_v60, %v8048_v31  ;;  %v8006_v22 = vrot.slane %v8004_v38, 2  ;;  %v13645_v31 = vld [vmem:[%s17186_s3 + $0x50] sm:$0xff]  }
 0x37c   : > { %12123 = vmatprep.subr.bf16.mxu0 %v13609_v37  ;;  %v4155_v54 = vpop.permute.xlu0 %4154  ;;  %12149 = vmatprep.subr.bf16.mxu1 %v13611_v5  ;;  %v13634_v33 = vld [vmem:[#allocation2 + $0xcc] ss:$12 sps:$4 sm:$0x7f]   ;;  %v8416_v40 = vrot.slane %v16086_v45, 3  ;;  %v13668_v45 = vld [vmem:[%s17186_s3 + $0x30] sm:$0xff]  }
 0x37d   : > { %4218 = vst.msk [vmem:[#allocation2 + $0x118] sm:$0xf] %vm1622_vm12, %v4155_v54  ;;  %8285 = vperm.xlu1 %13300, %v8275_v41   ;;  %v13626_v5 = vld [vmem:[%s17186_s3 + $0x78] sm:$0xff]   ;;  %v8009_v41 = vrot.slane %v8007_v2, 3  ;;  %v16062_v54 = vld [vmem:[%s17186_s3 + $0x80] sm:$0xff]  }
 0x37e   : > { %12124 = vmatpush3.bf16.msra.mxu0 %v13610_v14  ;;  %v4748_v39 = vpop.permute.xlu1 %4747  ;;  %v8012_v14 = vshrl.u32 %v13634_v33, 16  ;;  %v8417_v60 = vsel %vm4337_vm13, %v8415_v6, %v8416_v40  ;;  %v13648_v2 = vld [vmem:[%s17186_s3 + $0x58] sm:$0xff]  }
 0x37f   : > { %4816 = vst.msk [vmem:[#allocation2 + $0xdc] sm:$0xf] %vm2228_vm15, %v4748_v39  ;;  %8290 = vperm.xlu0 %13299, %v8276_v8   ;;  %12150 = vmatpush3.bf16.msra.mxu1 %v13612_v0  ;;  %v8015_v0 = vshll.u32 %v13634_v33, 16  ;;  %v8023_v8 = vrot.slane %v8021_v35, 2  ;;  %v13650_v33 = vld [vmem:[%s17186_s3 + $0x18] sm:$0xff]  }
 0x380   : > { %12125 = vmatprep.subr.bf16.mxu0 %v13613_v26  ;;  %v2186_v50 = vpop.permute.xlu0 %2185  ;;  %12151 = vmatprep.subr.bf16.mxu1 %v13615_v24  ;;  %v8026_v26 = vrot.slane %v8024_v49, 3  ;;  %v9400_v49 = vld [vmem:[%s17184_s1 + $0xd0] sm:$0xff]  ;;  %v13672_v6 = vld [vmem:[%s17186_s3 + $0x38] sm:$0xff]  }
 0x381   : > { %2251 = vst.msk [vmem:[#allocation2 + $0x108] sm:$0xf] %vm2228_vm15, %v2186_v50  ;;  %7112 = vperm.xlu1 %13300, %v7106_v17   ;;  %v6744_v17 = vld [vmem:[%s17184_s1 + $0x29] sm:$0xff] }
 0x382   : > { %12126 = vmatpush3.bf16.msra.mxu0 %v13614_v1  ;;  %v5456_v34 = vpop.permute.xlu1 %5455 }
 0x383   : > { %5524 = vst.msk [vmem:[#allocation2 + $0xdc] sm:$0xf] %vm2939_vm1, %v5456_v34  ;;  %7533 = vperm.xlu0 %13299, %v7515_v55   ;;  %12152 = vmatpush3.bf16.msra.mxu1 %v13616_v13  ;;  %v8014_v13 = vrot.slane %v8012_v14, 2  ;;  %v13637_v34 = vld [vmem:[%s17186_s3 + $0x40] sm:$0xff]   ;;  %v13653_v14 = vld [vmem:[%s17186_s3 + $0x8] sm:$0xff]  }
 0x384   : > { %12127 = vmatprep.subr.bf16.mxu0 %v13617_v53  ;;  %v2190_v23 = vpop.permute.xlu0 %2189  ;;  %12153 = vmatprep.subr.bf16.mxu1 %v13619_v3  ;;  %v8017_v53 = vrot.slane %v8015_v0, 3  ;;  %v13654_v0 = vld [vmem:[%s17186_s3 + $0x20] sm:$0xff]  }
 0x385   : > { %2253 = vst.msk [vmem:[#allocation2 + $0x120] sm:$0xf] %vm2228_vm15, %v2190_v23  ;;  %8644 = vperm.xlu1 %13300, %v8638_v36   ;;  %v8010_v36 = vor.u32 %v8009_v41, %v8006_v22  ;;  %v13638_v23 = vld [vmem:[%s17186_s3] sm:$0xff]  }
 0x386   : > { %12128 = vmatpush3.bf16.msra.mxu0 %v13618_v63  ;;  %v4157_v28 = vpop.permute.xlu1 %4156  ;;  %v6351_v63 = vld [vmem:[%s17184_s1 + $0x8] sm:$0xff]  ;;  %v16077_v27 = vor.u32 %v8017_v53, %v8014_v13  ;;  %v6350_v41 = vld [vmem:[%s17184_s1] sm:$0xff] }
 0x387   : > { %4219 = vst.msk [vmem:[#allocation2 + $0x124] sm:$0xf] %vm1622_vm12, %v4157_v28  ;;  %9065 = vperm.xlu0 %13299, %v9047_v12   ;;  %12154 = vmatpush3.bf16.msra.mxu1 %v13620_v47  ;;  %v8027_v47 = vor.u32 %v8026_v26, %v8023_v8  ;;  %v13656_v26 = vld [vmem:[%s17186_s3 + $0x68] sm:$0xff]  }
 0x388   : > { %v2897_v20 = vpop.permute.xlu0 %2896  ;;  %12155 = vmatprep.subr.bf16.mxu1 %v13621_v43  ;;  %13095 = vmatprep.subr.bf16.mxu0 %v13622_v9 }
 0x389   : > { %7807 = vmatmul.mubr.bf16.vlgmr.msra.gmra.mrb[52].mxu0 %v7649_v10  ;;  %2962 = vst.msk [vmem:[#allocation2 + $0x108] sm:$0xf] %vm2939_vm1, %v2897_v20  ;;  %7518 = vperm.xlu1 %13300, %v7512_v51   ;;  %v8640_v51 = vld [vmem:[%s17184_s1 + $0xa6] sm:$0xff]  ;;  %v7878_v10 = vld [vmem:[%s17184_s1 + $0x74] sm:$0xff] }
 0x38a   : > { %7814 = vmatprep.mubr.bf16.mxu0 %v7651_v29  ;;  %v2188_v25 = vpop.permute.xlu1 %2187  ;;  %13096 = vmatpush3.bf16.msra.mxu0 %v13622_v9  ;;  %v8044_v29 = vor.u32 %v8043_v7, %v8040_v44  ;;  %v13636_v16 = vld [vmem:[#allocation2 + $0xd0] ss:$12 sps:$4 sm:$0x7f]   ;;  %v13640_v9 = vld [vmem:[%s17186_s3 + $0x48] sm:$0xff]  }
 0x38b   : > { %2252 = vst.msk [vmem:[#allocation2 + $0x114] sm:$0xf] %vm2228_vm15, %v2188_v25  ;;  %9060 = vperm.xlu0 %13299, %v9046_v42   ;;  %12156 = vmatpush3.bf16.msra.mxu1 %v13623_v19  ;;  %v8029_v24 = vshrl.u32 %v13636_v16, 16  ;;  %v8032_v1 = vshll.u32 %v13636_v16, 16  ;;  %v13643_v19 = vld [vmem:[%s17186_s3 + $0x8] sm:$0xff]   ;;  %v7514_v42 = vld [vmem:[%s17184_s1 + $0x5b] sm:$0xff] }
 0x38c   : > { %v2901_v37 = vpop.permute.xlu0 %2900  ;;  %12157 = vmatprep.subr.bf16.mxu1 %v13624_v32  ;;  %13097 = vmatprep.subr.bf16.mxu0 %v13629_v4  ;;  %v8053_v3 = vsel %vm3629_vm8, %v8044_v29, %v16054_v11  ;;  %v13644_v44 = vld [vmem:[%s17186_s3 + $0x88] sm:$0xff]   ;;  %v13646_v32 = vld [vmem:[%s17186_s3 + $0x10] sm:$0xff]   ;;  %v13652_v16 = vld [vmem:[%s17186_s3 + $0x60] sm:$0xff]  }
 0x38d   : > { %2964 = vst.msk [vmem:[#allocation2 + $0x120] sm:$0xf] %vm2939_vm1, %v2901_v37  ;;  %9050 = vperm.xlu1 %13300, %v9044_v48   ;;  %v8031_v52 = vrot.slane %v8029_v24, 2  ;;  %v8034_v50 = vrot.slane %v8032_v1, 3  ;;  %v6353_v48 = vld [vmem:[%s17184_s1 + $0x18] sm:$0x1] }
 0x38e   : > { %v2899_v39 = vpop.permute.xlu1 %2898  ;;  %13098 = vmatpush3.bf16.msra.mxu0 %v13629_v4  ;;  %v13647_v4 = vld [vmem:[%s17186_s3 + $0x40] sm:$0xff]   ;;  %v1653_v29 = vld [vmem:[#allocation2 + $0x150] sm:$0x1] }
 0x38f   : > { %2963 = vst.msk [vmem:[#allocation2 + $0x114] sm:$0xf] %vm2939_vm1, %v2899_v39  ;;  %7897 = vperm.xlu0 %13299, %v7879_v46   ;;  %12158 = vmatpush3.bf16.msra.mxu1 %v13625_v58  ;;  %v8035_v12 = vor.u32 %v8034_v50, %v8031_v52  ;;  %v13649_v46 = vld [vmem:[%s17186_s3] sm:$0xff]   ;;  %v13651_v58 = vld [vmem:[%s17186_s3 + $0x48] sm:$0xff]   ;;  %v13657_v1 = vld [vmem:[%s17186_s3 + $0x10] sm:$0xff]  }
 0x390   : > { %v4752_v55 = vpop.permute.xlu0 %4751  ;;  %12159 = vmatprep.subr.bf16.mxu1 %v13626_v5  ;;  %13103 = vmatprep.subr.bf16.mxu0 %v16062_v54  ;;  %v9401_v5 = vld [vmem:[%s17184_s1 + $0xd8] sm:$0xff] }
 0x391   : > { %7815 = vmatmul.mubr.bf16.gmra.mrb[56].mxu0 %v7648_v30  ;;  %4818 = vst.msk [vmem:[#allocation2 + $0xf4] sm:$0xf] %vm2228_vm15, %v4752_v55  ;;  %6758 = vperm.xlu1 %13300, %v6744_v17   ;;  %v8036_v59 = vsel %vm3629_vm8, %v8027_v47, %v8035_v12  ;;  %v8019_v30 = vsel %vm3629_vm8, %v8010_v36, %v16077_v27  ;;  %v7876_v17 = vld [vmem:[%s17184_s1 + $0x64] sm:$0xff]  ;;  %v6352_v47 = vld [vmem:[%s17184_s1 + $0x10] sm:$0xff]  ;;  %vm2968_vm8 = vcmask 1041152  }
 0x392   : > { %13099 = vmatprep.mubr.msk.bf16.mxu0 %vm6241_vm2, %v8053_v3  ;;  %v4750_v61 = vpop.permute.xlu1 %4749  ;;  %8204 = vmatprep.mubr.bf16.mxu1 %v8036_v59  ;;  %v13665_v3 = vld [vmem:[%s17186_s3 + $0x58] sm:$0xff]   ;;  %vm16367_vm10 = vmand %vm2968_vm8, %vm956_vm9 }
 0x393   : > { %4817 = vst.msk [vmem:[#allocation2 + $0xe8] sm:$0xf] %vm2228_vm15, %v4750_v61  ;;  %6361 = vperm.xlu0 %13299, %v6351_v63   ;;  %12160 = vmatpush3.bf16.msra.mxu1 %v13630_v57  ;;  %v13658_v57 = vld [vmem:[%s17186_s3 + $0x28] sm:$0xff]   ;;  %v13666_v63 = vld [vmem:[%s17186_s3 + $0x70] sm:$0xff]   ;;  %v13669_v61 = vld [vmem:[%s17186_s3 + $0x60] sm:$0xff]  }
 0x394   : > { %v5460_v43 = vpop.permute.xlu0 %5459  ;;  %12177 = vmatprep.subr.bf16.mxu1 %v13637_v34  ;;  %v13670_v59 = vld [vmem:[%s17186_s3 + $0x78] sm:$0xff]  }
 0x395   : > { %5526 = vst.msk [vmem:[#allocation2 + $0xf4] sm:$0xf] %vm2939_vm1, %v5460_v43  ;;  %7122 = vperm.xlu1 %13300, %v7108_v15   ;;  %v16237_v43 = vld [vmem:[#allocation2 + $0xf0] ss:$12 sps:$4 sm:$0xff]  }
 0x396   : > { %8205 = vmatmul.mubr.bf16.vlgmr.msra.gmra.mrb[28].mxu1 %v8019_v30  ;;  %v5458_v28 = vpop.permute.xlu1 %5457  ;;  %v13681_v30 = vld [vmem:[#allocation2 + $0x104] ss:$12 sps:$4 sm:$0xf8]  }
 0x397   : > { %5525 = vst.msk [vmem:[#allocation2 + $0xe8] sm:$0xf] %vm2939_vm1, %v5458_v28  ;;  %8212 = vmatprep.mubr.bf16.mxu1 %v8035_v12  ;;  %12178 = vmatpush3.bf16.msra.mxu1 %v13638_v23  ;;  %v13682_v23 = vld [vmem:[#allocation2 + $0x11c] ss:$12 sps:$4 sm:$0xff]  }
 0x398   : > { %v4758_v7 = vpop.permute.xlu0 %4757  ;;  %12179 = vmatprep.subr.bf16.mxu1 %v13640_v9  ;;  %7887 = vperm.xlu0 %13299, %v7877_v62   ;;  %v13671_v9 = vld [vmem:[%s17186_s3 + $0x20] sm:$0xff]   ;;  %v13673_v62 = vld [vmem:[%s17186_s3 + $0x68] sm:$0xff]  }
 0x399   : > { %4821 = vst.msk [vmem:[#allocation2 + $0x118] sm:$0xf] %vm2228_vm15, %v4758_v7  ;;  %8654 = vperm.xlu1 %13300, %v8640_v51   ;;  %13100 = vmatmul.mubr.msk.bf16.vlgmr.msra.gmra.mrb[60].mxu0 %vm6241_vm2, %v16054_v11  ;;  %v9399_v28 = vld [vmem:[%s17184_s1 + $0xc8] sm:$0xff]  ;;  %v13659_v51 = vld [vmem:[#allocation2 + $0xd8] ss:$12 sps:$4 sm:$0xf8]  }
 0x39a   : > { %13104 = vmatpush3.bf16.msra.mxu0 %v16062_v54  ;;  %13107 = vmatprep.mubr.msk.bf16.mxu0 %vm6241_vm2, %v8417_v60  ;;  %v4754_v20 = vpop.permute.xlu1 %4753  ;;  %v13655_v54 = vld [vmem:[%s17186_s3 + $0x50] sm:$0xff]   ;;  %v13675_v7 = vld [vmem:[%s17186_s3 + $0x80] sm:$0xff]   ;;  %v8811_v60 = vshll.u32 %v13681_v30, 16 }
 0x39b   : > { %4819 = vst.msk [vmem:[#allocation2 + $0x100] sm:$0xf] %vm2228_vm15, %v4754_v20  ;;  %12180 = vmatpush3.bf16.msra.mxu1 %v13643_v19  ;;  %13105 = vmatprep.subr.bf16.mxu0 %v13644_v44  ;;  %v13683_v19 = vld [vmem:[#allocation2 + $0xfc] ss:$12 sps:$4 sm:$0xf8]   ;;  %v8410_v20 = vrot.slane %v16237_v43, 3 }
 0x39c   : > { %v5466_v38 = vpop.permute.xlu0 %5465  ;;  %12181 = vmatprep.subr.bf16.mxu1 %v13645_v31  ;;  %7892 = vperm.xlu0 %13299, %v7878_v10   ;;  %v8808_v31 = vshrl.u32 %v13681_v30, 16  ;;  %v8816_v10 = vshrl.u32 %v13682_v23, 16  ;;  %v13691_v43 = vld [vmem:[%s17186_s3 + $0x48] sm:$0xff]  }
 0x39d   : > { %5529 = vst.msk [vmem:[#allocation2 + $0x118] sm:$0xf] %vm2939_vm1, %v5466_v38  ;;  %7528 = vperm.xlu1 %13300, %v7514_v42   ;;  %v8819_v42 = vshll.u32 %v13682_v23, 16 }
 0x39e   : > { %8213 = vmatmul.mubr.bf16.gmra.mrb[32].mxu1 %v16077_v27  ;;  %13106 = vmatpush3.bf16.msra.mxu0 %v13644_v44  ;;  %v5462_v25 = vpop.permute.xlu1 %5461  ;;  %v13661_v24 = vld [vmem:[#allocation2 + $0xdc] ss:$12 sps:$4 sm:$0xf8]  }
 0x39f   : > { %5527 = vst.msk [vmem:[#allocation2 + $0x100] sm:$0xf] %vm2939_vm1, %v5462_v25  ;;  %12182 = vmatpush3.bf16.msra.mxu1 %v13646_v32  ;;  %12209 = vmatprep.subr.bf16.mxu0 %v13647_v4  ;;  %v8412_v50 = vrot.slane %v13661_v24, 3  ;;  %v4223_v4 = vld [vmem:[#allocation2 + $0x154] sm:$0x1]  ;;  %v8409_v25 = vrot.slane %v13659_v51, 3 }
 0x3a0   : > { %v1592_v11 = vpop.permute.xlu0 %1591  ;;  %12183 = vmatprep.subr.bf16.mxu1 %v13648_v2  ;;  %9410 = vperm.xlu0 %13299, %v9400_v49   ;;  %v13674_v2 = vld [vmem:[%s17186_s3 + $0x28] sm:$0xff]   ;;  %v9402_v49 = vld [vmem:[%s17184_s1 + $0xe0] sm:$0x1] }
 0x3a1   : > { %v1654_v37 = vsel %vm16144_vm4, %v1592_v11, %v1653_v29  ;;  %6371 = vperm.xlu1 %13300, %v6353_v48   ;;  %13108 = vmatmul.mubr.msk.bf16.vlgmr.msra.gmra.mrb[64].mxu0 %vm6241_vm2, %v8416_v40  ;;  %v13676_v29 = vld [vmem:[%s17186_s3 + $0x70] sm:$0xff]   ;;  %v13680_v11 = vld [vmem:[%s17186_s3 + $0x88] sm:$0xff]  }
 0x3a2   : > { %1655 = vst [vmem:[#allocation2 + $0x150] sm:$0x1] %v1654_v37  ;;  %12210 = vmatpush3.bf16.msra.mxu0 %v13649_v46  ;;  %v4756_v22 = vpop.permute.xlu1 %4755  ;;  %v8774_v46 = vshrl.u32 %v13683_v19, 16  ;;  %v8813_v37 = vrot.slane %v8811_v60, 4 }
 0x3a3   : > { %4820 = vst.msk [vmem:[#allocation2 + $0x10c] sm:$0xf] %vm2228_vm15, %v4756_v22  ;;  %12184 = vmatpush3.bf16.msra.mxu1 %v13650_v33  ;;  %12211 = vmatprep.subr.bf16.mxu0 %v13651_v58  ;;  %v8777_v33 = vshll.u32 %v13683_v19, 16  ;;  %v8411_v22 = vsel %vm4337_vm13, %v8409_v25, %v8410_v20  ;;  %v13693_v25 = vld [vmem:[#allocation2 + $0x134] ss:$12 sps:$4 sm:$0xff]  }
 0x3a4   : > { %v1586_v8 = vpop.permute.xlu0 %1585  ;;  %12185 = vmatprep.subr.bf16.mxu1 %v13652_v16  ;;  %9415 = vperm.xlu0 %13299, %v9401_v5   ;;  %v16271_v16 = vrot.slane %v8808_v31, 3  ;;  %v8818_v5 = vrot.slane %v8816_v10, 3 }
 0x3a5   : > { %1648 = vst.msk [vmem:[#allocation2 + $0x12c] sm:$0xf] %vm1622_vm12, %v1586_v8  ;;  %6356 = vperm.xlu1 %13300, %v6350_v41   ;;  %v13677_v41 = vld [vmem:[%s17186_s3 + $0x30] sm:$0xff]  }
 0x3a6   : > { %12212 = vmatpush3.bf16.msra.mxu0 %v13653_v14  ;;  %v5464_v39 = vpop.permute.xlu1 %5463  ;;  %v16197_v13 = vld [vmem:[#allocation2 + $0xf4] ss:$12 sps:$4 sm:$0xff]   ;;  %v8821_v14 = vrot.slane %v8819_v42, 4 }
 0x3a7   : > { %5528 = vst.msk [vmem:[#allocation2 + $0x10c] sm:$0xf] %vm2939_vm1, %v5464_v39  ;;  %12186 = vmatpush3.bf16.msra.mxu1 %v13654_v0  ;;  %12213 = vmatprep.subr.bf16.mxu0 %v13655_v54  ;;  %v8413_v55 = vrot.slane %v16197_v13, 3  ;;  %v8776_v39 = vrot.slane %v8774_v46, 3  ;;  %v16289_v13 = vld [vmem:[%s17186_s3 + $0x80] sm:$0xff]  }
 0x3a8   : > { %v2198_v52 = vpop.permute.xlu0 %2197  ;;  %12187 = vmatprep.subr.bf16.mxu1 %v13656_v26  ;;  %v13686_v26 = vld [vmem:[#allocation2 + $0x114] ss:$12 sps:$4 sm:$0xff]  }
 0x3a9   : > { %v2259_v27 = vld [vmem:[#allocation2 + $0x150] sm:$0x1]  ;;  %7882 = vperm.xlu1 %13300, %v7876_v17   ;;  %v8414_v12 = vsel %vm4337_vm13, %v8412_v50, %v8413_v55  ;;  %v8779_v17 = vrot.slane %v8777_v33, 4  ;;  %v8782_v50 = vshrl.u32 %v13686_v26, 16  ;;  %v13690_v42 = vld [vmem:[%s17186_s3] sm:$0xff]  }
 0x3aa   : > { %v2260_v34 = vsel %vm16201_vm7, %v2198_v52, %v2259_v27  ;;  %12214 = vmatpush3.bf16.msra.mxu0 %v13657_v1  ;;  %v4760_v36 = vpop.permute.xlu1 %4759  ;;  %8568 = vmatprep.mubr.bf16.mxu1 %v8414_v12  ;;  %v13678_v1 = vld [vmem:[%s17186_s3 + $0x78] sm:$0xff]   ;;  %v13695_v33 = vld [vmem:[%s17186_s3 + $0x10] sm:$0xff]  }
 0x3ab   : > { %2261 = vst [vmem:[#allocation2 + $0x150] sm:$0x1] %v2260_v34  ;;  %4822 = vst.msk [vmem:[#allocation2 + $0x124] sm:$0xf] %vm2228_vm15, %v4760_v36  ;;  %12188 = vmatpush3.bf16.msra.mxu1 %v13658_v57  ;;  %12215 = vmatprep.subr.bf16.mxu0 %v13665_v3  ;;  %v8785_v3 = vshll.u32 %v13686_v26, 16  ;;  %v8814_v34 = vor.u32 %v8813_v37, %v16271_v16  ;;  %v8822_v36 = vor.u32 %v8821_v14, %v8818_v5  ;;  %v13697_v5 = vld [vmem:[%s17186_s3 + $0x18] sm:$0xff]  }
 0x3ac   : > { %v4161_v15 = vpop.permute.xlu0 %4160  ;;  %12189 = vmatprep.subr.bf16.mxu1 %v13666_v63  ;;  %v8780_v51 = vor.u32 %v8779_v17, %v8776_v39  ;;  %v9109_v16 = vld [vmem:[#allocation2 + $0x158] sm:$0x1] }
 0x3ad   : > { %4221 = vst.msk [vmem:[#allocation2 + $0x13c] sm:$0xf] %vm1622_vm12, %v4161_v15  ;;  %6366 = vperm.xlu1 %13300, %v6352_v47   ;;  %v13679_v15 = vld [vmem:[%s17186_s3 + $0x38] sm:$0xff]   ;;  %v8787_v30 = vrot.slane %v8785_v3, 4  ;;  %v8823_v60 = vsel %vm4940_vm14, %v8814_v34, %v8822_v36  ;;  %v13703_v34 = vld [vmem:[%s17186_s3 + $0x30] sm:$0xff]  }
 0x3ae   : > { %12216 = vmatpush3.bf16.msra.mxu0 %v13667_v18  ;;  %v5468_v40 = vpop.permute.xlu1 %5467  ;;  %v13685_v32 = vld [vmem:[#allocation2 + $0x100] ss:$12 sps:$4 sm:$0xf8]  }
 0x3af   : > { %5530 = vst.msk [vmem:[#allocation2 + $0x124] sm:$0xf] %vm2939_vm1, %v5468_v40  ;;  %12190 = vmatpush3.bf16.msra.mxu1 %v13668_v45  ;;  %12217 = vmatprep.subr.bf16.mxu0 %v13669_v61  ;;  %v8791_v0 = vshrl.u32 %v13685_v32, 16  ;;  %v8794_v54 = vshll.u32 %v13685_v32, 16  ;;  %v13689_v40 = vld [vmem:[%s17186_s3 + $0x40] sm:$0xff]  }
 0x3b0   : > { %v2192_v44 = vpop.permute.xlu0 %2191  ;;  %12191 = vmatprep.subr.bf16.mxu1 %v13670_v59  ;;  %v8784_v59 = vrot.slane %v8782_v50, 3 }
 0x3b1   : > { %2254 = vst.msk [vmem:[#allocation2 + $0x12c] sm:$0xf] %vm2228_vm15, %v2192_v44  ;;  %9405 = vperm.xlu1 %13300, %v9399_v28   ;;  %v8793_v47 = vrot.slane %v8791_v0, 3  ;;  %v8796_v12 = vrot.slane %v8794_v54, 4  ;;  %v13699_v54 = vld [vmem:[%s17186_s3 + $0x20] sm:$0xff]  }
 0x3b2   : > { %12218 = vmatpush3.bf16.msra.mxu0 %v13671_v9  ;;  %v4165_v38 = vpop.permute.xlu1 %4164  ;;  %v8788_v19 = vor.u32 %v8787_v30, %v8784_v59 }
 0x3b3   : > { %v4224_v48 = vsel %vm16144_vm4, %v4165_v38, %v4223_v4  ;;  %12192 = vmatpush3.bf16.msra.mxu1 %v13672_v6  ;;  %12219 = vmatprep.subr.bf16.mxu0 %v13673_v62  ;;  %v8797_v44 = vor.u32 %v8796_v12, %v8793_v47  ;;  %v13692_v38 = vld [vmem:[%s17186_s3 + $0x8] sm:$0xff]  }
 0x3b4   : > { %4225 = vst [vmem:[#allocation2 + $0x154] sm:$0x1] %v4224_v48  ;;  %v2903_v58 = vpop.permute.xlu0 %2902  ;;  %13111 = vmatprep.subr.bf16.mxu1 %v13675_v7  ;;  %v8789_v10 = vsel %vm4940_vm14, %v8780_v51, %v8788_v19  ;;  %v13710_v48 = vld [vmem:[%s17186_s3 + $0x88] sm:$0xff]  }
 0x3b5   : > { %2965 = vst.msk [vmem:[#allocation2 + $0x12c] sm:$0xf] %vm2939_vm1, %v2903_v58  ;;  %9420 = vperm.xlu1 %13300, %v9402_v49   ;;  %v13696_v58 = vld [vmem:[%s17186_s3 + $0x58] sm:$0xff]  }
 0x3b6   : > { %8569 = vmatmul.mubr.bf16.vlgmr.msra.gmra.mrb[36].mxu1 %v8411_v22  ;;  %12220 = vmatpush3.bf16.msra.mxu0 %v13674_v2  ;;  %v1588_v8 = vpop.permute.xlu1 %1587  ;;  %v13688_v24 = vld [vmem:[#allocation2 + $0x118] ss:$12 sps:$4 sm:$0xff]   ;;  %v13694_v2 = vld [vmem:[%s17186_s3 + $0x50] sm:$0xff]  }
 0x3b7   : > { %1649 = vst.msk [vmem:[#allocation2 + $0x138] sm:$0xf] %vm1622_vm12, %v1588_v8  ;;  %8576 = vmatprep.mubr.bf16.mxu1 %v8413_v55  ;;  %13112 = vmatpush3.bf16.msra.mxu1 %v13675_v7  ;;  %v12001_v52 = vpop.f32.mrb[240].mxu1  ;;  %v8799_v63 = vshrl.u32 %v13688_v24, 16  ;;  %v8802_v27 = vshll.u32 %v13688_v24, 16  ;;  %v13698_v22 = vld [vmem:[%s17186_s3 + $0x60] sm:$0xff]  }
 0x3b8   : > { %v1590_v57 = vpop.permute.xlu0 %1589  ;;  %12221 = vmatprep.subr.bf16.mxu0 %v13676_v29  ;;  %13113 = vmatprep.subr.bf16.mxu1 %v13680_v11  ;;  %v12002_v55 = vpop.f32.mrb[241].mxu1  ;;  %v13700_v8 = vld [vmem:[%s17186_s3 + $0x68] sm:$0xff]  }
 0x3b9   : > { %1650 = vst.msk [vmem:[#allocation2 + $0x144] sm:$0xf] %vm1622_vm12, %v1590_v57  ;;  %v16293_v18 = vadd.f32 %v12002_v55, %v12001_v52  ;;  %v12004_v61 = vpop.f32.mrb[242].mxu1  ;;  %v8801_v23 = vrot.slane %v8799_v63, 3  ;;  %v8804_v6 = vrot.slane %v8802_v27, 4  ;;  %v13701_v52 = vld [vmem:[%s17186_s3 + $0x28] sm:$0xff]  }
 0x3ba   : > { %12222 = vmatpush3.bf16.msra.mxu0 %v13677_v41  ;;  %v4159_v45 = vpop.permute.xlu1 %4158  ;;  %v12005_v9 = vpop.f32.mrb[243].mxu1  ;;  %v13702_v63 = vld [vmem:[%s17186_s3 + $0x70] sm:$0xff]   ;;  %v16374_v55 = vld [vmem:[%s17187_s4] ss:$0 sm:$0xff] }
 0x3bb   : > { %4220 = vst.msk [vmem:[#allocation2 + $0x130] sm:$0xf] %vm1622_vm12, %v4159_v45  ;;  %12223 = vmatprep.subr.bf16.mxu0 %v13678_v1  ;;  %13114 = vmatpush3.bf16.msra.mxu1 %v13680_v11  ;;  %v16302_v62 = vadd.f32 %v12005_v9, %v12004_v61  ;;  %v8805_v7 = vor.u32 %v8804_v6, %v8801_v23  ;;  %v9107_v11 = vld [vmem:[#allocation2 + $0x14c] sm:$0xf]  ;;  %v4826_v39 = vld [vmem:[#allocation2 + $0x154] sm:$0x1] }
 0x3bc   : > { %v2196_v28 = vpop.permute.xlu0 %2195  ;;  %13119 = vmatprep.subr.bf16.mxu1 %v16289_v13  ;;  %v11451_v41 = vcombine.low %v9107_v11, %v9109_v16  ;;  %v6283_v30 = vadd.f32 %v16293_v18, %v16374_v55 }
 0x3bd   : > { %2256 = vst.msk [vmem:[#allocation2 + $0x144] sm:$0xf] %vm2228_vm15, %v2196_v28  ;;  %v8806_v32 = vsel %vm4940_vm14, %v8797_v44, %v8805_v7  ;;  %v13709_v44 = vld [vmem:[%s17186_s3 + $0x38] sm:$0xff]  }
 0x3be   : > { %8577 = vmatmul.mubr.bf16.gmra.mrb[40].mxu1 %v8410_v20  ;;  %12224 = vmatpush3.bf16.msra.mxu0 %v13679_v15  ;;  %v2194_v31 = vpop.permute.xlu1 %2193  ;;  %v13707_v15 = vld [vmem:[%s17186_s3 + $0x78] sm:$0xff]  }
 0x3bf   : > { %2255 = vst.msk [vmem:[#allocation2 + $0x138] sm:$0xf] %vm2228_vm15, %v2194_v31  ;;  %13115 = vmatprep.mubr.msk.bf16.mxu1 %vm6241_vm2, %v8823_v60  ;;  %12241 = vmatprep.subr.bf16.mxu0 %v13689_v40 }
 0x3c0   : > { %v4762_v20 = vpop.permute.xlu0 %4761  ;;  %8974 = vmatprep.mubr.bf16.mxu0 %v8806_v32 }
 0x3c1   : > { %4823 = vst.msk [vmem:[#allocation2 + $0x130] sm:$0xf] %vm2228_vm15, %v4762_v20  ;;  %8975 = vmatmul.mubr.bf16.vlgmr.msra.gmra.mrb[68].mxu0 %v8789_v10 }
 0x3c2   : > { %12242 = vmatpush3.bf16.msra.mxu0 %v13690_v42  ;;  %v2905_v4 = vpop.permute.xlu1 %2904  ;;  %8982 = vmatprep.mubr.bf16.mxu0 %v8805_v7 }
 0x3c3   : > { %2966 = vst.msk [vmem:[#allocation2 + $0x138] sm:$0xf] %vm2939_vm1, %v2905_v4  ;;  %12243 = vmatprep.subr.bf16.mxu0 %v13691_v43 }
 0x3c4   : > { %v5470_v49 = vpop.permute.xlu0 %5469 }
 0x3c5   : > { %5531 = vst.msk [vmem:[#allocation2 + $0x130] sm:$0xf] %vm2939_vm1, %v5470_v49 }
 0x3c6   : > { %13116 = vmatmul.mubr.msk.bf16.vlgmr.msra.gmra.mrb[44].mxu1 %vm6241_vm2, %v8822_v36  ;;  %12244 = vmatpush3.bf16.msra.mxu0 %v13692_v38  ;;  %v4163_v46 = vpop.permute.xlu1 %4162  ;;  %v2970_v36 = vld [vmem:[#allocation2 + $0x150] sm:$0x1] }
 0x3c7   : > { %4222 = vst.msk [vmem:[#allocation2 + $0x148] sm:$0xf] %vm1622_vm12, %v4163_v46  ;;  %13123 = vmatprep.mubr.msk.bf16.mxu1 %vm6241_vm2, %v13693_v25  ;;  %12245 = vmatprep.subr.bf16.mxu0 %v13694_v2 }
 0x3c8   : > { %v4766_v29 = vpop.permute.xlu0 %4765  ;;  %13120 = vmatpush3.bf16.msra.mxu1 %v16289_v13  ;;  %v9746_v13 = vlaneseq }
 0x3c9   : > { %4825 = vst.msk [vmem:[#allocation2 + $0x148] sm:$0xf] %vm2228_vm15, %v4766_v29  ;;  %8983 = vmatmul.mubr.bf16.gmra.mrb[72].mxu0 %v8788_v19  ;;  %13121 = vmatprep.subr.bf16.mxu1 %v13710_v48  ;;  %v6286_v19 = vadd.f32 %v16302_v62, %v16374_v55 }
 0x3ca   : > { %12246 = vmatpush3.bf16.msra.mxu0 %v13695_v33  ;;  %v4764_v37 = vpop.permute.xlu1 %4763  ;;  %v13704_v62 = vld [vmem:[#allocation2 + $0x12c] ss:$12 sps:$4 sm:$0xff]   ;;  %vm9777_vm9 = vcmp.ge.s32.totalorder %v9746_v13, 32  ;;  %vm9785_vm13 = vcmp.ge.s32.totalorder %v9746_v13, 64  ;;  %vm9786_vm14 = vcmp.lt.s32.totalorder %v9746_v13, 96  ;;  %vm9794_vm3 = vcmp.lt.s32.totalorder %v9746_v13, 128 }
 0x3cb   : > { %4824 = vst.msk [vmem:[#allocation2 + $0x13c] sm:$0xf] %vm2228_vm15, %v4764_v37  ;;  %12247 = vmatprep.subr.bf16.mxu0 %v13696_v58 }
 0x3cc   : > { %v2907_v14 = vpop.permute.xlu0 %2906  ;;  %13122 = vmatpush3.bf16.msra.mxu1 %v13710_v48 }
 0x3cd   : > { %2967 = vst.msk [vmem:[#allocation2 + $0x144] sm:$0xf] %vm2939_vm1, %v2907_v14 }
 0x3ce   : > { %12248 = vmatpush3.bf16.msra.mxu0 %v13697_v5  ;;  %v5472_v0 = vpop.permute.xlu1 %5471 }
 0x3cf   : > { %5532 = vst.msk [vmem:[#allocation2 + $0x13c] sm:$0xf] %vm2939_vm1, %v5472_v0  ;;  %12249 = vmatprep.subr.bf16.mxu0 %v13698_v22  ;;  %13124 = vmatmul.mubr.msk.bf16.vlgmr.msra.gmra.mrb[48].mxu1 %vm6241_vm2, %v11451_v41  ;;  %v12007_v26 = vpop.f32.mrb[244].mxu1 }
 0x3d0   : > { %v12008_v24 = vpop.f32.mrb[245].mxu1 }
 0x3d1   : > { %v12009_v1 = vadd.f32 %v12008_v24, %v12007_v26  ;;  %v12010_v57 = vpop.f32.mrb[246].mxu1 }
 0x3d2   : > { %12250 = vmatpush3.bf16.msra.mxu0 %v13699_v54  ;;  %v4768_v17 = vpop.permute.xlu1 %4767  ;;  %v12011_v3 = vpop.f32.mrb[247].mxu1 }
 0x3d3   : > { %v4827_v50 = vsel %vm16201_vm7, %v4768_v17, %v4826_v39  ;;  %12251 = vmatprep.subr.bf16.mxu0 %v13700_v8  ;;  %v12012_v27 = vadd.f32 %v12011_v3, %v12010_v57  ;;  %v6291_v61 = vadd.f32 %v12009_v1, %v16374_v55 }
 0x3d4   : > { %4828 = vst [vmem:[#allocation2 + $0x154] sm:$0x1] %v4827_v50 }
 0x3d5   : > { %v6294_v6 = vadd.f32 %v12012_v27, %v16374_v55 }
 0x3d6   : > { %12252 = vmatpush3.bf16.msra.mxu0 %v13701_v52  ;;  %v2909_v47 = vpop.permute.xlu1 %2908  ;;  %v13706_v12 = vld [vmem:[#allocation2 + $0x130] ss:$12 sps:$4 sm:$0xff]  }
 0x3d7   : > { %v2971_v45 = vsel %vm16367_vm10, %v2909_v47, %v2970_v36  ;;  %12253 = vmatprep.subr.bf16.mxu0 %v13702_v63  ;;  %v13061_v59 = vpop.f32.mrb[248].mxu1  ;;  %9329 = vmatprep.mubr.bf16.mxu0 %v13706_v12 }
 0x3d8   : > { %2972 = vst [vmem:[#allocation2 + $0x150] sm:$0x1] %v2971_v45  ;;  %v16387_v23 = vadd.f32 %v13061_v59, %v6291_v61  ;;  %v6331_v9 = vpop.f32.mrb[249].mxu1 }
 0x3d9   : > { %v16390_v28 = vadd.f32 %v6331_v9, %v6283_v30  ;;  %v13062_v51 = vpop.f32.mrb[250].mxu1 }
 0x3da   : > { %12254 = vmatpush3.bf16.msra.mxu0 %v13703_v34  ;;  %v5476_v40 = vpop.permute.xlu1 %5475  ;;  %v16397_v31 = vadd.f32 %v13062_v51, %v6294_v6  ;;  %v6334_v18 = vpop.f32.mrb[251].mxu1 }
 0x3db   : > { %v5534_v7 = vld [vmem:[#allocation2 + $0x154] sm:$0x1]  ;;  %12255 = vmatprep.subr.bf16.mxu0 %v13707_v15  ;;  %v16401_v10 = vadd.f32 %v6334_v18, %v6286_v19 }
 0x3dc   : > { %v5535_v60 = vsel %vm16367_vm10, %v5476_v40, %v5534_v7 }
 0x3dd   : > { %5536 = vst [vmem:[#allocation2 + $0x154] sm:$0x1] %v5535_v60  ;;  %v16403_v42 = vpop.permute.xlu0 %6763  ;;  %v6347_v60 = vmax.f32 %v16401_v10, 0.0 }
 0x3de   : > { %12256 = vmatpush3.bf16.msra.mxu0 %v13709_v44  ;;  %v5474_v32 = vpop.permute.xlu1 %5473 }
 0x3df   : > { %5533 = vst.msk [vmem:[#allocation2 + $0x148] sm:$0xf] %vm2939_vm1, %v5474_v32  ;;  %v13711_v4 = vld [vmem:[#allocation2 + $0x144] ss:$12 sps:$4 sm:$0x1f]  }
 0x3e1   : > { %9330 = vmatmul.mubr.bf16.vlgmr.msra.gmra.mrb[76].mxu0 %v13704_v62  ;;  %v6754_v43 = vpop.permute.xlu0 %6753 }
 0x3e5   : > { %v16406_v20 = vpop.permute.xlu0 %8280 }
 0x3e6   : > { %v13713_v38 = vld [vmem:[#allocation2 + $0x148] ss:$12 sps:$4 sm:$0x1f]  }
 0x3e7   : > { %9337 = vmatprep.mubr.bf16.mxu0 %v13713_v38 }
 0x3e9   : > { %v16408_v2 = vpop.permute.xlu0 %8659  ;;  %9338 = vmatmul.mubr.bf16.gmra.mrb[80].mxu0 %v13711_v4 }
 0x3ed   : > { %v16410_v49 = vpop.permute.xlu0 %7117 }
 0x3ef   : > { %v16412_v25 = vpop.permute.xlu1 %8295 }
 0x3f1   : > { %v16414_v48 = vpop.permute.xlu0 %8649 }
 0x3f3   : > { %v6749_v46 = vpop.permute.xlu1 %6748 }
 0x3f6   : > { %v16416_v33 = vpop.permute.xlu0 %7523 }
 0x3f8   : > { %v16418_v58 = vpop.permute.xlu1 %7127  ;;  %v12033_v29 = vpop.f32.mrb[252].mxu1 }
 0x3f9   : > { %v12034_v16 = vpop.f32.mrb[253].mxu1 }
 0x3fa   : > { %v16420_v11 = vpop.permute.xlu0 %9055  ;;  %v12035_v37 = vadd.f32 %v12034_v16, %v12033_v29  ;;  %v12036_v5 = vpop.f32.mrb[254].mxu1 }
 0x3fb   : > { %v12037_v41 = vpop.f32.mrb[255].mxu1 }
 0x3fc   : > { %v16422_v22 = vpop.permute.xlu1 %8285  ;;  %v12038_v14 = vadd.f32 %v12037_v41, %v12036_v5  ;;  %v6675_v34 = vadd.f32 %v12035_v37, %v16374_v55 }
 0x3fe   : > { %v16424_v0 = vpop.permute.xlu0 %8290  ;;  %v6678_v59 = vadd.f32 %v12038_v14, %v16374_v55 }
 0x400   : > { %v16426_v54 = vpop.permute.xlu1 %7112  ;;  %v12039_v8 = vpop.f32.mrb[0].mxu1 }
 0x401   : > { %v12040_v24 = vpop.f32.mrb[1].mxu1 }
 0x402   : > { %v16428_v26 = vpop.permute.xlu0 %7533  ;;  %v12041_v1 = vadd.f32 %v12040_v24, %v12039_v8  ;;  %v12042_v39 = vpop.f32.mrb[2].mxu1 }
 0x403   : > { %v12043_v57 = vpop.f32.mrb[3].mxu1 }
 0x404   : > { %v16430_v17 = vpop.permute.xlu1 %8644  ;;  %v12044_v52 = vadd.f32 %v12043_v57, %v12042_v39  ;;  %v6683_v63 = vadd.f32 %v12041_v1, %v16374_v55  ;;  %v6349_v1 = vmax.f32 %v16397_v31, 0.0  ;;  %v6348_v31 = vmax.f32 %v16387_v23, 0.0 }
 0x406   : > { %v16432_v50 = vpop.permute.xlu0 %9065  ;;  %v6686_v45 = vadd.f32 %v12044_v52, %v16374_v55  ;;  %v6397_v52 = vld [vmem:[#allocation3 + $0x24] sm:$0x1] }
 0x408   : > { %v16434_v3 = vpop.permute.xlu1 %7518  ;;  %v13069_v27 = vpop.f32.mrb[4].mxu1 }
 0x409   : > { %v6732_v47 = vadd.f32 %v13069_v27, %v6683_v63  ;;  %v6723_v12 = vpop.f32.mrb[5].mxu1  ;;  %v6346_v63 = vmax.f32 %v16390_v28, 0.0 }
 0x40a   : > { %v16438_v36 = vpop.permute.xlu0 %9060  ;;  %v6724_v61 = vadd.f32 %v6723_v12, %v6675_v34  ;;  %v13070_v15 = vpop.f32.mrb[6].mxu1 }
 0x40b   : > { %v6735_v9 = vadd.f32 %v13070_v15, %v6686_v45  ;;  %v6726_v6 = vpop.f32.mrb[7].mxu1  ;;  %v6740_v19 = vmax.f32 %v6732_v47, 0.0 }
 0x40c   : > { %v16442_v30 = vpop.permute.xlu1 %9050  ;;  %v6727_v40 = vadd.f32 %v6726_v6, %v6678_v59  ;;  %v6738_v44 = vmax.f32 %v6724_v61, 0.0 }
 0x40d   : > { %v6741_v4 = vmax.f32 %v6735_v9, 0.0 }
 0x40e   : > { %v16444_v51 = vpop.permute.xlu0 %7897  ;;  %v6739_v7 = vmax.f32 %v6727_v40, 0.0  ;;  %v6766_v29 = vmul.f32 %v6749_v46, %v6738_v44 }
 0x40f   : > { %v6769_v24 = vmul.f32 %v16403_v42, %v6741_v4 }
 0x410   : > { %v6759_v18 = vpop.permute.xlu1 %6758  ;;  %v6767_v32 = vmul.f32 %v6754_v43, %v6739_v7  ;;  %v11773_v8 = vpack.c.bf16 %v6766_v29, %v6766_v29 }
 0x411   : > { %v6768_v62 = vmul.f32 %v6759_v18, %v6740_v19  ;;  %v11776_v43 = vpack.c.bf16 %v6769_v24, %v6769_v24 }
 0x412   : > { %v6362_v38 = vpop.permute.xlu0 %6361  ;;  %v11774_v16 = vpack.c.bf16 %v6767_v32, %v6767_v32 }
 0x413   : > { %v11775_v37 = vpack.c.bf16 %v6768_v62, %v6768_v62  ;;  %v6375_v5 = vmul.f32 %v6362_v38, %v6347_v60 }
 0x414   : > { %v7123_v41 = vpop.permute.xlu1 %7122  ;;  %6784 = vrot.lane.b32.xlu0 %v11774_v16, %s13750_s16 }
 0x415   : > { %v11770_v14 = vpack.c.bf16 %v6375_v5, %v6375_v5  ;;  %6786 = vrot.lane.b32.xlu1 %v11775_v37, %s13750_s16 }
 0x417   : > { %6395 = vst.msk [vmem:[#allocation3 + $0xc] sm:$0xf] %vm926_vm6, %v11770_v14 }
 0x418   : > { %v16451_v10 = vpop.permute.xlu1 %8654 }
 0x419   : > { %6782 = vrot.lane.b32.xlu1 %v11773_v8, %s13750_s16 }
 0x41c   : > { %v16454_v46 = vpop.permute.xlu1 %7528 }
 0x41d   : > { %6788 = vrot.lane.b32.xlu1 %v11776_v43, %s13750_s16 }
 0x420   : > { %v6372_v39 = vpop.permute.xlu1 %6371 }
 0x421   : > { %v6377_v57 = vmul.f32 %v6372_v39, %v6349_v1 }
 0x423   : > { %v11772_v27 = vpack.c.bf16 %v6377_v57, %v6377_v57 }
 0x424   : > { %v6357_v42 = vpop.permute.xlu1 %6356 }
 0x425   : > { %v6398_v34 = vsel %vm14580_vm11, %v11772_v27, %v6397_v52  ;;  %v6374_v47 = vmul.f32 %v6357_v42, %v6346_v63 }
 0x426   : > { %6399 = vst [vmem:[#allocation3 + $0x24] sm:$0x1] %v6398_v34 }
 0x427   : > { %v11769_v12 = vpack.c.bf16 %v6374_v47, %v6374_v47 }
 0x428   : > { %v16461_v45 = vpop.permute.xlu1 %7882  ;;  %v12065_v61 = vpop.f32.mrb[8].mxu1 }
 0x429   : > { %6394 = vst.msk [vmem:[#allocation3] sm:$0xf] %vm926_vm6, %v11769_v12  ;;  %v12066_v15 = vpop.f32.mrb[9].mxu1 }
 0x42a   : > { %v12067_v59 = vadd.f32 %v12066_v15, %v12065_v61  ;;  %v12068_v9 = vpop.f32.mrb[10].mxu1 }
 0x42b   : > { %v12069_v28 = vpop.f32.mrb[11].mxu1 }
 0x42c   : > { %v6367_v6 = vpop.permute.xlu1 %6366  ;;  %v12070_v19 = vadd.f32 %v12069_v28, %v12068_v9  ;;  %v7039_v23 = vadd.f32 %v12067_v59, %v16374_v55 }
 0x42d   : > { %v6376_v40 = vmul.f32 %v6367_v6, %v6348_v31 }
 0x42e   : > { %v7042_v24 = vadd.f32 %v12070_v19, %v16374_v55 }
 0x42f   : > { %v11771_v44 = vpack.c.bf16 %v6376_v40, %v6376_v40 }
 0x430   : > { %v12071_v7 = vpop.f32.mrb[12].mxu1 }
 0x431   : > { %6396 = vst.msk [vmem:[#allocation3 + $0x18] sm:$0xf] %vm926_vm6, %v11771_v44  ;;  %v12072_v18 = vpop.f32.mrb[13].mxu1 }
 0x432   : > { %v12073_v60 = vadd.f32 %v12072_v18, %v12071_v7  ;;  %v12074_v32 = vpop.f32.mrb[14].mxu1 }
 0x433   : > { %v12075_v62 = vpop.f32.mrb[15].mxu1 }
 0x434   : > { %v12076_v4 = vadd.f32 %v12075_v62, %v12074_v32  ;;  %v7047_v38 = vadd.f32 %v12073_v60, %v16374_v55 }
 0x436   : > { %v7050_v5 = vadd.f32 %v12076_v4, %v16374_v55 }
 0x438   : > { %v13077_v29 = vpop.f32.mrb[16].mxu1 }
 0x439   : > { %v7096_v16 = vadd.f32 %v13077_v29, %v7047_v38  ;;  %v7087_v37 = vpop.f32.mrb[17].mxu1 }
 0x43a   : > { %v7088_v14 = vadd.f32 %v7087_v37, %v7039_v23  ;;  %v13078_v8 = vpop.f32.mrb[18].mxu1 }
 0x43b   : > { %v7104_v43 = vmax.f32 %v7096_v16, 0.0  ;;  %v7099_v1 = vadd.f32 %v13078_v8, %v7050_v5  ;;  %v7090_v39 = vpop.f32.mrb[19].mxu1  ;;  %v12097_v57 = vpop.f32.mrb[44].mxu0 }
 0x43c   : > { %v7102_v52 = vmax.f32 %v7088_v14, 0.0  ;;  %v7091_v63 = vadd.f32 %v7090_v39, %v7042_v24  ;;  %v12098_v27 = vpop.f32.mrb[45].mxu0 }
 0x43d   : > { %v7132_v42 = vmul.f32 %v7123_v41, %v7104_v43  ;;  %v12099_v34 = vadd.f32 %v12098_v27, %v12097_v57  ;;  %v12100_v47 = vpop.f32.mrb[46].mxu0  ;;  %v7105_v59 = vmax.f32 %v7099_v1, 0.0 }
 0x43e   : > { %v7130_v12 = vmul.f32 %v16426_v54, %v7102_v52  ;;  %v7103_v61 = vmax.f32 %v7091_v63, 0.0  ;;  %v12101_v15 = vpop.f32.mrb[47].mxu0 }
 0x43f   : > { %v11779_v31 = vpack.c.bf16 %v7132_v42, %v7132_v42  ;;  %v12102_v9 = vadd.f32 %v12101_v15, %v12100_v47  ;;  %v7445_v6 = vadd.f32 %v12099_v34, %v16374_v55  ;;  %v7133_v54 = vmul.f32 %v16418_v58, %v7105_v59 }
 0x440   : > { %v7131_v28 = vmul.f32 %v16410_v49, %v7103_v61  ;;  %v11777_v60 = vpack.c.bf16 %v7130_v12, %v7130_v12 }
 0x441   : > { %v13085_v40 = vpop.f32.mrb[20].mxu1  ;;  %7150 = vrot.lane.b32.xlu1 %v11779_v31, %s13751_s27  ;;  %v7448_v44 = vadd.f32 %v12102_v9, %v16374_v55  ;;  %v11780_v14 = vpack.c.bf16 %v7133_v54, %v7133_v54  ;;  %v13716_v31 = vld [vmem:[%s17188_s5 + $0x88] sm:$0xff]  }
 0x442   : > { %v7493_v19 = vpop.f32.mrb[21].mxu1  ;;  %v11778_v41 = vpack.c.bf16 %v7131_v28, %v7131_v28 }
 0x443   : > { %v7494_v7 = vadd.f32 %v7493_v19, %v7445_v6  ;;  %v13086_v18 = vpop.f32.mrb[22].mxu1 }
 0x444   : > { %v12103_v32 = vpop.f32.mrb[48].mxu0  ;;  %v7496_v62 = vpop.f32.mrb[23].mxu1  ;;  %7148 = vrot.lane.b32.xlu0 %v11778_v41, %s13751_s27 }
 0x445   : > { %v7508_v4 = vmax.f32 %v7494_v7, 0.0  ;;  %v7497_v38 = vadd.f32 %v7496_v62, %v7448_v44  ;;  %v12104_v29 = vpop.f32.mrb[49].mxu0  ;;  %7146 = vrot.lane.b32.xlu1 %v11777_v60, %s13751_s27 }
 0x446   : > { %v12105_v49 = vadd.f32 %v12104_v29, %v12103_v32  ;;  %v12106_v23 = vpop.f32.mrb[50].mxu0 }
 0x447   : > { %v7536_v16 = vmul.f32 %v16434_v3, %v7508_v4  ;;  %v7509_v37 = vmax.f32 %v7497_v38, 0.0  ;;  %v12107_v5 = vpop.f32.mrb[51].mxu0  ;;  %v7888_v38 = vpop.permute.xlu0 %7887 }
 0x448   : > { %v7453_v8 = vadd.f32 %v12105_v49, %v16374_v55  ;;  %v12108_v24 = vadd.f32 %v12107_v5, %v12106_v23 }
 0x449   : > { %v11781_v58 = vpack.c.bf16 %v7536_v16, %v7536_v16  ;;  %v7537_v43 = vmul.f32 %v16416_v33, %v7509_v37  ;;  %v13093_v1 = vpop.f32.mrb[24].mxu1  ;;  %7152 = vrot.lane.b32.xlu1 %v11780_v14, %s13751_s27  ;;  %v13715_v33 = vld [vmem:[%s17188_s5 + $0x80] sm:$0xff]  }
 0x44a   : > { %v7502_v39 = vadd.f32 %v13085_v40, %v7453_v8  ;;  %v7456_v57 = vadd.f32 %v12108_v24, %v16374_v55  ;;  %v7857_v52 = vpop.f32.mrb[25].mxu1  ;;  %13127 = vmatprep.subr.bf16.mxu0 %v13715_v33 }
 0x44b   : > { %v11782_v63 = vpack.c.bf16 %v7537_v43, %v7537_v43  ;;  %v13094_v27 = vpop.f32.mrb[26].mxu1  ;;  %7552 = vrot.lane.b32.xlu0 %v11781_v58, %s13752_s28  ;;  %13128 = vmatpush3.bf16.msra.mxu0 %v13715_v33 }
 0x44c   : > { %v7510_v3 = vmax.f32 %v7502_v39, 0.0  ;;  %v7505_v42 = vadd.f32 %v13086_v18, %v7456_v57  ;;  %v7860_v34 = vpop.f32.mrb[27].mxu1  ;;  %13129 = vmatprep.subr.bf16.mxu0 %v13716_v31 }
 0x44d   : > { %7554 = vrot.lane.b32.xlu1 %v11782_v63, %s13752_s28 }
 0x44e   : > { %v16485_v47 = vmul.f32 %v16454_v46, %v7510_v3  ;;  %v7511_v12 = vmax.f32 %v7505_v42, 0.0  ;;  %v7893_v3 = vpop.permute.xlu0 %7892 }
 0x44f   : > { %13130 = vmatpush3.bf16.msra.mxu0 %v13716_v31 }
 0x450   : > { %v7539_v61 = vmul.f32 %v16428_v26, %v7511_v12 }
 0x452   : > { %v11784_v15 = vpack.c.bf16 %v7539_v61, %v7539_v61 }
 0x454   : > { %7558 = vrot.lane.b32.xlu0 %v11784_v15, %s13752_s28 }
 0x45c   : > { %v12129_v46 = vpop.f32.mrb[52].mxu0 }
 0x45d   : > { %v12130_v59 = vpop.f32.mrb[53].mxu0 }
 0x45e   : > { %v12131_v9 = vadd.f32 %v12130_v59, %v12129_v46  ;;  %v12132_v6 = vpop.f32.mrb[54].mxu0 }
 0x45f   : > { %v12133_v28 = vpop.f32.mrb[55].mxu0 }
 0x460   : > { %v7809_v40 = vadd.f32 %v12131_v9, %v16374_v55  ;;  %v12134_v19 = vadd.f32 %v12133_v28, %v12132_v6 }
 0x462   : > { %v7858_v26 = vadd.f32 %v7857_v52, %v7809_v40  ;;  %v7812_v44 = vadd.f32 %v12134_v19, %v16374_v55  ;;  %v7923_v40 = vld [vmem:[#allocation3 + $0x28] sm:$0x1] }
 0x464   : > { %v7872_v41 = vmax.f32 %v7858_v26, 0.0  ;;  %v7861_v7 = vadd.f32 %v7860_v34, %v7812_v44  ;;  %v12135_v18 = vpop.f32.mrb[56].mxu0 }
 0x465   : > { %v12136_v60 = vpop.f32.mrb[57].mxu0 }
 0x466   : > { %v7873_v54 = vmax.f32 %v7861_v7, 0.0  ;;  %v12137_v32 = vadd.f32 %v12136_v60, %v12135_v18  ;;  %v12138_v62 = vpop.f32.mrb[58].mxu0  ;;  %v7900_v4 = vmul.f32 %v16461_v45, %v7872_v41 }
 0x467   : > { %v12139_v29 = vpop.f32.mrb[59].mxu0 }
 0x468   : > { %v7817_v49 = vadd.f32 %v12137_v32, %v16374_v55  ;;  %v12140_v23 = vadd.f32 %v12139_v29, %v12138_v62  ;;  %v11785_v16 = vpack.c.bf16 %v7900_v4, %v7900_v4  ;;  %v7901_v37 = vmul.f32 %v7888_v38, %v7873_v54 }
 0x469   : > { %v12161_v5 = vpop.f32.mrb[28].mxu1 }
 0x46a   : > { %v7866_v14 = vadd.f32 %v13093_v1, %v7817_v49  ;;  %v7820_v8 = vadd.f32 %v12140_v23, %v16374_v55  ;;  %v12162_v24 = vpop.f32.mrb[29].mxu1  ;;  %7920 = vst.msk [vmem:[#allocation3 + $0x4] sm:$0xf] %vm926_vm6, %v11785_v16  ;;  %v11786_v58 = vpack.c.bf16 %v7901_v37, %v7901_v37 }
 0x46b   : > { %v12163_v43 = vadd.f32 %v12162_v24, %v12161_v5  ;;  %v12164_v39 = vpop.f32.mrb[30].mxu1  ;;  %v13717_v5 = vld [vmem:[%s17188_s5 + $0x40] sm:$0xff]  }
 0x46c   : > { %v7874_v57 = vmax.f32 %v7866_v14, 0.0  ;;  %v7869_v52 = vadd.f32 %v13094_v27, %v7820_v8  ;;  %v12165_v45 = vpop.f32.mrb[31].mxu1  ;;  %v13101_v63 = vpop.f32.mrb[60].mxu0  ;;  %7921 = vst.msk [vmem:[#allocation3 + $0x10] sm:$0xf] %vm926_vm6, %v11786_v58  ;;  %v13719_v14 = vld [vmem:[%s17188_s5 + $0x48] sm:$0xff]   ;;  %12273 = vmatprep.subr.bf16.mxu1 %v13717_v5 }
 0x46d   : > { %v12166_v42 = vadd.f32 %v12165_v45, %v12164_v39  ;;  %v8207_v34 = vadd.f32 %v12163_v43, %v16374_v55  ;;  %v8255_v12 = vpop.f32.mrb[61].mxu0  ;;  %v13720_v58 = vld [vmem:[%s17188_s5 + $0x8] sm:$0xff]  }
 0x46e   : > { %v7875_v1 = vmax.f32 %v7869_v52, 0.0  ;;  %v13102_v33 = vpop.f32.mrb[62].mxu0  ;;  %v7902_v61 = vmul.f32 %v7893_v3, %v7874_v57  ;;  %v16532_v57 = vpop.permute.xlu1 %9405  ;;  %v13727_v5 = vld [vmem:[%s17188_s5 + $0x68] sm:$0xff]  }
 0x46f   : > { %v8256_v15 = vadd.f32 %v8255_v12, %v8207_v34  ;;  %v8210_v31 = vadd.f32 %v12166_v42, %v16374_v55  ;;  %v8258_v46 = vpop.f32.mrb[63].mxu0  ;;  %v16534_v52 = vpop.permute.xlu0 %9410 }
 0x470   : > { %v7903_v59 = vmul.f32 %v16444_v51, %v7875_v1  ;;  %v11787_v9 = vpack.c.bf16 %v7902_v61, %v7902_v61 }
 0x471   : > { %v8270_v27 = vmax.f32 %v8256_v15, 0.0  ;;  %v8259_v6 = vadd.f32 %v8258_v46, %v8210_v31  ;;  %v12167_v28 = vpop.f32.mrb[32].mxu1 }
 0x472   : > { %v11788_v19 = vpack.c.bf16 %v7903_v59, %v7903_v59  ;;  %v12168_v26 = vpop.f32.mrb[33].mxu1  ;;  %7922 = vst.msk [vmem:[#allocation3 + $0x1c] sm:$0xf] %vm926_vm6, %v11787_v9  ;;  %v16538_v42 = vpop.permute.xlu1 %9420  ;;  %v13723_v9 = vld [vmem:[%s17188_s5 + $0x58] sm:$0xff]  }
 0x473   : > { %v8298_v44 = vmul.f32 %v16406_v20, %v8270_v27  ;;  %v8271_v41 = vmax.f32 %v8259_v6, 0.0  ;;  %v12169_v7 = vadd.f32 %v12168_v26, %v12167_v28  ;;  %v12170_v18 = vpop.f32.mrb[34].mxu1  ;;  %v16540_v34 = vpop.permute.xlu0 %9415  ;;  %v13724_v27 = vld [vmem:[%s17188_s5 + $0x18] sm:$0xff]   ;;  %v13725_v6 = vld [vmem:[%s17188_s5 + $0x60] sm:$0xff]  }
 0x474   : > { %v12171_v60 = vpop.f32.mrb[35].mxu1  ;;  %v16508_v54 = vpop.f32.mrb[64].mxu0  ;;  %v7924_v51 = vsel %vm14580_vm11, %v11788_v19, %v7923_v40 }
 0x475   : > { %v11789_v32 = vpack.c.bf16 %v8298_v44, %v8298_v44  ;;  %v8299_v62 = vmul.f32 %v16422_v22, %v8271_v41  ;;  %v8215_v4 = vadd.f32 %v12169_v7, %v16374_v55  ;;  %v12172_v38 = vadd.f32 %v12171_v60, %v12170_v18  ;;  %v8619_v29 = vpop.f32.mrb[65].mxu0  ;;  %7925 = vst [vmem:[#allocation3 + $0x28] sm:$0x1] %v7924_v51  ;;  %v13718_v22 = vld [vmem:[%s17188_s5] sm:$0xff]  }
 0x476   : > { %v16514_v49 = vpop.f32.mrb[66].mxu0  ;;  %12274 = vmatpush3.bf16.msra.mxu1 %v13718_v22  ;;  %v6797_v44 = vld [vmem:[#allocation3 + $0x24] sm:$0x1] }
 0x477   : > { %v11790_v20 = vpack.c.bf16 %v8299_v62, %v8299_v62  ;;  %v8264_v23 = vadd.f32 %v13101_v63, %v8215_v4  ;;  %v8218_v16 = vadd.f32 %v12172_v38, %v16374_v55  ;;  %v8622_v37 = vpop.f32.mrb[67].mxu0  ;;  %8314 = vrot.lane.b32.xlu0 %v11789_v32, %s13750_s16  ;;  %12275 = vmatprep.subr.bf16.mxu1 %v13719_v14  ;;  %v13726_v32 = vld [vmem:[%s17188_s5 + $0x20] sm:$0xff]  }
 0x479   : > { %v8272_v8 = vmax.f32 %v8264_v23, 0.0  ;;  %v8267_v24 = vadd.f32 %v13102_v33, %v8218_v16  ;;  %8316 = vrot.lane.b32.xlu1 %v11790_v20, %s13750_s16  ;;  %v13722_v33 = vld [vmem:[%s17188_s5 + $0x10] sm:$0xff]  }
 0x47a   : > { %12276 = vmatpush3.bf16.msra.mxu1 %v13720_v58 }
 0x47b   : > { %v8300_v43 = vmul.f32 %v16424_v0, %v8272_v8  ;;  %v8273_v39 = vmax.f32 %v8267_v24, 0.0 }
 0x47d   : > { %v8301_v45 = vmul.f32 %v16412_v25, %v8273_v39  ;;  %v11791_v63 = vpack.c.bf16 %v8300_v43, %v8300_v43  ;;  %v13721_v25 = vld [vmem:[%s17188_s5 + $0x50] sm:$0xff]  }
 0x47e   : > { %12277 = vmatprep.subr.bf16.mxu1 %v13721_v25 }
 0x47f   : > { %8318 = vrot.lane.b32.xlu0 %v11791_v63, %s13750_s16  ;;  %v11792_v3 = vpack.c.bf16 %v8301_v45, %v8301_v45  ;;  %12278 = vmatpush3.bf16.msra.mxu1 %v13722_v33 }
 0x480   : > { %12279 = vmatprep.subr.bf16.mxu1 %v13723_v9 }
 0x483   : > { %8320 = vrot.lane.b32.xlu0 %v11792_v3, %s13750_s16  ;;  %12280 = vmatpush3.bf16.msra.mxu1 %v13724_v27 }
 0x484   : > { %12281 = vmatprep.subr.bf16.mxu1 %v13725_v6 }
 0x486   : > { %v6785_v12 = vpop.permute.xlu0 %6784 }
 0x487   : > { %v6787_v0 = vpop.permute.xlu1 %6786  ;;  %6795 = vst.msk [vmem:[#allocation3 + $0xc] sm:$0xf] %vm1622_vm12, %v6785_v12  ;;  %12282 = vmatpush3.bf16.msra.mxu1 %v13726_v32  ;;  %v13729_v12 = vld [vmem:[%s17188_s5 + $0x70] sm:$0xff]  }
 0x488   : > { %6796 = vst.msk [vmem:[#allocation3 + $0x18] sm:$0xf] %vm1622_vm12, %v6787_v0  ;;  %12283 = vmatprep.subr.bf16.mxu1 %v13727_v5 }
 0x489   : > { %v12193_v1 = vpop.f32.mrb[36].mxu1 }
 0x48a   : > { %v12194_v61 = vpop.f32.mrb[37].mxu1 }
 0x48b   : > { %v12195_v15 = vadd.f32 %v12194_v61, %v12193_v1  ;;  %v6783_v31 = vpop.permute.xlu1 %6782  ;;  %v12196_v46 = vpop.f32.mrb[38].mxu1 }
 0x48c   : > { %6794 = vst.msk [vmem:[#allocation3] sm:$0xf] %vm1622_vm12, %v6783_v31  ;;  %v12197_v59 = vpop.f32.mrb[39].mxu1 }
 0x48d   : > { %v8571_v28 = vadd.f32 %v12195_v15, %v16374_v55  ;;  %v12198_v40 = vadd.f32 %v12197_v59, %v12196_v46 }
 0x48f   : > { %v8620_v19 = vadd.f32 %v8619_v29, %v8571_v28  ;;  %v8574_v26 = vadd.f32 %v12198_v40, %v16374_v55  ;;  %v6789_v41 = vpop.permute.xlu1 %6788 }
 0x490   : > { %v6798_v7 = vsel %vm16144_vm4, %v6789_v41, %v6797_v44 }
 0x491   : > { %v8634_v18 = vmax.f32 %v8620_v19, 0.0  ;;  %v8623_v60 = vadd.f32 %v8622_v37, %v8574_v26  ;;  %6799 = vst [vmem:[#allocation3 + $0x24] sm:$0x1] %v6798_v7  ;;  %v12199_v51 = vpop.f32.mrb[40].mxu1  ;;  %v13732_v19 = vld [vmem:[%s17188_s5 + $0x38] sm:$0xff]  }
 0x492   : > { %v12200_v62 = vpop.f32.mrb[41].mxu1 }
 0x493   : > { %v8662_v4 = vmul.f32 %v16430_v17, %v8634_v18  ;;  %v8635_v38 = vmax.f32 %v8623_v60, 0.0  ;;  %v12201_v29 = vadd.f32 %v12200_v62, %v12199_v51  ;;  %v12202_v20 = vpop.f32.mrb[42].mxu1  ;;  %v13728_v17 = vld [vmem:[%s17188_s5 + $0x28] sm:$0xff]  }
 0x494   : > { %v12203_v23 = vpop.f32.mrb[43].mxu1  ;;  %v12225_v16 = vpop.f32.mrb[68].mxu0  ;;  %12284 = vmatpush3.bf16.msra.mxu1 %v13728_v17 }
 0x495   : > { %v8663_v37 = vmul.f32 %v16414_v48, %v8635_v38  ;;  %v8579_v22 = vadd.f32 %v12201_v29, %v16374_v55  ;;  %v12204_v14 = vadd.f32 %v12203_v23, %v12202_v20  ;;  %v12226_v8 = vpop.f32.mrb[69].mxu0  ;;  %v11793_v24 = vpack.c.bf16 %v8662_v4, %v8662_v4  ;;  %12285 = vmatprep.subr.bf16.mxu1 %v13729_v12 }
 0x496   : > { %v12227_v58 = vadd.f32 %v12226_v8, %v12225_v16  ;;  %v12228_v43 = vpop.f32.mrb[70].mxu0 }
 0x497   : > { %v8628_v39 = vadd.f32 %v16508_v54, %v8579_v22  ;;  %v8582_v45 = vadd.f32 %v12204_v14, %v16374_v55  ;;  %8678 = vrot.lane.b32.xlu1 %v11793_v24, %s13751_s27  ;;  %v12229_v63 = vpop.f32.mrb[71].mxu0  ;;  %v11794_v48 = vpack.c.bf16 %v8663_v37, %v8663_v37  ;;  %v13730_v54 = vld [vmem:[%s17188_s5 + $0x30] sm:$0xff]  }
 0x498   : > { %v12230_v3 = vadd.f32 %v12229_v63, %v12228_v43  ;;  %v8977_v0 = vadd.f32 %v12227_v58, %v16374_v55  ;;  %12286 = vmatpush3.bf16.msra.mxu1 %v13730_v54  ;;  %v11783_v58 = vpack.c.bf16 %v16485_v47, %v16485_v47 }
 0x499   : > { %v8631_v25 = vadd.f32 %v16514_v49, %v8582_v45  ;;  %v13117_v1 = vpop.f32.mrb[44].mxu1  ;;  %8680 = vrot.lane.b32.xlu0 %v11794_v48, %s13751_s27  ;;  %v13731_v49 = vld [vmem:[%s17188_s5 + $0x78] sm:$0xff]   ;;  %v8636_v41 = vmax.f32 %v8628_v39, 0.0 }
 0x49a   : > { %v9025_v33 = vpop.f32.mrb[45].mxu1  ;;  %v8980_v61 = vadd.f32 %v12230_v3, %v16374_v55  ;;  %12287 = vmatprep.subr.bf16.mxu1 %v13731_v49 }
 0x49b   : > { %v8637_v15 = vmax.f32 %v8631_v25, 0.0  ;;  %v9026_v31 = vadd.f32 %v9025_v33, %v8977_v0  ;;  %v13118_v46 = vpop.f32.mrb[46].mxu1  ;;  %v8664_v20 = vmul.f32 %v16451_v10, %v8636_v41 }
 0x49c   : > { %v9028_v59 = vpop.f32.mrb[47].mxu1  ;;  %v12231_v9 = vpop.f32.mrb[72].mxu0  ;;  %12288 = vmatpush3.bf16.msra.mxu1 %v13732_v19 }
 0x49d   : > { %v8665_v27 = vmul.f32 %v16408_v2, %v8637_v15  ;;  %v9040_v6 = vmax.f32 %v9026_v31, 0.0  ;;  %v9029_v28 = vadd.f32 %v9028_v59, %v8980_v61  ;;  %v12232_v40 = vpop.f32.mrb[73].mxu0  ;;  %v11795_v8 = vpack.c.bf16 %v8664_v20, %v8664_v20  ;;  %v7161_v61 = vld [vmem:[#allocation3 + $0x24] sm:$0x1] }
 0x49e   : > { %v12233_v26 = vadd.f32 %v12232_v40, %v12231_v9  ;;  %v12234_v44 = vpop.f32.mrb[74].mxu0 }
 0x49f   : > { %v9068_v7 = vmul.f32 %v16442_v30, %v9040_v6  ;;  %v9041_v18 = vmax.f32 %v9029_v28, 0.0  ;;  %v12235_v60 = vpop.f32.mrb[75].mxu0  ;;  %v11796_v51 = vpack.c.bf16 %v8665_v27, %v8665_v27 }
 0x4a0   : > { %v8985_v32 = vadd.f32 %v12233_v26, %v16374_v55  ;;  %v12236_v2 = vadd.f32 %v12235_v60, %v12234_v44 }
 0x4a1   : > { %v9069_v62 = vmul.f32 %v16420_v11, %v9041_v18  ;;  %8684 = vrot.lane.b32.xlu0 %v11796_v51, %s13751_s27  ;;  %v11797_v23 = vpack.c.bf16 %v9068_v7, %v9068_v7 }
 0x4a2   : > { %v9034_v4 = vadd.f32 %v13117_v1, %v8985_v32  ;;  %v8988_v38 = vadd.f32 %v12236_v2, %v16374_v55  ;;  %v13125_v29 = vpop.f32.mrb[48].mxu1 }
 0x4a3   : > { %v11798_v16 = vpack.c.bf16 %v9069_v62, %v9069_v62  ;;  %v9380_v30 = vpop.f32.mrb[49].mxu1 }
 0x4a4   : > { %v9037_v5 = vadd.f32 %v13118_v46, %v8988_v38  ;;  %v13126_v37 = vpop.f32.mrb[50].mxu1  ;;  %v9042_v14 = vmax.f32 %v9034_v4, 0.0 }
 0x4a5   : > { %9086 = vrot.lane.b32.xlu1 %v11798_v16, %s13752_s28  ;;  %9084 = vrot.lane.b32.xlu0 %v11797_v23, %s13752_s28  ;;  %v9383_v22 = vpop.f32.mrb[51].mxu1  ;;  %v9446_v16 = vld [vmem:[#allocation3 + $0x2c] sm:$0x1] }
 0x4a6   : > { %v9043_v11 = vmax.f32 %v9037_v5, 0.0  ;;  %v9070_v17 = vmul.f32 %v16438_v36, %v9042_v14 }
 0x4a8   : > { %v9071_v24 = vmul.f32 %v16432_v50, %v9043_v11  ;;  %v11799_v43 = vpack.c.bf16 %v9070_v17, %v9070_v17  ;;  %v8329_v11 = vld [vmem:[#allocation3 + $0x28] sm:$0x1] }
 0x4a9   : > { %8682 = vrot.lane.b32.xlu1 %v11795_v8, %s13751_s27 }
 0x4aa   : > { %v11800_v10 = vpack.c.bf16 %v9071_v24, %v9071_v24 }
 0x4ac   : > { %9090 = vrot.lane.b32.xlu0 %v11800_v10, %s13752_s28 }
 0x4ad   : > { %7556 = vrot.lane.b32.xlu1 %v11783_v58, %s13752_s28 }
 0x4b0   : > { %9088 = vrot.lane.b32.xlu0 %v11799_v43, %s13752_s28 }
 0x4b3   : > { %v7151_v45 = vpop.permute.xlu1 %7150 }
 0x4b4   : > { %v12257_v39 = vpop.f32.mrb[76].mxu0  ;;  %7160 = vst.msk [vmem:[#allocation3 + $0x18] sm:$0xf] %vm2228_vm15, %v7151_v45 }
 0x4b5   : > { %v12258_v50 = vpop.f32.mrb[77].mxu0 }
 0x4b6   : > { %v12259_v63 = vadd.f32 %v12258_v50, %v12257_v39  ;;  %v12260_v48 = vpop.f32.mrb[78].mxu0  ;;  %v7149_v36 = vpop.permute.xlu0 %7148 }
 0x4b7   : > { %v12261_v3 = vpop.f32.mrb[79].mxu0  ;;  %7159 = vst.msk [vmem:[#allocation3 + $0xc] sm:$0xf] %vm2228_vm15, %v7149_v36  ;;  %v7147_v47 = vpop.permute.xlu1 %7146 }
 0x4b8   : > { %v12262_v0 = vadd.f32 %v12261_v3, %v12260_v48  ;;  %v9332_v12 = vadd.f32 %v12259_v63, %v16374_v55  ;;  %7158 = vst.msk [vmem:[#allocation3] sm:$0xf] %vm2228_vm15, %v7147_v47 }
 0x4ba   : > { %v9381_v25 = vadd.f32 %v9380_v30, %v9332_v12  ;;  %v9335_v1 = vadd.f32 %v12262_v0, %v16374_v55 }
 0x4bb   : > { %v7153_v15 = vpop.permute.xlu1 %7152 }
 0x4bc   : > { %v9395_v54 = vmax.f32 %v9381_v25, 0.0  ;;  %v9384_v33 = vadd.f32 %v9383_v22, %v9335_v1  ;;  %v7162_v31 = vsel %vm16201_vm7, %v7153_v15, %v7161_v61  ;;  %v12263_v46 = vpop.f32.mrb[80].mxu0  ;;  %v13753_v61 = vmov 1966171168  }
 0x4bd   : > { %v7553_v59 = vpop.permute.xlu0 %7552  ;;  %7163 = vst [vmem:[#allocation3 + $0x24] sm:$0x1] %v7162_v31  ;;  %v12264_v27 = vpop.f32.mrb[81].mxu0  ;;  %v9753_v15 = vunpack.c.l.s4 %v13753_v61 }
 0x4be   : > { %v9423_v9 = vmul.f32 %v16532_v57, %v9395_v54  ;;  %v9396_v49 = vmax.f32 %v9384_v33, 0.0  ;;  %7564 = vst.msk [vmem:[#allocation3] sm:$0xf] %vm2939_vm1, %v7553_v59  ;;  %v12265_v6 = vadd.f32 %v12264_v27, %v12263_v46  ;;  %v12266_v28 = vpop.f32.mrb[82].mxu0  ;;  %v11476_v46 = vld [vmem:[%s17189_s6] ss:$0 sm:$0xff] }
 0x4bf   : > { %v12267_v26 = vpop.f32.mrb[83].mxu0  ;;  %v7555_v44 = vpop.permute.xlu1 %7554  ;;  %v16657_v27 = vshrl.u32 %v9746_v13, 7 }
 0x4c0   : > { %v11801_v40 = vpack.c.bf16 %v9423_v9, %v9423_v9  ;;  %v9424_v19 = vmul.f32 %v16534_v52, %v9396_v49  ;;  %v9340_v41 = vadd.f32 %v12265_v6, %v16374_v55  ;;  %v12268_v7 = vadd.f32 %v12267_v26, %v12266_v28  ;;  %7565 = vst.msk [vmem:[#allocation3 + $0xc] sm:$0xf] %vm2939_vm1, %v7555_v44 }
 0x4c1   : > { %v9754_v49 = vunpack.c.0.s8 %v9753_v15  ;;  %v9994_v15 = vld [vmem:[%s17190_s7 + $0x10] sm:$0xff] }
 0x4c2   : > { %9443 = vst.msk [vmem:[#allocation3 + $0x8] sm:$0xf] %vm926_vm6, %v11801_v40  ;;  %v11802_v57 = vpack.c.bf16 %v9424_v19, %v9424_v19  ;;  %v9389_v18 = vadd.f32 %v13125_v29, %v9340_v41  ;;  %v9343_v60 = vadd.f32 %v12268_v7, %v16374_v55  ;;  %v9999_v7 = vld [vmem:[%s17190_s7 + $0x38] sm:$0xff] }
 0x4c3   : > { %v16660_v44 = vsub.s32 %v9754_v49, %v16657_v27  ;;  %v10026_v49 = vld [vmem:[%s17190_s7 + $0x110] sm:$0xff] }
 0x4c4   : > { %9444 = vst.msk [vmem:[#allocation3 + $0x14] sm:$0xf] %vm926_vm6, %v11802_v57  ;;  %v9397_v51 = vmax.f32 %v9389_v18, 0.0  ;;  %v9392_v32 = vadd.f32 %v13126_v37, %v9343_v60  ;;  %v7567_v2 = vld [vmem:[#allocation3 + $0x24] sm:$0x1] }
 0x4c6   : > { %v7559_v62 = vpop.permute.xlu0 %7558  ;;  %v9425_v52 = vmul.f32 %v16540_v34, %v9397_v51  ;;  %v9398_v4 = vmax.f32 %v9392_v32, 0.0 }
 0x4c7   : > { %v7568_v38 = vsel %vm16367_vm10, %v7559_v62, %v7567_v2  ;;  %v13733_v36 = vld [vmem:[#allocation3] ss:$12 sps:$4 sm:$0xff]  }
 0x4c8   : > { %7569 = vst [vmem:[#allocation3 + $0x24] sm:$0x1] %v7568_v38  ;;  %v11803_v20 = vpack.c.bf16 %v9425_v52, %v9425_v52  ;;  %v9426_v23 = vmul.f32 %v16538_v42, %v9398_v4 }
 0x4ca   : > { %9445 = vst.msk [vmem:[#allocation3 + $0x20] sm:$0xf] %vm926_vm6, %v11803_v20  ;;  %v11804_v55 = vpack.c.bf16 %v9426_v23, %v9426_v23  ;;  %vm16663_vm6 = vcmp.lt.s32.totalorder %v9746_v13, 32 }
 0x4cb   : > { %v13714_v29 = vld [vmem:[#allocation3 + $0x8] ss:$12 sps:$4 sm:$0xff]  }
 0x4cc   : > { %v9447_v30 = vsel %vm14580_vm11, %v11804_v55, %v9446_v16  ;;  %13131 = vmatprep.mubr.msk.bf16.mxu0 %vm6241_vm2, %v13714_v29  ;;  %vm9778_vm11 = vcmp.lt.s32.totalorder %v9746_v13, 64 }
 0x4cd   : > { %9448 = vst [vmem:[#allocation3 + $0x2c] sm:$0x1] %v9447_v30 }
 0x4d1   : > { %v9454_v34 = vld [vmem:[#allocation3 + $0x20] sm:$0xf] }
 0x4d4   : > { %v9456_v5 = vld [vmem:[#allocation3 + $0x2c] sm:$0x1] }
 0x4d5   : > { %v11482_v37 = vcombine.low %v9454_v34, %v9456_v5 }
 0x4d7   : > { %13132 = vmatmul.mubr.msk.bf16.vlgmr.msra.gmra.mrb[84].mxu0 %vm6241_vm2, %v11482_v37 }
 0x4e9   : > { %v8315_v22 = vpop.permute.xlu0 %8314 }
 0x4ea   : > { %8326 = vst.msk [vmem:[#allocation3 + $0x4] sm:$0xf] %vm1622_vm12, %v8315_v22 }
 0x4eb   : > { %v8317_v42 = vpop.permute.xlu1 %8316 }
 0x4ec   : > { %8327 = vst.msk [vmem:[#allocation3 + $0x10] sm:$0xf] %vm1622_vm12, %v8317_v42 }
 0x4f1   : > { %v8319_v14 = vpop.permute.xlu0 %8318 }
 0x4f2   : > { %8328 = vst.msk [vmem:[#allocation3 + $0x1c] sm:$0xf] %vm1622_vm12, %v8319_v14  ;;  %v10008_v14 = vld [vmem:[%s17190_s7 + $0x80] sm:$0xff]  ;;  %vm16959_vm12 = vmand %vm9777_vm9, %vm9778_vm11 }
 0x4f5   : > { %v8321_v21 = vpop.permute.xlu0 %8320 }
 0x4f6   : > { %v8330_v8 = vsel %vm16144_vm4, %v8321_v21, %v8329_v11  ;;  %v10009_v11 = vld [vmem:[%s17190_s7 + $0x88] sm:$0xff] }
 0x4f7   : > { %8331 = vst [vmem:[#allocation3 + $0x28] sm:$0x1] %v8330_v8  ;;  %v10040_v8 = vld [vmem:[%s17190_s7 + $0x180] sm:$0xff] }
 0x4fe   : > { %v8693_v10 = vld [vmem:[#allocation3 + $0x28] sm:$0x1] }
 0x509   : > { %v8679_v24 = vpop.permute.xlu1 %8678 }
 0x50a   : > { %8690 = vst.msk [vmem:[#allocation3 + $0x4] sm:$0xf] %vm2228_vm15, %v8679_v24  ;;  %v10041_v24 = vld [vmem:[%s17190_s7 + $0x188] sm:$0xff] }
 0x50b   : > { %v8681_v17 = vpop.permute.xlu0 %8680 }
 0x50c   : > { %8691 = vst.msk [vmem:[#allocation3 + $0x10] sm:$0xf] %vm2228_vm15, %v8681_v17  ;;  %v9992_v17 = vld [vmem:[%s17190_s7] sm:$0xff] }
 0x513   : > { %v8685_v58 = vpop.permute.xlu0 %8684 }
 0x514   : > { %v8694_v43 = vsel %vm16201_vm7, %v8685_v58, %v8693_v10 }
 0x515   : > { %8695 = vst [vmem:[#allocation3 + $0x28] sm:$0x1] %v8694_v43 }
 0x517   : > { %v9087_v39 = vpop.permute.xlu1 %9086  ;;  %v9085_v45 = vpop.permute.xlu0 %9084 }
 0x518   : > { %9097 = vst.msk [vmem:[#allocation3 + $0x10] sm:$0xf] %vm2939_vm1, %v9087_v39  ;;  %9096 = vst.msk [vmem:[#allocation3 + $0x4] sm:$0xf] %vm2939_vm1, %v9085_v45  ;;  %v9993_v45 = vld [vmem:[%s17190_s7 + $0x8] sm:$0xff] }
 0x51b   : > { %v8683_v35 = vpop.permute.xlu1 %8682 }
 0x51c   : > { %8692 = vst.msk [vmem:[#allocation3 + $0x1c] sm:$0xf] %vm2228_vm15, %v8683_v35  ;;  %v9099_v50 = vld [vmem:[#allocation3 + $0x28] sm:$0x1]  ;;  %vm16967_vm15 = vmand %vm9785_vm13, %vm9786_vm14 }
 0x51d   : > { %v10024_v35 = vld [vmem:[%s17190_s7 + $0x100] sm:$0xff] }
 0x51e   : > { %v9091_v63 = vpop.permute.xlu0 %9090 }
 0x51f   : > { %v7557_v48 = vpop.permute.xlu1 %7556  ;;  %v9100_v3 = vsel %vm16367_vm10, %v9091_v63, %v9099_v50  ;;  %v13735_v53 = vld [vmem:[#allocation3 + $0x4] ss:$12 sps:$4 sm:$0xff]  }
 0x520   : > { %7566 = vst.msk [vmem:[#allocation3 + $0x18] sm:$0xf] %vm2939_vm1, %v7557_v48  ;;  %9101 = vst [vmem:[#allocation3 + $0x28] sm:$0x1] %v9100_v3  ;;  %9676 = vmatprep.mubr.bf16.mxu1 %v13735_v53  ;;  %v10025_v50 = vld [vmem:[%s17190_s7 + $0x108] sm:$0xff]  ;;  %v10010_v48 = vld [vmem:[%s17190_s7 + $0x90] sm:$0xff] }
 0x521   : > { %9677 = vmatmul.mubr.bf16.vlgmr.msra.gmra.mrb[52].mxu1 %v13733_v36  ;;  %v13202_v61 = vpack.c.bf16 %v10025_v50, %v10024_v35  ;;  %v10048_v35 = vld [vmem:[%s17190_s7 + $0x1c0] sm:$0xff] }
 0x522   : > { %v9089_v0 = vpop.permute.xlu0 %9088 }
 0x523   : > { %9098 = vst.msk [vmem:[#allocation3 + $0x1c] sm:$0xf] %vm2939_vm1, %v9089_v0  ;;  %vm9793_vm1 = vcmp.ge.s32.totalorder %v9746_v13, 96 }
 0x524   : > { %vm16985_vm4 = vmand %vm9793_vm1, %vm9794_vm3 }
 0x527   : > { %v13736_v47 = vld [vmem:[#allocation3 + $0x18] ss:$12 sps:$4 sm:$0x1f]  }
 0x52a   : > { %v13738_v12 = vld [vmem:[#allocation3 + $0x1c] ss:$12 sps:$4 sm:$0x1f]  }
 0x52b   : > { %9684 = vmatprep.mubr.bf16.mxu1 %v13738_v12  ;;  %v10042_v12 = vld [vmem:[%s17190_s7 + $0x190] sm:$0xff] }
 0x52c   : > { %9685 = vmatmul.mubr.bf16.gmra.mrb[56].mxu1 %v13736_v47  ;;  %v10011_v47 = vld [vmem:[%s17190_s7 + $0x98] sm:$0xff] }
 0x5aa   : > { %v13133_v25 = vpop.f32.mrb[84].mxu0 }
 0x5ab   : > { %v9727_v1 = vpop.f32.mrb[85].mxu0 }
 0x5ac   : > { %v13134_v54 = vpop.f32.mrb[86].mxu0 }
 0x5ad   : > { %v9730_v33 = vpop.f32.mrb[87].mxu0 }
 0x5f4   : > { %v12289_v31 = vpop.f32.mrb[52].mxu1 }
 0x5f5   : > { %v12290_v59 = vpop.f32.mrb[53].mxu1 }
 0x5f6   : > { %v12291_v9 = vadd.f32 %v12290_v59, %v12289_v31  ;;  %v12292_v6 = vpop.f32.mrb[54].mxu1 }
 0x5f7   : > { %v12293_v28 = vpop.f32.mrb[55].mxu1 }
 0x5f8   : > { %v9679_v40 = vadd.f32 %v12291_v9, %v11476_v46  ;;  %v12294_v19 = vadd.f32 %v12293_v28, %v12292_v6  ;;  %v9995_v9 = vld [vmem:[%s17190_s7 + $0x18] sm:$0xff] }
 0x5f9   : > { %v10027_v6 = vld [vmem:[%s17190_s7 + $0x118] sm:$0xff] }
 0x5fa   : > { %v9728_v26 = vadd.f32 %v9727_v1, %v9679_v40  ;;  %v9682_v41 = vadd.f32 %v12294_v19, %v11476_v46  ;;  %v13168_v1 = vpack.c.bf16 %v10009_v11, %v10008_v14  ;;  %v13172_v40 = vpack.c.bf16 %v10011_v47, %v10010_v48  ;;  %v9998_v11 = vld [vmem:[%s17190_s7 + $0x30] sm:$0xff]  ;;  %v10032_v47 = vld [vmem:[%s17190_s7 + $0x140] sm:$0xff] }
 0x5fb   : > { %v13182_v50 = vpack.c.bf16 %v9999_v7, %v9998_v11  ;;  %v10006_v11 = vld [vmem:[%s17190_s7 + $0x70] sm:$0xff]  ;;  %v10007_v7 = vld [vmem:[%s17190_s7 + $0x78] sm:$0xff] }
 0x5fc   : > { %v9742_v57 = vmax.f32 %v9728_v26, 0.0  ;;  %v9731_v18 = vadd.f32 %v9730_v33, %v9682_v41  ;;  %v13170_v33 = vpack.c.bf16 %v9993_v45, %v9992_v17  ;;  %13169 = vmatprep.subr.bf16.mxu1 %v13168_v1  ;;  %v10012_v26 = vld [vmem:[%s17190_s7 + $0xa0] sm:$0xff]  ;;  %v10013_v41 = vld [vmem:[%s17190_s7 + $0xa8] sm:$0xff]  ;;  %v10030_v17 = vld [vmem:[%s17190_s7 + $0x130] sm:$0xff] }
 0x5fd   : > { %v10017_v45 = vld [vmem:[%s17190_s7 + $0xc8] sm:$0xff]  ;;  %v10018_v1 = vld [vmem:[%s17190_s7 + $0xd0] sm:$0xff] }
 0x5fe   : > { %v9758_v60 = vrot.slane %v9742_v57, %v16660_v44  ;;  %v9797_v51 = vcombine.high %v9742_v57, %v9742_v57  ;;  %v9743_v32 = vmax.f32 %v9731_v18, 0.0  ;;  %9750 = vst.msk [vmem:[#allocation4] sm:$0x1] %vm16663_vm6, %v9742_v57  ;;  %13171 = vmatpush3.bf16.msra.mxu1 %v13170_v33  ;;  %v10044_v18 = vld [vmem:[%s17190_s7 + $0x1a0] sm:$0xff]  ;;  %v10050_v33 = vld [vmem:[%s17190_s7 + $0x1d0] sm:$0xff] }
 0x5ff   : > { %v12295_v2 = vpop.f32.mrb[56].mxu1  ;;  %13173 = vmatprep.subr.bf16.mxu1 %v13172_v40  ;;  %v10034_v40 = vld [vmem:[%s17190_s7 + $0x150] sm:$0xff] }
 0x600   : > { %v9874_v62 = vcombine.high %v9743_v32, %v9743_v32  ;;  %v12296_v52 = vpop.f32.mrb[57].mxu1  ;;  %9836 = vst.msk [vmem:[#allocation4 + $0x2] sm:$0x1] %vm16663_vm6, %v9743_v32  ;;  %v9759_v4 = vcombine.high %v9758_v60, %v9758_v60  ;;  %v9804_v38 = vrot.slane %v9797_v51, %v16660_v44  ;;  %v9844_v20 = vrot.slane %v9743_v32, %v16660_v44 }
 0x601   : > { %v12297_v23 = vadd.f32 %v12296_v52, %v12295_v2  ;;  %v12298_v16 = vpop.f32.mrb[58].mxu1  ;;  %v9766_v34 = vrot.slane %v9758_v60, %v16660_v44  ;;  %v10045_v60 = vld [vmem:[%s17190_s7 + $0x1a8] sm:$0xff]  ;;  %v13174_v32 = vpack.c.bf16 %v9995_v9, %v9994_v15  ;;  %v13206_v2 = vpack.c.bf16 %v10027_v6, %v10026_v49  ;;  %v10051_v15 = vld [vmem:[%s17190_s7 + $0x1d8] sm:$0xff]  ;;  %v10002_v9 = vld [vmem:[%s17190_s7 + $0x50] sm:$0xff] }
 0x602   : > { %v12299_v55 = vpop.f32.mrb[59].mxu1  ;;  %v16675_v29 = vrot.slane %v9759_v4, %v16660_v44  ;;  %v9814_v30 = vcombine.high %v9804_v38, %v9804_v38  ;;  %v9811_v5 = vrot.slane %v9804_v38, %v16660_v44  ;;  %v9881_v42 = vrot.slane %v9874_v62, %v16660_v44  ;;  %v9996_v62 = vld [vmem:[%s17190_s7 + $0x20] sm:$0xff]  ;;  %v9997_v52 = vld [vmem:[%s17190_s7 + $0x28] sm:$0xff]  ;;  %v10003_v49 = vld [vmem:[%s17190_s7 + $0x58] sm:$0xff] }
 0x603   : > { %v9687_v37 = vadd.f32 %v12297_v23, %v11476_v46  ;;  %v12300_v22 = vadd.f32 %v12299_v55, %v12298_v16  ;;  %v9845_v43 = vcombine.high %v9844_v20, %v9844_v20  ;;  %v9781_v63 = vcombine.high %v9766_v34, %v9766_v34  ;;  %v10029_v23 = vld [vmem:[%s17190_s7 + $0x128] sm:$0xff]  ;;  %v10015_v34 = vld [vmem:[%s17190_s7 + $0xb8] sm:$0xff]  ;;  %13175 = vmatpush3.bf16.msra.mxu1 %v13174_v32 }
 0x604   : > { %9774 = vrot.lane.b32.xlu1 %v16675_v29, %s13750_s16  ;;  %v16689_v21 = vrot.slane %v9814_v30, %v16660_v44  ;;  %9813 = vst.msk [vmem:[#allocation4 + $0x1] sm:$0x1] %vm16663_vm6, %v9811_v5  ;;  %v16703_v39 = vrot.slane %v9881_v42, %v16660_v44  ;;  %v9826_v53 = vcombine.high %v9811_v5, %v9811_v5  ;;  %v10014_v30 = vld [vmem:[%s17190_s7 + $0xb0] sm:$0xff] }
 0x605   : > { %v9736_v10 = vadd.f32 %v13133_v25, %v9687_v37  ;;  %v9690_v58 = vadd.f32 %v12300_v22, %v11476_v46  ;;  %v9891_v0 = vcombine.high %v9881_v42, %v9881_v42  ;;  %v10043_v25 = vld [vmem:[%s17190_s7 + $0x198] sm:$0xff]  ;;  %v16743_v59 = vrot.slane %v9845_v43, %v16660_v44  ;;  %v10046_v5 = vld [vmem:[%s17190_s7 + $0x1b0] sm:$0xff] }
 0x606   : > { %9822 = vrot.lane.b32.xlu0 %v16689_v21, %s13750_s16  ;;  %9890 = vst.msk [vmem:[#allocation4 + $0x3] sm:$0x1] %vm16663_vm6, %v16703_v39  ;;  %v9852_v28 = vrot.slane %v9844_v20, %v16660_v44  ;;  %v13204_v19 = vpack.c.bf16 %v10043_v25, %v10042_v12  ;;  %v13176_v38 = vpack.c.bf16 %v10013_v41, %v10012_v26  ;;  %v10028_v20 = vld [vmem:[%s17190_s7 + $0x120] sm:$0xff]  ;;  %v10047_v22 = vld [vmem:[%s17190_s7 + $0x1b8] sm:$0xff] }
 0x607   : > { %v16719_v3 = vmax.f32 %v9736_v10, 0.0  ;;  %v9739_v36 = vadd.f32 %v13134_v54, %v9690_v58  ;;  %v13200_v54 = vpack.c.bf16 %v10041_v24, %v10040_v8  ;;  %v16776_v51 = vrot.slane %v9891_v0, %v16660_v44  ;;  %v10031_v10 = vld [vmem:[%s17190_s7 + $0x138] sm:$0xff]  ;;  %v10020_v26 = vld [vmem:[%s17190_s7 + $0xe0] sm:$0xff] }
 0x608   : > { %9782 = vrot.lane.b32.xlu1 %v9781_v63, %s13751_s27  ;;  %v9864_v16 = vcombine.high %v9852_v28, %v9852_v28  ;;  %v13208_v55 = vpack.c.bf16 %v10045_v60, %v10044_v18  ;;  %v13178_v37 = vpack.c.bf16 %v9997_v52, %v9996_v62  ;;  %v9903_v42 = vcombine.high %v16703_v39, %v16703_v39  ;;  %v10016_v39 = vld [vmem:[%s17190_s7 + $0xc0] sm:$0xff]  ;;  %v10049_v63 = vld [vmem:[%s17190_s7 + $0x1c8] sm:$0xff] }
 0x609   : > { %v9951_v31 = vcombine.high %v16719_v3, %v16719_v3  ;;  %v9745_v46 = vmax.f32 %v9739_v36, 0.0  ;;  %9913 = vst.msk [vmem:[#allocation4 + $0x4] sm:$0x1] %vm16663_vm6, %v16719_v3  ;;  %13201 = vmatprep.subr.bf16.mxu0 %v13200_v54  ;;  %v13210_v14 = vpack.c.bf16 %v10029_v23, %v10028_v20  ;;  %13177 = vmatprep.subr.bf16.mxu1 %v13176_v38  ;;  %v10001_v36 = vld [vmem:[%s17190_s7 + $0x48] sm:$0xff]  ;;  %v10019_v54 = vld [vmem:[%s17190_s7 + $0xd8] sm:$0xff]  ;;  %v10052_v60 = vld [vmem:[%s17190_s7 + $0x1e0] sm:$0xff] }
 0x60a   : > { %9827 = vrot.lane.b32.xlu0 %v9826_v53, %s13751_s27  ;;  %13203 = vmatpush3.bf16.msra.mxu0 %v13202_v61  ;;  %v13180_v8 = vpack.c.bf16 %v10015_v34, %v10014_v30  ;;  %v13212_v24 = vpack.c.bf16 %v10047_v22, %v10046_v5  ;;  %v9921_v58 = vrot.slane %v16719_v3, %v16660_v44  ;;  %v10000_v3 = vld [vmem:[%s17190_s7 + $0x40] sm:$0xff]  ;;  %v10021_v18 = vld [vmem:[%s17190_s7 + $0xe8] sm:$0xff]  ;;  %v10023_v34 = vld [vmem:[%s17190_s7 + $0xf8] sm:$0xff] }
 0x60b   : > { %9990 = vst.msk [vmem:[#allocation4 + $0x6] sm:$0x1] %vm16663_vm6, %v9745_v46  ;;  %v16765_v57 = vrot.slane %v9951_v31, %v16660_v44  ;;  %13205 = vmatprep.subr.bf16.mxu0 %v13204_v19  ;;  %v9789_v43 = vcombine.high %v16675_v29, %v16675_v29  ;;  %13179 = vmatpush3.bf16.msra.mxu1 %v13178_v37  ;;  %v10035_v19 = vld [vmem:[%s17190_s7 + $0x158] sm:$0xff]  ;;  %v10004_v52 = vld [vmem:[%s17190_s7 + $0x60] sm:$0xff]  ;;  %v10005_v38 = vld [vmem:[%s17190_s7 + $0x68] sm:$0xff] }
 0x60c   : > { %9860 = vrot.lane.b32.xlu1 %v16743_v59, %s13750_s16  ;;  %v9831_v29 = vcombine.high %v16689_v21, %v16689_v21  ;;  %v13214_v48 = vpack.c.bf16 %v10031_v10, %v10030_v17  ;;  %13181 = vmatprep.subr.bf16.mxu1 %v13180_v8  ;;  %v13184_v53 = vpack.c.bf16 %v10017_v45, %v10016_v39  ;;  %v10033_v21 = vld [vmem:[%s17190_s7 + $0x148] sm:$0xff]  ;;  %v10054_v5 = vld [vmem:[%s17190_s7 + $0x1f0] sm:$0xff]  ;;  %v10055_v37 = vld [vmem:[%s17190_s7 + $0x1f8] sm:$0xff] }
 0x60d   : > { %v16786_v4 = vrot.slane %v16765_v57, %v16660_v44  ;;  %v13216_v0 = vpack.c.bf16 %v10049_v63, %v10048_v35  ;;  %v9869_v12 = vcombine.high %v16743_v59, %v16743_v59  ;;  %v9922_v25 = vcombine.high %v9921_v58, %v9921_v58  ;;  %v10038_v17 = vld [vmem:[%s17190_s7 + $0x170] sm:$0xff] }
 0x60e   : > { %9899 = vrot.lane.b32.xlu0 %v16776_v51, %s13750_s16  ;;  %13207 = vmatpush3.bf16.msra.mxu0 %v13206_v2  ;;  %v13186_v61 = vpack.c.bf16 %v10001_v36, %v10000_v3  ;;  %v9908_v31 = vcombine.high %v16776_v51, %v16776_v51  ;;  %v9968_v46 = vcombine.high %v16765_v57, %v16765_v57  ;;  %v10053_v51 = vld [vmem:[%s17190_s7 + $0x1e8] sm:$0xff]  ;;  %v13754_v63 = vmov 0.0|0.0   ;;  %v10064_v36 = vld [vmem:[%s17190_s7 + $0x240] sm:$0xff] }
 0x60f   : > { %9967 = vst.msk [vmem:[#allocation4 + $0x5] sm:$0x1] %vm16663_vm6, %v16786_v4  ;;  %13209 = vmatprep.subr.bf16.mxu0 %v13208_v55  ;;  %13183 = vmatpush3.bf16.msra.mxu1 %v13182_v50  ;;  %v13218_v59 = vpack.c.bf16 %v10033_v21, %v10032_v47  ;;  %v13188_v6 = vpack.c.bf16 %v10019_v54, %v10018_v1  ;;  %v10022_v55 = vld [vmem:[%s17190_s7 + $0xf0] sm:$0xff]  ;;  %v10067_v1 = vld [vmem:[%s17190_s7 + $0x258] sm:$0xff] }
 0x610   : > { %9865 = vrot.lane.b32.xlu1 %v9864_v16, %s13751_s27  ;;  %13185 = vmatprep.subr.bf16.mxu1 %v13184_v53  ;;  %v13220_v28 = vpack.c.bf16 %v10051_v15, %v10050_v33  ;;  %v9936_v41 = vrot.slane %v9922_v25, %v16660_v44  ;;  %v9929_v57 = vrot.slane %v9921_v58, %v16660_v44  ;;  %v10036_v16 = vld [vmem:[%s17190_s7 + $0x160] sm:$0xff] }
 0x611   : > { %v13190_v32 = vpack.c.bf16 %v10003_v49, %v10002_v9  ;;  %v9975_v2 = vrot.slane %v9968_v46, %v16660_v44  ;;  %v13222_v62 = vpack.c.bf16 %v10035_v19, %v10034_v40  ;;  %v13192_v20 = vpack.c.bf16 %v10021_v18, %v10020_v26  ;;  %v10037_v44 = vld [vmem:[%s17190_s7 + $0x168] sm:$0xff]  ;;  %v10072_v58 = vld [vmem:[%s17190_s7 + $0x280] sm:$0xff] }
 0x612   : > { %9904 = vrot.lane.b32.xlu0 %v9903_v42, %s13751_s27  ;;  %13211 = vmatpush3.bf16.msra.mxu0 %v13210_v14  ;;  %v13224_v23 = vpack.c.bf16 %v10053_v51, %v10052_v60  ;;  %v9941_v30 = vcombine.high %v9929_v57, %v9929_v57  ;;  %v13194_v22 = vpack.c.bf16 %v10005_v38, %v10004_v52  ;;  %v10108_v40 = vsub.s32 3, %v16657_v27  ;;  %v10088_v57 = vld [vmem:[%s17190_s7 + $0x300] sm:$0xff]  ;;  %v10089_v18 = vld [vmem:[%s17190_s7 + $0x308] sm:$0xff]  ;;  %v10074_v60 = vld [vmem:[%s17190_s7 + $0x290] sm:$0xff] }
 0x613   : > { %13213 = vmatprep.subr.bf16.mxu0 %v13212_v24  ;;  %13187 = vmatpush3.bf16.msra.mxu1 %v13186_v61  ;;  %v9980_v42 = vcombine.high %v16786_v4, %v16786_v4  ;;  %v13226_v14 = vpack.c.bf16 %v10037_v44, %v10036_v16  ;;  %v13196_v8 = vpack.c.bf16 %v10023_v34, %v10022_v55  ;;  %v10039_v4 = vld [vmem:[%s17190_s7 + $0x178] sm:$0xff]  ;;  %v10096_v19 = vsub.s32 0, %v16657_v27  ;;  %v10058_v44 = vld [vmem:[%s17190_s7 + $0x210] sm:$0xff] }
 0x614   : > { %9790 = vrot.lane.b32.xlu1 %v9789_v43, %s13752_s28  ;;  %13189 = vmatprep.subr.bf16.mxu1 %v13188_v6  ;;  %v13228_v24 = vpack.c.bf16 %v10055_v37, %v10054_v5  ;;  %v9946_v10 = vcombine.high %v9936_v41, %v9936_v41  ;;  %v10073_v43 = vld [vmem:[%s17190_s7 + $0x288] sm:$0xff]  ;;  %v13198_v39 = vpack.c.bf16 %v10007_v7, %v10006_v11  ;;  %v10100_v6 = vsub.s32 1, %v16657_v27  ;;  %v10075_v51 = vld [vmem:[%s17190_s7 + $0x298] sm:$0xff]  ;;  %v10090_v34 = vld [vmem:[%s17190_s7 + $0x310] sm:$0xff] }
 0x615   : > { %v9985_v45 = vcombine.high %v9975_v2, %v9975_v2  ;;  %v13230_v35 = vpack.c.bf16 %v10039_v4, %v10038_v17  ;;  %v13232_v50 = vpack.c.bf16 %v10073_v43, %v10072_v58  ;;  %v10104_v26 = vsub.s32 2, %v16657_v27  ;;  %v10091_v5 = vld [vmem:[%s17190_s7 + $0x318] sm:$0xff]  ;;  %v10076_v37 = vld [vmem:[%s17190_s7 + $0x2a0] sm:$0xff]  ;;  %v10061_v17 = vld [vmem:[%s17190_s7 + $0x228] sm:$0xff] }
 0x616   : > { %9832 = vrot.lane.b32.xlu0 %v9831_v29, %s13752_s28  ;;  %13215 = vmatpush3.bf16.msra.mxu0 %v13214_v48  ;;  %v10116_v52 = vsub.s32 5, %v16657_v27  ;;  %v13236_v55 = vpack.c.bf16 %v10075_v51, %v10074_v60  ;;  %v13268_v11 = vpack.c.bf16 %v10091_v5, %v10090_v34  ;;  %v10078_v4 = vld [vmem:[%s17190_s7 + $0x2b0] sm:$0xff]  ;;  %v10081_v29 = vld [vmem:[%s17190_s7 + $0x2c8] sm:$0xff]  ;;  %v10414_v60 = vld [vmem:[%s17192_s9 + $0x18] sm:$0xff] }
 0x617   : > { %13217 = vmatprep.subr.bf16.mxu0 %v13216_v0  ;;  %13191 = vmatpush3.bf16.msra.mxu1 %v13190_v32 }
 0x618   : > { %9870 = vrot.lane.b32.xlu1 %v9869_v12, %s13752_s28  ;;  %13193 = vmatprep.subr.bf16.mxu1 %v13192_v20 }
 0x61a   : > { %9909 = vrot.lane.b32.xlu0 %v9908_v31, %s13752_s28  ;;  %13219 = vmatpush3.bf16.msra.mxu0 %v13218_v59 }
 0x61b   : > { %13221 = vmatprep.subr.bf16.mxu0 %v13220_v28  ;;  %13195 = vmatpush3.bf16.msra.mxu1 %v13194_v22  ;;  %v10056_v28 = vld [vmem:[%s17190_s7 + $0x200] sm:$0xff]  ;;  %v10077_v22 = vld [vmem:[%s17190_s7 + $0x2a8] sm:$0xff] }
 0x61c   : > { %9937 = vrot.lane.b32.xlu1 %v9936_v41, %s13750_s16  ;;  %13197 = vmatprep.subr.bf16.mxu1 %v13196_v8  ;;  %v10057_v41 = vld [vmem:[%s17190_s7 + $0x208] sm:$0xff]  ;;  %v13240_v7 = vpack.c.bf16 %v10077_v22, %v10076_v37  ;;  %v10120_v8 = vsub.s32 6, %v16657_v27 }
 0x61e   : > { %9976 = vrot.lane.b32.xlu0 %v9975_v2, %s13750_s16  ;;  %13223 = vmatpush3.bf16.msra.mxu0 %v13222_v62  ;;  %v13234_v2 = vpack.c.bf16 %v10057_v41, %v10056_v28  ;;  %v13265_v62 = vpack.c.bf16 %v10089_v18, %v10088_v57  ;;  %v10071_v28 = vld [vmem:[%s17190_s7 + $0x278] sm:$0xff]  ;;  %v10411_v41 = vld [vmem:[%s17192_s9] sm:$0xff]  ;;  %v10412_v57 = vld [vmem:[%s17192_s9 + $0x8] sm:$0xff] }
 0x61f   : > { %13225 = vmatprep.subr.bf16.mxu0 %v13224_v23  ;;  %13199 = vmatpush3.bf16.msra.mxu1 %v13198_v39  ;;  %v13271_v18 = vpack.c.bf16 %v10412_v57, %v10411_v41 }
 0x620   : > { %9942 = vrot.lane.b32.xlu1 %v9941_v30, %s13751_s27  ;;  %13233 = vmatprep.subr.bf16.mxu1 %v13232_v50  ;;  %v10059_v30 = vld [vmem:[%s17190_s7 + $0x218] sm:$0xff]  ;;  %v10080_v50 = vld [vmem:[%s17190_s7 + $0x2c0] sm:$0xff] }
 0x622   : > { %9981 = vrot.lane.b32.xlu0 %v9980_v42, %s13751_s27  ;;  %13227 = vmatpush3.bf16.msra.mxu0 %v13226_v14  ;;  %v13238_v14 = vpack.c.bf16 %v10059_v30, %v10058_v44 }
 0x623   : > { %13229 = vmatprep.subr.bf16.mxu0 %v13228_v24  ;;  %v10060_v24 = vld [vmem:[%s17190_s7 + $0x220] sm:$0xff] }
 0x624   : > { %9947 = vrot.lane.b32.xlu1 %v9946_v10, %s13752_s28  ;;  %v10079_v10 = vld [vmem:[%s17190_s7 + $0x2b8] sm:$0xff]  ;;  %v13242_v58 = vpack.c.bf16 %v10061_v17, %v10060_v24  ;;  %v10491_v24 = vld [vmem:[%s17194_s11 + $0x10] sm:$0xff] }
 0x625   : > { %v13244_v39 = vpack.c.bf16 %v10079_v10, %v10078_v4  ;;  %v10492_v17 = vld [vmem:[%s17194_s11 + $0x18] sm:$0xff]  ;;  %v10415_v10 = vld [vmem:[%s17193_s10] sm:$0x1] }
 0x626   : > { %9986 = vrot.lane.b32.xlu0 %v9985_v45, %s13752_s28  ;;  %13231 = vmatpush3.bf16.msra.mxu0 %v13230_v35  ;;  %v10062_v45 = vld [vmem:[%s17190_s7 + $0x230] sm:$0xff]  ;;  %v10063_v35 = vld [vmem:[%s17190_s7 + $0x238] sm:$0xff]  ;;  %v13280_v4 = vpack.c.bf16 %v10492_v17, %v10491_v24 }
 0x627   : > { %13264 = vmatprep.subr.bf16.mxu0 %v13754_v63 }
 0x676   : > { %v9775_v48 = vpop.permute.xlu1 %9774 }
 0x677   : > { %9780 = vst.msk [vmem:[#allocation4] sm:$0x1] %vm16959_vm12, %v9775_v48  ;;  %v13246_v48 = vpack.c.bf16 %v10063_v35, %v10062_v45 }
 0x678   : > { %v9823_v3 = vpop.permute.xlu0 %9822 }
 0x679   : > { %9825 = vst.msk [vmem:[#allocation4 + $0x1] sm:$0x1] %vm16959_vm12, %v9823_v3  ;;  %v13248_v3 = vpack.c.bf16 %v10081_v29, %v10080_v50 }
 0x67a   : > { %v9783_v53 = vpop.permute.xlu1 %9782 }
 0x67b   : > { %9788 = vst.msk [vmem:[#allocation4] sm:$0x1] %vm16967_vm15, %v9783_v53  ;;  %v10065_v53 = vld [vmem:[%s17190_s7 + $0x248] sm:$0xff] }
 0x67c   : > { %v9828_v0 = vpop.permute.xlu0 %9827 }
 0x67d   : > { %9830 = vst.msk [vmem:[#allocation4 + $0x1] sm:$0x1] %vm16967_vm15, %v9828_v0  ;;  %v10082_v0 = vld [vmem:[%s17190_s7 + $0x2d0] sm:$0xff] }
 0x67e   : > { %v9861_v47 = vpop.permute.xlu1 %9860 }
 0x67f   : > { %9863 = vst.msk [vmem:[#allocation4 + $0x2] sm:$0x1] %vm16959_vm12, %v9861_v47  ;;  %v10083_v47 = vld [vmem:[%s17190_s7 + $0x2d8] sm:$0xff] }
 0x680   : > { %v9900_v21 = vpop.permute.xlu0 %9899 }
 0x681   : > { %9902 = vst.msk [vmem:[#allocation4 + $0x3] sm:$0x1] %vm16959_vm12, %v9900_v21  ;;  %v13250_v21 = vpack.c.bf16 %v10065_v53, %v10064_v36 }
 0x682   : > { %v9866_v12 = vpop.permute.xlu1 %9865 }
 0x683   : > { %9868 = vst.msk [vmem:[#allocation4 + $0x2] sm:$0x1] %vm16967_vm15, %v9866_v12  ;;  %v13252_v12 = vpack.c.bf16 %v10083_v47, %v10082_v0 }
 0x684   : > { %v9905_v25 = vpop.permute.xlu0 %9904 }
 0x685   : > { %9907 = vst.msk [vmem:[#allocation4 + $0x3] sm:$0x1] %vm16967_vm15, %v9905_v25  ;;  %v10066_v25 = vld [vmem:[%s17190_s7 + $0x250] sm:$0xff] }
 0x686   : > { %v9791_v54 = vpop.permute.xlu1 %9790 }
 0x687   : > { %9796 = vst.msk [vmem:[#allocation4] sm:$0x1] %vm16985_vm4, %v9791_v54  ;;  %v10084_v54 = vld [vmem:[%s17190_s7 + $0x2e0] sm:$0xff] }
 0x688   : > { %v9833_v33 = vpop.permute.xlu0 %9832 }
 0x689   : > { %9835 = vst.msk [vmem:[#allocation4 + $0x1] sm:$0x1] %vm16985_vm4, %v9833_v33  ;;  %v10085_v33 = vld [vmem:[%s17190_s7 + $0x2e8] sm:$0xff] }
 0x68a   : > { %v9871_v13 = vpop.permute.xlu1 %9870 }
 0x68b   : > { %9873 = vst.msk [vmem:[#allocation4 + $0x2] sm:$0x1] %vm16985_vm4, %v9871_v13  ;;  %v13254_v13 = vpack.c.bf16 %v10067_v1, %v10066_v25 }
 0x68c   : > { %v9910_v61 = vpop.permute.xlu0 %9909 }
 0x68d   : > { %9912 = vst.msk [vmem:[#allocation4 + $0x3] sm:$0x1] %vm16985_vm4, %v9910_v61  ;;  %v13256_v61 = vpack.c.bf16 %v10085_v33, %v10084_v54 }
 0x68e   : > { %v9938_v15 = vpop.permute.xlu1 %9937 }
 0x68f   : > { %9940 = vst.msk [vmem:[#allocation4 + $0x4] sm:$0x1] %vm16959_vm12, %v9938_v15  ;;  %v10068_v15 = vld [vmem:[%s17190_s7 + $0x260] sm:$0xff] }
 0x690   : > { %v9977_v31 = vpop.permute.xlu0 %9976 }
 0x691   : > { %9979 = vst.msk [vmem:[#allocation4 + $0x5] sm:$0x1] %vm16959_vm12, %v9977_v31  ;;  %v10069_v31 = vld [vmem:[%s17190_s7 + $0x268] sm:$0xff] }
 0x692   : > { %v9943_v46 = vpop.permute.xlu1 %9942 }
 0x693   : > { %9945 = vst.msk [vmem:[#allocation4 + $0x4] sm:$0x1] %vm16967_vm15, %v9943_v46  ;;  %v10086_v46 = vld [vmem:[%s17190_s7 + $0x2f0] sm:$0xff] }
 0x694   : > { %v9982_v59 = vpop.permute.xlu0 %9981 }
 0x695   : > { %9984 = vst.msk [vmem:[#allocation4 + $0x5] sm:$0x1] %vm16967_vm15, %v9982_v59  ;;  %v10087_v59 = vld [vmem:[%s17190_s7 + $0x2f8] sm:$0xff] }
 0x696   : > { %v9948_v9 = vpop.permute.xlu1 %9947 }
 0x697   : > { %9950 = vst.msk [vmem:[#allocation4 + $0x4] sm:$0x1] %vm16985_vm4, %v9948_v9  ;;  %v13258_v9 = vpack.c.bf16 %v10069_v31, %v10068_v15 }
 0x698   : > { %v9987_v49 = vpop.permute.xlu0 %9986 }
 0x699   : > { %9989 = vst.msk [vmem:[#allocation4 + $0x5] sm:$0x1] %vm16985_vm4, %v9987_v49  ;;  %v13260_v49 = vpack.c.bf16 %v10087_v59, %v10086_v46 }
 0x6a0   : > { %v17033_v32 = vld [vmem:[#allocation4] sm:$0x7f] }
 0x6a1   : > { %v10101_v38 = vrot.slane %v17033_v32, %v10100_v6  ;;  %v10109_v20 = vrot.slane %v17033_v32, %v10108_v40  ;;  %v10097_v23 = vrot.slane %v17033_v32, %v10096_v19  ;;  %v10105_v16 = vrot.slane %v17033_v32, %v10104_v26  ;;  %v10070_v6 = vld [vmem:[%s17190_s7 + $0x270] sm:$0xff] }
 0x6a2   : > { %v10117_v42 = vrot.slane %v17033_v32, %v10116_v52  ;;  %v10121_v43 = vrot.slane %v17033_v32, %v10120_v8  ;;  %v13262_v40 = vpack.c.bf16 %v10071_v28, %v10070_v6  ;;  %v10112_v19 = vsub.s32 4, %v16657_v27  ;;  %v10413_v27 = vld [vmem:[%s17192_s9 + $0x10] sm:$0xff] }
 0x6a3   : > { %10194 = vmatprep.mubr.f32.mxu1 %v10101_v38  ;;  %10264 = vmatprep.mubr.f32.mxu0 %v10109_v20  ;;  %v13274_v51 = vpack.c.bf16 %v10414_v60, %v10413_v27 }
 0x6a4   : > { %10195 = vmatmul.mubr.f32.vlgmr.msra.gmra.mrb[60].mxu1 %v10097_v23  ;;  %10265 = vmatmul.mubr.f32.vlgmr.msra.gmra.mrb[88].mxu0 %v10105_v16  ;;  %v10113_v26 = vrot.slane %v17033_v32, %v10112_v19 }
 0x6a5   : > { %13235 = vmatpush3.bf16.msra.mxu1 %v13234_v2  ;;  %13266 = vmatpush3.bf16.msra.mxu0 %v13265_v62  ;;  %v10092_v62 = vld [vmem:[%s17191_s8] sm:$0x1] }
 0x6a6   : > { %10334 = vmatprep.mubr.f32.mxu1 %v10117_v42  ;;  %13237 = vmatprep.subr.bf16.mxu1 %v13236_v55  ;;  %v10489_v42 = vld [vmem:[%s17194_s11] sm:$0xff] }
 0x6a7   : > { %13267 = vmatprep.subr.bf16.mxu0 %v13754_v63  ;;  %13143 = vmatprep.mubr.msk.f32.mxu0 %vm13749_vm0, %v17221_v56 }
 0x6a9   : > { %13239 = vmatpush3.bf16.msra.mxu1 %v13238_v14  ;;  %13269 = vmatpush3.bf16.msra.mxu0 %v13268_v11  ;;  %v10490_v14 = vld [vmem:[%s17194_s11 + $0x8] sm:$0xff] }
 0x6aa   : > { %13241 = vmatprep.subr.bf16.mxu1 %v13240_v7  ;;  %13270 = vmatprep.subr.bf16.mxu0 %v13754_v63  ;;  %v13277_v7 = vpack.c.bf16 %v10490_v14, %v10489_v42 }
 0x6ac   : > { %13144 = vmatmul.mubr.msk.f32.vlgmr.msra.gmra.mrb[90].mxu0 %vm6241_vm2, %v10121_v43 }
 0x6ad   : > { %13243 = vmatpush3.bf16.msra.mxu1 %v13242_v58  ;;  %13154 = vmatprep.mubr.msk.f32.mxu0 %vm13749_vm0, %v17221_v56 }
 0x6ae   : > { %13245 = vmatprep.subr.bf16.mxu1 %v13244_v39  ;;  %13272 = vmatpush3.bf16.msra.mxu0 %v13271_v18 }
 0x6af   : > { %13273 = vmatprep.subr.bf16.mxu0 %v13754_v63 }
 0x6b1   : > { %13247 = vmatpush3.bf16.msra.mxu1 %v13246_v48 }
 0x6b2   : > { %13249 = vmatprep.subr.bf16.mxu1 %v13248_v3  ;;  %13275 = vmatpush3.bf16.msra.mxu0 %v13274_v51 }
 0x6b3   : > { %13276 = vmatprep.subr.bf16.mxu0 %v13754_v63 }
 0x6b5   : > { %13251 = vmatpush3.bf16.msra.mxu1 %v13250_v21 }
 0x6b6   : > { %13253 = vmatprep.subr.bf16.mxu1 %v13252_v12 }
 0x6b9   : > { %13255 = vmatpush3.bf16.msra.mxu1 %v13254_v13 }
 0x6ba   : > { %13257 = vmatprep.subr.bf16.mxu1 %v13256_v61 }
 0x6bd   : > { %13259 = vmatpush3.bf16.msra.mxu1 %v13258_v9 }
 0x6be   : > { %13261 = vmatprep.subr.bf16.mxu1 %v13260_v49 }
 0x6c1   : > { %13263 = vmatpush3.bf16.msra.mxu1 %v13262_v40 }
 0x6c4   : > { %10335 = vmatmul.mubr.f32.vlgmr.msra.gmra.mrb[62].mxu1 %v10113_v26 }
 0x777   : > { %v12337_v32 = vpop.f32.mrb[60].mxu1  ;;  %v12372_v2 = vpop.f32.mrb[88].mxu0 }
 0x778   : > { %v12338_v52 = vpop.f32.mrb[61].mxu1  ;;  %v12373_v38 = vpop.f32.mrb[89].mxu0 }
 0x779   : > { %v12339_v20 = vadd.f32 %v12338_v52, %v12337_v32  ;;  %v12374_v23 = vadd.f32 %v12373_v38, %v12372_v2 }
 0x77b   : > { %v10197_v16 = vadd.f32 %v12339_v20, %v10092_v62 }
 0x77d   : > { %v10267_v44 = vadd.f32 %v12374_v23, %v10197_v16 }
 0x77f   : > { %v10406_v55 = vpop.f32.mrb[90].mxu0 }
 0x780   : > { %v13145_v30 = vpop.f32.mrb[91].mxu0 }
 0x797   : > { %v12407_v34 = vpop.f32.mrb[62].mxu1 }
 0x798   : > { %v12408_v5 = vpop.f32.mrb[63].mxu1 }
 0x799   : > { %v12409_v37 = vadd.f32 %v12408_v5, %v12407_v34 }
 0x79b   : > { %v10337_v22 = vadd.f32 %v12409_v37, %v10267_v44 }
 0x79d   : > { %v10407_v11 = vadd.f32 %v10406_v55, %v10337_v22 }
 0x79f   : > { %v10410_v8 = vmax.f32 %v10407_v11, 0.0 }
 0x7a1   : > { %13155 = vmatmul.mubr.msk.f32.vlgmr.msra.gmra.mrb[92].mxu0 %vm6241_vm2, %v10410_v8 }
 0x7a2   : > { %13278 = vmatpush3.bf16.msra.mxu0 %v13277_v7  ;;  %13165 = vmatprep.mubr.msk.f32.mxu0 %vm13749_vm0, %v17221_v56  ;;  %v10493_v56 = vld [vmem:[%s17195_s12] sm:$0x1] }
 0x7a3   : > { %13279 = vmatprep.subr.bf16.mxu0 %v13754_v63 }
 0x7a6   : > { %13281 = vmatpush3.bf16.msra.mxu0 %v13280_v4 }
 0x874   : > { %v10485_v58 = vpop.f32.mrb[92].mxu0 }
 0x875   : > { %v10486_v43 = vadd.f32 %v10485_v58, %v10415_v10  ;;  %v13156_v39 = vpop.f32.mrb[93].mxu0 }
 0x877   : > { %13166 = vmatmul.mubr.msk.f32.vlgmr.msra.gmra.mrb[94].mxu0 %vm6241_vm2, %v10486_v43 }
 0x94a   : > { %v10563_v63 = vpop.f32.mrb[94].mxu0 }
 0x94b   : > { %v10564_v45 = vadd.f32 %v10563_v63, %v10493_v56  ;;  %v13167_v35 = vpop.f32.mrb[95].mxu0 }
 0x94d   : > { %10567 = vst [vmem:[%s436_s19] sm:$0x1] %v10564_v45 }
 0x94e PF: > { %s23_s25 = sadd.s32 1, %s13745_s25  }
 0x94f   : > { %p20_p4 = scmp.ge.s32.totalorder %s23_s25, 4  }
 0x951   :  { %22 = sbr.rel (!%p20_p4) target bundleno = 1 (0x1), region = 102 }

</bundles_post_ra>
